<compile_context>
chip_gen: v7x
topology: tpu7x:2x2x1
jax: 0.10.0
libtpu: 0.0.40
codegen_flags: <defaults>
</compile_context>

<pallas_src>
import functools

import jax
import jax.numpy as jnp
from jax.experimental import pallas as pl
from jax.experimental.pallas import tpu as pltpu

D_MODEL = 64
NHEAD = 8
HEAD_DIM = D_MODEL // NHEAD
NUM_LAYERS = 3
DIM_FF = 2048          # PyTorch TransformerEncoderLayer default dim_feedforward
OUTPUT_SIZE = 90
FC_PAD = 128           # lane-dense padded width of the fc head
MAX_POS = 1000
LN_EPS = 1e-5


# ----------------------------- fused Pallas kernel -----------------------------

def _layer_norm(z, gamma, beta):
    mean = jnp.mean(z, axis=-1, keepdims=True)
    zc = z - mean
    var = jnp.mean(zc * zc, axis=-1, keepdims=True)
    return zc * jax.lax.rsqrt(var + LN_EPS) * gamma + beta


def _fused_forward_kernel(
        x_ref, pos_ref, in_w_ref, in_b_ref,
        qkv_w_ref, qkv_b_ref, out_w_ref, out_b_ref,
        ln1_g_ref, ln1_b_ref, ff_w1_ref, ff_b1_ref,
        ff_w2_ref, ff_b2_ref, ln2_g_ref, ln2_b_ref,
        fc_w_ref, fc_b_ref, o_ref, ctx_ref, *, matmul_dtype):
    """One grid step = full forward for one batch element's sequence."""
    f32 = jnp.float32
    scale = 1.0 / (HEAD_DIM ** 0.5)

    # Hoist the small f32 parameter tables out of the layer loop (loaded once).
    qkv_b = qkv_b_ref[...]          # (L, 3D)
    out_b = out_b_ref[...]          # (L, D)
    ln1_g = ln1_g_ref[...]
    ln1_b = ln1_b_ref[...]
    ln2_g = ln2_g_ref[...]
    ln2_b = ln2_b_ref[...]
    ff_b1 = ff_b1_ref[...]          # (L, F)
    ff_b2 = ff_b2_ref[...]          # (L, D)

    # ---- input projection + positional encoding ----
    x = x_ref[0]                                              # (S, IN) f32
    h = (jnp.dot(x.astype(matmul_dtype), in_w_ref[...],
                 preferred_element_type=f32)
         + in_b_ref[...] + pos_ref[...])                      # (S, D) f32

    for li in range(NUM_LAYERS):
        # ---- QKV projection: one lane-dense (S, 3D) slab ----
        qkv = (jnp.dot(h.astype(matmul_dtype), qkv_w_ref[li],
                       preferred_element_type=f32)
               + qkv_b[li:li + 1, :])                         # (S, 3D) f32
        q = qkv[:, 0:D_MODEL]
        k = qkv[:, D_MODEL:2 * D_MODEL]
        v = qkv[:, 2 * D_MODEL:3 * D_MODEL]

        # ---- attention: all heads of this batch element, unrolled, f32 ----
        for hh in range(NHEAD):
            lo, hi = hh * HEAD_DIM, (hh + 1) * HEAD_DIM
            qh = q[:, lo:hi]
            kh = k[:, lo:hi]
            vh = v[:, lo:hi]
            s = jnp.dot(qh, kh.T, preferred_element_type=f32) * scale
            s = s - jnp.max(s, axis=-1, keepdims=True)
            p = jnp.exp(s)
            p = p * pl.reciprocal(jnp.sum(p, axis=-1, keepdims=True),
                                  approx=True)
            ctx_ref[:, lo:hi] = jnp.dot(p, vh, preferred_element_type=f32)
        ctx = ctx_ref[...]                                    # (S, D) f32

        # ---- output projection + residual + LN1 (post-norm) ----
        attn = (jnp.dot(ctx.astype(matmul_dtype), out_w_ref[li],
                        preferred_element_type=f32)
                + out_b[li:li + 1, :])
        h1 = _layer_norm(h + attn, ln1_g[li:li + 1, :], ln1_b[li:li + 1, :])

        # ---- feed-forward + residual + LN2 ----
        mid = (jnp.dot(h1.astype(matmul_dtype), ff_w1_ref[li],
                       preferred_element_type=f32)
               + ff_b1[li:li + 1, :])
        mid = jnp.maximum(mid, 0.0)                           # ReLU (f32)
        ff = (jnp.dot(mid.astype(matmul_dtype), ff_w2_ref[li],
                      preferred_element_type=f32)
              + ff_b2[li:li + 1, :])
        h = _layer_norm(h1 + ff, ln2_g[li:li + 1, :], ln2_b[li:li + 1, :])

    # ---- last timestep -> padded (lane-dense) fc head ----
    last = h[h.shape[0] - 1:, :]                              # (1, D)
    out = (jnp.dot(last.astype(matmul_dtype), fc_w_ref[...],
                   preferred_element_type=f32)
           + fc_b_ref[...])                                   # (1, FC_PAD)
    o_ref[0] = out


def _full_spec(shape):
    nd = len(shape)
    return pl.BlockSpec(shape, lambda b: (0,) * nd)


@functools.partial(jax.jit, static_argnames=("matmul_dtype",))
def transformer_forecaster(x, params, *, matmul_dtype=jnp.float32):
    """x: (B, S, input_size) -> (B, OUTPUT_SIZE)."""
    B, S, IN = x.shape
    f32 = jnp.float32
    wd = matmul_dtype

    pos_s = params["pos"][:S]                                 # (S, D)
    in_b = params["in_b"].reshape(1, D_MODEL)
    fc_w = jnp.zeros((D_MODEL, FC_PAD), f32).at[:, :OUTPUT_SIZE].set(params["fc_w"])
    fc_b = jnp.zeros((1, FC_PAD), f32).at[:, :OUTPUT_SIZE].set(params["fc_b"])

    inputs = (
        x,
        pos_s,
        params["in_w"].astype(wd), in_b,
        params["qkv_w"].astype(wd), params["qkv_b"],
        params["out_w"].astype(wd), params["out_b"],
        params["ln1_g"], params["ln1_b"],
        params["ff_w1"].astype(wd), params["ff_b1"],
        params["ff_w2"].astype(wd), params["ff_b2"],
        params["ln2_g"], params["ln2_b"],
        fc_w.astype(wd), fc_b,
    )

    in_specs = [pl.BlockSpec((1, S, IN), lambda b: (b, 0, 0))]
    in_specs += [_full_spec(a.shape) for a in inputs[1:]]

    kern = functools.partial(_fused_forward_kernel, matmul_dtype=wd)

    out = pl.pallas_call(
        kern,
        grid=(B,),
        out_shape=jax.ShapeDtypeStruct((B, 1, FC_PAD), f32),
        in_specs=in_specs,
        out_specs=pl.BlockSpec((1, 1, FC_PAD), lambda b: (b, 0, 0)),
        scratch_shapes=[pltpu.VMEM((S, D_MODEL), f32)],
        compiler_params=pltpu.CompilerParams(
            dimension_semantics=("parallel",)),   # splits batch across v7x's 2 TCs
    )(*inputs)

    return out.reshape(B, FC_PAD)[:, :OUTPUT_SIZE]


# ------------------------------ params / reference ------------------------------

def init_params(key, input_size):
    def dense(k, shape, fan_in):
        kw, kb = jax.random.split(k)
        w = jax.random.normal(kw, shape, jnp.float32) / jnp.sqrt(jnp.float32(fan_in))
        b = 0.01 * jax.random.normal(kb, shape[:-2] + (shape[-1],), jnp.float32)
        return w, b

    keys = jax.random.split(key, 7)
    in_w, in_b = dense(keys[0], (input_size, D_MODEL), input_size)
    pos = jax.random.normal(keys[1], (MAX_POS, D_MODEL), jnp.float32)
    fc_w, fc_b = dense(keys[2], (D_MODEL, OUTPUT_SIZE), D_MODEL)
    qkv_w, qkv_b = dense(keys[3], (NUM_LAYERS, D_MODEL, 3 * D_MODEL), D_MODEL)
    out_w, out_b = dense(keys[4], (NUM_LAYERS, D_MODEL, D_MODEL), D_MODEL)
    ff_w1, ff_b1 = dense(keys[5], (NUM_LAYERS, D_MODEL, DIM_FF), D_MODEL)
    ff_w2, ff_b2 = dense(keys[6], (NUM_LAYERS, DIM_FF, D_MODEL), DIM_FF)
    ones = jnp.ones((NUM_LAYERS, D_MODEL), jnp.float32)
    zeros = jnp.zeros((NUM_LAYERS, D_MODEL), jnp.float32)
    return dict(in_w=in_w, in_b=in_b, pos=pos, fc_w=fc_w, fc_b=fc_b,
                qkv_w=qkv_w, qkv_b=qkv_b, out_w=out_w, out_b=out_b,
                ff_w1=ff_w1, ff_b1=ff_b1, ff_w2=ff_w2, ff_b2=ff_b2,
                ln1_g=ones, ln1_b=zeros, ln2_g=ones, ln2_b=zeros)


def reference_forward(x, params):
    """Pure-JAX f32 reference matching the PyTorch module (eval mode)."""
    B, S, _ = x.shape

    def ln(z, g, b):
        m = jnp.mean(z, axis=-1, keepdims=True)
        v = jnp.mean((z - m) ** 2, axis=-1, keepdims=True)
        return (z - m) * jax.lax.rsqrt(v + LN_EPS) * g + b

    h = x @ params["in_w"] + params["in_b"] + params["pos"][:S][None]
    for li in range(NUM_LAYERS):
        qkv = h @ params["qkv_w"][li] + params["qkv_b"][li]
        q = qkv[..., :D_MODEL].reshape(B, S, NHEAD, HEAD_DIM).transpose(0, 2, 1, 3)
        k = qkv[..., D_MODEL:2 * D_MODEL].reshape(B, S, NHEAD, HEAD_DIM).transpose(0, 2, 1, 3)
        v = qkv[..., 2 * D_MODEL:].reshape(B, S, NHEAD, HEAD_DIM).transpose(0, 2, 1, 3)
        s = jnp.einsum("bhqd,bhkd->bhqk", q, k) / jnp.sqrt(jnp.float32(HEAD_DIM))
        p = jax.nn.softmax(s, axis=-1)
        a = jnp.einsum("bhqk,bhkd->bhqd", p, v)
        a = a.transpose(0, 2, 1, 3).reshape(B, S, D_MODEL)
        a = a @ params["out_w"][li] + params["out_b"][li]
        h = ln(h + a, params["ln1_g"][li], params["ln1_b"][li])
        f = jnp.maximum(h @ params["ff_w1"][li] + params["ff_b1"][li], 0.0)
        f = f @ params["ff_w2"][li] + params["ff_b2"][li]
        h = ln(h + f, params["ln2_g"][li], params["ln2_b"][li])
    return h[:, -1, :] @ params["fc_w"] + params["fc_b"]


# ------------------------------------ main ---------------------------------------

if __name__ == "__main__":
    key = jax.random.PRNGKey(0)
    k_x, k_p = jax.random.split(key)

    batch, seq_len, input_size = 2, 8, 8
    x = jax.random.normal(k_x, (batch, seq_len, input_size), jnp.float32)
    params = init_params(k_p, input_size)

    ref = jax.block_until_ready(reference_forward(x, params))

    # f32 matmul path: bit-accurate check against the f32 reference.
    out_f32 = jax.block_until_ready(
        transformer_forecaster(x, params, matmul_dtype=jnp.float32))
    assert out_f32.shape == (batch, OUTPUT_SIZE), out_f32.shape
    assert bool(jnp.all(jnp.isfinite(out_f32)))
    assert bool(jnp.allclose(out_f32, ref, atol=2e-2, rtol=2e-2)), (
        float(jnp.max(jnp.abs(out_f32 - ref))))

    # bf16-operand path (v6e/v7x fast path; f32 accumulation, f32 LN/softmax).
    # Looser tolerance accounts for bf16 operand rounding through 3 layers.
    out_bf16 = jax.block_until_ready(
        transformer_forecaster(x, params, matmul_dtype=jnp.bfloat16))
    assert out_bf16.shape == (batch, OUTPUT_SIZE), out_bf16.shape
    assert bool(jnp.all(jnp.isfinite(out_bf16)))
    assert bool(jnp.allclose(out_bf16, ref, atol=1e-1, rtol=1e-1)), (
        float(jnp.max(jnp.abs(out_bf16 - ref))))

    print("KERNEL_OK")
</pallas_src>

<mosaic_0001>
module attributes {stable_mosaic.version = 11 : i64} {
  func.func @_fused_forward_kernel(%arg0: i32, %arg1: memref<1x8x8xf32, #tpu.memory_space<vmem>>, %arg2: memref<8x64xf32, #tpu.memory_space<vmem>>, %arg3: memref<8x64xf32, #tpu.memory_space<vmem>>, %arg4: memref<1x64xf32, #tpu.memory_space<vmem>>, %arg5: memref<3x64x192xf32, #tpu.memory_space<vmem>>, %arg6: memref<3x192xf32, #tpu.memory_space<vmem>>, %arg7: memref<3x64x64xf32, #tpu.memory_space<vmem>>, %arg8: memref<3x64xf32, #tpu.memory_space<vmem>>, %arg9: memref<3x64xf32, #tpu.memory_space<vmem>>, %arg10: memref<3x64xf32, #tpu.memory_space<vmem>>, %arg11: memref<3x64x2048xf32, #tpu.memory_space<vmem>>, %arg12: memref<3x2048xf32, #tpu.memory_space<vmem>>, %arg13: memref<3x2048x64xf32, #tpu.memory_space<vmem>>, %arg14: memref<3x64xf32, #tpu.memory_space<vmem>>, %arg15: memref<3x64xf32, #tpu.memory_space<vmem>>, %arg16: memref<3x64xf32, #tpu.memory_space<vmem>>, %arg17: memref<64x128xf32, #tpu.memory_space<vmem>>, %arg18: memref<1x128xf32, #tpu.memory_space<vmem>>, %arg19: memref<1x1x128xf32, #tpu.memory_space<vmem>>, %arg20: memref<8x64xf32, #tpu.memory_space<vmem>>) attributes {dimension_semantics = [#tpu.dimension_semantics<parallel>], iteration_bounds = array<i64: 2>, scalar_prefetch = 0 : i64, scratch_operands = 1 : i64, tpu.core_type = #tpu.core_type<tc>, window_params = [{transform_indices = @transform_0, window_bounds = array<i64: 1, 8, 8>}, {pipeline_mode = #tpu.pipeline_mode<synchronous>, transform_indices = @transform_1, window_bounds = array<i64: 8, 64>}, {pipeline_mode = #tpu.pipeline_mode<synchronous>, transform_indices = @transform_2, window_bounds = array<i64: 8, 64>}, {pipeline_mode = #tpu.pipeline_mode<synchronous>, transform_indices = @transform_3, window_bounds = array<i64: 1, 64>}, {pipeline_mode = #tpu.pipeline_mode<synchronous>, transform_indices = @transform_4, window_bounds = array<i64: 3, 64, 192>}, {pipeline_mode = #tpu.pipeline_mode<synchronous>, transform_indices = @transform_5, window_bounds = array<i64: 3, 192>}, {pipeline_mode = #tpu.pipeline_mode<synchronous>, transform_indices = @transform_6, window_bounds = array<i64: 3, 64, 64>}, {pipeline_mode = #tpu.pipeline_mode<synchronous>, transform_indices = @transform_7, window_bounds = array<i64: 3, 64>}, {pipeline_mode = #tpu.pipeline_mode<synchronous>, transform_indices = @transform_8, window_bounds = array<i64: 3, 64>}, {pipeline_mode = #tpu.pipeline_mode<synchronous>, transform_indices = @transform_9, window_bounds = array<i64: 3, 64>}, {pipeline_mode = #tpu.pipeline_mode<synchronous>, transform_indices = @transform_10, window_bounds = array<i64: 3, 64, 2048>}, {pipeline_mode = #tpu.pipeline_mode<synchronous>, transform_indices = @transform_11, window_bounds = array<i64: 3, 2048>}, {pipeline_mode = #tpu.pipeline_mode<synchronous>, transform_indices = @transform_12, window_bounds = array<i64: 3, 2048, 64>}, {pipeline_mode = #tpu.pipeline_mode<synchronous>, transform_indices = @transform_13, window_bounds = array<i64: 3, 64>}, {pipeline_mode = #tpu.pipeline_mode<synchronous>, transform_indices = @transform_14, window_bounds = array<i64: 3, 64>}, {pipeline_mode = #tpu.pipeline_mode<synchronous>, transform_indices = @transform_15, window_bounds = array<i64: 3, 64>}, {pipeline_mode = #tpu.pipeline_mode<synchronous>, transform_indices = @transform_16, window_bounds = array<i64: 64, 128>}, {pipeline_mode = #tpu.pipeline_mode<synchronous>, transform_indices = @transform_17, window_bounds = array<i64: 1, 128>}, {transform_indices = @transform_18, window_bounds = array<i64: 1, 1, 128>}]} {
    %c0 = arith.constant 0 : index
    %c0_0 = arith.constant 0 : index
    %0 = vector.load %arg6[%c0, %c0_0] : memref<3x192xf32, #tpu.memory_space<vmem>>, vector<3x192xf32>
    %c0_1 = arith.constant 0 : index
    %c0_2 = arith.constant 0 : index
    %1 = vector.load %arg8[%c0_1, %c0_2] : memref<3x64xf32, #tpu.memory_space<vmem>>, vector<3x64xf32>
    %c0_3 = arith.constant 0 : index
    %c0_4 = arith.constant 0 : index
    %2 = vector.load %arg9[%c0_3, %c0_4] : memref<3x64xf32, #tpu.memory_space<vmem>>, vector<3x64xf32>
    %c0_5 = arith.constant 0 : index
    %c0_6 = arith.constant 0 : index
    %3 = vector.load %arg10[%c0_5, %c0_6] : memref<3x64xf32, #tpu.memory_space<vmem>>, vector<3x64xf32>
    %c0_7 = arith.constant 0 : index
    %c0_8 = arith.constant 0 : index
    %4 = vector.load %arg15[%c0_7, %c0_8] : memref<3x64xf32, #tpu.memory_space<vmem>>, vector<3x64xf32>
    %c0_9 = arith.constant 0 : index
    %c0_10 = arith.constant 0 : index
    %5 = vector.load %arg16[%c0_9, %c0_10] : memref<3x64xf32, #tpu.memory_space<vmem>>, vector<3x64xf32>
    %c0_11 = arith.constant 0 : index
    %c0_12 = arith.constant 0 : index
    %6 = vector.load %arg12[%c0_11, %c0_12] : memref<3x2048xf32, #tpu.memory_space<vmem>>, vector<3x2048xf32>
    %c0_13 = arith.constant 0 : index
    %c0_14 = arith.constant 0 : index
    %7 = vector.load %arg14[%c0_13, %c0_14] : memref<3x64xf32, #tpu.memory_space<vmem>>, vector<3x64xf32>
    %c0_15 = arith.constant 0 : index
    %c0_16 = arith.constant 0 : index
    %c0_17 = arith.constant 0 : index
    %8 = vector.load %arg1[%c0_15, %c0_16, %c0_17] : memref<1x8x8xf32, #tpu.memory_space<vmem>>, vector<1x8x8xf32>
    %9 = vector.shape_cast %8 : vector<1x8x8xf32> to vector<8x8xf32>
    %c0_18 = arith.constant 0 : index
    %c0_19 = arith.constant 0 : index
    %10 = vector.load %arg3[%c0_18, %c0_19] : memref<8x64xf32, #tpu.memory_space<vmem>>, vector<8x64xf32>
    %cst = arith.constant dense<0.000000e+00> : vector<8x64xf32>
    %11 = tpu.matmul %9, %10, %cst {dimension_numbers = #tpu.dot_dimension_numbers<[1], [0], [0], [1], [0, 0, 1, 1], [], []>} : vector<8x8xf32>, vector<8x64xf32>, vector<8x64xf32> -> vector<8x64xf32>
    %c0_20 = arith.constant 0 : index
    %c0_21 = arith.constant 0 : index
    %12 = vector.load %arg4[%c0_20, %c0_21] : memref<1x64xf32, #tpu.memory_space<vmem>>, vector<1x64xf32>
    %13 = vector.broadcast %12 : vector<1x64xf32> to vector<8x64xf32>
    %14 = arith.addf %11, %13 : vector<8x64xf32>
    %c0_22 = arith.constant 0 : index
    %c0_23 = arith.constant 0 : index
    %15 = vector.load %arg2[%c0_22, %c0_23] : memref<8x64xf32, #tpu.memory_space<vmem>>, vector<8x64xf32>
    %16 = arith.addf %14, %15 : vector<8x64xf32>
    %c0_24 = arith.constant 0 : index
    %c0_25 = arith.constant 0 : index
    %c0_26 = arith.constant 0 : index
    %17 = vector.load %arg5[%c0_24, %c0_25, %c0_26] : memref<3x64x192xf32, #tpu.memory_space<vmem>>, vector<1x64x192xf32>
    %18 = vector.shape_cast %17 : vector<1x64x192xf32> to vector<64x192xf32>
    %cst_27 = arith.constant dense<0.000000e+00> : vector<8x192xf32>
    %19 = tpu.matmul %16, %18, %cst_27 {dimension_numbers = #tpu.dot_dimension_numbers<[1], [0], [0], [1], [0, 0, 1, 1], [], []>} : vector<8x64xf32>, vector<64x192xf32>, vector<8x192xf32> -> vector<8x192xf32>
    %20 = vector.extract_strided_slice %0 {offsets = [0, 0], sizes = [1, 192], strides = [1, 1]} : vector<3x192xf32> to vector<1x192xf32>
    %21 = vector.broadcast %20 : vector<1x192xf32> to vector<8x192xf32>
    %22 = arith.addf %19, %21 : vector<8x192xf32>
    %23 = vector.extract_strided_slice %22 {offsets = [0, 0], sizes = [8, 64], strides = [1, 1]} : vector<8x192xf32> to vector<8x64xf32>
    %24 = vector.extract_strided_slice %22 {offsets = [0, 64], sizes = [8, 64], strides = [1, 1]} : vector<8x192xf32> to vector<8x64xf32>
    %25 = vector.extract_strided_slice %22 {offsets = [0, 128], sizes = [8, 64], strides = [1, 1]} : vector<8x192xf32> to vector<8x64xf32>
    %26 = vector.extract_strided_slice %23 {offsets = [0, 0], sizes = [8, 8], strides = [1, 1]} : vector<8x64xf32> to vector<8x8xf32>
    %27 = vector.extract_strided_slice %24 {offsets = [0, 0], sizes = [8, 8], strides = [1, 1]} : vector<8x64xf32> to vector<8x8xf32>
    %28 = vector.extract_strided_slice %25 {offsets = [0, 0], sizes = [8, 8], strides = [1, 1]} : vector<8x64xf32> to vector<8x8xf32>
    %29 = tpu.transpose %27, [1, 0] : vector<8x8xf32> -> vector<8x8xf32>
    %cst_28 = arith.constant dense<0.000000e+00> : vector<8x8xf32>
    %30 = tpu.matmul %26, %29, %cst_28 {dimension_numbers = #tpu.dot_dimension_numbers<[1], [0], [0], [1], [0, 0, 1, 1], [], []>} : vector<8x8xf32>, vector<8x8xf32>, vector<8x8xf32> -> vector<8x8xf32>
    %cst_29 = arith.constant 0.353553385 : f32
    %31 = vector.broadcast %cst_29 : f32 to vector<8x8xf32>
    %32 = arith.mulf %30, %31 : vector<8x8xf32>
    %cst_30 = arith.constant dense<0xFF800000> : vector<8xf32>
    %33 = vector.multi_reduction <maximumf>, %32, %cst_30 [1] : vector<8x8xf32> to vector<8xf32>
    %34 = vector.shape_cast %33 : vector<8xf32> to vector<8x1xf32>
    %35 = vector.broadcast %34 : vector<8x1xf32> to vector<8x8xf32>
    %36 = arith.subf %32, %35 : vector<8x8xf32>
    %37 = math.exp %36 : vector<8x8xf32>
    %cst_31 = arith.constant dense<0.000000e+00> : vector<8xf32>
    %38 = vector.multi_reduction <add>, %37, %cst_31 [1] : vector<8x8xf32> to vector<8xf32>
    %39 = vector.shape_cast %38 : vector<8xf32> to vector<8x1xf32>
    %40 = tpu.reciprocal %39 {approx = true} : vector<8x1xf32> -> vector<8x1xf32>
    %41 = vector.broadcast %40 : vector<8x1xf32> to vector<8x8xf32>
    %42 = arith.mulf %37, %41 : vector<8x8xf32>
    %cst_32 = arith.constant dense<0.000000e+00> : vector<8x8xf32>
    %43 = tpu.matmul %42, %28, %cst_32 {dimension_numbers = #tpu.dot_dimension_numbers<[1], [0], [0], [1], [0, 0, 1, 1], [], []>} : vector<8x8xf32>, vector<8x8xf32>, vector<8x8xf32> -> vector<8x8xf32>
    %c0_33 = arith.constant 0 : index
    %c0_34 = arith.constant 0 : index
    %44 = vector.load %arg20[%c0_33, %c0_34] : memref<8x64xf32, #tpu.memory_space<vmem>>, vector<8x8xf32>
    tpu.vector_store %arg20[%c0_33, %c0_34], %43 {strides = array<i32>} : memref<8x64xf32, #tpu.memory_space<vmem>>, vector<8x8xf32>,
    %45 = vector.extract_strided_slice %23 {offsets = [0, 8], sizes = [8, 8], strides = [1, 1]} : vector<8x64xf32> to vector<8x8xf32>
    %46 = vector.extract_strided_slice %24 {offsets = [0, 8], sizes = [8, 8], strides = [1, 1]} : vector<8x64xf32> to vector<8x8xf32>
    %47 = vector.extract_strided_slice %25 {offsets = [0, 8], sizes = [8, 8], strides = [1, 1]} : vector<8x64xf32> to vector<8x8xf32>
    %48 = tpu.transpose %46, [1, 0] : vector<8x8xf32> -> vector<8x8xf32>
    %cst_35 = arith.constant dense<0.000000e+00> : vector<8x8xf32>
    %49 = tpu.matmul %45, %48, %cst_35 {dimension_numbers = #tpu.dot_dimension_numbers<[1], [0], [0], [1], [0, 0, 1, 1], [], []>} : vector<8x8xf32>, vector<8x8xf32>, vector<8x8xf32> -> vector<8x8xf32>
    %cst_36 = arith.constant 0.353553385 : f32
    %50 = vector.broadcast %cst_36 : f32 to vector<8x8xf32>
    %51 = arith.mulf %49, %50 : vector<8x8xf32>
    %cst_37 = arith.constant dense<0xFF800000> : vector<8xf32>
    %52 = vector.multi_reduction <maximumf>, %51, %cst_37 [1] : vector<8x8xf32> to vector<8xf32>
    %53 = vector.shape_cast %52 : vector<8xf32> to vector<8x1xf32>
    %54 = vector.broadcast %53 : vector<8x1xf32> to vector<8x8xf32>
    %55 = arith.subf %51, %54 : vector<8x8xf32>
    %56 = math.exp %55 : vector<8x8xf32>
    %cst_38 = arith.constant dense<0.000000e+00> : vector<8xf32>
    %57 = vector.multi_reduction <add>, %56, %cst_38 [1] : vector<8x8xf32> to vector<8xf32>
    %58 = vector.shape_cast %57 : vector<8xf32> to vector<8x1xf32>
    %59 = tpu.reciprocal %58 {approx = true} : vector<8x1xf32> -> vector<8x1xf32>
    %60 = vector.broadcast %59 : vector<8x1xf32> to vector<8x8xf32>
    %61 = arith.mulf %56, %60 : vector<8x8xf32>
    %cst_39 = arith.constant dense<0.000000e+00> : vector<8x8xf32>
    %62 = tpu.matmul %61, %47, %cst_39 {dimension_numbers = #tpu.dot_dimension_numbers<[1], [0], [0], [1], [0, 0, 1, 1], [], []>} : vector<8x8xf32>, vector<8x8xf32>, vector<8x8xf32> -> vector<8x8xf32>
    %c0_40 = arith.constant 0 : index
    %c8 = arith.constant 8 : index
    %63 = vector.load %arg20[%c0_40, %c8] : memref<8x64xf32, #tpu.memory_space<vmem>>, vector<8x8xf32>
    tpu.vector_store %arg20[%c0_40, %c8], %62 {strides = array<i32>} : memref<8x64xf32, #tpu.memory_space<vmem>>, vector<8x8xf32>,
    %64 = vector.extract_strided_slice %23 {offsets = [0, 16], sizes = [8, 8], strides = [1, 1]} : vector<8x64xf32> to vector<8x8xf32>
    %65 = vector.extract_strided_slice %24 {offsets = [0, 16], sizes = [8, 8], strides = [1, 1]} : vector<8x64xf32> to vector<8x8xf32>
    %66 = vector.extract_strided_slice %25 {offsets = [0, 16], sizes = [8, 8], strides = [1, 1]} : vector<8x64xf32> to vector<8x8xf32>
    %67 = tpu.transpose %65, [1, 0] : vector<8x8xf32> -> vector<8x8xf32>
    %cst_41 = arith.constant dense<0.000000e+00> : vector<8x8xf32>
    %68 = tpu.matmul %64, %67, %cst_41 {dimension_numbers = #tpu.dot_dimension_numbers<[1], [0], [0], [1], [0, 0, 1, 1], [], []>} : vector<8x8xf32>, vector<8x8xf32>, vector<8x8xf32> -> vector<8x8xf32>
    %cst_42 = arith.constant 0.353553385 : f32
    %69 = vector.broadcast %cst_42 : f32 to vector<8x8xf32>
    %70 = arith.mulf %68, %69 : vector<8x8xf32>
    %cst_43 = arith.constant dense<0xFF800000> : vector<8xf32>
    %71 = vector.multi_reduction <maximumf>, %70, %cst_43 [1] : vector<8x8xf32> to vector<8xf32>
    %72 = vector.shape_cast %71 : vector<8xf32> to vector<8x1xf32>
    %73 = vector.broadcast %72 : vector<8x1xf32> to vector<8x8xf32>
    %74 = arith.subf %70, %73 : vector<8x8xf32>
    %75 = math.exp %74 : vector<8x8xf32>
    %cst_44 = arith.constant dense<0.000000e+00> : vector<8xf32>
    %76 = vector.multi_reduction <add>, %75, %cst_44 [1] : vector<8x8xf32> to vector<8xf32>
    %77 = vector.shape_cast %76 : vector<8xf32> to vector<8x1xf32>
    %78 = tpu.reciprocal %77 {approx = true} : vector<8x1xf32> -> vector<8x1xf32>
    %79 = vector.broadcast %78 : vector<8x1xf32> to vector<8x8xf32>
    %80 = arith.mulf %75, %79 : vector<8x8xf32>
    %cst_45 = arith.constant dense<0.000000e+00> : vector<8x8xf32>
    %81 = tpu.matmul %80, %66, %cst_45 {dimension_numbers = #tpu.dot_dimension_numbers<[1], [0], [0], [1], [0, 0, 1, 1], [], []>} : vector<8x8xf32>, vector<8x8xf32>, vector<8x8xf32> -> vector<8x8xf32>
    %c0_46 = arith.constant 0 : index
    %c16 = arith.constant 16 : index
    %82 = vector.load %arg20[%c0_46, %c16] : memref<8x64xf32, #tpu.memory_space<vmem>>, vector<8x8xf32>
    tpu.vector_store %arg20[%c0_46, %c16], %81 {strides = array<i32>} : memref<8x64xf32, #tpu.memory_space<vmem>>, vector<8x8xf32>,
    %83 = vector.extract_strided_slice %23 {offsets = [0, 24], sizes = [8, 8], strides = [1, 1]} : vector<8x64xf32> to vector<8x8xf32>
    %84 = vector.extract_strided_slice %24 {offsets = [0, 24], sizes = [8, 8], strides = [1, 1]} : vector<8x64xf32> to vector<8x8xf32>
    %85 = vector.extract_strided_slice %25 {offsets = [0, 24], sizes = [8, 8], strides = [1, 1]} : vector<8x64xf32> to vector<8x8xf32>
    %86 = tpu.transpose %84, [1, 0] : vector<8x8xf32> -> vector<8x8xf32>
    %cst_47 = arith.constant dense<0.000000e+00> : vector<8x8xf32>
    %87 = tpu.matmul %83, %86, %cst_47 {dimension_numbers = #tpu.dot_dimension_numbers<[1], [0], [0], [1], [0, 0, 1, 1], [], []>} : vector<8x8xf32>, vector<8x8xf32>, vector<8x8xf32> -> vector<8x8xf32>
    %cst_48 = arith.constant 0.353553385 : f32
    %88 = vector.broadcast %cst_48 : f32 to vector<8x8xf32>
    %89 = arith.mulf %87, %88 : vector<8x8xf32>
    %cst_49 = arith.constant dense<0xFF800000> : vector<8xf32>
    %90 = vector.multi_reduction <maximumf>, %89, %cst_49 [1] : vector<8x8xf32> to vector<8xf32>
    %91 = vector.shape_cast %90 : vector<8xf32> to vector<8x1xf32>
    %92 = vector.broadcast %91 : vector<8x1xf32> to vector<8x8xf32>
    %93 = arith.subf %89, %92 : vector<8x8xf32>
    %94 = math.exp %93 : vector<8x8xf32>
    %cst_50 = arith.constant dense<0.000000e+00> : vector<8xf32>
    %95 = vector.multi_reduction <add>, %94, %cst_50 [1] : vector<8x8xf32> to vector<8xf32>
    %96 = vector.shape_cast %95 : vector<8xf32> to vector<8x1xf32>
    %97 = tpu.reciprocal %96 {approx = true} : vector<8x1xf32> -> vector<8x1xf32>
    %98 = vector.broadcast %97 : vector<8x1xf32> to vector<8x8xf32>
    %99 = arith.mulf %94, %98 : vector<8x8xf32>
    %cst_51 = arith.constant dense<0.000000e+00> : vector<8x8xf32>
    %100 = tpu.matmul %99, %85, %cst_51 {dimension_numbers = #tpu.dot_dimension_numbers<[1], [0], [0], [1], [0, 0, 1, 1], [], []>} : vector<8x8xf32>, vector<8x8xf32>, vector<8x8xf32> -> vector<8x8xf32>
    %c0_52 = arith.constant 0 : index
    %c24 = arith.constant 24 : index
    %101 = vector.load %arg20[%c0_52, %c24] : memref<8x64xf32, #tpu.memory_space<vmem>>, vector<8x8xf32>
    tpu.vector_store %arg20[%c0_52, %c24], %100 {strides = array<i32>} : memref<8x64xf32, #tpu.memory_space<vmem>>, vector<8x8xf32>,
    %102 = vector.extract_strided_slice %23 {offsets = [0, 32], sizes = [8, 8], strides = [1, 1]} : vector<8x64xf32> to vector<8x8xf32>
    %103 = vector.extract_strided_slice %24 {offsets = [0, 32], sizes = [8, 8], strides = [1, 1]} : vector<8x64xf32> to vector<8x8xf32>
    %104 = vector.extract_strided_slice %25 {offsets = [0, 32], sizes = [8, 8], strides = [1, 1]} : vector<8x64xf32> to vector<8x8xf32>
    %105 = tpu.transpose %103, [1, 0] : vector<8x8xf32> -> vector<8x8xf32>
    %cst_53 = arith.constant dense<0.000000e+00> : vector<8x8xf32>
    %106 = tpu.matmul %102, %105, %cst_53 {dimension_numbers = #tpu.dot_dimension_numbers<[1], [0], [0], [1], [0, 0, 1, 1], [], []>} : vector<8x8xf32>, vector<8x8xf32>, vector<8x8xf32> -> vector<8x8xf32>
    %cst_54 = arith.constant 0.353553385 : f32
    %107 = vector.broadcast %cst_54 : f32 to vector<8x8xf32>
    %108 = arith.mulf %106, %107 : vector<8x8xf32>
    %cst_55 = arith.constant dense<0xFF800000> : vector<8xf32>
    %109 = vector.multi_reduction <maximumf>, %108, %cst_55 [1] : vector<8x8xf32> to vector<8xf32>
    %110 = vector.shape_cast %109 : vector<8xf32> to vector<8x1xf32>
    %111 = vector.broadcast %110 : vector<8x1xf32> to vector<8x8xf32>
    %112 = arith.subf %108, %111 : vector<8x8xf32>
    %113 = math.exp %112 : vector<8x8xf32>
    %cst_56 = arith.constant dense<0.000000e+00> : vector<8xf32>
    %114 = vector.multi_reduction <add>, %113, %cst_56 [1] : vector<8x8xf32> to vector<8xf32>
    %115 = vector.shape_cast %114 : vector<8xf32> to vector<8x1xf32>
    %116 = tpu.reciprocal %115 {approx = true} : vector<8x1xf32> -> vector<8x1xf32>
    %117 = vector.broadcast %116 : vector<8x1xf32> to vector<8x8xf32>
    %118 = arith.mulf %113, %117 : vector<8x8xf32>
    %cst_57 = arith.constant dense<0.000000e+00> : vector<8x8xf32>
    %119 = tpu.matmul %118, %104, %cst_57 {dimension_numbers = #tpu.dot_dimension_numbers<[1], [0], [0], [1], [0, 0, 1, 1], [], []>} : vector<8x8xf32>, vector<8x8xf32>, vector<8x8xf32> -> vector<8x8xf32>
    %c0_58 = arith.constant 0 : index
    %c32 = arith.constant 32 : index
    %120 = vector.load %arg20[%c0_58, %c32] : memref<8x64xf32, #tpu.memory_space<vmem>>, vector<8x8xf32>
    tpu.vector_store %arg20[%c0_58, %c32], %119 {strides = array<i32>} : memref<8x64xf32, #tpu.memory_space<vmem>>, vector<8x8xf32>,
    %121 = vector.extract_strided_slice %23 {offsets = [0, 40], sizes = [8, 8], strides = [1, 1]} : vector<8x64xf32> to vector<8x8xf32>
    %122 = vector.extract_strided_slice %24 {offsets = [0, 40], sizes = [8, 8], strides = [1, 1]} : vector<8x64xf32> to vector<8x8xf32>
    %123 = vector.extract_strided_slice %25 {offsets = [0, 40], sizes = [8, 8], strides = [1, 1]} : vector<8x64xf32> to vector<8x8xf32>
    %124 = tpu.transpose %122, [1, 0] : vector<8x8xf32> -> vector<8x8xf32>
    %cst_59 = arith.constant dense<0.000000e+00> : vector<8x8xf32>
    %125 = tpu.matmul %121, %124, %cst_59 {dimension_numbers = #tpu.dot_dimension_numbers<[1], [0], [0], [1], [0, 0, 1, 1], [], []>} : vector<8x8xf32>, vector<8x8xf32>, vector<8x8xf32> -> vector<8x8xf32>
    %cst_60 = arith.constant 0.353553385 : f32
    %126 = vector.broadcast %cst_60 : f32 to vector<8x8xf32>
    %127 = arith.mulf %125, %126 : vector<8x8xf32>
    %cst_61 = arith.constant dense<0xFF800000> : vector<8xf32>
    %128 = vector.multi_reduction <maximumf>, %127, %cst_61 [1] : vector<8x8xf32> to vector<8xf32>
    %129 = vector.shape_cast %128 : vector<8xf32> to vector<8x1xf32>
    %130 = vector.broadcast %129 : vector<8x1xf32> to vector<8x8xf32>
    %131 = arith.subf %127, %130 : vector<8x8xf32>
    %132 = math.exp %131 : vector<8x8xf32>
    %cst_62 = arith.constant dense<0.000000e+00> : vector<8xf32>
    %133 = vector.multi_reduction <add>, %132, %cst_62 [1] : vector<8x8xf32> to vector<8xf32>
    %134 = vector.shape_cast %133 : vector<8xf32> to vector<8x1xf32>
    %135 = tpu.reciprocal %134 {approx = true} : vector<8x1xf32> -> vector<8x1xf32>
    %136 = vector.broadcast %135 : vector<8x1xf32> to vector<8x8xf32>
    %137 = arith.mulf %132, %136 : vector<8x8xf32>
    %cst_63 = arith.constant dense<0.000000e+00> : vector<8x8xf32>
    %138 = tpu.matmul %137, %123, %cst_63 {dimension_numbers = #tpu.dot_dimension_numbers<[1], [0], [0], [1], [0, 0, 1, 1], [], []>} : vector<8x8xf32>, vector<8x8xf32>, vector<8x8xf32> -> vector<8x8xf32>
    %c0_64 = arith.constant 0 : index
    %c40 = arith.constant 40 : index
    %139 = vector.load %arg20[%c0_64, %c40] : memref<8x64xf32, #tpu.memory_space<vmem>>, vector<8x8xf32>
    tpu.vector_store %arg20[%c0_64, %c40], %138 {strides = array<i32>} : memref<8x64xf32, #tpu.memory_space<vmem>>, vector<8x8xf32>,
    %140 = vector.extract_strided_slice %23 {offsets = [0, 48], sizes = [8, 8], strides = [1, 1]} : vector<8x64xf32> to vector<8x8xf32>
    %141 = vector.extract_strided_slice %24 {offsets = [0, 48], sizes = [8, 8], strides = [1, 1]} : vector<8x64xf32> to vector<8x8xf32>
    %142 = vector.extract_strided_slice %25 {offsets = [0, 48], sizes = [8, 8], strides = [1, 1]} : vector<8x64xf32> to vector<8x8xf32>
    %143 = tpu.transpose %141, [1, 0] : vector<8x8xf32> -> vector<8x8xf32>
    %cst_65 = arith.constant dense<0.000000e+00> : vector<8x8xf32>
    %144 = tpu.matmul %140, %143, %cst_65 {dimension_numbers = #tpu.dot_dimension_numbers<[1], [0], [0], [1], [0, 0, 1, 1], [], []>} : vector<8x8xf32>, vector<8x8xf32>, vector<8x8xf32> -> vector<8x8xf32>
    %cst_66 = arith.constant 0.353553385 : f32
    %145 = vector.broadcast %cst_66 : f32 to vector<8x8xf32>
    %146 = arith.mulf %144, %145 : vector<8x8xf32>
    %cst_67 = arith.constant dense<0xFF800000> : vector<8xf32>
    %147 = vector.multi_reduction <maximumf>, %146, %cst_67 [1] : vector<8x8xf32> to vector<8xf32>
    %148 = vector.shape_cast %147 : vector<8xf32> to vector<8x1xf32>
    %149 = vector.broadcast %148 : vector<8x1xf32> to vector<8x8xf32>
    %150 = arith.subf %146, %149 : vector<8x8xf32>
    %151 = math.exp %150 : vector<8x8xf32>
    %cst_68 = arith.constant dense<0.000000e+00> : vector<8xf32>
    %152 = vector.multi_reduction <add>, %151, %cst_68 [1] : vector<8x8xf32> to vector<8xf32>
    %153 = vector.shape_cast %152 : vector<8xf32> to vector<8x1xf32>
    %154 = tpu.reciprocal %153 {approx = true} : vector<8x1xf32> -> vector<8x1xf32>
    %155 = vector.broadcast %154 : vector<8x1xf32> to vector<8x8xf32>
    %156 = arith.mulf %151, %155 : vector<8x8xf32>
    %cst_69 = arith.constant dense<0.000000e+00> : vector<8x8xf32>
    %157 = tpu.matmul %156, %142, %cst_69 {dimension_numbers = #tpu.dot_dimension_numbers<[1], [0], [0], [1], [0, 0, 1, 1], [], []>} : vector<8x8xf32>, vector<8x8xf32>, vector<8x8xf32> -> vector<8x8xf32>
    %c0_70 = arith.constant 0 : index
    %c48 = arith.constant 48 : index
    %158 = vector.load %arg20[%c0_70, %c48] : memref<8x64xf32, #tpu.memory_space<vmem>>, vector<8x8xf32>
    tpu.vector_store %arg20[%c0_70, %c48], %157 {strides = array<i32>} : memref<8x64xf32, #tpu.memory_space<vmem>>, vector<8x8xf32>,
    %159 = vector.extract_strided_slice %23 {offsets = [0, 56], sizes = [8, 8], strides = [1, 1]} : vector<8x64xf32> to vector<8x8xf32>
    %160 = vector.extract_strided_slice %24 {offsets = [0, 56], sizes = [8, 8], strides = [1, 1]} : vector<8x64xf32> to vector<8x8xf32>
    %161 = vector.extract_strided_slice %25 {offsets = [0, 56], sizes = [8, 8], strides = [1, 1]} : vector<8x64xf32> to vector<8x8xf32>
    %162 = tpu.transpose %160, [1, 0] : vector<8x8xf32> -> vector<8x8xf32>
    %cst_71 = arith.constant dense<0.000000e+00> : vector<8x8xf32>
    %163 = tpu.matmul %159, %162, %cst_71 {dimension_numbers = #tpu.dot_dimension_numbers<[1], [0], [0], [1], [0, 0, 1, 1], [], []>} : vector<8x8xf32>, vector<8x8xf32>, vector<8x8xf32> -> vector<8x8xf32>
    %cst_72 = arith.constant 0.353553385 : f32
    %164 = vector.broadcast %cst_72 : f32 to vector<8x8xf32>
    %165 = arith.mulf %163, %164 : vector<8x8xf32>
    %cst_73 = arith.constant dense<0xFF800000> : vector<8xf32>
    %166 = vector.multi_reduction <maximumf>, %165, %cst_73 [1] : vector<8x8xf32> to vector<8xf32>
    %167 = vector.shape_cast %166 : vector<8xf32> to vector<8x1xf32>
    %168 = vector.broadcast %167 : vector<8x1xf32> to vector<8x8xf32>
    %169 = arith.subf %165, %168 : vector<8x8xf32>
    %170 = math.exp %169 : vector<8x8xf32>
    %cst_74 = arith.constant dense<0.000000e+00> : vector<8xf32>
    %171 = vector.multi_reduction <add>, %170, %cst_74 [1] : vector<8x8xf32> to vector<8xf32>
    %172 = vector.shape_cast %171 : vector<8xf32> to vector<8x1xf32>
    %173 = tpu.reciprocal %172 {approx = true} : vector<8x1xf32> -> vector<8x1xf32>
    %174 = vector.broadcast %173 : vector<8x1xf32> to vector<8x8xf32>
    %175 = arith.mulf %170, %174 : vector<8x8xf32>
    %cst_75 = arith.constant dense<0.000000e+00> : vector<8x8xf32>
    %176 = tpu.matmul %175, %161, %cst_75 {dimension_numbers = #tpu.dot_dimension_numbers<[1], [0], [0], [1], [0, 0, 1, 1], [], []>} : vector<8x8xf32>, vector<8x8xf32>, vector<8x8xf32> -> vector<8x8xf32>
    %c0_76 = arith.constant 0 : index
    %c56 = arith.constant 56 : index
    %177 = vector.load %arg20[%c0_76, %c56] : memref<8x64xf32, #tpu.memory_space<vmem>>, vector<8x8xf32>
    tpu.vector_store %arg20[%c0_76, %c56], %176 {strides = array<i32>} : memref<8x64xf32, #tpu.memory_space<vmem>>, vector<8x8xf32>,
    %c0_77 = arith.constant 0 : index
    %c0_78 = arith.constant 0 : index
    %178 = vector.load %arg20[%c0_77, %c0_78] : memref<8x64xf32, #tpu.memory_space<vmem>>, vector<8x64xf32>
    %c0_79 = arith.constant 0 : index
    %c0_80 = arith.constant 0 : index
    %c0_81 = arith.constant 0 : index
    %179 = vector.load %arg7[%c0_79, %c0_80, %c0_81] : memref<3x64x64xf32, #tpu.memory_space<vmem>>, vector<1x64x64xf32>
    %180 = vector.shape_cast %179 : vector<1x64x64xf32> to vector<64x64xf32>
    %cst_82 = arith.constant dense<0.000000e+00> : vector<8x64xf32>
    %181 = tpu.matmul %178, %180, %cst_82 {dimension_numbers = #tpu.dot_dimension_numbers<[1], [0], [0], [1], [0, 0, 1, 1], [], []>} : vector<8x64xf32>, vector<64x64xf32>, vector<8x64xf32> -> vector<8x64xf32>
    %182 = vector.extract_strided_slice %1 {offsets = [0, 0], sizes = [1, 64], strides = [1, 1]} : vector<3x64xf32> to vector<1x64xf32>
    %183 = vector.broadcast %182 : vector<1x64xf32> to vector<8x64xf32>
    %184 = arith.addf %181, %183 : vector<8x64xf32>
    %185 = arith.addf %16, %184 : vector<8x64xf32>
    %186 = vector.extract_strided_slice %2 {offsets = [0, 0], sizes = [1, 64], strides = [1, 1]} : vector<3x64xf32> to vector<1x64xf32>
    %187 = vector.extract_strided_slice %3 {offsets = [0, 0], sizes = [1, 64], strides = [1, 1]} : vector<3x64xf32> to vector<1x64xf32>
    %cst_83 = arith.constant dense<0.000000e+00> : vector<8xf32>
    %188 = vector.multi_reduction <add>, %185, %cst_83 [1] : vector<8x64xf32> to vector<8xf32>
    %189 = vector.shape_cast %188 : vector<8xf32> to vector<8x1xf32>
    %cst_84 = arith.constant 6.400000e+01 : f32
    %190 = vector.broadcast %cst_84 : f32 to vector<8x1xf32>
    %191 = arith.divf %189, %190 : vector<8x1xf32>
    %192 = vector.broadcast %191 : vector<8x1xf32> to vector<8x64xf32>
    %193 = arith.subf %185, %192 : vector<8x64xf32>
    %194 = arith.mulf %193, %193 : vector<8x64xf32>
    %cst_85 = arith.constant dense<0.000000e+00> : vector<8xf32>
    %195 = vector.multi_reduction <add>, %194, %cst_85 [1] : vector<8x64xf32> to vector<8xf32>
    %196 = vector.shape_cast %195 : vector<8xf32> to vector<8x1xf32>
    %cst_86 = arith.constant 6.400000e+01 : f32
    %197 = vector.broadcast %cst_86 : f32 to vector<8x1xf32>
    %198 = arith.divf %196, %197 : vector<8x1xf32>
    %cst_87 = arith.constant 9.99999974E-6 : f32
    %199 = vector.broadcast %cst_87 : f32 to vector<8x1xf32>
    %200 = arith.addf %198, %199 : vector<8x1xf32>
    %201 = math.rsqrt %200 : vector<8x1xf32>
    %202 = vector.broadcast %201 : vector<8x1xf32> to vector<8x64xf32>
    %203 = arith.mulf %193, %202 : vector<8x64xf32>
    %204 = vector.broadcast %186 : vector<1x64xf32> to vector<8x64xf32>
    %205 = arith.mulf %203, %204 : vector<8x64xf32>
    %206 = vector.broadcast %187 : vector<1x64xf32> to vector<8x64xf32>
    %207 = arith.addf %205, %206 : vector<8x64xf32>
    %c0_88 = arith.constant 0 : index
    %c0_89 = arith.constant 0 : index
    %c0_90 = arith.constant 0 : index
    %208 = vector.load %arg11[%c0_88, %c0_89, %c0_90] : memref<3x64x2048xf32, #tpu.memory_space<vmem>>, vector<1x64x2048xf32>
    %209 = vector.shape_cast %208 : vector<1x64x2048xf32> to vector<64x2048xf32>
    %cst_91 = arith.constant dense<0.000000e+00> : vector<8x2048xf32>
    %210 = tpu.matmul %207, %209, %cst_91 {dimension_numbers = #tpu.dot_dimension_numbers<[1], [0], [0], [1], [0, 0, 1, 1], [], []>} : vector<8x64xf32>, vector<64x2048xf32>, vector<8x2048xf32> -> vector<8x2048xf32>
    %211 = vector.extract_strided_slice %6 {offsets = [0, 0], sizes = [1, 2048], strides = [1, 1]} : vector<3x2048xf32> to vector<1x2048xf32>
    %212 = vector.broadcast %211 : vector<1x2048xf32> to vector<8x2048xf32>
    %213 = arith.addf %210, %212 : vector<8x2048xf32>
    %cst_92 = arith.constant 0.000000e+00 : f32
    %214 = vector.broadcast %cst_92 : f32 to vector<8x2048xf32>
    %215 = arith.maximumf %213, %214 : vector<8x2048xf32>
    %c0_93 = arith.constant 0 : index
    %c0_94 = arith.constant 0 : index
    %c0_95 = arith.constant 0 : index
    %216 = vector.load %arg13[%c0_93, %c0_94, %c0_95] : memref<3x2048x64xf32, #tpu.memory_space<vmem>>, vector<1x2048x64xf32>
    %217 = vector.shape_cast %216 : vector<1x2048x64xf32> to vector<2048x64xf32>
    %cst_96 = arith.constant dense<0.000000e+00> : vector<8x64xf32>
    %218 = tpu.matmul %215, %217, %cst_96 {dimension_numbers = #tpu.dot_dimension_numbers<[1], [0], [0], [1], [0, 0, 1, 1], [], []>} : vector<8x2048xf32>, vector<2048x64xf32>, vector<8x64xf32> -> vector<8x64xf32>
    %219 = vector.extract_strided_slice %7 {offsets = [0, 0], sizes = [1, 64], strides = [1, 1]} : vector<3x64xf32> to vector<1x64xf32>
    %220 = vector.broadcast %219 : vector<1x64xf32> to vector<8x64xf32>
    %221 = arith.addf %218, %220 : vector<8x64xf32>
    %222 = arith.addf %207, %221 : vector<8x64xf32>
    %223 = vector.extract_strided_slice %4 {offsets = [0, 0], sizes = [1, 64], strides = [1, 1]} : vector<3x64xf32> to vector<1x64xf32>
    %224 = vector.extract_strided_slice %5 {offsets = [0, 0], sizes = [1, 64], strides = [1, 1]} : vector<3x64xf32> to vector<1x64xf32>
    %cst_97 = arith.constant dense<0.000000e+00> : vector<8xf32>
    %225 = vector.multi_reduction <add>, %222, %cst_97 [1] : vector<8x64xf32> to vector<8xf32>
    %226 = vector.shape_cast %225 : vector<8xf32> to vector<8x1xf32>
    %cst_98 = arith.constant 6.400000e+01 : f32
    %227 = vector.broadcast %cst_98 : f32 to vector<8x1xf32>
    %228 = arith.divf %226, %227 : vector<8x1xf32>
    %229 = vector.broadcast %228 : vector<8x1xf32> to vector<8x64xf32>
    %230 = arith.subf %222, %229 : vector<8x64xf32>
    %231 = arith.mulf %230, %230 : vector<8x64xf32>
    %cst_99 = arith.constant dense<0.000000e+00> : vector<8xf32>
    %232 = vector.multi_reduction <add>, %231, %cst_99 [1] : vector<8x64xf32> to vector<8xf32>
    %233 = vector.shape_cast %232 : vector<8xf32> to vector<8x1xf32>
    %cst_100 = arith.constant 6.400000e+01 : f32
    %234 = vector.broadcast %cst_100 : f32 to vector<8x1xf32>
    %235 = arith.divf %233, %234 : vector<8x1xf32>
    %cst_101 = arith.constant 9.99999974E-6 : f32
    %236 = vector.broadcast %cst_101 : f32 to vector<8x1xf32>
    %237 = arith.addf %235, %236 : vector<8x1xf32>
    %238 = math.rsqrt %237 : vector<8x1xf32>
    %239 = vector.broadcast %238 : vector<8x1xf32> to vector<8x64xf32>
    %240 = arith.mulf %230, %239 : vector<8x64xf32>
    %241 = vector.broadcast %223 : vector<1x64xf32> to vector<8x64xf32>
    %242 = arith.mulf %240, %241 : vector<8x64xf32>
    %243 = vector.broadcast %224 : vector<1x64xf32> to vector<8x64xf32>
    %244 = arith.addf %242, %243 : vector<8x64xf32>
    %c1 = arith.constant 1 : index
    %c0_102 = arith.constant 0 : index
    %c0_103 = arith.constant 0 : index
    %245 = vector.load %arg5[%c1, %c0_102, %c0_103] : memref<3x64x192xf32, #tpu.memory_space<vmem>>, vector<1x64x192xf32>
    %246 = vector.shape_cast %245 : vector<1x64x192xf32> to vector<64x192xf32>
    %cst_104 = arith.constant dense<0.000000e+00> : vector<8x192xf32>
    %247 = tpu.matmul %244, %246, %cst_104 {dimension_numbers = #tpu.dot_dimension_numbers<[1], [0], [0], [1], [0, 0, 1, 1], [], []>} : vector<8x64xf32>, vector<64x192xf32>, vector<8x192xf32> -> vector<8x192xf32>
    %248 = vector.extract_strided_slice %0 {offsets = [1, 0], sizes = [1, 192], strides = [1, 1]} : vector<3x192xf32> to vector<1x192xf32>
    %249 = vector.broadcast %248 : vector<1x192xf32> to vector<8x192xf32>
    %250 = arith.addf %247, %249 : vector<8x192xf32>
    %251 = vector.extract_strided_slice %250 {offsets = [0, 0], sizes = [8, 64], strides = [1, 1]} : vector<8x192xf32> to vector<8x64xf32>
    %252 = vector.extract_strided_slice %250 {offsets = [0, 64], sizes = [8, 64], strides = [1, 1]} : vector<8x192xf32> to vector<8x64xf32>
    %253 = vector.extract_strided_slice %250 {offsets = [0, 128], sizes = [8, 64], strides = [1, 1]} : vector<8x192xf32> to vector<8x64xf32>
    %254 = vector.extract_strided_slice %251 {offsets = [0, 0], sizes = [8, 8], strides = [1, 1]} : vector<8x64xf32> to vector<8x8xf32>
    %255 = vector.extract_strided_slice %252 {offsets = [0, 0], sizes = [8, 8], strides = [1, 1]} : vector<8x64xf32> to vector<8x8xf32>
    %256 = vector.extract_strided_slice %253 {offsets = [0, 0], sizes = [8, 8], strides = [1, 1]} : vector<8x64xf32> to vector<8x8xf32>
    %257 = tpu.transpose %255, [1, 0] : vector<8x8xf32> -> vector<8x8xf32>
    %cst_105 = arith.constant dense<0.000000e+00> : vector<8x8xf32>
    %258 = tpu.matmul %254, %257, %cst_105 {dimension_numbers = #tpu.dot_dimension_numbers<[1], [0], [0], [1], [0, 0, 1, 1], [], []>} : vector<8x8xf32>, vector<8x8xf32>, vector<8x8xf32> -> vector<8x8xf32>
    %cst_106 = arith.constant 0.353553385 : f32
    %259 = vector.broadcast %cst_106 : f32 to vector<8x8xf32>
    %260 = arith.mulf %258, %259 : vector<8x8xf32>
    %cst_107 = arith.constant dense<0xFF800000> : vector<8xf32>
    %261 = vector.multi_reduction <maximumf>, %260, %cst_107 [1] : vector<8x8xf32> to vector<8xf32>
    %262 = vector.shape_cast %261 : vector<8xf32> to vector<8x1xf32>
    %263 = vector.broadcast %262 : vector<8x1xf32> to vector<8x8xf32>
    %264 = arith.subf %260, %263 : vector<8x8xf32>
    %265 = math.exp %264 : vector<8x8xf32>
    %cst_108 = arith.constant dense<0.000000e+00> : vector<8xf32>
    %266 = vector.multi_reduction <add>, %265, %cst_108 [1] : vector<8x8xf32> to vector<8xf32>
    %267 = vector.shape_cast %266 : vector<8xf32> to vector<8x1xf32>
    %268 = tpu.reciprocal %267 {approx = true} : vector<8x1xf32> -> vector<8x1xf32>
    %269 = vector.broadcast %268 : vector<8x1xf32> to vector<8x8xf32>
    %270 = arith.mulf %265, %269 : vector<8x8xf32>
    %cst_109 = arith.constant dense<0.000000e+00> : vector<8x8xf32>
    %271 = tpu.matmul %270, %256, %cst_109 {dimension_numbers = #tpu.dot_dimension_numbers<[1], [0], [0], [1], [0, 0, 1, 1], [], []>} : vector<8x8xf32>, vector<8x8xf32>, vector<8x8xf32> -> vector<8x8xf32>
    %c0_110 = arith.constant 0 : index
    %c0_111 = arith.constant 0 : index
    %272 = vector.load %arg20[%c0_110, %c0_111] : memref<8x64xf32, #tpu.memory_space<vmem>>, vector<8x8xf32>
    tpu.vector_store %arg20[%c0_110, %c0_111], %271 {strides = array<i32>} : memref<8x64xf32, #tpu.memory_space<vmem>>, vector<8x8xf32>,
    %273 = vector.extract_strided_slice %251 {offsets = [0, 8], sizes = [8, 8], strides = [1, 1]} : vector<8x64xf32> to vector<8x8xf32>
    %274 = vector.extract_strided_slice %252 {offsets = [0, 8], sizes = [8, 8], strides = [1, 1]} : vector<8x64xf32> to vector<8x8xf32>
    %275 = vector.extract_strided_slice %253 {offsets = [0, 8], sizes = [8, 8], strides = [1, 1]} : vector<8x64xf32> to vector<8x8xf32>
    %276 = tpu.transpose %274, [1, 0] : vector<8x8xf32> -> vector<8x8xf32>
    %cst_112 = arith.constant dense<0.000000e+00> : vector<8x8xf32>
    %277 = tpu.matmul %273, %276, %cst_112 {dimension_numbers = #tpu.dot_dimension_numbers<[1], [0], [0], [1], [0, 0, 1, 1], [], []>} : vector<8x8xf32>, vector<8x8xf32>, vector<8x8xf32> -> vector<8x8xf32>
    %cst_113 = arith.constant 0.353553385 : f32
    %278 = vector.broadcast %cst_113 : f32 to vector<8x8xf32>
    %279 = arith.mulf %277, %278 : vector<8x8xf32>
    %cst_114 = arith.constant dense<0xFF800000> : vector<8xf32>
    %280 = vector.multi_reduction <maximumf>, %279, %cst_114 [1] : vector<8x8xf32> to vector<8xf32>
    %281 = vector.shape_cast %280 : vector<8xf32> to vector<8x1xf32>
    %282 = vector.broadcast %281 : vector<8x1xf32> to vector<8x8xf32>
    %283 = arith.subf %279, %282 : vector<8x8xf32>
    %284 = math.exp %283 : vector<8x8xf32>
    %cst_115 = arith.constant dense<0.000000e+00> : vector<8xf32>
    %285 = vector.multi_reduction <add>, %284, %cst_115 [1] : vector<8x8xf32> to vector<8xf32>
    %286 = vector.shape_cast %285 : vector<8xf32> to vector<8x1xf32>
    %287 = tpu.reciprocal %286 {approx = true} : vector<8x1xf32> -> vector<8x1xf32>
    %288 = vector.broadcast %287 : vector<8x1xf32> to vector<8x8xf32>
    %289 = arith.mulf %284, %288 : vector<8x8xf32>
    %cst_116 = arith.constant dense<0.000000e+00> : vector<8x8xf32>
    %290 = tpu.matmul %289, %275, %cst_116 {dimension_numbers = #tpu.dot_dimension_numbers<[1], [0], [0], [1], [0, 0, 1, 1], [], []>} : vector<8x8xf32>, vector<8x8xf32>, vector<8x8xf32> -> vector<8x8xf32>
    %c0_117 = arith.constant 0 : index
    %c8_118 = arith.constant 8 : index
    %291 = vector.load %arg20[%c0_117, %c8_118] : memref<8x64xf32, #tpu.memory_space<vmem>>, vector<8x8xf32>
    tpu.vector_store %arg20[%c0_117, %c8_118], %290 {strides = array<i32>} : memref<8x64xf32, #tpu.memory_space<vmem>>, vector<8x8xf32>,
    %292 = vector.extract_strided_slice %251 {offsets = [0, 16], sizes = [8, 8], strides = [1, 1]} : vector<8x64xf32> to vector<8x8xf32>
    %293 = vector.extract_strided_slice %252 {offsets = [0, 16], sizes = [8, 8], strides = [1, 1]} : vector<8x64xf32> to vector<8x8xf32>
    %294 = vector.extract_strided_slice %253 {offsets = [0, 16], sizes = [8, 8], strides = [1, 1]} : vector<8x64xf32> to vector<8x8xf32>
    %295 = tpu.transpose %293, [1, 0] : vector<8x8xf32> -> vector<8x8xf32>
    %cst_119 = arith.constant dense<0.000000e+00> : vector<8x8xf32>
    %296 = tpu.matmul %292, %295, %cst_119 {dimension_numbers = #tpu.dot_dimension_numbers<[1], [0], [0], [1], [0, 0, 1, 1], [], []>} : vector<8x8xf32>, vector<8x8xf32>, vector<8x8xf32> -> vector<8x8xf32>
    %cst_120 = arith.constant 0.353553385 : f32
    %297 = vector.broadcast %cst_120 : f32 to vector<8x8xf32>
    %298 = arith.mulf %296, %297 : vector<8x8xf32>
    %cst_121 = arith.constant dense<0xFF800000> : vector<8xf32>
    %299 = vector.multi_reduction <maximumf>, %298, %cst_121 [1] : vector<8x8xf32> to vector<8xf32>
    %300 = vector.shape_cast %299 : vector<8xf32> to vector<8x1xf32>
    %301 = vector.broadcast %300 : vector<8x1xf32> to vector<8x8xf32>
    %302 = arith.subf %298, %301 : vector<8x8xf32>
    %303 = math.exp %302 : vector<8x8xf32>
    %cst_122 = arith.constant dense<0.000000e+00> : vector<8xf32>
    %304 = vector.multi_reduction <add>, %303, %cst_122 [1] : vector<8x8xf32> to vector<8xf32>
    %305 = vector.shape_cast %304 : vector<8xf32> to vector<8x1xf32>
    %306 = tpu.reciprocal %305 {approx = true} : vector<8x1xf32> -> vector<8x1xf32>
    %307 = vector.broadcast %306 : vector<8x1xf32> to vector<8x8xf32>
    %308 = arith.mulf %303, %307 : vector<8x8xf32>
    %cst_123 = arith.constant dense<0.000000e+00> : vector<8x8xf32>
    %309 = tpu.matmul %308, %294, %cst_123 {dimension_numbers = #tpu.dot_dimension_numbers<[1], [0], [0], [1], [0, 0, 1, 1], [], []>} : vector<8x8xf32>, vector<8x8xf32>, vector<8x8xf32> -> vector<8x8xf32>
    %c0_124 = arith.constant 0 : index
    %c16_125 = arith.constant 16 : index
    %310 = vector.load %arg20[%c0_124, %c16_125] : memref<8x64xf32, #tpu.memory_space<vmem>>, vector<8x8xf32>
    tpu.vector_store %arg20[%c0_124, %c16_125], %309 {strides = array<i32>} : memref<8x64xf32, #tpu.memory_space<vmem>>, vector<8x8xf32>,
    %311 = vector.extract_strided_slice %251 {offsets = [0, 24], sizes = [8, 8], strides = [1, 1]} : vector<8x64xf32> to vector<8x8xf32>
    %312 = vector.extract_strided_slice %252 {offsets = [0, 24], sizes = [8, 8], strides = [1, 1]} : vector<8x64xf32> to vector<8x8xf32>
    %313 = vector.extract_strided_slice %253 {offsets = [0, 24], sizes = [8, 8], strides = [1, 1]} : vector<8x64xf32> to vector<8x8xf32>
    %314 = tpu.transpose %312, [1, 0] : vector<8x8xf32> -> vector<8x8xf32>
    %cst_126 = arith.constant dense<0.000000e+00> : vector<8x8xf32>
    %315 = tpu.matmul %311, %314, %cst_126 {dimension_numbers = #tpu.dot_dimension_numbers<[1], [0], [0], [1], [0, 0, 1, 1], [], []>} : vector<8x8xf32>, vector<8x8xf32>, vector<8x8xf32> -> vector<8x8xf32>
    %cst_127 = arith.constant 0.353553385 : f32
    %316 = vector.broadcast %cst_127 : f32 to vector<8x8xf32>
    %317 = arith.mulf %315, %316 : vector<8x8xf32>
    %cst_128 = arith.constant dense<0xFF800000> : vector<8xf32>
    %318 = vector.multi_reduction <maximumf>, %317, %cst_128 [1] : vector<8x8xf32> to vector<8xf32>
    %319 = vector.shape_cast %318 : vector<8xf32> to vector<8x1xf32>
    %320 = vector.broadcast %319 : vector<8x1xf32> to vector<8x8xf32>
    %321 = arith.subf %317, %320 : vector<8x8xf32>
    %322 = math.exp %321 : vector<8x8xf32>
    %cst_129 = arith.constant dense<0.000000e+00> : vector<8xf32>
    %323 = vector.multi_reduction <add>, %322, %cst_129 [1] : vector<8x8xf32> to vector<8xf32>
    %324 = vector.shape_cast %323 : vector<8xf32> to vector<8x1xf32>
    %325 = tpu.reciprocal %324 {approx = true} : vector<8x1xf32> -> vector<8x1xf32>
    %326 = vector.broadcast %325 : vector<8x1xf32> to vector<8x8xf32>
    %327 = arith.mulf %322, %326 : vector<8x8xf32>
    %cst_130 = arith.constant dense<0.000000e+00> : vector<8x8xf32>
    %328 = tpu.matmul %327, %313, %cst_130 {dimension_numbers = #tpu.dot_dimension_numbers<[1], [0], [0], [1], [0, 0, 1, 1], [], []>} : vector<8x8xf32>, vector<8x8xf32>, vector<8x8xf32> -> vector<8x8xf32>
    %c0_131 = arith.constant 0 : index
    %c24_132 = arith.constant 24 : index
    %329 = vector.load %arg20[%c0_131, %c24_132] : memref<8x64xf32, #tpu.memory_space<vmem>>, vector<8x8xf32>
    tpu.vector_store %arg20[%c0_131, %c24_132], %328 {strides = array<i32>} : memref<8x64xf32, #tpu.memory_space<vmem>>, vector<8x8xf32>,
    %330 = vector.extract_strided_slice %251 {offsets = [0, 32], sizes = [8, 8], strides = [1, 1]} : vector<8x64xf32> to vector<8x8xf32>
    %331 = vector.extract_strided_slice %252 {offsets = [0, 32], sizes = [8, 8], strides = [1, 1]} : vector<8x64xf32> to vector<8x8xf32>
    %332 = vector.extract_strided_slice %253 {offsets = [0, 32], sizes = [8, 8], strides = [1, 1]} : vector<8x64xf32> to vector<8x8xf32>
    %333 = tpu.transpose %331, [1, 0] : vector<8x8xf32> -> vector<8x8xf32>
    %cst_133 = arith.constant dense<0.000000e+00> : vector<8x8xf32>
    %334 = tpu.matmul %330, %333, %cst_133 {dimension_numbers = #tpu.dot_dimension_numbers<[1], [0], [0], [1], [0, 0, 1, 1], [], []>} : vector<8x8xf32>, vector<8x8xf32>, vector<8x8xf32> -> vector<8x8xf32>
    %cst_134 = arith.constant 0.353553385 : f32
    %335 = vector.broadcast %cst_134 : f32 to vector<8x8xf32>
    %336 = arith.mulf %334, %335 : vector<8x8xf32>
    %cst_135 = arith.constant dense<0xFF800000> : vector<8xf32>
    %337 = vector.multi_reduction <maximumf>, %336, %cst_135 [1] : vector<8x8xf32> to vector<8xf32>
    %338 = vector.shape_cast %337 : vector<8xf32> to vector<8x1xf32>
    %339 = vector.broadcast %338 : vector<8x1xf32> to vector<8x8xf32>
    %340 = arith.subf %336, %339 : vector<8x8xf32>
    %341 = math.exp %340 : vector<8x8xf32>
    %cst_136 = arith.constant dense<0.000000e+00> : vector<8xf32>
    %342 = vector.multi_reduction <add>, %341, %cst_136 [1] : vector<8x8xf32> to vector<8xf32>
    %343 = vector.shape_cast %342 : vector<8xf32> to vector<8x1xf32>
    %344 = tpu.reciprocal %343 {approx = true} : vector<8x1xf32> -> vector<8x1xf32>
    %345 = vector.broadcast %344 : vector<8x1xf32> to vector<8x8xf32>
    %346 = arith.mulf %341, %345 : vector<8x8xf32>
    %cst_137 = arith.constant dense<0.000000e+00> : vector<8x8xf32>
    %347 = tpu.matmul %346, %332, %cst_137 {dimension_numbers = #tpu.dot_dimension_numbers<[1], [0], [0], [1], [0, 0, 1, 1], [], []>} : vector<8x8xf32>, vector<8x8xf32>, vector<8x8xf32> -> vector<8x8xf32>
    %c0_138 = arith.constant 0 : index
    %c32_139 = arith.constant 32 : index
    %348 = vector.load %arg20[%c0_138, %c32_139] : memref<8x64xf32, #tpu.memory_space<vmem>>, vector<8x8xf32>
    tpu.vector_store %arg20[%c0_138, %c32_139], %347 {strides = array<i32>} : memref<8x64xf32, #tpu.memory_space<vmem>>, vector<8x8xf32>,
    %349 = vector.extract_strided_slice %251 {offsets = [0, 40], sizes = [8, 8], strides = [1, 1]} : vector<8x64xf32> to vector<8x8xf32>
    %350 = vector.extract_strided_slice %252 {offsets = [0, 40], sizes = [8, 8], strides = [1, 1]} : vector<8x64xf32> to vector<8x8xf32>
    %351 = vector.extract_strided_slice %253 {offsets = [0, 40], sizes = [8, 8], strides = [1, 1]} : vector<8x64xf32> to vector<8x8xf32>
    %352 = tpu.transpose %350, [1, 0] : vector<8x8xf32> -> vector<8x8xf32>
    %cst_140 = arith.constant dense<0.000000e+00> : vector<8x8xf32>
    %353 = tpu.matmul %349, %352, %cst_140 {dimension_numbers = #tpu.dot_dimension_numbers<[1], [0], [0], [1], [0, 0, 1, 1], [], []>} : vector<8x8xf32>, vector<8x8xf32>, vector<8x8xf32> -> vector<8x8xf32>
    %cst_141 = arith.constant 0.353553385 : f32
    %354 = vector.broadcast %cst_141 : f32 to vector<8x8xf32>
    %355 = arith.mulf %353, %354 : vector<8x8xf32>
    %cst_142 = arith.constant dense<0xFF800000> : vector<8xf32>
    %356 = vector.multi_reduction <maximumf>, %355, %cst_142 [1] : vector<8x8xf32> to vector<8xf32>
    %357 = vector.shape_cast %356 : vector<8xf32> to vector<8x1xf32>
    %358 = vector.broadcast %357 : vector<8x1xf32> to vector<8x8xf32>
    %359 = arith.subf %355, %358 : vector<8x8xf32>
    %360 = math.exp %359 : vector<8x8xf32>
    %cst_143 = arith.constant dense<0.000000e+00> : vector<8xf32>
    %361 = vector.multi_reduction <add>, %360, %cst_143 [1] : vector<8x8xf32> to vector<8xf32>
    %362 = vector.shape_cast %361 : vector<8xf32> to vector<8x1xf32>
    %363 = tpu.reciprocal %362 {approx = true} : vector<8x1xf32> -> vector<8x1xf32>
    %364 = vector.broadcast %363 : vector<8x1xf32> to vector<8x8xf32>
    %365 = arith.mulf %360, %364 : vector<8x8xf32>
    %cst_144 = arith.constant dense<0.000000e+00> : vector<8x8xf32>
    %366 = tpu.matmul %365, %351, %cst_144 {dimension_numbers = #tpu.dot_dimension_numbers<[1], [0], [0], [1], [0, 0, 1, 1], [], []>} : vector<8x8xf32>, vector<8x8xf32>, vector<8x8xf32> -> vector<8x8xf32>
    %c0_145 = arith.constant 0 : index
    %c40_146 = arith.constant 40 : index
    %367 = vector.load %arg20[%c0_145, %c40_146] : memref<8x64xf32, #tpu.memory_space<vmem>>, vector<8x8xf32>
    tpu.vector_store %arg20[%c0_145, %c40_146], %366 {strides = array<i32>} : memref<8x64xf32, #tpu.memory_space<vmem>>, vector<8x8xf32>,
    %368 = vector.extract_strided_slice %251 {offsets = [0, 48], sizes = [8, 8], strides = [1, 1]} : vector<8x64xf32> to vector<8x8xf32>
    %369 = vector.extract_strided_slice %252 {offsets = [0, 48], sizes = [8, 8], strides = [1, 1]} : vector<8x64xf32> to vector<8x8xf32>
    %370 = vector.extract_strided_slice %253 {offsets = [0, 48], sizes = [8, 8], strides = [1, 1]} : vector<8x64xf32> to vector<8x8xf32>
    %371 = tpu.transpose %369, [1, 0] : vector<8x8xf32> -> vector<8x8xf32>
    %cst_147 = arith.constant dense<0.000000e+00> : vector<8x8xf32>
    %372 = tpu.matmul %368, %371, %cst_147 {dimension_numbers = #tpu.dot_dimension_numbers<[1], [0], [0], [1], [0, 0, 1, 1], [], []>} : vector<8x8xf32>, vector<8x8xf32>, vector<8x8xf32> -> vector<8x8xf32>
    %cst_148 = arith.constant 0.353553385 : f32
    %373 = vector.broadcast %cst_148 : f32 to vector<8x8xf32>
    %374 = arith.mulf %372, %373 : vector<8x8xf32>
    %cst_149 = arith.constant dense<0xFF800000> : vector<8xf32>
    %375 = vector.multi_reduction <maximumf>, %374, %cst_149 [1] : vector<8x8xf32> to vector<8xf32>
    %376 = vector.shape_cast %375 : vector<8xf32> to vector<8x1xf32>
    %377 = vector.broadcast %376 : vector<8x1xf32> to vector<8x8xf32>
    %378 = arith.subf %374, %377 : vector<8x8xf32>
    %379 = math.exp %378 : vector<8x8xf32>
    %cst_150 = arith.constant dense<0.000000e+00> : vector<8xf32>
    %380 = vector.multi_reduction <add>, %379, %cst_150 [1] : vector<8x8xf32> to vector<8xf32>
    %381 = vector.shape_cast %380 : vector<8xf32> to vector<8x1xf32>
    %382 = tpu.reciprocal %381 {approx = true} : vector<8x1xf32> -> vector<8x1xf32>
    %383 = vector.broadcast %382 : vector<8x1xf32> to vector<8x8xf32>
    %384 = arith.mulf %379, %383 : vector<8x8xf32>
    %cst_151 = arith.constant dense<0.000000e+00> : vector<8x8xf32>
    %385 = tpu.matmul %384, %370, %cst_151 {dimension_numbers = #tpu.dot_dimension_numbers<[1], [0], [0], [1], [0, 0, 1, 1], [], []>} : vector<8x8xf32>, vector<8x8xf32>, vector<8x8xf32> -> vector<8x8xf32>
    %c0_152 = arith.constant 0 : index
    %c48_153 = arith.constant 48 : index
    %386 = vector.load %arg20[%c0_152, %c48_153] : memref<8x64xf32, #tpu.memory_space<vmem>>, vector<8x8xf32>
    tpu.vector_store %arg20[%c0_152, %c48_153], %385 {strides = array<i32>} : memref<8x64xf32, #tpu.memory_space<vmem>>, vector<8x8xf32>,
    %387 = vector.extract_strided_slice %251 {offsets = [0, 56], sizes = [8, 8], strides = [1, 1]} : vector<8x64xf32> to vector<8x8xf32>
    %388 = vector.extract_strided_slice %252 {offsets = [0, 56], sizes = [8, 8], strides = [1, 1]} : vector<8x64xf32> to vector<8x8xf32>
    %389 = vector.extract_strided_slice %253 {offsets = [0, 56], sizes = [8, 8], strides = [1, 1]} : vector<8x64xf32> to vector<8x8xf32>
    %390 = tpu.transpose %388, [1, 0] : vector<8x8xf32> -> vector<8x8xf32>
    %cst_154 = arith.constant dense<0.000000e+00> : vector<8x8xf32>
    %391 = tpu.matmul %387, %390, %cst_154 {dimension_numbers = #tpu.dot_dimension_numbers<[1], [0], [0], [1], [0, 0, 1, 1], [], []>} : vector<8x8xf32>, vector<8x8xf32>, vector<8x8xf32> -> vector<8x8xf32>
    %cst_155 = arith.constant 0.353553385 : f32
    %392 = vector.broadcast %cst_155 : f32 to vector<8x8xf32>
    %393 = arith.mulf %391, %392 : vector<8x8xf32>
    %cst_156 = arith.constant dense<0xFF800000> : vector<8xf32>
    %394 = vector.multi_reduction <maximumf>, %393, %cst_156 [1] : vector<8x8xf32> to vector<8xf32>
    %395 = vector.shape_cast %394 : vector<8xf32> to vector<8x1xf32>
    %396 = vector.broadcast %395 : vector<8x1xf32> to vector<8x8xf32>
    %397 = arith.subf %393, %396 : vector<8x8xf32>
    %398 = math.exp %397 : vector<8x8xf32>
    %cst_157 = arith.constant dense<0.000000e+00> : vector<8xf32>
    %399 = vector.multi_reduction <add>, %398, %cst_157 [1] : vector<8x8xf32> to vector<8xf32>
    %400 = vector.shape_cast %399 : vector<8xf32> to vector<8x1xf32>
    %401 = tpu.reciprocal %400 {approx = true} : vector<8x1xf32> -> vector<8x1xf32>
    %402 = vector.broadcast %401 : vector<8x1xf32> to vector<8x8xf32>
    %403 = arith.mulf %398, %402 : vector<8x8xf32>
    %cst_158 = arith.constant dense<0.000000e+00> : vector<8x8xf32>
    %404 = tpu.matmul %403, %389, %cst_158 {dimension_numbers = #tpu.dot_dimension_numbers<[1], [0], [0], [1], [0, 0, 1, 1], [], []>} : vector<8x8xf32>, vector<8x8xf32>, vector<8x8xf32> -> vector<8x8xf32>
    %c0_159 = arith.constant 0 : index
    %c56_160 = arith.constant 56 : index
    %405 = vector.load %arg20[%c0_159, %c56_160] : memref<8x64xf32, #tpu.memory_space<vmem>>, vector<8x8xf32>
    tpu.vector_store %arg20[%c0_159, %c56_160], %404 {strides = array<i32>} : memref<8x64xf32, #tpu.memory_space<vmem>>, vector<8x8xf32>,
    %c0_161 = arith.constant 0 : index
    %c0_162 = arith.constant 0 : index
    %406 = vector.load %arg20[%c0_161, %c0_162] : memref<8x64xf32, #tpu.memory_space<vmem>>, vector<8x64xf32>
    %c1_163 = arith.constant 1 : index
    %c0_164 = arith.constant 0 : index
    %c0_165 = arith.constant 0 : index
    %407 = vector.load %arg7[%c1_163, %c0_164, %c0_165] : memref<3x64x64xf32, #tpu.memory_space<vmem>>, vector<1x64x64xf32>
    %408 = vector.shape_cast %407 : vector<1x64x64xf32> to vector<64x64xf32>
    %cst_166 = arith.constant dense<0.000000e+00> : vector<8x64xf32>
    %409 = tpu.matmul %406, %408, %cst_166 {dimension_numbers = #tpu.dot_dimension_numbers<[1], [0], [0], [1], [0, 0, 1, 1], [], []>} : vector<8x64xf32>, vector<64x64xf32>, vector<8x64xf32> -> vector<8x64xf32>
    %410 = vector.extract_strided_slice %1 {offsets = [1, 0], sizes = [1, 64], strides = [1, 1]} : vector<3x64xf32> to vector<1x64xf32>
    %411 = vector.broadcast %410 : vector<1x64xf32> to vector<8x64xf32>
    %412 = arith.addf %409, %411 : vector<8x64xf32>
    %413 = arith.addf %244, %412 : vector<8x64xf32>
    %414 = vector.extract_strided_slice %2 {offsets = [1, 0], sizes = [1, 64], strides = [1, 1]} : vector<3x64xf32> to vector<1x64xf32>
    %415 = vector.extract_strided_slice %3 {offsets = [1, 0], sizes = [1, 64], strides = [1, 1]} : vector<3x64xf32> to vector<1x64xf32>
    %cst_167 = arith.constant dense<0.000000e+00> : vector<8xf32>
    %416 = vector.multi_reduction <add>, %413, %cst_167 [1] : vector<8x64xf32> to vector<8xf32>
    %417 = vector.shape_cast %416 : vector<8xf32> to vector<8x1xf32>
    %cst_168 = arith.constant 6.400000e+01 : f32
    %418 = vector.broadcast %cst_168 : f32 to vector<8x1xf32>
    %419 = arith.divf %417, %418 : vector<8x1xf32>
    %420 = vector.broadcast %419 : vector<8x1xf32> to vector<8x64xf32>
    %421 = arith.subf %413, %420 : vector<8x64xf32>
    %422 = arith.mulf %421, %421 : vector<8x64xf32>
    %cst_169 = arith.constant dense<0.000000e+00> : vector<8xf32>
    %423 = vector.multi_reduction <add>, %422, %cst_169 [1] : vector<8x64xf32> to vector<8xf32>
    %424 = vector.shape_cast %423 : vector<8xf32> to vector<8x1xf32>
    %cst_170 = arith.constant 6.400000e+01 : f32
    %425 = vector.broadcast %cst_170 : f32 to vector<8x1xf32>
    %426 = arith.divf %424, %425 : vector<8x1xf32>
    %cst_171 = arith.constant 9.99999974E-6 : f32
    %427 = vector.broadcast %cst_171 : f32 to vector<8x1xf32>
    %428 = arith.addf %426, %427 : vector<8x1xf32>
    %429 = math.rsqrt %428 : vector<8x1xf32>
    %430 = vector.broadcast %429 : vector<8x1xf32> to vector<8x64xf32>
    %431 = arith.mulf %421, %430 : vector<8x64xf32>
    %432 = vector.broadcast %414 : vector<1x64xf32> to vector<8x64xf32>
    %433 = arith.mulf %431, %432 : vector<8x64xf32>
    %434 = vector.broadcast %415 : vector<1x64xf32> to vector<8x64xf32>
    %435 = arith.addf %433, %434 : vector<8x64xf32>
    %c1_172 = arith.constant 1 : index
    %c0_173 = arith.constant 0 : index
    %c0_174 = arith.constant 0 : index
    %436 = vector.load %arg11[%c1_172, %c0_173, %c0_174] : memref<3x64x2048xf32, #tpu.memory_space<vmem>>, vector<1x64x2048xf32>
    %437 = vector.shape_cast %436 : vector<1x64x2048xf32> to vector<64x2048xf32>
    %cst_175 = arith.constant dense<0.000000e+00> : vector<8x2048xf32>
    %438 = tpu.matmul %435, %437, %cst_175 {dimension_numbers = #tpu.dot_dimension_numbers<[1], [0], [0], [1], [0, 0, 1, 1], [], []>} : vector<8x64xf32>, vector<64x2048xf32>, vector<8x2048xf32> -> vector<8x2048xf32>
    %439 = vector.extract_strided_slice %6 {offsets = [1, 0], sizes = [1, 2048], strides = [1, 1]} : vector<3x2048xf32> to vector<1x2048xf32>
    %440 = vector.broadcast %439 : vector<1x2048xf32> to vector<8x2048xf32>
    %441 = arith.addf %438, %440 : vector<8x2048xf32>
    %cst_176 = arith.constant 0.000000e+00 : f32
    %442 = vector.broadcast %cst_176 : f32 to vector<8x2048xf32>
    %443 = arith.maximumf %441, %442 : vector<8x2048xf32>
    %c1_177 = arith.constant 1 : index
    %c0_178 = arith.constant 0 : index
    %c0_179 = arith.constant 0 : index
    %444 = vector.load %arg13[%c1_177, %c0_178, %c0_179] : memref<3x2048x64xf32, #tpu.memory_space<vmem>>, vector<1x2048x64xf32>
    %445 = vector.shape_cast %444 : vector<1x2048x64xf32> to vector<2048x64xf32>
    %cst_180 = arith.constant dense<0.000000e+00> : vector<8x64xf32>
    %446 = tpu.matmul %443, %445, %cst_180 {dimension_numbers = #tpu.dot_dimension_numbers<[1], [0], [0], [1], [0, 0, 1, 1], [], []>} : vector<8x2048xf32>, vector<2048x64xf32>, vector<8x64xf32> -> vector<8x64xf32>
    %447 = vector.extract_strided_slice %7 {offsets = [1, 0], sizes = [1, 64], strides = [1, 1]} : vector<3x64xf32> to vector<1x64xf32>
    %448 = vector.broadcast %447 : vector<1x64xf32> to vector<8x64xf32>
    %449 = arith.addf %446, %448 : vector<8x64xf32>
    %450 = arith.addf %435, %449 : vector<8x64xf32>
    %451 = vector.extract_strided_slice %4 {offsets = [1, 0], sizes = [1, 64], strides = [1, 1]} : vector<3x64xf32> to vector<1x64xf32>
    %452 = vector.extract_strided_slice %5 {offsets = [1, 0], sizes = [1, 64], strides = [1, 1]} : vector<3x64xf32> to vector<1x64xf32>
    %cst_181 = arith.constant dense<0.000000e+00> : vector<8xf32>
    %453 = vector.multi_reduction <add>, %450, %cst_181 [1] : vector<8x64xf32> to vector<8xf32>
    %454 = vector.shape_cast %453 : vector<8xf32> to vector<8x1xf32>
    %cst_182 = arith.constant 6.400000e+01 : f32
    %455 = vector.broadcast %cst_182 : f32 to vector<8x1xf32>
    %456 = arith.divf %454, %455 : vector<8x1xf32>
    %457 = vector.broadcast %456 : vector<8x1xf32> to vector<8x64xf32>
    %458 = arith.subf %450, %457 : vector<8x64xf32>
    %459 = arith.mulf %458, %458 : vector<8x64xf32>
    %cst_183 = arith.constant dense<0.000000e+00> : vector<8xf32>
    %460 = vector.multi_reduction <add>, %459, %cst_183 [1] : vector<8x64xf32> to vector<8xf32>
    %461 = vector.shape_cast %460 : vector<8xf32> to vector<8x1xf32>
    %cst_184 = arith.constant 6.400000e+01 : f32
    %462 = vector.broadcast %cst_184 : f32 to vector<8x1xf32>
    %463 = arith.divf %461, %462 : vector<8x1xf32>
    %cst_185 = arith.constant 9.99999974E-6 : f32
    %464 = vector.broadcast %cst_185 : f32 to vector<8x1xf32>
    %465 = arith.addf %463, %464 : vector<8x1xf32>
    %466 = math.rsqrt %465 : vector<8x1xf32>
    %467 = vector.broadcast %466 : vector<8x1xf32> to vector<8x64xf32>
    %468 = arith.mulf %458, %467 : vector<8x64xf32>
    %469 = vector.broadcast %451 : vector<1x64xf32> to vector<8x64xf32>
    %470 = arith.mulf %468, %469 : vector<8x64xf32>
    %471 = vector.broadcast %452 : vector<1x64xf32> to vector<8x64xf32>
    %472 = arith.addf %470, %471 : vector<8x64xf32>
    %c2 = arith.constant 2 : index
    %c0_186 = arith.constant 0 : index
    %c0_187 = arith.constant 0 : index
    %473 = vector.load %arg5[%c2, %c0_186, %c0_187] : memref<3x64x192xf32, #tpu.memory_space<vmem>>, vector<1x64x192xf32>
    %474 = vector.shape_cast %473 : vector<1x64x192xf32> to vector<64x192xf32>
    %cst_188 = arith.constant dense<0.000000e+00> : vector<8x192xf32>
    %475 = tpu.matmul %472, %474, %cst_188 {dimension_numbers = #tpu.dot_dimension_numbers<[1], [0], [0], [1], [0, 0, 1, 1], [], []>} : vector<8x64xf32>, vector<64x192xf32>, vector<8x192xf32> -> vector<8x192xf32>
    %476 = vector.extract_strided_slice %0 {offsets = [2, 0], sizes = [1, 192], strides = [1, 1]} : vector<3x192xf32> to vector<1x192xf32>
    %477 = vector.broadcast %476 : vector<1x192xf32> to vector<8x192xf32>
    %478 = arith.addf %475, %477 : vector<8x192xf32>
    %479 = vector.extract_strided_slice %478 {offsets = [0, 0], sizes = [8, 64], strides = [1, 1]} : vector<8x192xf32> to vector<8x64xf32>
    %480 = vector.extract_strided_slice %478 {offsets = [0, 64], sizes = [8, 64], strides = [1, 1]} : vector<8x192xf32> to vector<8x64xf32>
    %481 = vector.extract_strided_slice %478 {offsets = [0, 128], sizes = [8, 64], strides = [1, 1]} : vector<8x192xf32> to vector<8x64xf32>
    %482 = vector.extract_strided_slice %479 {offsets = [0, 0], sizes = [8, 8], strides = [1, 1]} : vector<8x64xf32> to vector<8x8xf32>
    %483 = vector.extract_strided_slice %480 {offsets = [0, 0], sizes = [8, 8], strides = [1, 1]} : vector<8x64xf32> to vector<8x8xf32>
    %484 = vector.extract_strided_slice %481 {offsets = [0, 0], sizes = [8, 8], strides = [1, 1]} : vector<8x64xf32> to vector<8x8xf32>
    %485 = tpu.transpose %483, [1, 0] : vector<8x8xf32> -> vector<8x8xf32>
    %cst_189 = arith.constant dense<0.000000e+00> : vector<8x8xf32>
    %486 = tpu.matmul %482, %485, %cst_189 {dimension_numbers = #tpu.dot_dimension_numbers<[1], [0], [0], [1], [0, 0, 1, 1], [], []>} : vector<8x8xf32>, vector<8x8xf32>, vector<8x8xf32> -> vector<8x8xf32>
    %cst_190 = arith.constant 0.353553385 : f32
    %487 = vector.broadcast %cst_190 : f32 to vector<8x8xf32>
    %488 = arith.mulf %486, %487 : vector<8x8xf32>
    %cst_191 = arith.constant dense<0xFF800000> : vector<8xf32>
    %489 = vector.multi_reduction <maximumf>, %488, %cst_191 [1] : vector<8x8xf32> to vector<8xf32>
    %490 = vector.shape_cast %489 : vector<8xf32> to vector<8x1xf32>
    %491 = vector.broadcast %490 : vector<8x1xf32> to vector<8x8xf32>
    %492 = arith.subf %488, %491 : vector<8x8xf32>
    %493 = math.exp %492 : vector<8x8xf32>
    %cst_192 = arith.constant dense<0.000000e+00> : vector<8xf32>
    %494 = vector.multi_reduction <add>, %493, %cst_192 [1] : vector<8x8xf32> to vector<8xf32>
    %495 = vector.shape_cast %494 : vector<8xf32> to vector<8x1xf32>
    %496 = tpu.reciprocal %495 {approx = true} : vector<8x1xf32> -> vector<8x1xf32>
    %497 = vector.broadcast %496 : vector<8x1xf32> to vector<8x8xf32>
    %498 = arith.mulf %493, %497 : vector<8x8xf32>
    %cst_193 = arith.constant dense<0.000000e+00> : vector<8x8xf32>
    %499 = tpu.matmul %498, %484, %cst_193 {dimension_numbers = #tpu.dot_dimension_numbers<[1], [0], [0], [1], [0, 0, 1, 1], [], []>} : vector<8x8xf32>, vector<8x8xf32>, vector<8x8xf32> -> vector<8x8xf32>
    %c0_194 = arith.constant 0 : index
    %c0_195 = arith.constant 0 : index
    %500 = vector.load %arg20[%c0_194, %c0_195] : memref<8x64xf32, #tpu.memory_space<vmem>>, vector<8x8xf32>
    tpu.vector_store %arg20[%c0_194, %c0_195], %499 {strides = array<i32>} : memref<8x64xf32, #tpu.memory_space<vmem>>, vector<8x8xf32>,
    %501 = vector.extract_strided_slice %479 {offsets = [0, 8], sizes = [8, 8], strides = [1, 1]} : vector<8x64xf32> to vector<8x8xf32>
    %502 = vector.extract_strided_slice %480 {offsets = [0, 8], sizes = [8, 8], strides = [1, 1]} : vector<8x64xf32> to vector<8x8xf32>
    %503 = vector.extract_strided_slice %481 {offsets = [0, 8], sizes = [8, 8], strides = [1, 1]} : vector<8x64xf32> to vector<8x8xf32>
    %504 = tpu.transpose %502, [1, 0] : vector<8x8xf32> -> vector<8x8xf32>
    %cst_196 = arith.constant dense<0.000000e+00> : vector<8x8xf32>
    %505 = tpu.matmul %501, %504, %cst_196 {dimension_numbers = #tpu.dot_dimension_numbers<[1], [0], [0], [1], [0, 0, 1, 1], [], []>} : vector<8x8xf32>, vector<8x8xf32>, vector<8x8xf32> -> vector<8x8xf32>
    %cst_197 = arith.constant 0.353553385 : f32
    %506 = vector.broadcast %cst_197 : f32 to vector<8x8xf32>
    %507 = arith.mulf %505, %506 : vector<8x8xf32>
    %cst_198 = arith.constant dense<0xFF800000> : vector<8xf32>
    %508 = vector.multi_reduction <maximumf>, %507, %cst_198 [1] : vector<8x8xf32> to vector<8xf32>
    %509 = vector.shape_cast %508 : vector<8xf32> to vector<8x1xf32>
    %510 = vector.broadcast %509 : vector<8x1xf32> to vector<8x8xf32>
    %511 = arith.subf %507, %510 : vector<8x8xf32>
    %512 = math.exp %511 : vector<8x8xf32>
    %cst_199 = arith.constant dense<0.000000e+00> : vector<8xf32>
    %513 = vector.multi_reduction <add>, %512, %cst_199 [1] : vector<8x8xf32> to vector<8xf32>
    %514 = vector.shape_cast %513 : vector<8xf32> to vector<8x1xf32>
    %515 = tpu.reciprocal %514 {approx = true} : vector<8x1xf32> -> vector<8x1xf32>
    %516 = vector.broadcast %515 : vector<8x1xf32> to vector<8x8xf32>
    %517 = arith.mulf %512, %516 : vector<8x8xf32>
    %cst_200 = arith.constant dense<0.000000e+00> : vector<8x8xf32>
    %518 = tpu.matmul %517, %503, %cst_200 {dimension_numbers = #tpu.dot_dimension_numbers<[1], [0], [0], [1], [0, 0, 1, 1], [], []>} : vector<8x8xf32>, vector<8x8xf32>, vector<8x8xf32> -> vector<8x8xf32>
    %c0_201 = arith.constant 0 : index
    %c8_202 = arith.constant 8 : index
    %519 = vector.load %arg20[%c0_201, %c8_202] : memref<8x64xf32, #tpu.memory_space<vmem>>, vector<8x8xf32>
    tpu.vector_store %arg20[%c0_201, %c8_202], %518 {strides = array<i32>} : memref<8x64xf32, #tpu.memory_space<vmem>>, vector<8x8xf32>,
    %520 = vector.extract_strided_slice %479 {offsets = [0, 16], sizes = [8, 8], strides = [1, 1]} : vector<8x64xf32> to vector<8x8xf32>
    %521 = vector.extract_strided_slice %480 {offsets = [0, 16], sizes = [8, 8], strides = [1, 1]} : vector<8x64xf32> to vector<8x8xf32>
    %522 = vector.extract_strided_slice %481 {offsets = [0, 16], sizes = [8, 8], strides = [1, 1]} : vector<8x64xf32> to vector<8x8xf32>
    %523 = tpu.transpose %521, [1, 0] : vector<8x8xf32> -> vector<8x8xf32>
    %cst_203 = arith.constant dense<0.000000e+00> : vector<8x8xf32>
    %524 = tpu.matmul %520, %523, %cst_203 {dimension_numbers = #tpu.dot_dimension_numbers<[1], [0], [0], [1], [0, 0, 1, 1], [], []>} : vector<8x8xf32>, vector<8x8xf32>, vector<8x8xf32> -> vector<8x8xf32>
    %cst_204 = arith.constant 0.353553385 : f32
    %525 = vector.broadcast %cst_204 : f32 to vector<8x8xf32>
    %526 = arith.mulf %524, %525 : vector<8x8xf32>
    %cst_205 = arith.constant dense<0xFF800000> : vector<8xf32>
    %527 = vector.multi_reduction <maximumf>, %526, %cst_205 [1] : vector<8x8xf32> to vector<8xf32>
    %528 = vector.shape_cast %527 : vector<8xf32> to vector<8x1xf32>
    %529 = vector.broadcast %528 : vector<8x1xf32> to vector<8x8xf32>
    %530 = arith.subf %526, %529 : vector<8x8xf32>
    %531 = math.exp %530 : vector<8x8xf32>
    %cst_206 = arith.constant dense<0.000000e+00> : vector<8xf32>
    %532 = vector.multi_reduction <add>, %531, %cst_206 [1] : vector<8x8xf32> to vector<8xf32>
    %533 = vector.shape_cast %532 : vector<8xf32> to vector<8x1xf32>
    %534 = tpu.reciprocal %533 {approx = true} : vector<8x1xf32> -> vector<8x1xf32>
    %535 = vector.broadcast %534 : vector<8x1xf32> to vector<8x8xf32>
    %536 = arith.mulf %531, %535 : vector<8x8xf32>
    %cst_207 = arith.constant dense<0.000000e+00> : vector<8x8xf32>
    %537 = tpu.matmul %536, %522, %cst_207 {dimension_numbers = #tpu.dot_dimension_numbers<[1], [0], [0], [1], [0, 0, 1, 1], [], []>} : vector<8x8xf32>, vector<8x8xf32>, vector<8x8xf32> -> vector<8x8xf32>
    %c0_208 = arith.constant 0 : index
    %c16_209 = arith.constant 16 : index
    %538 = vector.load %arg20[%c0_208, %c16_209] : memref<8x64xf32, #tpu.memory_space<vmem>>, vector<8x8xf32>
    tpu.vector_store %arg20[%c0_208, %c16_209], %537 {strides = array<i32>} : memref<8x64xf32, #tpu.memory_space<vmem>>, vector<8x8xf32>,
    %539 = vector.extract_strided_slice %479 {offsets = [0, 24], sizes = [8, 8], strides = [1, 1]} : vector<8x64xf32> to vector<8x8xf32>
    %540 = vector.extract_strided_slice %480 {offsets = [0, 24], sizes = [8, 8], strides = [1, 1]} : vector<8x64xf32> to vector<8x8xf32>
    %541 = vector.extract_strided_slice %481 {offsets = [0, 24], sizes = [8, 8], strides = [1, 1]} : vector<8x64xf32> to vector<8x8xf32>
    %542 = tpu.transpose %540, [1, 0] : vector<8x8xf32> -> vector<8x8xf32>
    %cst_210 = arith.constant dense<0.000000e+00> : vector<8x8xf32>
    %543 = tpu.matmul %539, %542, %cst_210 {dimension_numbers = #tpu.dot_dimension_numbers<[1], [0], [0], [1], [0, 0, 1, 1], [], []>} : vector<8x8xf32>, vector<8x8xf32>, vector<8x8xf32> -> vector<8x8xf32>
    %cst_211 = arith.constant 0.353553385 : f32
    %544 = vector.broadcast %cst_211 : f32 to vector<8x8xf32>
    %545 = arith.mulf %543, %544 : vector<8x8xf32>
    %cst_212 = arith.constant dense<0xFF800000> : vector<8xf32>
    %546 = vector.multi_reduction <maximumf>, %545, %cst_212 [1] : vector<8x8xf32> to vector<8xf32>
    %547 = vector.shape_cast %546 : vector<8xf32> to vector<8x1xf32>
    %548 = vector.broadcast %547 : vector<8x1xf32> to vector<8x8xf32>
    %549 = arith.subf %545, %548 : vector<8x8xf32>
    %550 = math.exp %549 : vector<8x8xf32>
    %cst_213 = arith.constant dense<0.000000e+00> : vector<8xf32>
    %551 = vector.multi_reduction <add>, %550, %cst_213 [1] : vector<8x8xf32> to vector<8xf32>
    %552 = vector.shape_cast %551 : vector<8xf32> to vector<8x1xf32>
    %553 = tpu.reciprocal %552 {approx = true} : vector<8x1xf32> -> vector<8x1xf32>
    %554 = vector.broadcast %553 : vector<8x1xf32> to vector<8x8xf32>
    %555 = arith.mulf %550, %554 : vector<8x8xf32>
    %cst_214 = arith.constant dense<0.000000e+00> : vector<8x8xf32>
    %556 = tpu.matmul %555, %541, %cst_214 {dimension_numbers = #tpu.dot_dimension_numbers<[1], [0], [0], [1], [0, 0, 1, 1], [], []>} : vector<8x8xf32>, vector<8x8xf32>, vector<8x8xf32> -> vector<8x8xf32>
    %c0_215 = arith.constant 0 : index
    %c24_216 = arith.constant 24 : index
    %557 = vector.load %arg20[%c0_215, %c24_216] : memref<8x64xf32, #tpu.memory_space<vmem>>, vector<8x8xf32>
    tpu.vector_store %arg20[%c0_215, %c24_216], %556 {strides = array<i32>} : memref<8x64xf32, #tpu.memory_space<vmem>>, vector<8x8xf32>,
    %558 = vector.extract_strided_slice %479 {offsets = [0, 32], sizes = [8, 8], strides = [1, 1]} : vector<8x64xf32> to vector<8x8xf32>
    %559 = vector.extract_strided_slice %480 {offsets = [0, 32], sizes = [8, 8], strides = [1, 1]} : vector<8x64xf32> to vector<8x8xf32>
    %560 = vector.extract_strided_slice %481 {offsets = [0, 32], sizes = [8, 8], strides = [1, 1]} : vector<8x64xf32> to vector<8x8xf32>
    %561 = tpu.transpose %559, [1, 0] : vector<8x8xf32> -> vector<8x8xf32>
    %cst_217 = arith.constant dense<0.000000e+00> : vector<8x8xf32>
    %562 = tpu.matmul %558, %561, %cst_217 {dimension_numbers = #tpu.dot_dimension_numbers<[1], [0], [0], [1], [0, 0, 1, 1], [], []>} : vector<8x8xf32>, vector<8x8xf32>, vector<8x8xf32> -> vector<8x8xf32>
    %cst_218 = arith.constant 0.353553385 : f32
    %563 = vector.broadcast %cst_218 : f32 to vector<8x8xf32>
    %564 = arith.mulf %562, %563 : vector<8x8xf32>
    %cst_219 = arith.constant dense<0xFF800000> : vector<8xf32>
    %565 = vector.multi_reduction <maximumf>, %564, %cst_219 [1] : vector<8x8xf32> to vector<8xf32>
    %566 = vector.shape_cast %565 : vector<8xf32> to vector<8x1xf32>
    %567 = vector.broadcast %566 : vector<8x1xf32> to vector<8x8xf32>
    %568 = arith.subf %564, %567 : vector<8x8xf32>
    %569 = math.exp %568 : vector<8x8xf32>
    %cst_220 = arith.constant dense<0.000000e+00> : vector<8xf32>
    %570 = vector.multi_reduction <add>, %569, %cst_220 [1] : vector<8x8xf32> to vector<8xf32>
    %571 = vector.shape_cast %570 : vector<8xf32> to vector<8x1xf32>
    %572 = tpu.reciprocal %571 {approx = true} : vector<8x1xf32> -> vector<8x1xf32>
    %573 = vector.broadcast %572 : vector<8x1xf32> to vector<8x8xf32>
    %574 = arith.mulf %569, %573 : vector<8x8xf32>
    %cst_221 = arith.constant dense<0.000000e+00> : vector<8x8xf32>
    %575 = tpu.matmul %574, %560, %cst_221 {dimension_numbers = #tpu.dot_dimension_numbers<[1], [0], [0], [1], [0, 0, 1, 1], [], []>} : vector<8x8xf32>, vector<8x8xf32>, vector<8x8xf32> -> vector<8x8xf32>
    %c0_222 = arith.constant 0 : index
    %c32_223 = arith.constant 32 : index
    %576 = vector.load %arg20[%c0_222, %c32_223] : memref<8x64xf32, #tpu.memory_space<vmem>>, vector<8x8xf32>
    tpu.vector_store %arg20[%c0_222, %c32_223], %575 {strides = array<i32>} : memref<8x64xf32, #tpu.memory_space<vmem>>, vector<8x8xf32>,
    %577 = vector.extract_strided_slice %479 {offsets = [0, 40], sizes = [8, 8], strides = [1, 1]} : vector<8x64xf32> to vector<8x8xf32>
    %578 = vector.extract_strided_slice %480 {offsets = [0, 40], sizes = [8, 8], strides = [1, 1]} : vector<8x64xf32> to vector<8x8xf32>
    %579 = vector.extract_strided_slice %481 {offsets = [0, 40], sizes = [8, 8], strides = [1, 1]} : vector<8x64xf32> to vector<8x8xf32>
    %580 = tpu.transpose %578, [1, 0] : vector<8x8xf32> -> vector<8x8xf32>
    %cst_224 = arith.constant dense<0.000000e+00> : vector<8x8xf32>
    %581 = tpu.matmul %577, %580, %cst_224 {dimension_numbers = #tpu.dot_dimension_numbers<[1], [0], [0], [1], [0, 0, 1, 1], [], []>} : vector<8x8xf32>, vector<8x8xf32>, vector<8x8xf32> -> vector<8x8xf32>
    %cst_225 = arith.constant 0.353553385 : f32
    %582 = vector.broadcast %cst_225 : f32 to vector<8x8xf32>
    %583 = arith.mulf %581, %582 : vector<8x8xf32>
    %cst_226 = arith.constant dense<0xFF800000> : vector<8xf32>
    %584 = vector.multi_reduction <maximumf>, %583, %cst_226 [1] : vector<8x8xf32> to vector<8xf32>
    %585 = vector.shape_cast %584 : vector<8xf32> to vector<8x1xf32>
    %586 = vector.broadcast %585 : vector<8x1xf32> to vector<8x8xf32>
    %587 = arith.subf %583, %586 : vector<8x8xf32>
    %588 = math.exp %587 : vector<8x8xf32>
    %cst_227 = arith.constant dense<0.000000e+00> : vector<8xf32>
    %589 = vector.multi_reduction <add>, %588, %cst_227 [1] : vector<8x8xf32> to vector<8xf32>
    %590 = vector.shape_cast %589 : vector<8xf32> to vector<8x1xf32>
    %591 = tpu.reciprocal %590 {approx = true} : vector<8x1xf32> -> vector<8x1xf32>
    %592 = vector.broadcast %591 : vector<8x1xf32> to vector<8x8xf32>
    %593 = arith.mulf %588, %592 : vector<8x8xf32>
    %cst_228 = arith.constant dense<0.000000e+00> : vector<8x8xf32>
    %594 = tpu.matmul %593, %579, %cst_228 {dimension_numbers = #tpu.dot_dimension_numbers<[1], [0], [0], [1], [0, 0, 1, 1], [], []>} : vector<8x8xf32>, vector<8x8xf32>, vector<8x8xf32> -> vector<8x8xf32>
    %c0_229 = arith.constant 0 : index
    %c40_230 = arith.constant 40 : index
    %595 = vector.load %arg20[%c0_229, %c40_230] : memref<8x64xf32, #tpu.memory_space<vmem>>, vector<8x8xf32>
    tpu.vector_store %arg20[%c0_229, %c40_230], %594 {strides = array<i32>} : memref<8x64xf32, #tpu.memory_space<vmem>>, vector<8x8xf32>,
    %596 = vector.extract_strided_slice %479 {offsets = [0, 48], sizes = [8, 8], strides = [1, 1]} : vector<8x64xf32> to vector<8x8xf32>
    %597 = vector.extract_strided_slice %480 {offsets = [0, 48], sizes = [8, 8], strides = [1, 1]} : vector<8x64xf32> to vector<8x8xf32>
    %598 = vector.extract_strided_slice %481 {offsets = [0, 48], sizes = [8, 8], strides = [1, 1]} : vector<8x64xf32> to vector<8x8xf32>
    %599 = tpu.transpose %597, [1, 0] : vector<8x8xf32> -> vector<8x8xf32>
    %cst_231 = arith.constant dense<0.000000e+00> : vector<8x8xf32>
    %600 = tpu.matmul %596, %599, %cst_231 {dimension_numbers = #tpu.dot_dimension_numbers<[1], [0], [0], [1], [0, 0, 1, 1], [], []>} : vector<8x8xf32>, vector<8x8xf32>, vector<8x8xf32> -> vector<8x8xf32>
    %cst_232 = arith.constant 0.353553385 : f32
    %601 = vector.broadcast %cst_232 : f32 to vector<8x8xf32>
    %602 = arith.mulf %600, %601 : vector<8x8xf32>
    %cst_233 = arith.constant dense<0xFF800000> : vector<8xf32>
    %603 = vector.multi_reduction <maximumf>, %602, %cst_233 [1] : vector<8x8xf32> to vector<8xf32>
    %604 = vector.shape_cast %603 : vector<8xf32> to vector<8x1xf32>
    %605 = vector.broadcast %604 : vector<8x1xf32> to vector<8x8xf32>
    %606 = arith.subf %602, %605 : vector<8x8xf32>
    %607 = math.exp %606 : vector<8x8xf32>
    %cst_234 = arith.constant dense<0.000000e+00> : vector<8xf32>
    %608 = vector.multi_reduction <add>, %607, %cst_234 [1] : vector<8x8xf32> to vector<8xf32>
    %609 = vector.shape_cast %608 : vector<8xf32> to vector<8x1xf32>
    %610 = tpu.reciprocal %609 {approx = true} : vector<8x1xf32> -> vector<8x1xf32>
    %611 = vector.broadcast %610 : vector<8x1xf32> to vector<8x8xf32>
    %612 = arith.mulf %607, %611 : vector<8x8xf32>
    %cst_235 = arith.constant dense<0.000000e+00> : vector<8x8xf32>
    %613 = tpu.matmul %612, %598, %cst_235 {dimension_numbers = #tpu.dot_dimension_numbers<[1], [0], [0], [1], [0, 0, 1, 1], [], []>} : vector<8x8xf32>, vector<8x8xf32>, vector<8x8xf32> -> vector<8x8xf32>
    %c0_236 = arith.constant 0 : index
    %c48_237 = arith.constant 48 : index
    %614 = vector.load %arg20[%c0_236, %c48_237] : memref<8x64xf32, #tpu.memory_space<vmem>>, vector<8x8xf32>
    tpu.vector_store %arg20[%c0_236, %c48_237], %613 {strides = array<i32>} : memref<8x64xf32, #tpu.memory_space<vmem>>, vector<8x8xf32>,
    %615 = vector.extract_strided_slice %479 {offsets = [0, 56], sizes = [8, 8], strides = [1, 1]} : vector<8x64xf32> to vector<8x8xf32>
    %616 = vector.extract_strided_slice %480 {offsets = [0, 56], sizes = [8, 8], strides = [1, 1]} : vector<8x64xf32> to vector<8x8xf32>
    %617 = vector.extract_strided_slice %481 {offsets = [0, 56], sizes = [8, 8], strides = [1, 1]} : vector<8x64xf32> to vector<8x8xf32>
    %618 = tpu.transpose %616, [1, 0] : vector<8x8xf32> -> vector<8x8xf32>
    %cst_238 = arith.constant dense<0.000000e+00> : vector<8x8xf32>
    %619 = tpu.matmul %615, %618, %cst_238 {dimension_numbers = #tpu.dot_dimension_numbers<[1], [0], [0], [1], [0, 0, 1, 1], [], []>} : vector<8x8xf32>, vector<8x8xf32>, vector<8x8xf32> -> vector<8x8xf32>
    %cst_239 = arith.constant 0.353553385 : f32
    %620 = vector.broadcast %cst_239 : f32 to vector<8x8xf32>
    %621 = arith.mulf %619, %620 : vector<8x8xf32>
    %cst_240 = arith.constant dense<0xFF800000> : vector<8xf32>
    %622 = vector.multi_reduction <maximumf>, %621, %cst_240 [1] : vector<8x8xf32> to vector<8xf32>
    %623 = vector.shape_cast %622 : vector<8xf32> to vector<8x1xf32>
    %624 = vector.broadcast %623 : vector<8x1xf32> to vector<8x8xf32>
    %625 = arith.subf %621, %624 : vector<8x8xf32>
    %626 = math.exp %625 : vector<8x8xf32>
    %cst_241 = arith.constant dense<0.000000e+00> : vector<8xf32>
    %627 = vector.multi_reduction <add>, %626, %cst_241 [1] : vector<8x8xf32> to vector<8xf32>
    %628 = vector.shape_cast %627 : vector<8xf32> to vector<8x1xf32>
    %629 = tpu.reciprocal %628 {approx = true} : vector<8x1xf32> -> vector<8x1xf32>
    %630 = vector.broadcast %629 : vector<8x1xf32> to vector<8x8xf32>
    %631 = arith.mulf %626, %630 : vector<8x8xf32>
    %cst_242 = arith.constant dense<0.000000e+00> : vector<8x8xf32>
    %632 = tpu.matmul %631, %617, %cst_242 {dimension_numbers = #tpu.dot_dimension_numbers<[1], [0], [0], [1], [0, 0, 1, 1], [], []>} : vector<8x8xf32>, vector<8x8xf32>, vector<8x8xf32> -> vector<8x8xf32>
    %c0_243 = arith.constant 0 : index
    %c56_244 = arith.constant 56 : index
    %633 = vector.load %arg20[%c0_243, %c56_244] : memref<8x64xf32, #tpu.memory_space<vmem>>, vector<8x8xf32>
    tpu.vector_store %arg20[%c0_243, %c56_244], %632 {strides = array<i32>} : memref<8x64xf32, #tpu.memory_space<vmem>>, vector<8x8xf32>,
    %c0_245 = arith.constant 0 : index
    %c0_246 = arith.constant 0 : index
    %634 = vector.load %arg20[%c0_245, %c0_246] : memref<8x64xf32, #tpu.memory_space<vmem>>, vector<8x64xf32>
    %c2_247 = arith.constant 2 : index
    %c0_248 = arith.constant 0 : index
    %c0_249 = arith.constant 0 : index
    %635 = vector.load %arg7[%c2_247, %c0_248, %c0_249] : memref<3x64x64xf32, #tpu.memory_space<vmem>>, vector<1x64x64xf32>
    %636 = vector.shape_cast %635 : vector<1x64x64xf32> to vector<64x64xf32>
    %cst_250 = arith.constant dense<0.000000e+00> : vector<8x64xf32>
    %637 = tpu.matmul %634, %636, %cst_250 {dimension_numbers = #tpu.dot_dimension_numbers<[1], [0], [0], [1], [0, 0, 1, 1], [], []>} : vector<8x64xf32>, vector<64x64xf32>, vector<8x64xf32> -> vector<8x64xf32>
    %638 = vector.extract_strided_slice %1 {offsets = [2, 0], sizes = [1, 64], strides = [1, 1]} : vector<3x64xf32> to vector<1x64xf32>
    %639 = vector.broadcast %638 : vector<1x64xf32> to vector<8x64xf32>
    %640 = arith.addf %637, %639 : vector<8x64xf32>
    %641 = arith.addf %472, %640 : vector<8x64xf32>
    %642 = vector.extract_strided_slice %2 {offsets = [2, 0], sizes = [1, 64], strides = [1, 1]} : vector<3x64xf32> to vector<1x64xf32>
    %643 = vector.extract_strided_slice %3 {offsets = [2, 0], sizes = [1, 64], strides = [1, 1]} : vector<3x64xf32> to vector<1x64xf32>
    %cst_251 = arith.constant dense<0.000000e+00> : vector<8xf32>
    %644 = vector.multi_reduction <add>, %641, %cst_251 [1] : vector<8x64xf32> to vector<8xf32>
    %645 = vector.shape_cast %644 : vector<8xf32> to vector<8x1xf32>
    %cst_252 = arith.constant 6.400000e+01 : f32
    %646 = vector.broadcast %cst_252 : f32 to vector<8x1xf32>
    %647 = arith.divf %645, %646 : vector<8x1xf32>
    %648 = vector.broadcast %647 : vector<8x1xf32> to vector<8x64xf32>
    %649 = arith.subf %641, %648 : vector<8x64xf32>
    %650 = arith.mulf %649, %649 : vector<8x64xf32>
    %cst_253 = arith.constant dense<0.000000e+00> : vector<8xf32>
    %651 = vector.multi_reduction <add>, %650, %cst_253 [1] : vector<8x64xf32> to vector<8xf32>
    %652 = vector.shape_cast %651 : vector<8xf32> to vector<8x1xf32>
    %cst_254 = arith.constant 6.400000e+01 : f32
    %653 = vector.broadcast %cst_254 : f32 to vector<8x1xf32>
    %654 = arith.divf %652, %653 : vector<8x1xf32>
    %cst_255 = arith.constant 9.99999974E-6 : f32
    %655 = vector.broadcast %cst_255 : f32 to vector<8x1xf32>
    %656 = arith.addf %654, %655 : vector<8x1xf32>
    %657 = math.rsqrt %656 : vector<8x1xf32>
    %658 = vector.broadcast %657 : vector<8x1xf32> to vector<8x64xf32>
    %659 = arith.mulf %649, %658 : vector<8x64xf32>
    %660 = vector.broadcast %642 : vector<1x64xf32> to vector<8x64xf32>
    %661 = arith.mulf %659, %660 : vector<8x64xf32>
    %662 = vector.broadcast %643 : vector<1x64xf32> to vector<8x64xf32>
    %663 = arith.addf %661, %662 : vector<8x64xf32>
    %c2_256 = arith.constant 2 : index
    %c0_257 = arith.constant 0 : index
    %c0_258 = arith.constant 0 : index
    %664 = vector.load %arg11[%c2_256, %c0_257, %c0_258] : memref<3x64x2048xf32, #tpu.memory_space<vmem>>, vector<1x64x2048xf32>
    %665 = vector.shape_cast %664 : vector<1x64x2048xf32> to vector<64x2048xf32>
    %cst_259 = arith.constant dense<0.000000e+00> : vector<8x2048xf32>
    %666 = tpu.matmul %663, %665, %cst_259 {dimension_numbers = #tpu.dot_dimension_numbers<[1], [0], [0], [1], [0, 0, 1, 1], [], []>} : vector<8x64xf32>, vector<64x2048xf32>, vector<8x2048xf32> -> vector<8x2048xf32>
    %667 = vector.extract_strided_slice %6 {offsets = [2, 0], sizes = [1, 2048], strides = [1, 1]} : vector<3x2048xf32> to vector<1x2048xf32>
    %668 = vector.broadcast %667 : vector<1x2048xf32> to vector<8x2048xf32>
    %669 = arith.addf %666, %668 : vector<8x2048xf32>
    %cst_260 = arith.constant 0.000000e+00 : f32
    %670 = vector.broadcast %cst_260 : f32 to vector<8x2048xf32>
    %671 = arith.maximumf %669, %670 : vector<8x2048xf32>
    %c2_261 = arith.constant 2 : index
    %c0_262 = arith.constant 0 : index
    %c0_263 = arith.constant 0 : index
    %672 = vector.load %arg13[%c2_261, %c0_262, %c0_263] : memref<3x2048x64xf32, #tpu.memory_space<vmem>>, vector<1x2048x64xf32>
    %673 = vector.shape_cast %672 : vector<1x2048x64xf32> to vector<2048x64xf32>
    %cst_264 = arith.constant dense<0.000000e+00> : vector<8x64xf32>
    %674 = tpu.matmul %671, %673, %cst_264 {dimension_numbers = #tpu.dot_dimension_numbers<[1], [0], [0], [1], [0, 0, 1, 1], [], []>} : vector<8x2048xf32>, vector<2048x64xf32>, vector<8x64xf32> -> vector<8x64xf32>
    %675 = vector.extract_strided_slice %7 {offsets = [2, 0], sizes = [1, 64], strides = [1, 1]} : vector<3x64xf32> to vector<1x64xf32>
    %676 = vector.broadcast %675 : vector<1x64xf32> to vector<8x64xf32>
    %677 = arith.addf %674, %676 : vector<8x64xf32>
    %678 = arith.addf %663, %677 : vector<8x64xf32>
    %679 = vector.extract_strided_slice %4 {offsets = [2, 0], sizes = [1, 64], strides = [1, 1]} : vector<3x64xf32> to vector<1x64xf32>
    %680 = vector.extract_strided_slice %5 {offsets = [2, 0], sizes = [1, 64], strides = [1, 1]} : vector<3x64xf32> to vector<1x64xf32>
    %cst_265 = arith.constant dense<0.000000e+00> : vector<8xf32>
    %681 = vector.multi_reduction <add>, %678, %cst_265 [1] : vector<8x64xf32> to vector<8xf32>
    %682 = vector.shape_cast %681 : vector<8xf32> to vector<8x1xf32>
    %cst_266 = arith.constant 6.400000e+01 : f32
    %683 = vector.broadcast %cst_266 : f32 to vector<8x1xf32>
    %684 = arith.divf %682, %683 : vector<8x1xf32>
    %685 = vector.broadcast %684 : vector<8x1xf32> to vector<8x64xf32>
    %686 = arith.subf %678, %685 : vector<8x64xf32>
    %687 = arith.mulf %686, %686 : vector<8x64xf32>
    %cst_267 = arith.constant dense<0.000000e+00> : vector<8xf32>
    %688 = vector.multi_reduction <add>, %687, %cst_267 [1] : vector<8x64xf32> to vector<8xf32>
    %689 = vector.shape_cast %688 : vector<8xf32> to vector<8x1xf32>
    %cst_268 = arith.constant 6.400000e+01 : f32
    %690 = vector.broadcast %cst_268 : f32 to vector<8x1xf32>
    %691 = arith.divf %689, %690 : vector<8x1xf32>
    %cst_269 = arith.constant 9.99999974E-6 : f32
    %692 = vector.broadcast %cst_269 : f32 to vector<8x1xf32>
    %693 = arith.addf %691, %692 : vector<8x1xf32>
    %694 = math.rsqrt %693 : vector<8x1xf32>
    %695 = vector.broadcast %694 : vector<8x1xf32> to vector<8x64xf32>
    %696 = arith.mulf %686, %695 : vector<8x64xf32>
    %697 = vector.broadcast %679 : vector<1x64xf32> to vector<8x64xf32>
    %698 = arith.mulf %696, %697 : vector<8x64xf32>
    %699 = vector.broadcast %680 : vector<1x64xf32> to vector<8x64xf32>
    %700 = arith.addf %698, %699 : vector<8x64xf32>
    %701 = vector.extract_strided_slice %700 {offsets = [7, 0], sizes = [1, 64], strides = [1, 1]} : vector<8x64xf32> to vector<1x64xf32>
    %c0_270 = arith.constant 0 : index
    %c0_271 = arith.constant 0 : index
    %702 = vector.load %arg17[%c0_270, %c0_271] : memref<64x128xf32, #tpu.memory_space<vmem>>, vector<64x128xf32>
    %cst_272 = arith.constant dense<0.000000e+00> : vector<1x128xf32>
    %703 = tpu.matmul %701, %702, %cst_272 {dimension_numbers = #tpu.dot_dimension_numbers<[1], [0], [0], [1], [0, 0, 1, 1], [], []>} : vector<1x64xf32>, vector<64x128xf32>, vector<1x128xf32> -> vector<1x128xf32>
    %c0_273 = arith.constant 0 : index
    %c0_274 = arith.constant 0 : index
    %704 = vector.load %arg18[%c0_273, %c0_274] : memref<1x128xf32, #tpu.memory_space<vmem>>, vector<1x128xf32>
    %705 = arith.addf %703, %704 : vector<1x128xf32>
    %c0_275 = arith.constant 0 : index
    %c0_276 = arith.constant 0 : index
    %c0_277 = arith.constant 0 : index
    %706 = vector.load %arg19[%c0_275, %c0_276, %c0_277] : memref<1x1x128xf32, #tpu.memory_space<vmem>>, vector<1x1x128xf32>
    %707 = vector.shape_cast %706 : vector<1x1x128xf32> to vector<1x128xf32>
    %708 = vector.shape_cast %705 : vector<1x128xf32> to vector<1x1x128xf32>
    tpu.vector_store %arg19[%c0_275, %c0_276, %c0_277], %708 {strides = array<i32>} : memref<1x1x128xf32, #tpu.memory_space<vmem>>, vector<1x1x128xf32>,
    return
  }
  func.func @transform_0(%arg0: i32) -> (i32, i32, i32) {
    %c0_i32 = arith.constant 0 : i32
    %c0_i32_0 = arith.constant 0 : i32
    %c0_i32_1 = arith.constant 0 : i32
    return %arg0, %c0_i32, %c0_i32_0 : i32, i32, i32
  }
  func.func @transform_1(%arg0: i32) -> (i32, i32) {
    %c0_i32 = arith.constant 0 : i32
    %c0_i32_0 = arith.constant 0 : i32
    %c0_i32_1 = arith.constant 0 : i32
    return %c0_i32, %c0_i32_0 : i32, i32
  }
  func.func @transform_2(%arg0: i32) -> (i32, i32) {
    %c0_i32 = arith.constant 0 : i32
    %c0_i32_0 = arith.constant 0 : i32
    %c0_i32_1 = arith.constant 0 : i32
    return %c0_i32, %c0_i32_0 : i32, i32
  }
  func.func @transform_3(%arg0: i32) -> (i32, i32) {
    %c0_i32 = arith.constant 0 : i32
    %c0_i32_0 = arith.constant 0 : i32
    %c0_i32_1 = arith.constant 0 : i32
    return %c0_i32, %c0_i32_0 : i32, i32
  }
  func.func @transform_4(%arg0: i32) -> (i32, i32, i32) {
    %c0_i32 = arith.constant 0 : i32
    %c0_i32_0 = arith.constant 0 : i32
    %c0_i32_1 = arith.constant 0 : i32
    %c0_i32_2 = arith.constant 0 : i32
    return %c0_i32, %c0_i32_0, %c0_i32_1 : i32, i32, i32
  }
  func.func @transform_5(%arg0: i32) -> (i32, i32) {
    %c0_i32 = arith.constant 0 : i32
    %c0_i32_0 = arith.constant 0 : i32
    %c0_i32_1 = arith.constant 0 : i32
    return %c0_i32, %c0_i32_0 : i32, i32
  }
  func.func @transform_6(%arg0: i32) -> (i32, i32, i32) {
    %c0_i32 = arith.constant 0 : i32
    %c0_i32_0 = arith.constant 0 : i32
    %c0_i32_1 = arith.constant 0 : i32
    %c0_i32_2 = arith.constant 0 : i32
    return %c0_i32, %c0_i32_0, %c0_i32_1 : i32, i32, i32
  }
  func.func @transform_7(%arg0: i32) -> (i32, i32) {
    %c0_i32 = arith.constant 0 : i32
    %c0_i32_0 = arith.constant 0 : i32
    %c0_i32_1 = arith.constant 0 : i32
    return %c0_i32, %c0_i32_0 : i32, i32
  }
  func.func @transform_8(%arg0: i32) -> (i32, i32) {
    %c0_i32 = arith.constant 0 : i32
    %c0_i32_0 = arith.constant 0 : i32
    %c0_i32_1 = arith.constant 0 : i32
    return %c0_i32, %c0_i32_0 : i32, i32
  }
  func.func @transform_9(%arg0: i32) -> (i32, i32) {
    %c0_i32 = arith.constant 0 : i32
    %c0_i32_0 = arith.constant 0 : i32
    %c0_i32_1 = arith.constant 0 : i32
    return %c0_i32, %c0_i32_0 : i32, i32
  }
  func.func @transform_10(%arg0: i32) -> (i32, i32, i32) {
    %c0_i32 = arith.constant 0 : i32
    %c0_i32_0 = arith.constant 0 : i32
    %c0_i32_1 = arith.constant 0 : i32
    %c0_i32_2 = arith.constant 0 : i32
    return %c0_i32, %c0_i32_0, %c0_i32_1 : i32, i32, i32
  }
  func.func @transform_11(%arg0: i32) -> (i32, i32) {
    %c0_i32 = arith.constant 0 : i32
    %c0_i32_0 = arith.constant 0 : i32
    %c0_i32_1 = arith.constant 0 : i32
    return %c0_i32, %c0_i32_0 : i32, i32
  }
  func.func @transform_12(%arg0: i32) -> (i32, i32, i32) {
    %c0_i32 = arith.constant 0 : i32
    %c0_i32_0 = arith.constant 0 : i32
    %c0_i32_1 = arith.constant 0 : i32
    %c0_i32_2 = arith.constant 0 : i32
    return %c0_i32, %c0_i32_0, %c0_i32_1 : i32, i32, i32
  }
  func.func @transform_13(%arg0: i32) -> (i32, i32) {
    %c0_i32 = arith.constant 0 : i32
    %c0_i32_0 = arith.constant 0 : i32
    %c0_i32_1 = arith.constant 0 : i32
    return %c0_i32, %c0_i32_0 : i32, i32
  }
  func.func @transform_14(%arg0: i32) -> (i32, i32) {
    %c0_i32 = arith.constant 0 : i32
    %c0_i32_0 = arith.constant 0 : i32
    %c0_i32_1 = arith.constant 0 : i32
    return %c0_i32, %c0_i32_0 : i32, i32
  }
  func.func @transform_15(%arg0: i32) -> (i32, i32) {
    %c0_i32 = arith.constant 0 : i32
    %c0_i32_0 = arith.constant 0 : i32
    %c0_i32_1 = arith.constant 0 : i32
    return %c0_i32, %c0_i32_0 : i32, i32
  }
  func.func @transform_16(%arg0: i32) -> (i32, i32) {
    %c0_i32 = arith.constant 0 : i32
    %c0_i32_0 = arith.constant 0 : i32
    %c0_i32_1 = arith.constant 0 : i32
    return %c0_i32, %c0_i32_0 : i32, i32
  }
  func.func @transform_17(%arg0: i32) -> (i32, i32) {
    %c0_i32 = arith.constant 0 : i32
    %c0_i32_0 = arith.constant 0 : i32
    %c0_i32_1 = arith.constant 0 : i32
    return %c0_i32, %c0_i32_0 : i32, i32
  }
  func.func @transform_18(%arg0: i32) -> (i32, i32, i32) {
    %c0_i32 = arith.constant 0 : i32
    %c0_i32_0 = arith.constant 0 : i32
    %c0_i32_1 = arith.constant 0 : i32
    return %arg0, %c0_i32, %c0_i32_0 : i32, i32, i32
  }
}

</mosaic_0001>

<bundles_post_ra>
// kernel: transformer_forecaster.1
= control target key start
LH: loop header
LB: loop body
LE: loop exit
PB: predicated region body
PF: predicated region fallthrough
CT: control target
= control target key end

     0   :  { %s19414_s0 = inlined_call_operand.vmem [shape: f32[2,8,8], index: 0, kind: input, shape index: {}]   ;;  %s19415_s1 = inlined_call_operand.vmem [shape: f32[8,64], index: 1, kind: input, shape index: {}]   ;;  %s19416_s2 = inlined_call_operand.vmem [shape: f32[8,64], index: 2, kind: input, shape index: {}]   ;;  %s19417_s3 = inlined_call_operand.vmem [shape: f32[1,64], index: 3, kind: input, shape index: {}]   ;;  %s19418_s4 = inlined_call_operand.vmem [shape: f32[3,64,192], index: 4, kind: input, shape index: {}]   ;;  %s19419_s5 = inlined_call_operand.vmem [shape: f32[3,192], index: 5, kind: input, shape index: {}]   ;;  %s19420_s6 = inlined_call_operand.vmem [shape: f32[3,64,64], index: 6, kind: input, shape index: {}]   ;;  %s19421_s7 = inlined_call_operand.vmem [shape: f32[3,64], index: 7, kind: input, shape index: {}]   ;;  %s19422_s8 = inlined_call_operand.vmem [shape: f32[3,64], index: 8, kind: input, shape index: {}]   ;;  %s19423_s9 = inlined_call_operand.vmem [shape: f32[3,64], index: 9, kind: input, shape index: {}]   ;;  %s19424_s10 = inlined_call_operand.vmem [shape: f32[3,64,2048], index: 10, kind: input, shape index: {}]   ;;  %s19425_s11 = inlined_call_operand.vmem [shape: f32[3,2048], index: 11, kind: input, shape index: {}]   ;;  %s19426_s12 = inlined_call_operand.vmem [shape: f32[3,2048,64], index: 12, kind: input, shape index: {}]   ;;  %s19427_s13 = inlined_call_operand.vmem [shape: f32[3,64], index: 13, kind: input, shape index: {}]   ;;  %s19428_s14 = inlined_call_operand.vmem [shape: f32[3,64], index: 14, kind: input, shape index: {}]   ;;  %s19429_s15 = inlined_call_operand.vmem [shape: f32[3,64], index: 15, kind: input, shape index: {}]   ;;  %s19430_s16 = inlined_call_operand.vmem [shape: f32[64,128], index: 16, kind: input, shape index: {}]   ;;  %s19431_s17 = inlined_call_operand.vmem [shape: f32[1,128], index: 17, kind: input, shape index: {}]   ;;  %s19432_s18 = inlined_call_operand.hbm [shape: f32[2,1,128], index: 18, kind: output, shape index: {}]  }
   0x1   :  { %19481 = sst [smem:[#allocation15_spill]] %s19414_s0 }
   0x2   :  { %19482 = sst [smem:[#allocation16_spill]] %s19415_s1 }
   0x3   :  { %19483 = sst [smem:[#allocation17_spill]] %s19416_s2 }
   0x4   :  { %19484 = sst [smem:[#allocation18_spill]] %s19417_s3 }
   0x5   :  { %19485 = sst [smem:[#allocation19_spill]] %s19420_s6 }
   0x6   :  { %19486 = sst [smem:[#allocation20_spill]] %s19421_s7 }
   0x7   :  { %19487 = sst [smem:[#allocation21_spill]] %s19423_s9 }
   0x8   :  { %19488 = sst [smem:[#allocation22_spill]] %s19430_s16 }
   0x9   :  { %19489 = sst [smem:[#allocation23_spill]] %s19431_s17 }
   0xa   :  { %19490 = sst [smem:[#allocation24_spill]] %s19432_s18 }
   0xb   :  { %23 = vsyncpa [#allocation4], 0 }
   0xc   :  { %25 = vsyncpa [#allocation4 + $0x1], 0  ;;  %s14539_s27 = smov 0   ;;  %s14541_s28 = smov 0  }
   0xd   :  { %s14543_s29 = smov 0   ;;  %s14545_s30 = smov 0  }
   0xe LB: > { %19491 = sst [smem:[#allocation6_spill]] %s14411_s27  ;;  %s14560_s0 = sadd.s32 4294967295, %s14423_s30   ;;  %s14423_s30 = sphi %s14545_s30, %s19542_s30   ;;  %s14419_s29 = sphi %s14543_s29, %s19545_s29   ;;  %s14415_s28 = sphi %s14541_s28, %s19544_s28   ;;  %s14411_s27 = sphi %s14539_s27, %s19543_s27  }
   0xf   : > { %19492 = sst [smem:[#allocation7_spill]] %s14415_s28  ;;  %s10694_s19 = sadd.s32 4294967294, %s14423_s30  }
  0x10   : > { %19493 = sst [smem:[#allocation8_spill]] %s14419_s29  ;;  %s14564_s1 = sadd.s32 1, %s14423_s30  }
  0x11   : > { %19494 = sst [smem:[#allocation9_spill]] %s14423_s30  ;;  %s421_s20 = sadd.s32 1, %s14419_s29 }
  0x12   : > { %19495 = sst [smem:[#allocation10_spill]] %s14560_s0  ;;  %s418_s21 = ssub.s32 %s14423_s30, %s14564_s1 }
  0x13   : > { %19496 = sst [smem:[#allocation11_spill]] %s14564_s1  ;;  %p431_p0 = scmp.ne.s32.totalorder %s14419_s29, %s14415_s28 }
  0x14   : > { %p419_p1 = scmp.eq.s32.totalorder %s418_s21, 0  ;;  %p432_p2 = scmp.eq.s32.totalorder %s14560_s0, 1 }
  0x15   : > { %p437_p3 = scmp.ne.s32.totalorder %s14415_s28, %s14411_s27  ;;  %p438_p4 = scmp.eq.s32.totalorder %s10694_s19, 1 }
  0x16   : > { %s14575_s22 = scalar_select %p419_p1, %s14419_s29, %s421_s20  }
  0x17   : > { %p14577_p5 = por %p432_p2, %p431_p0  ;;  %p14581_p6 = por %p438_p4, %p437_p3 }
  0x18   : > { %19497 = sst [smem:[#allocation12_spill]] %s14575_s22  ;;  %p10697_p7 = scmp.ge.s32.totalorder %s14423_s30, 1 }
  0x19   : > { %s19498_s2 = scalar_select %p14577_p5, 1, 0 }
  0x1a   : > { %s19500_s23 = scalar_select %p14581_p6, 1, 0 }
  0x1b   : > { %19499 = sst [smem:[#allocation13_spill]] %s19498_s2  ;;  %p514_p8 = scmp.lt.s32.totalorder %s14423_s30, 3 }
  0x1c   : > { %19501 = sst [smem:[#allocation14_spill]] %s19500_s23 }
  0x1d   : > { %p515_p9 = pnand %p10697_p7, %p514_p8 }
  0x1e   : > { %s19502_s26 = sld [smem:[#allocation17_spill]] (!%p515_p9)  ;;  %p566_p10 = scmp.lt.s32.totalorder (!%p515_p9), %s14560_s0, 1  ;;  %v671_v1 = vld [vmem:[%s19418_s4 + $0x8] sm:$0xff] (!%p515_p9)  ;;  %v14425_v2 = vmov (!%p515_p9), 0.0   ;;  %vm14426_vm0 = vmmov (!%p515_p9), 0   ;;  %v673_v3 = vld [vmem:[%s19418_s4 + $0x18] sm:$0xff] (!%p515_p9)  ;;  %v687_v33 = vlaneseq (!%p515_p9) }
  0x1f   : > { %518 = sbr.rel (%p515_p9) target bundleno = 8966 (0x2306), region = 92  ;;  %12597 = vmatprep.subr.mxu0 (!%p515_p9), %v14425_v2  ;;  %12599 = vmatprep.mubr.msk.f32.mxu0 (!%p515_p9), %vm14426_vm0, %v14425_v2  ;;  %v670_v4 = vld [vmem:[%s19418_s4] sm:$0xff] (!%p515_p9)  ;;  %v672_v5 = vld [vmem:[%s19418_s4 + $0x10] sm:$0xff] (!%p515_p9)  ;;  %v12918_v6 = vpack.c.bf16 (!%p515_p9), %v673_v3, %v671_v1  ;;  %v675_v8 = vld [vmem:[%s19418_s4 + $0x28] sm:$0xff] (!%p515_p9)  ;;  %vm594_vm1 = vcmask (!%p515_p9), 64512   ;;  %s19503_s21 = sld [smem:[#allocation15_spill]] (!%p515_p9) }
  0x20   : > { %v12920_v7 = vpack.c.bf16 (!%p515_p9), %v672_v5, %v670_v4  ;;  %v677_v9 = vld [vmem:[%s19418_s4 + $0x38] sm:$0xff] (!%p515_p9)  ;;  %v674_v10 = vld [vmem:[%s19418_s4 + $0x20] sm:$0xff] (!%p515_p9)  ;;  %773 = vmatprep.mubr.f32.mxu1 (!%p515_p9), %v14425_v2  ;;  %v676_v12 = vld [vmem:[%s19418_s4 + $0x30] sm:$0xff] (!%p515_p9)  ;;  %s19504_s3 = sld [smem:[#allocation18_spill]] (!%p515_p9)  ;;  %vm705_vm2 = vcmask (!%p515_p9), 523264   ;;  %v14664_v34 = vshrl.u32 (!%p515_p9), %v687_v33, 7 }
  0x21   : > { %v12922_v11 = vpack.c.bf16 (!%p515_p9), %v677_v9, %v675_v8  ;;  %v679_v13 = vld [vmem:[%s19418_s4 + $0x48] sm:$0xff] (!%p515_p9)  ;;  %v681_v14 = vld [vmem:[%s19418_s4 + $0x58] sm:$0xff] (!%p515_p9)  ;;  %12919 = vmatprep.subr.bf16.mxu1 (!%p515_p9), %v12918_v6  ;;  %v12924_v15 = vpack.c.bf16 (!%p515_p9), %v676_v12, %v674_v10  ;;  %v678_v18 = vld [vmem:[%s19418_s4 + $0x40] sm:$0xff] (!%p515_p9)  ;;  %s19441_s20 = smov (!%p515_p9), 56   ;;  %s19467_s23 = smov (!%p515_p9), 120   ;;  %vm1114_vm3 = vcmask (!%p515_p9), 130112  }
  0x22   : > { %12921 = vmatpush1.bf16.msra.mxu1 (!%p515_p9), %v12920_v7  ;;  %v12926_v17 = vpack.c.bf16 (!%p515_p9), %v681_v14, %v679_v13  ;;  %v680_v19 = vld [vmem:[%s19418_s4 + $0x50] sm:$0xff] (!%p515_p9)  ;;  %v683_v21 = vld [vmem:[%s19418_s4 + $0x68] sm:$0xff] (!%p515_p9)  ;;  %v685_v22 = vld [vmem:[%s19418_s4 + $0x78] sm:$0xff] (!%p515_p9)  ;;  %v14667_v35 = vsub.s32 (!%p515_p9), 0, %v14664_v34  ;;  %s19443_s22 = smov (!%p515_p9), 48   ;;  %s19465_s29 = smov (!%p515_p9), 40  }
  0x23   : > { %12923 = vmatprep.subr.bf16.mxu1 (!%p515_p9), %v12922_v11  ;;  %v12928_v20 = vpack.c.bf16 (!%p515_p9), %v680_v19, %v678_v18  ;;  %v12930_v23 = vpack.c.bf16 (!%p515_p9), %v685_v22, %v683_v21  ;;  %v682_v24 = vld [vmem:[%s19418_s4 + $0x60] sm:$0xff] (!%p515_p9)  ;;  %v684_v25 = vld [vmem:[%s19418_s4 + $0x70] sm:$0xff] (!%p515_p9)  ;;  %s19463_s24 = smov (!%p515_p9), 32   ;;  %v14691_v42 = vsub.s32 (!%p515_p9), 4, %v14664_v34  ;;  %s19455_s25 = smov (!%p515_p9), 104   ;;  %vm1286_vm4 = vcmask (!%p515_p9), 195712  }
  0x24   : > { %v586_v0 = vld [vmem:[%s19502_s26] sm:$0xff] (!%p515_p9)  ;;  %v12932_v26 = vpack.c.bf16 (!%p515_p9), %v684_v25, %v682_v24  ;;  %s19447_s26 = smov (!%p515_p9), 80   ;;  %s19461_s1 = smov (!%p515_p9), 24   ;;  %vm1458_vm5 = vcmask (!%p515_p9), 261312   ;;  %vm1630_vm6 = vcmask (!%p515_p9), 326912   ;;  %vm1802_vm7 = vcmask (!%p515_p9), 392512  }
  0x25   : > { %12598 = vmatpush3.msra.mxu0 (!%p515_p9), %v586_v0  ;;  %v570_v36 = vld [vmem:[%s19419_s5] sm:$0x77] (!%p515_p9)  ;;  %s19506_s6 = sld [smem:[#allocation19_spill]] (!%p515_p9)  ;;  %vm1974_vm8 = vcmask (!%p515_p9), 458112   ;;  %vm2146_vm9 = vcmask (!%p515_p9), 523712   ;;  %s19509_s7 = sld [smem:[#allocation20_spill]] (!%p515_p9) }
  0x26   : > { %s567_s19 = scalar_select %p566_p10, %s14560_s0, 1  ;;  %12602 = vmatprep.subr.mxu0 %v14425_v2  ;;  %12925 = vmatpush1.bf16.msra.mxu1 %v12924_v15  ;;  %v10699_v27 = vld [vmem:[%s19504_s3] ss:$0 sm:$0xff]  ;;  %v690_v37 = vrot.slane %v570_v36, %v14667_v35  ;;  %v694_v43 = vrot.slane %v570_v36, %v14691_v42 }
  0x27   : > { %12927 = vmatprep.subr.bf16.mxu1 %v12926_v17  ;;  %s19510_s9 = sld [smem:[#allocation21_spill]]  ;;  %s19511_s3 = smov 64  }
  0x28   : > { %s10698_s27 = sshll.u32 %s567_s19, 3  ;;  %v700_v38 = vrot.slane %v690_v37, %v14667_v35  ;;  %v704_v44 = vrot.slane %v694_v43, %v14667_v35  ;;  %s19451_s19 = smov 96  }
  0x29   : > { %s569_s30 = scalar_lea.vmem %s19503_s21, %s10698_s27  ;;  %s19439_s27 = smov 64  }
  0x2a   : > { %v585_v16 = vld [vmem:[%s569_s30] sm:$0xff]  ;;  %12929 = vmatpush1.bf16.msra.mxu1 %v12928_v20  ;;  %s19505_s30 = sld [smem:[#allocation16_spill]]  ;;  %s19459_s21 = smov 112  }
  0x2b   : > { %12600 = vmatmul.mubr.msk.f32.vlgmr.msra.gmra.mrb[0].mxu0 %vm594_vm1, %v585_v16  ;;  %12931 = vmatprep.subr.bf16.mxu1 %v12930_v23  ;;  %s19513_s18 = smov 112   ;;  %s19523_s17 = smov 72  }
  0x2c   : > { %12604 = vmatprep.mubr.msk.f32.mxu0 %vm14426_vm0, %v14425_v2  ;;  %s19528_s16 = smov 8  }
  0x2e   : > { %12933 = vmatpush1.bf16.msra.mxu1 %v12932_v26 }
  0x2f   : > { %12622 = vmatprep.subr.mxu1 %v14425_v2 }
  0x30   : > { %v668_v29 = vld [vmem:[%s19505_s30] sm:$0xff]  ;;  %s19445_s30 = smov 72  }
  0xfe   : > { %v664_v28 = vpop.f32.mrb[0].mxu0 }
  0xff   : > { %v665_v30 = vadd.f32 %v10699_v27, %v664_v28  ;;  %v12601_v31 = vpop.f32.mrb[1].mxu0 }
 0x101   : > { %v14658_v32 = vadd.f32 %v668_v29, %v665_v30 }
 0x103   : > { %10701 = vmatmul.mubr.msk.f32.vlgmr.msra.gmra.mrb[0].mxu1 %vm705_vm2, %v14658_v32 }
 0x104   : > { %12624 = vmatprep.mubr.msk.f32.mxu1 %vm14426_vm0, %v14425_v2 }
 0x1d6   : > { %v775_v39 = vpop.f32.mrb[0].mxu1 }
 0x1d7   : > { %v14674_v40 = vadd.f32 %v775_v39, %v700_v38  ;;  %v777_v41 = vpop.f32.mrb[1].mxu1 }
 0x1d8   : > { %v14699_v47 = vadd.f32 %v777_v41, %v704_v44 }
 0x1d9   : > { %945 = vrot.lane.b32.xlu1 %v14674_v40, %s19441_s20  ;;  %781 = vrot.lane.b32.xlu0 %v14674_v40, %s19439_s27  ;;  %s19449_s27 = smov 88   ;;  %s19457_s20 = smov 16  }
 0x1dd   : > { %943 = vrot.lane.b32.xlu1 %v14674_v40, %s19467_s23 }
 0x1e1   : > { %1118 = vrot.lane.b32.xlu1 %v14674_v40, %s19443_s22  ;;  %s19453_s22 = smov 8  }
 0x1e5   : > { %1116 = vrot.lane.b32.xlu1 %v14674_v40, %s19459_s21 }
 0x1e9   : > { %1290 = vrot.lane.b32.xlu1 %v14674_v40, %s19465_s29 }
 0x1ed   : > { %1462 = vrot.lane.b32.xlu1 %v14674_v40, %s19463_s24 }
 0x24b   : > { %v14695_v45 = vpop.permute.xlu1 %945  ;;  %v782_v46 = vpop.permute.xlu0 %781 }
 0x24c   : > { %12603 = vmatpush3.xpose.msk.msra.mxu0 %vm594_vm1, %v782_v46 }
 0x24d   : > { %12607 = vmatprep.subr.mxu0 %v14425_v2 }
 0x24f   : > { %v14701_v48 = vpop.permute.xlu1 %943  ;;  %12605 = vmatmul.mubr.msk.f32.vlgmr.msra.gmra.mrb[2].mxu0 %vm594_vm1, %v14674_v40 }
 0x250   : > { %12608 = vmatpush3.msra.mxu0 %v14699_v47  ;;  %12609 = vmatprep.mubr.msk.f32.mxu0 %vm14426_vm0, %v14425_v2 }
 0x251   : > { %12612 = vmatprep.subr.mxu0 %v14425_v2 }
 0x253   : > { %v1119_v49 = vpop.permute.xlu1 %1118 }
 0x254   : > { %12623 = vmatpush3.xpose.msk.msra.mxu1 %vm594_vm1, %v1119_v49 }
 0x255   : > { %12632 = vmatprep.subr.mxu1 %v14425_v2 }
 0x257   : > { %v1117_v50 = vpop.permute.xlu1 %1116 }
 0x258   : > { %12625 = vmatmul.mubr.msk.f32.vlgmr.msra.gmra.mrb[2].mxu1 %vm594_vm1, %v1117_v50 }
 0x259   : > { %12634 = vmatprep.mubr.msk.f32.mxu1 %vm14426_vm0, %v14425_v2 }
 0x25b   : > { %v1291_v51 = vpop.permute.xlu1 %1290 }
 0x25c   : > { %12633 = vmatpush3.xpose.msk.msra.mxu1 %vm594_vm1, %v1291_v51 }
 0x25d   : > { %12642 = vmatprep.subr.mxu1 %v14425_v2 }
 0x25f   : > { %v1463_v0 = vpop.permute.xlu1 %1462 }
 0x322   : > { %v853_v52 = vpop.f32.mrb[2].mxu0 }
 0x323   : > { %v857_v53 = vmul.f32 0.35355338, %v853_v52  ;;  %v12606_v54 = vpop.f32.mrb[3].mxu0 }
 0x325   : > { %v858_v55 = vsel %vm594_vm1, %v857_v53, -inf }
 0x326   : > { %859 = vmax.xlane.f32.xlu0 %v858_v55 }
 0x32b   : > { %v1190_v56 = vpop.f32.mrb[2].mxu1 }
 0x32c   : > { %v12626_v57 = vpop.f32.mrb[3].mxu1  ;;  %v14723_v58 = vmul.f32 0.35355338, %v1190_v56 }
 0x32e   : > { %v1195_v59 = vsel %vm594_vm1, %v14723_v58, -inf }
 0x33c   : > { %1288 = vrot.lane.b32.xlu0 %v14674_v40, %s19455_s25 }
 0x340   : > { %1804 = vrot.lane.b32.xlu0 %v14674_v40, %s19447_s26 }
 0x344   : > { %1976 = vrot.lane.b32.xlu0 %v14674_v40, %s19445_s30 }
 0x363   : > { %1196 = vmax.xlane.f32.xlu0 %v1195_v59 }
 0x3b3   : > { %v860_v60 = vpop.xlane.xlu0 %859 }
 0x3b4   : > { %v861_v61 = vsub.f32 %v857_v53, %v860_v60 }
 0x3b6   : > { %v862_v62 = vmul.f32 1.442695, %v861_v61 }
 0x3b7   : > { %v1289_v63 = vpop.permute.xlu0 %1288 }
 0x3b8   : > { %14223 = vpow2.f32 %v862_v62  ;;  %12635 = vmatmul.mubr.msk.f32.vlgmr.msra.gmra.mrb[4].mxu1 %vm594_vm1, %v1289_v63 }
 0x3b9   : > { %12643 = vmatpush3.xpose.msk.msra.mxu1 %vm594_vm1, %v1463_v0  ;;  %12644 = vmatprep.mubr.msk.f32.mxu1 %vm14426_vm0, %v14425_v2 }
 0x3ba   : > { %12652 = vmatprep.subr.mxu1 %v14425_v2 }
 0x3bb   : > { %v1805_v11 = vpop.permute.xlu0 %1804 }
 0x3bf   : > { %v1977_v13 = vpop.permute.xlu0 %1976 }
 0x3c2   : > { %v14224_v1 = vpop.eup %14223 }
 0x3c3   : > { %v864_v3 = vsel %vm594_vm1, %v14224_v1, 0.0 }
 0x3c4   : > { %865 = vadd.xlane.f32.xlu1 %v864_v3 }
 0x3d5   : > { %1460 = vrot.lane.b32.xlu1 %v14674_v40, %s19451_s19 }
 0x3d9   : > { %1634 = vrot.lane.b32.xlu1 %v14674_v40, %s19461_s1 }
 0x3dd   : > { %1632 = vrot.lane.b32.xlu1 %v14674_v40, %s19449_s27 }
 0x3e1   : > { %1806 = vrot.lane.b32.xlu1 %v14674_v40, %s19457_s20 }
 0x3e5   : > { %1978 = vrot.lane.b32.xlu1 %v14674_v40, %s19453_s22 }
 0x3f0   : > { %v1197_v18 = vpop.xlane.xlu0 %1196 }
 0x3f1   : > { %v1198_v22 = vsub.f32 %v14723_v58, %v1197_v18 }
 0x3f3   : > { %v1199_v25 = vmul.f32 1.442695, %v1198_v22 }
 0x451   : > { %v866_v4 = vpop.xlane.xlu1 %865 }
 0x452   : > { %14225 = vrcp.f32 %v866_v4 }
 0x453   : > { %14227 = vpow2.f32 %v1199_v25 }
 0x455   : > { %v1461_v5 = vpop.permute.xlu1 %1460 }
 0x456   : > { %12645 = vmatmul.mubr.msk.f32.vlgmr.msra.gmra.mrb[6].mxu1 %vm594_vm1, %v1461_v5 }
 0x457   : > { %12654 = vmatprep.mubr.msk.f32.mxu1 %vm14426_vm0, %v14425_v2 }
 0x459   : > { %v1635_v6 = vpop.permute.xlu1 %1634 }
 0x45a   : > { %12653 = vmatpush3.xpose.msk.msra.mxu1 %vm594_vm1, %v1635_v6 }
 0x45b   : > { %12662 = vmatprep.subr.mxu1 %v14425_v2 }
 0x45c   : > { %v14226_v7 = vpop.eup %14225 }
 0x45d   : > { %v1633_v8 = vpop.permute.xlu1 %1632  ;;  %v868_v9 = vmul.f32 %v14226_v7, %v14224_v1  ;;  %v14777_v50 = vpop.eup %14227 }
 0x45e   : > { %12655 = vmatmul.mubr.msk.f32.vlgmr.msra.gmra.mrb[8].mxu1 %vm594_vm1, %v1633_v8  ;;  %v1201_v53 = vsel %vm594_vm1, %v14777_v50, 0.0 }
 0x45f   : > { %12610 = vmatmul.mubr.msk.f32.vlgmr.msra.gmra.mrb[4].mxu0 %vm594_vm1, %v868_v9  ;;  %12664 = vmatprep.mubr.msk.f32.mxu1 %vm14426_vm0, %v14425_v2 }
 0x460   : > { %12613 = vmatpush3.xpose.msk.msra.mxu0 %vm594_vm1, %v14695_v45  ;;  %12614 = vmatprep.mubr.msk.f32.mxu0 %vm14426_vm0, %v14425_v2 }
 0x461   : > { %v1807_v10 = vpop.permute.xlu1 %1806  ;;  %12617 = vmatprep.subr.mxu0 %v14425_v2 }
 0x462   : > { %12663 = vmatpush3.xpose.msk.msra.mxu1 %vm594_vm1, %v1807_v10 }
 0x463   : > { %12615 = vmatmul.mubr.msk.f32.vlgmr.msra.gmra.mrb[6].mxu0 %vm594_vm1, %v14701_v48  ;;  %12672 = vmatprep.subr.mxu1 %v14425_v2 }
 0x464   : > { %12619 = vmatprep.mubr.msk.f32.mxu0 %vm14426_vm0, %v14425_v2 }
 0x465   : > { %v1979_v12 = vpop.permute.xlu1 %1978  ;;  %12665 = vmatmul.mubr.msk.f32.vlgmr.msra.gmra.mrb[10].mxu1 %vm594_vm1, %v1805_v11 }
 0x466   : > { %12673 = vmatpush3.xpose.msk.msra.mxu1 %vm594_vm1, %v1979_v12  ;;  %12674 = vmatprep.mubr.msk.f32.mxu1 %vm14426_vm0, %v14425_v2 }
 0x469   : > { %12675 = vmatmul.mubr.msk.f32.vlgmr.msra.gmra.mrb[12].mxu1 %vm594_vm1, %v1977_v13 }
 0x46a   : > { %12698 = vmatprep.mubr.msk.f32.mxu1 %vm14426_vm0, %v14425_v2 }
 0x48b   : > { %v1362_v14 = vpop.f32.mrb[4].mxu1 }
 0x48c   : > { %v1366_v15 = vmul.f32 0.35355338, %v1362_v14  ;;  %v12636_v16 = vpop.f32.mrb[5].mxu1 }
 0x48e   : > { %v1367_v17 = vsel %vm594_vm1, %v1366_v15, -inf }
 0x48f   : > { %1368 = vmax.xlane.f32.xlu0 %v1367_v17 }
 0x51c   : > { %v1369_v21 = vpop.xlane.xlu0 %1368 }
 0x51d   : > { %v1370_v23 = vsub.f32 %v1366_v15, %v1369_v21 }
 0x51f   : > { %v1371_v30 = vmul.f32 1.442695, %v1370_v23 }
 0x521   : > { %14229 = vpow2.f32 %v1371_v30 }
 0x529   : > { %v1534_v19 = vpop.f32.mrb[6].mxu1 }
 0x52a   : > { %v12646_v20 = vpop.f32.mrb[7].mxu1  ;;  %v1538_v39 = vmul.f32 0.35355338, %v1534_v19 }
 0x52b   : > { %v14780_v52 = vpop.eup %14229 }
 0x52c   : > { %v1539_v48 = vsel %vm594_vm1, %v1538_v39, -inf  ;;  %v1373_v54 = vsel %vm594_vm1, %v14780_v52, 0.0 }
 0x531   : > { %v1706_v24 = vpop.f32.mrb[8].mxu1 }
 0x532   : > { %v1710_v26 = vmul.f32 0.35355338, %v1706_v24  ;;  %v938_v27 = vpop.f32.mrb[4].mxu0  ;;  %v12656_v28 = vpop.f32.mrb[9].mxu1 }
 0x533   : > { %942 = vst.msk [vmem:[#allocation2] sm:$0xff] %vm594_vm1, %v938_v27  ;;  %v12611_v29 = vpop.f32.mrb[5].mxu0 }
 0x534   : > { %v1711_v31 = vsel %vm594_vm1, %v1710_v26, -inf }
 0x535   : > { %1712 = vmax.xlane.f32.xlu0 %v1711_v31 }
 0x536   : > { %v1017_v33 = vpop.f32.mrb[6].mxu0 }
 0x537   : > { %v1021_v36 = vmul.f32 0.35355338, %v1017_v33  ;;  %v12616_v37 = vpop.f32.mrb[7].mxu0 }
 0x538   : > { %v1878_v38 = vpop.f32.mrb[10].mxu1 }
 0x539   : > { %v12666_v40 = vpop.f32.mrb[11].mxu1  ;;  %v1022_v41 = vsel %vm594_vm1, %v1021_v36, -inf  ;;  %v1882_v44 = vmul.f32 0.35355338, %v1878_v38 }
 0x53a   : > { %1023 = vmax.xlane.f32.xlu1 %v1022_v41 }
 0x53b   : > { %v1883_v51 = vsel %vm594_vm1, %v1882_v44, -inf }
 0x53c   : > { %v2050_v43 = vpop.f32.mrb[12].mxu1 }
 0x53d   : > { %v2054_v45 = vmul.f32 0.35355338, %v2050_v43  ;;  %v12676_v46 = vpop.f32.mrb[13].mxu1 }
 0x53e   : > { %1540 = vmax.xlane.f32.xlu1 %v1539_v48 }
 0x53f   : > { %v2055_v49 = vsel %vm594_vm1, %v2054_v45, -inf }
 0x540   : > { %2056 = vmax.xlane.f32.xlu0 %v2055_v49 }
 0x542   : > { %1884 = vmax.xlane.f32.xlu1 %v1883_v51  ;;  %v2149_v51 = vld [vmem:[%s19506_s6] sm:$0xff] }
 0x544   : > { %1202 = vadd.xlane.f32.xlu0 %v1201_v53 }
 0x546   : > { %1374 = vadd.xlane.f32.xlu1 %v1373_v54 }
 0x5c2   : > { %v1713_v55 = vpop.xlane.xlu0 %1712 }
 0x5c3   : > { %v1714_v56 = vsub.f32 %v1710_v26, %v1713_v55 }
 0x5c5   : > { %v1715_v57 = vmul.f32 1.442695, %v1714_v56  ;;  %v14442_v56 = vmov 0.0|0.0  }
 0x5c6   : > { %12934 = vmatprep.subr.bf16.mxu1 %v14442_v56 }
 0x5c7   : > { %14231 = vpow2.f32 %v1715_v57  ;;  %v1024_v58 = vpop.xlane.xlu1 %1023  ;;  %v2151_v57 = vld [vmem:[%s19506_s6 + $0x10] sm:$0xff] }
 0x5c8   : > { %v1025_v13 = vsub.f32 %v1021_v36, %v1024_v58  ;;  %v2152_v58 = vld [vmem:[%s19506_s6 + $0x18] sm:$0xff] }
 0x5ca   : > { %v1026_v14 = vmul.f32 1.442695, %v1025_v13 }
 0x5cb   : > { %v1541_v59 = vpop.xlane.xlu1 %1540 }
 0x5cc   : > { %v1542_v60 = vsub.f32 %v1538_v39, %v1541_v59 }
 0x5cd   : > { %v2057_v61 = vpop.xlane.xlu0 %2056 }
 0x5ce   : > { %v1543_v62 = vmul.f32 1.442695, %v1542_v60  ;;  %v2058_v63 = vsub.f32 %v2054_v45, %v2057_v61  ;;  %v12938_v60 = vpack.c.bf16 %v2152_v58, %v2151_v57  ;;  %v2293_v58 = vld [vmem:[%s19424_s10 + $0x110] sm:$0xff] }
 0x5cf   : > { %v1885_v0 = vpop.xlane.xlu1 %1884 }
 0x5d0   : > { %14233 = vpow2.f32 %v1543_v62  ;;  %v2059_v1 = vmul.f32 1.442695, %v2058_v63  ;;  %v1886_v3 = vsub.f32 %v1882_v44, %v1885_v0  ;;  %v2153_v62 = vld [vmem:[%s19506_s6 + $0x20] sm:$0xff]  ;;  %v2154_v63 = vld [vmem:[%s19506_s6 + $0x28] sm:$0xff] }
 0x5d1   : > { %v14786_v4 = vpop.eup %14231  ;;  %v1203_v17 = vpop.xlane.xlu0 %1202 }
 0x5d2   : > { %14235 = vpow2.f32 %v2059_v1  ;;  %v1887_v5 = vmul.f32 1.442695, %v1886_v3  ;;  %v1717_v6 = vsel %vm594_vm1, %v14786_v4, 0.0  ;;  %v12941_v1 = vpack.c.bf16 %v2154_v63, %v2153_v62  ;;  %v2155_v3 = vld [vmem:[%s19506_s6 + $0x30] sm:$0xff]  ;;  %v2340_v62 = vld [vmem:[%s19424_s10 + $0x288] sm:$0xff]  ;;  %v2326_v63 = vld [vmem:[%s19424_s10 + $0x218] sm:$0xff] }
 0x5d3   : > { %1718 = vadd.xlane.f32.xlu1 %v1717_v6  ;;  %v1375_v21 = vpop.xlane.xlu1 %1374 }
 0x5d4   : > { %14237 = vpow2.f32 %v1887_v5 }
 0x5d5   : > { %14239 = vpow2.f32 %v1026_v14 }
 0x5da   : > { %v14234_v7 = vpop.eup %14233 }
 0x5db   : > { %v1545_v8 = vsel %vm594_vm1, %v14234_v7, 0.0 }
 0x5dc   : > { %v14791_v9 = vpop.eup %14235  ;;  %1546 = vadd.xlane.f32.xlu0 %v1545_v8 }
 0x5dd   : > { %v2061_v10 = vsel %vm594_vm1, %v14791_v9, 0.0 }
 0x5de   : > { %v14795_v11 = vpop.eup %14237  ;;  %2062 = vadd.xlane.f32.xlu1 %v2061_v10 }
 0x5df   : > { %v1889_v12 = vsel %vm594_vm1, %v14795_v11, 0.0  ;;  %v14240_v15 = vpop.eup %14239 }
 0x5e0   : > { %1890 = vadd.xlane.f32.xlu0 %v1889_v12  ;;  %v1028_v16 = vsel %vm594_vm1, %v14240_v15, 0.0 }
 0x5ef   : > { %1206 = vrot.lane.b32.xlu1 %v14699_v47, %s19459_s21  ;;  %s19508_s21 = smov 56  }
 0x5f6   : > { %1034 = vrot.lane.b32.xlu0 %v14699_v47, %s19467_s23  ;;  %s19521_s23 = smov 80  }
 0x5fa   : > { %1550 = vrot.lane.b32.xlu0 %v14699_v47, %s19451_s19  ;;  %s19515_s19 = smov 104  }
 0x5fe   : > { %1894 = vrot.lane.b32.xlu0 %v14699_v47, %s19447_s26  ;;  %s19518_s26 = smov 24  }
 0x613   : > { %1029 = vadd.xlane.f32.xlu1 %v1028_v16 }
 0x624   : > { %1378 = vrot.lane.b32.xlu1 %v14699_v47, %s19455_s25  ;;  %s19517_s25 = smov 96  }
 0x628   : > { %1722 = vrot.lane.b32.xlu1 %v14699_v47, %s19449_s27  ;;  %s19520_s27 = smov 16  }
 0x62c   : > { %2066 = vrot.lane.b32.xlu1 %v14699_v47, %s19445_s30  ;;  %s19519_s30 = smov 88  }
 0x660   : > { %v1719_v22 = vpop.xlane.xlu1 %1718 }
 0x669   : > { %v1547_v18 = vpop.xlane.xlu0 %1546 }
 0x66b   : > { %v2063_v23 = vpop.xlane.xlu1 %2062 }
 0x66d   : > { %v1891_v19 = vpop.xlane.xlu0 %1890 }
 0x66f   : > { %v1207_v24 = vpop.permute.xlu1 %1206 }
 0x671   : > { %v1035_v20 = vpop.permute.xlu0 %1034 }
 0x672   : > { %12618 = vmatpush3.msra.mxu0 %v1035_v20 }
 0x673   : > { %12627 = vmatprep.subr.mxu0 %v14425_v2 }
 0x675   : > { %v1551_v36 = vpop.permute.xlu0 %1550 }
 0x679   : > { %v1895_v43 = vpop.permute.xlu0 %1894 }
 0x6a0   : > { %v1030_v25 = vpop.xlane.xlu1 %1029 }
 0x6a1   : > { %14241 = vrcp.f32 %v1030_v25 }
 0x6a2   : > { %14243 = vrcp.f32 %v1203_v17 }
 0x6a3   : > { %14245 = vrcp.f32 %v1375_v21  ;;  %v571_v21 = vld [vmem:[%s19509_s7] sm:$0x7] }
 0x6a4   : > { %14247 = vrcp.f32 %v1547_v18  ;;  %v1379_v30 = vpop.permute.xlu1 %1378 }
 0x6a5   : > { %14249 = vrcp.f32 %v1719_v22  ;;  %v2160_v22 = vrot.slane %v571_v21, %v14667_v35 }
 0x6a6   : > { %14251 = vrcp.f32 %v1891_v19 }
 0x6a7   : > { %14253 = vrcp.f32 %v2063_v23 }
 0x6a8   : > { %v1723_v39 = vpop.permute.xlu1 %1722 }
 0x6ab   : > { %v14242_v26 = vpop.eup %14241 }
 0x6ac   : > { %v1032_v27 = vmul.f32 %v14242_v26, %v14240_v15  ;;  %v14244_v28 = vpop.eup %14243  ;;  %v2067_v46 = vpop.permute.xlu1 %2066 }
 0x6ad   : > { %v1205_v47 = vmul.f32 %v14244_v28, %v14777_v50  ;;  %v14246_v29 = vpop.eup %14245 }
 0x6ae   : > { %12620 = vmatmul.mubr.msk.f32.vlgmr.msra.gmra.mrb[8].mxu0 %vm594_vm1, %v1032_v27  ;;  %v1377_v31 = vmul.f32 %v14246_v29, %v14780_v52  ;;  %v14248_v33 = vpop.eup %14247  ;;  %v2150_v52 = vld [vmem:[%s19506_s6 + $0x8] sm:$0xff] }
 0x6af   : > { %12628 = vmatpush3.msra.mxu0 %v1207_v24  ;;  %12629 = vmatprep.mubr.msk.f32.mxu0 %vm14426_vm0, %v14425_v2  ;;  %v1549_v37 = vmul.f32 %v14248_v33, %v14234_v7  ;;  %v14250_v38 = vpop.eup %14249  ;;  %v12935_v54 = vpack.c.bf16 %v2150_v52, %v2149_v51  ;;  %v2260_v33 = vld [vmem:[%s19424_s10 + $0x8] sm:$0xff]  ;;  %v2310_v52 = vld [vmem:[%s19424_s10 + $0x198] sm:$0xff] }
 0x6b0   : > { %12637 = vmatprep.subr.mxu0 %v14425_v2  ;;  %v1721_v40 = vmul.f32 %v14250_v38, %v14786_v4  ;;  %v14252_v41 = vpop.eup %14251  ;;  %v2156_v4 = vld [vmem:[%s19506_s6 + $0x38] sm:$0xff] }
 0x6b1   : > { %v1893_v44 = vmul.f32 %v14252_v41, %v14795_v11  ;;  %v14254_v45 = vpop.eup %14253  ;;  %12936 = vmatpush3.bf16.msra.mxu1 %v12935_v54  ;;  %v12944_v6 = vpack.c.bf16 %v2156_v4, %v2155_v3  ;;  %v2278_v38 = vld [vmem:[%s19424_s10 + $0x98] sm:$0xff]  ;;  %v2307_v54 = vld [vmem:[%s19424_s10 + $0x180] sm:$0xff] }
 0x6b2   : > { %12630 = vmatmul.mubr.msk.f32.vlgmr.msra.gmra.mrb[10].mxu0 %vm594_vm1, %v1205_v47  ;;  %v2065_v48 = vmul.f32 %v14254_v45, %v14791_v9  ;;  %12937 = vmatprep.subr.bf16.mxu1 %v14442_v56  ;;  %v2277_v45 = vld [vmem:[%s19424_s10 + $0x90] sm:$0xff]  ;;  %v2323_v3 = vld [vmem:[%s19424_s10 + $0x200] sm:$0xff] }
 0x6b3   : > { %12638 = vmatpush3.msra.mxu0 %v1379_v30  ;;  %12639 = vmatprep.mubr.msk.f32.mxu0 %vm14426_vm0, %v14425_v2  ;;  %v2339_v4 = vld [vmem:[%s19424_s10 + $0x280] sm:$0xff] }
 0x6b4   : > { %12647 = vmatprep.subr.mxu0 %v14425_v2 }
 0x6b5   : > { %12939 = vmatpush3.bf16.msra.mxu1 %v12938_v60 }
 0x6b6   : > { %12640 = vmatmul.mubr.msk.f32.vlgmr.msra.gmra.mrb[12].mxu0 %vm594_vm1, %v1377_v31  ;;  %12940 = vmatprep.subr.bf16.mxu1 %v14442_v56 }
 0x6b7   : > { %12648 = vmatpush3.msra.mxu0 %v1551_v36  ;;  %12649 = vmatprep.mubr.msk.f32.mxu0 %vm14426_vm0, %v14425_v2  ;;  %v2262_v36 = vld [vmem:[%s19424_s10 + $0x18] sm:$0xff] }
 0x6b8   : > { %12657 = vmatprep.subr.mxu0 %v14425_v2  ;;  %v12962_v41 = vpack.c.bf16 %v2278_v38, %v2262_v36  ;;  %v2279_v38 = vld [vmem:[%s19424_s10 + $0xa0] sm:$0xff] }
 0x6b9   : > { %12942 = vmatpush3.bf16.msra.mxu1 %v12941_v1  ;;  %v2342_v1 = vld [vmem:[%s19424_s10 + $0x298] sm:$0xff] }
 0x6ba   : > { %12650 = vmatmul.mubr.msk.f32.vlgmr.msra.gmra.mrb[14].mxu0 %vm594_vm1, %v1549_v37  ;;  %12943 = vmatprep.subr.bf16.mxu1 %v14442_v56 }
 0x6bb   : > { %12658 = vmatpush3.msra.mxu0 %v1723_v39  ;;  %12659 = vmatprep.mubr.msk.f32.mxu0 %vm14426_vm0, %v14425_v2  ;;  %v2259_v39 = vld [vmem:[%s19424_s10] sm:$0xff] }
 0x6bc   : > { %12667 = vmatprep.subr.mxu0 %v14425_v2 }
 0x6bd   : > { %12945 = vmatpush3.bf16.msra.mxu1 %v12944_v6  ;;  %v12956_v6 = vpack.c.bf16 %v2339_v4, %v2323_v3  ;;  %v2343_v3 = vld [vmem:[%s19424_s10 + $0x2a0] sm:$0xff] }
 0x6be   : > { %12660 = vmatmul.mubr.msk.f32.vlgmr.msra.gmra.mrb[16].mxu0 %vm594_vm1, %v1721_v40  ;;  %v2275_v40 = vld [vmem:[%s19424_s10 + $0x80] sm:$0xff]  ;;  %12963 = vmatprep.subr.bf16.mxu1 %v12962_v41  ;;  %v2265_v41 = vld [vmem:[%s19424_s10 + $0x30] sm:$0xff] }
 0x6bf   : > { %12668 = vmatpush3.msra.mxu0 %v1895_v43  ;;  %12669 = vmatprep.mubr.msk.f32.mxu0 %vm14426_vm0, %v14425_v2  ;;  %v12948_v43 = vpack.c.bf16 %v2275_v40, %v2259_v39 }
 0x6c0   : > { %12677 = vmatprep.subr.mxu0 %v14425_v2 }
 0x6c2   : > { %12670 = vmatmul.mubr.msk.f32.vlgmr.msra.gmra.mrb[18].mxu0 %vm594_vm1, %v1893_v44  ;;  %v2261_v44 = vld [vmem:[%s19424_s10 + $0x10] sm:$0xff] }
 0x6c3   : > { %12678 = vmatpush3.msra.mxu0 %v2067_v46  ;;  %12679 = vmatprep.mubr.msk.f32.mxu0 %vm14426_vm0, %v14425_v2  ;;  %v12964_v46 = vpack.c.bf16 %v2277_v45, %v2261_v44  ;;  %v2296_v44 = vld [vmem:[%s19424_s10 + $0x128] sm:$0xff] }
 0x6c4   : > { %v2312_v45 = vld [vmem:[%s19424_s10 + $0x1a8] sm:$0xff] }
 0x6c6   : > { %12680 = vmatmul.mubr.msk.f32.vlgmr.msra.gmra.mrb[20].mxu0 %vm594_vm1, %v2065_v48  ;;  %v2292_v48 = vld [vmem:[%s19424_s10 + $0x108] sm:$0xff] }
 0x6c7   : > { %2606 = vmatprep.mubr.f32.mxu0 %v14425_v2 }
 0x781   : > { %v1106_v49 = vpop.f32.mrb[8].mxu0 }
 0x782   : > { %1111 = vrot.lane.b32.xlu0 %v1106_v49, %s19453_s22  ;;  %v12621_v50 = vpop.f32.mrb[9].mxu0  ;;  %v2308_v49 = vld [vmem:[%s19424_s10 + $0x188] sm:$0xff]  ;;  %s19516_s22 = smov 32  }
 0x783   : > { %v2294_v50 = vld [vmem:[%s19424_s10 + $0x118] sm:$0xff]  ;;  %v12950_v51 = vpack.c.bf16 %v2308_v49, %v2292_v48 }
 0x785   : > { %v1278_v53 = vpop.f32.mrb[10].mxu0 }
 0x786   : > { %1283 = vrot.lane.b32.xlu1 %v1278_v53, %s19457_s20  ;;  %v12631_v55 = vpop.f32.mrb[11].mxu0  ;;  %s19507_s20 = smov 48   ;;  %v2291_v53 = vld [vmem:[%s19424_s10 + $0x100] sm:$0xff] }
 0x787   : > { %v12966_v55 = vpack.c.bf16 %v2310_v52, %v2294_v50  ;;  %v12952_v57 = vpack.c.bf16 %v2307_v54, %v2291_v53  ;;  %v2311_v52 = vld [vmem:[%s19424_s10 + $0x1a0] sm:$0xff]  ;;  %v12982_v54 = vpack.c.bf16 %v2312_v45, %v2296_v44  ;;  %v2301_v45 = vld [vmem:[%s19424_s10 + $0x150] sm:$0xff] }
 0x789   : > { %v1450_v59 = vpop.f32.mrb[12].mxu0 }
 0x78a   : > { %1455 = vrot.lane.b32.xlu0 %v1450_v59, %s19461_s1  ;;  %v12641_v61 = vpop.f32.mrb[13].mxu0  ;;  %v2309_v59 = vld [vmem:[%s19424_s10 + $0x190] sm:$0xff]  ;;  %s19514_s1 = smov 40  }
 0x78b   : > { %v12968_v60 = vpack.c.bf16 %v2309_v59, %v2293_v58  ;;  %v2324_v61 = vld [vmem:[%s19424_s10 + $0x208] sm:$0xff]  ;;  %v2313_v58 = vld [vmem:[%s19424_s10 + $0x1b0] sm:$0xff] }
 0x78c   : > { %v2328_v59 = vld [vmem:[%s19424_s10 + $0x228] sm:$0xff] }
 0x78d   : > { %v1622_v0 = vpop.f32.mrb[14].mxu0 }
 0x78e   : > { %1627 = vrot.lane.b32.xlu1 %v1622_v0, %s19463_s24  ;;  %v12651_v5 = vpop.f32.mrb[15].mxu0  ;;  %v12954_v0 = vpack.c.bf16 %v2340_v62, %v2324_v61  ;;  %v2330_v61 = vld [vmem:[%s19424_s10 + $0x238] sm:$0xff]  ;;  %s19512_s24 = smov 120  }
 0x78f   : > { %v12970_v5 = vpack.c.bf16 %v2342_v1, %v2326_v63  ;;  %v2346_v62 = vld [vmem:[%s19424_s10 + $0x2b8] sm:$0xff]  ;;  %v2327_v1 = vld [vmem:[%s19424_s10 + $0x220] sm:$0xff] }
 0x791   : > { %v1794_v7 = vpop.f32.mrb[16].mxu0 }
 0x792   : > { %1799 = vrot.lane.b32.xlu0 %v1794_v7, %s19465_s29  ;;  %v12661_v8 = vpop.f32.mrb[17].mxu0  ;;  %v2325_v7 = vld [vmem:[%s19424_s10 + $0x210] sm:$0xff]  ;;  %s19522_s29 = smov 8  }
 0x793   : > { %v2341_v8 = vld [vmem:[%s19424_s10 + $0x290] sm:$0xff] }
 0x795   : > { %v1966_v9 = vpop.f32.mrb[18].mxu0 }
 0x796   : > { %1971 = vrot.lane.b32.xlu1 %v1966_v9, %s19507_s20  ;;  %v12671_v10 = vpop.f32.mrb[19].mxu0  ;;  %v12972_v9 = vpack.c.bf16 %v2341_v8, %v2325_v7  ;;  %v2345_v7 = vld [vmem:[%s19424_s10 + $0x2b0] sm:$0xff]  ;;  %v2360_v8 = vld [vmem:[%s19424_s10 + $0x328] sm:$0xff] }
 0x797   : > { %v2356_v10 = vld [vmem:[%s19424_s10 + $0x308] sm:$0xff] }
 0x799   : > { %v2138_v11 = vpop.f32.mrb[20].mxu0 }
 0x79a   : > { %2143 = vrot.lane.b32.xlu0 %v2138_v11, %s19508_s21  ;;  %v12681_v12 = vpop.f32.mrb[21].mxu0  ;;  %v2372_v11 = vld [vmem:[%s19424_s10 + $0x388] sm:$0xff] }
 0x79b   : > { %v2358_v12 = vld [vmem:[%s19424_s10 + $0x318] sm:$0xff] }
 0x7f4   : > { %v1112_v13 = vpop.permute.xlu0 %1111 }
 0x7f5   : > { %1115 = vst.msk [vmem:[#allocation2] sm:$0xff] %vm1114_vm3, %v1112_v13  ;;  %v12958_v13 = vpack.c.bf16 %v2372_v11, %v2356_v10  ;;  %v2362_v10 = vld [vmem:[%s19424_s10 + $0x338] sm:$0xff] }
 0x7f6   : > { %v2378_v11 = vld [vmem:[%s19424_s10 + $0x3b8] sm:$0xff] }
 0x7f8   : > { %v1284_v14 = vpop.permute.xlu1 %1283 }
 0x7f9   : > { %1287 = vst.msk [vmem:[#allocation2] sm:$0xff] %vm1286_vm4, %v1284_v14  ;;  %v2374_v14 = vld [vmem:[%s19424_s10 + $0x398] sm:$0xff] }
 0x7fc   : > { %v1456_v15 = vpop.permute.xlu0 %1455 }
 0x7fd   : > { %1459 = vst.msk [vmem:[#allocation2] sm:$0xff] %vm1458_vm5, %v1456_v15  ;;  %v2355_v15 = vld [vmem:[%s19424_s10 + $0x300] sm:$0xff] }
 0x800   : > { %v1628_v16 = vpop.permute.xlu1 %1627 }
 0x801   : > { %1631 = vst.msk [vmem:[#allocation2] sm:$0xff] %vm1630_vm6, %v1628_v16  ;;  %v2371_v16 = vld [vmem:[%s19424_s10 + $0x380] sm:$0xff] }
 0x804   : > { %v1800_v17 = vpop.permute.xlu0 %1799 }
 0x805   : > { %1803 = vst.msk [vmem:[#allocation2] sm:$0xff] %vm1802_vm7, %v1800_v17  ;;  %v12974_v17 = vpack.c.bf16 %v2374_v14, %v2358_v12  ;;  %v12988_v12 = vpack.c.bf16 %v2343_v3, %v2327_v1  ;;  %v2359_v14 = vld [vmem:[%s19424_s10 + $0x320] sm:$0xff] }
 0x808   : > { %v1972_v18 = vpop.permute.xlu1 %1971 }
 0x809   : > { %1975 = vst.msk [vmem:[#allocation2] sm:$0xff] %vm1974_vm8, %v1972_v18  ;;  %v12960_v18 = vpack.c.bf16 %v2371_v16, %v2355_v15  ;;  %v2375_v15 = vld [vmem:[%s19424_s10 + $0x3a0] sm:$0xff] }
 0x80c   : > { %v2144_v19 = vpop.permute.xlu0 %2143 }
 0x80d   : > { %2147 = vst.msk [vmem:[#allocation2] sm:$0xff] %vm2146_vm9, %v2144_v19  ;;  %v2357_v19 = vld [vmem:[%s19424_s10 + $0x310] sm:$0xff] }
 0x814   : > { %v2148_v20 = vld [vmem:[#allocation2] sm:$0xff] }
 0x815   : > { %12699 = vmatmul.mubr.msk.f32.vlgmr.msra.gmra.mrb[14].mxu1 %vm705_vm2, %v2148_v20  ;;  %v2373_v20 = vld [vmem:[%s19424_s10 + $0x390] sm:$0xff] }
 0x816   : > { %2677 = vmatprep.mubr.f32.mxu1 %v14425_v2  ;;  %12965 = vmatpush1.bf16.msra.mxu1 %v12964_v46  ;;  %v12976_v21 = vpack.c.bf16 %v2373_v20, %v2357_v19  ;;  %v2314_v46 = vld [vmem:[%s19424_s10 + $0x1b8] sm:$0xff]  ;;  %v2377_v19 = vld [vmem:[%s19424_s10 + $0x3b0] sm:$0xff]  ;;  %v2268_v20 = vld [vmem:[%s19424_s10 + $0x48] sm:$0xff] }
 0x817   : > { %12967 = vmatprep.subr.bf16.mxu1 %v12966_v55 }
 0x81a   : > { %12969 = vmatpush1.bf16.msra.mxu1 %v12968_v60  ;;  %v2344_v60 = vld [vmem:[%s19424_s10 + $0x2a8] sm:$0xff] }
 0x81b   : > { %12971 = vmatprep.subr.bf16.mxu1 %v12970_v5  ;;  %v12986_v4 = vpack.c.bf16 %v2344_v60, %v2328_v59  ;;  %v13002_v5 = vpack.c.bf16 %v2346_v62, %v2330_v61  ;;  %v2333_v59 = vld [vmem:[%s19424_s10 + $0x250] sm:$0xff]  ;;  %v2364_v61 = vld [vmem:[%s19424_s10 + $0x348] sm:$0xff] }
 0x81c   : > { %v2349_v60 = vld [vmem:[%s19424_s10 + $0x2d0] sm:$0xff]  ;;  %v2380_v62 = vld [vmem:[%s19424_s10 + $0x3c8] sm:$0xff] }
 0x81d   : > { %v13036_v3 = vpack.c.bf16 %v2349_v60, %v2333_v59 }
 0x81e   : > { %12973 = vmatpush1.bf16.msra.mxu1 %v12972_v9  ;;  %v2376_v9 = vld [vmem:[%s19424_s10 + $0x3a8] sm:$0xff] }
 0x81f   : > { %12975 = vmatprep.subr.bf16.mxu1 %v12974_v17  ;;  %v12990_v16 = vpack.c.bf16 %v2376_v9, %v2360_v8  ;;  %v13006_v17 = vpack.c.bf16 %v2378_v11, %v2362_v10  ;;  %v2365_v8 = vld [vmem:[%s19424_s10 + $0x350] sm:$0xff]  ;;  %v2272_v10 = vld [vmem:[%s19424_s10 + $0x68] sm:$0xff] }
 0x820   : > { %v2381_v9 = vld [vmem:[%s19424_s10 + $0x3d0] sm:$0xff]  ;;  %v2288_v11 = vld [vmem:[%s19424_s10 + $0xe8] sm:$0xff] }
 0x822   : > { %12977 = vmatpush1.bf16.msra.mxu1 %v12976_v21  ;;  %v2284_v21 = vld [vmem:[%s19424_s10 + $0xc8] sm:$0xff] }
 0x8e8   : > { %v2230_v23 = vpop.f32.mrb[14].mxu1 }
 0x8e9   : > { %v2231_v24 = vadd.f32 %v2230_v23, %v2160_v22  ;;  %v12700_v25 = vpop.f32.mrb[15].mxu1  ;;  %v2264_v22 = vld [vmem:[%s19424_s10 + $0x28] sm:$0xff] }
 0x8ea   : > { %v2280_v23 = vld [vmem:[%s19424_s10 + $0xa8] sm:$0xff] }
 0x8eb   : > { %v2234_v26 = vadd.f32 %v2231_v24, %v14658_v32  ;;  %v2276_v32 = vld [vmem:[%s19424_s10 + $0x88] sm:$0xff]  ;;  %v2266_v24 = vld [vmem:[%s19424_s10 + $0x38] sm:$0xff]  ;;  %v12978_v25 = vpack.c.bf16 %v2280_v23, %v2264_v22 }
 0x8ec   : > { %v12946_v37 = vpack.c.bf16 %v2276_v32, %v2260_v33  ;;  %v573_v33 = vld [vmem:[%s19510_s9] sm:$0x7]  ;;  %v2270_v22 = vld [vmem:[%s19424_s10 + $0x58] sm:$0xff] }
 0x8ed   : > { %v2235_v27 = vsel %vm705_vm2, %v2234_v26, 0.0  ;;  %v2257_v39 = vrot.slane %v573_v33, %v14667_v35  ;;  %v2286_v23 = vld [vmem:[%s19424_s10 + $0xd8] sm:$0xff]  ;;  %v2300_v33 = vld [vmem:[%s19424_s10 + $0x148] sm:$0xff] }
 0x8ee   : > { %2236 = vadd.xlane.f32.xlu1 %v2235_v27  ;;  %12947 = vmatprep.subr.bf16.mxu0 %v12946_v37  ;;  %v2263_v37 = vld [vmem:[%s19424_s10 + $0x20] sm:$0xff] }
 0x8ef   : > { %12949 = vmatpush1.bf16.msra.mxu0 %v12948_v43  ;;  %v2281_v43 = vld [vmem:[%s19424_s10 + $0xb0] sm:$0xff]  ;;  %v12980_v49 = vpack.c.bf16 %v2279_v38, %v2263_v37  ;;  %v2318_v37 = vld [vmem:[%s19424_s10 + $0x1d8] sm:$0xff] }
 0x8f0   : > { %12951 = vmatprep.subr.bf16.mxu0 %v12950_v51  ;;  %v12996_v50 = vpack.c.bf16 %v2281_v43, %v2265_v41  ;;  %v2295_v51 = vld [vmem:[%s19424_s10 + $0x120] sm:$0xff] }
 0x8f1   : > { %v12984_v63 = vpack.c.bf16 %v2311_v52, %v2295_v51  ;;  %v2315_v41 = vld [vmem:[%s19424_s10 + $0x1c0] sm:$0xff] }
 0x8f3   : > { %12953 = vmatpush1.bf16.msra.mxu0 %v12952_v57  ;;  %v2297_v57 = vld [vmem:[%s19424_s10 + $0x130] sm:$0xff] }
 0x8f4   : > { %12955 = vmatprep.subr.bf16.mxu0 %v12954_v0  ;;  %v13000_v0 = vpack.c.bf16 %v2313_v58, %v2297_v57 }
 0x8f7   : > { %12957 = vmatpush1.bf16.msra.mxu0 %v12956_v6  ;;  %v2329_v6 = vld [vmem:[%s19424_s10 + $0x230] sm:$0xff] }
 0x8f8   : > { %12959 = vmatprep.subr.bf16.mxu0 %v12958_v13  ;;  %v13004_v13 = vpack.c.bf16 %v2345_v7, %v2329_v6  ;;  %v13022_v6 = vpack.c.bf16 %v2380_v62, %v2364_v61  ;;  %v2369_v61 = vld [vmem:[%s19424_s10 + $0x370] sm:$0xff] }
 0x8f9   : > { %v2385_v62 = vld [vmem:[%s19424_s10 + $0x3f0] sm:$0xff] }
 0x8fb   : > { %12961 = vmatpush1.bf16.msra.mxu0 %v12960_v18  ;;  %v2361_v18 = vld [vmem:[%s19424_s10 + $0x330] sm:$0xff] }
 0x8fc   : > { %12979 = vmatprep.subr.bf16.mxu0 %v12978_v25  ;;  %v13008_v25 = vpack.c.bf16 %v2377_v19, %v2361_v18  ;;  %v13042_v18 = vpack.c.bf16 %v2288_v11, %v2272_v10  ;;  %v3158_v10 = vld [vmem:[%s19426_s12 + $0x100] sm:$0xff]  ;;  %v3159_v11 = vld [vmem:[%s19426_s12 + $0x108] sm:$0xff] }
 0x97b   : > { %v2237_v28 = vpop.xlane.xlu1 %2236 }
 0x97c   : > { %v2239_v47 = vmul.f32 0.015625, %v2237_v28 }
 0x97e   : > { %v14895_v29 = vsub.f32 %v2234_v26, %v2239_v47  ;;  %v2282_v26 = vld [vmem:[%s19424_s10 + $0xb8] sm:$0xff] }
 0x97f   : > { %v12994_v27 = vpack.c.bf16 %v2282_v26, %v2266_v24  ;;  %v12992_v24 = vpack.c.bf16 %v2375_v15, %v2359_v14  ;;  %v2267_v26 = vld [vmem:[%s19424_s10 + $0x40] sm:$0xff]  ;;  %v13040_v15 = vpack.c.bf16 %v2381_v9, %v2365_v8 }
 0x980   : > { %v2241_v30 = vmul.f32 %v14895_v29, %v14895_v29 }
 0x981   : > { %12995 = vmatprep.subr.bf16.mxu1 %v12994_v27  ;;  %v2283_v27 = vld [vmem:[%s19424_s10 + $0xc0] sm:$0xff] }
 0x982   : > { %v2242_v31 = vsel %vm705_vm2, %v2241_v30, 0.0  ;;  %v13012_v38 = vpack.c.bf16 %v2283_v27, %v2267_v26 }
 0x983   : > { %2243 = vadd.xlane.f32.xlu0 %v2242_v31  ;;  %v572_v31 = vld [vmem:[%s19422_s8] sm:$0x7] }
 0x984   : > { %v2252_v32 = vrot.slane %v572_v31, %v14667_v35  ;;  %v2285_v31 = vld [vmem:[%s19424_s10 + $0xd0] sm:$0xff] }
 0xa10   : > { %v2244_v28 = vpop.xlane.xlu0 %2243 }
 0xa11   : > { %v2245_v47 = vmul.f32 0.015625, %v2244_v28  ;;  %v13010_v28 = vpack.c.bf16 %v2284_v21, %v2268_v20  ;;  %v2273_v20 = vld [vmem:[%s19424_s10 + $0x70] sm:$0xff] }
 0xa12   : > { %v2289_v21 = vld [vmem:[%s19424_s10 + $0xf0] sm:$0xff] }
 0xa13   : > { %v2246_v30 = vadd.f32 1e-05, %v2245_v47  ;;  %v13026_v47 = vpack.c.bf16 %v2286_v23, %v2270_v22  ;;  %v2304_v22 = vld [vmem:[%s19424_s10 + $0x168] sm:$0xff]  ;;  %v13060_v27 = vpack.c.bf16 %v2289_v21, %v2273_v20 }
 0xa14   : > { %v2320_v23 = vld [vmem:[%s19424_s10 + $0x1e8] sm:$0xff] }
 0xa15   : > { %14255 = vrsqrt.f32 %v2246_v30  ;;  %v2269_v30 = vld [vmem:[%s19424_s10 + $0x50] sm:$0xff] }
 0xa1f   : > { %v14256_v36 = vpop.eup %14255 }
 0xa20   : > { %v2248_v40 = vmul.f32 %v14256_v36, %v14895_v29  ;;  %v2298_v29 = vld [vmem:[%s19424_s10 + $0x138] sm:$0xff] }
 0xa21   : > { %v12998_v55 = vpack.c.bf16 %v2314_v46, %v2298_v29  ;;  %v2302_v36 = vld [vmem:[%s19424_s10 + $0x158] sm:$0xff]  ;;  %v2317_v29 = vld [vmem:[%s19424_s10 + $0x1d0] sm:$0xff]  ;;  %v2332_v46 = vld [vmem:[%s19424_s10 + $0x248] sm:$0xff] }
 0xa22   : > { %v2253_v48 = vmul.f32 %v2252_v32, %v2248_v40  ;;  %v2316_v32 = vld [vmem:[%s19424_s10 + $0x1c8] sm:$0xff]  ;;  %v2299_v40 = vld [vmem:[%s19424_s10 + $0x140] sm:$0xff]  ;;  %v13030_v44 = vpack.c.bf16 %v2318_v37, %v2302_v36  ;;  %v13032_v52 = vpack.c.bf16 %v2317_v29, %v2301_v45 }
 0xa23   : > { %v13014_v43 = vpack.c.bf16 %v2316_v32, %v2300_v33  ;;  %v13016_v51 = vpack.c.bf16 %v2315_v41, %v2299_v40  ;;  %v2305_v33 = vld [vmem:[%s19424_s10 + $0x170] sm:$0xff]  ;;  %v2336_v36 = vld [vmem:[%s19424_s10 + $0x268] sm:$0xff] }
 0xa24   : > { %v15047_v53 = vadd.f32 %v2257_v39, %v2253_v48  ;;  %v13028_v39 = vpack.c.bf16 %v2285_v31, %v2269_v30  ;;  %v2348_v48 = vld [vmem:[%s19424_s10 + $0x2c8] sm:$0xff]  ;;  %v13046_v30 = vpack.c.bf16 %v2320_v23, %v2304_v22  ;;  %v2321_v32 = vld [vmem:[%s19424_s10 + $0x1f0] sm:$0xff]  ;;  %v3161_v23 = vld [vmem:[%s19426_s12 + $0x118] sm:$0xff] }
 0xa25   : > { %v13018_v57 = vpack.c.bf16 %v2348_v48, %v2332_v46  ;;  %v2352_v37 = vld [vmem:[%s19424_s10 + $0x2e8] sm:$0xff]  ;;  %v13064_v41 = vpack.c.bf16 %v2321_v32, %v2305_v33  ;;  %v2337_v46 = vld [vmem:[%s19424_s10 + $0x270] sm:$0xff] }
 0xa26   : > { %10727 = vmatmul.mubr.msk.f32.vlgmr.msra.gmra.mrb[22].mxu0 %vm705_vm2, %v15047_v53  ;;  %10728 = vmatmul.mubr.msk.f32.vlgmr.msra.gmra.mrb[16].mxu1 %vm705_vm2, %v15047_v53  ;;  %v13050_v45 = vpack.c.bf16 %v2352_v37, %v2336_v36  ;;  %v2353_v48 = vld [vmem:[%s19424_s10 + $0x2f0] sm:$0xff]  ;;  %v3162_v36 = vld [vmem:[%s19426_s12 + $0x120] sm:$0xff]  ;;  %v3163_v37 = vld [vmem:[%s19426_s12 + $0x128] sm:$0xff] }
 0xa27   : > { %12981 = vmatpush1.bf16.msra.mxu0 %v12980_v49  ;;  %12997 = vmatpush1.bf16.msra.mxu1 %v12996_v50  ;;  %v2334_v49 = vld [vmem:[%s19424_s10 + $0x258] sm:$0xff]  ;;  %v3160_v22 = vld [vmem:[%s19426_s12 + $0x110] sm:$0xff] }
 0xa28   : > { %12983 = vmatprep.subr.bf16.mxu0 %v12982_v54  ;;  %12999 = vmatprep.subr.bf16.mxu1 %v12998_v55  ;;  %v2350_v50 = vld [vmem:[%s19424_s10 + $0x2d8] sm:$0xff]  ;;  %v2331_v54 = vld [vmem:[%s19424_s10 + $0x240] sm:$0xff] }
 0xa29   : > { %2748 = vmatprep.mubr.f32.mxu0 %v14425_v2  ;;  %2819 = vmatprep.mubr.f32.mxu1 %v14425_v2  ;;  %v2347_v55 = vld [vmem:[%s19424_s10 + $0x2c0] sm:$0xff]  ;;  %v13034_v58 = vpack.c.bf16 %v2350_v50, %v2334_v49  ;;  %v2368_v49 = vld [vmem:[%s19424_s10 + $0x368] sm:$0xff] }
 0xa2a   : > { %v13020_v1 = vpack.c.bf16 %v2347_v55, %v2331_v54  ;;  %v2384_v50 = vld [vmem:[%s19424_s10 + $0x3e8] sm:$0xff]  ;;  %v13068_v55 = vpack.c.bf16 %v2353_v48, %v2337_v46 }
 0xa2b   : > { %12985 = vmatpush1.bf16.msra.mxu0 %v12984_v63  ;;  %13001 = vmatpush1.bf16.msra.mxu1 %v13000_v0  ;;  %v2366_v63 = vld [vmem:[%s19424_s10 + $0x358] sm:$0xff]  ;;  %v13054_v59 = vpack.c.bf16 %v2384_v50, %v2368_v49  ;;  %v3164_v49 = vld [vmem:[%s19426_s12 + $0x130] sm:$0xff] }
 0xa2c   : > { %12987 = vmatprep.subr.bf16.mxu0 %v12986_v4  ;;  %13003 = vmatprep.subr.bf16.mxu1 %v13002_v5  ;;  %v2382_v0 = vld [vmem:[%s19424_s10 + $0x3d8] sm:$0xff]  ;;  %v2363_v4 = vld [vmem:[%s19424_s10 + $0x340] sm:$0xff] }
 0xa2d   : > { %v2379_v5 = vld [vmem:[%s19424_s10 + $0x3c0] sm:$0xff]  ;;  %v13038_v7 = vpack.c.bf16 %v2382_v0, %v2366_v63  ;;  %v3143_v0 = vld [vmem:[%s19426_s12 + $0x88] sm:$0xff]  ;;  %v3165_v50 = vld [vmem:[%s19426_s12 + $0x138] sm:$0xff] }
 0xa2e   : > { %v13024_v14 = vpack.c.bf16 %v2379_v5, %v2363_v4  ;;  %v3142_v63 = vld [vmem:[%s19426_s12 + $0x80] sm:$0xff]  ;;  %v13072_v5 = vpack.c.bf16 %v2385_v62, %v2369_v61 }
 0xa2f   : > { %12989 = vmatpush1.bf16.msra.mxu0 %v12988_v12  ;;  %13005 = vmatpush1.bf16.msra.mxu1 %v13004_v13  ;;  %v2274_v12 = vld [vmem:[%s19424_s10 + $0x78] sm:$0xff]  ;;  %v13074_v8 = vpack.c.bf16 %v3143_v0, %v3142_v63  ;;  %v3166_v63 = vld [vmem:[%s19426_s12 + $0x140] sm:$0xff]  ;;  %v3167_v0 = vld [vmem:[%s19426_s12 + $0x148] sm:$0xff] }
 0xa30   : > { %12991 = vmatprep.subr.bf16.mxu0 %v12990_v16  ;;  %13007 = vmatprep.subr.bf16.mxu1 %v13006_v17  ;;  %v2290_v13 = vld [vmem:[%s19424_s10 + $0xf8] sm:$0xff]  ;;  %v2271_v16 = vld [vmem:[%s19424_s10 + $0x60] sm:$0xff] }
 0xa31   : > { %v2287_v17 = vld [vmem:[%s19424_s10 + $0xe0] sm:$0xff]  ;;  %v13058_v19 = vpack.c.bf16 %v2290_v13, %v2274_v12  ;;  %v3144_v12 = vld [vmem:[%s19426_s12 + $0x90] sm:$0xff]  ;;  %v3145_v13 = vld [vmem:[%s19426_s12 + $0x98] sm:$0xff] }
 0xa32   : > { %v13044_v26 = vpack.c.bf16 %v2287_v17, %v2271_v16  ;;  %v13108_v17 = vpack.c.bf16 %v3159_v11, %v3158_v10  ;;  %v13078_v20 = vpack.c.bf16 %v3145_v13, %v3144_v12  ;;  %v3168_v12 = vld [vmem:[%s19426_s12 + $0x150] sm:$0xff]  ;;  %v3169_v13 = vld [vmem:[%s19426_s12 + $0x158] sm:$0xff] }
 0xa33   : > { %12993 = vmatpush1.bf16.msra.mxu0 %v12992_v24  ;;  %13009 = vmatpush1.bf16.msra.mxu1 %v13008_v25  ;;  %v2306_v24 = vld [vmem:[%s19424_s10 + $0x178] sm:$0xff] }
 0xa34   : > { %13011 = vmatprep.subr.bf16.mxu0 %v13010_v28  ;;  %13027 = vmatprep.subr.bf16.mxu1 %v13026_v47  ;;  %v2322_v25 = vld [vmem:[%s19424_s10 + $0x1f8] sm:$0xff]  ;;  %v2303_v28 = vld [vmem:[%s19424_s10 + $0x160] sm:$0xff] }
 0xa35   : > { %v2319_v47 = vld [vmem:[%s19424_s10 + $0x1e0] sm:$0xff]  ;;  %v13062_v31 = vpack.c.bf16 %v2322_v25, %v2306_v24  ;;  %v3147_v25 = vld [vmem:[%s19426_s12 + $0xa8] sm:$0xff] }
 0xa36   : > { %10729 = vmatmul.mubr.msk.f32.vlgmr.msra.gmra.mrb[24].mxu0 %vm705_vm2, %v15047_v53  ;;  %10730 = vmatmul.mubr.msk.f32.vlgmr.msra.gmra.mrb[18].mxu1 %vm705_vm2, %v15047_v53  ;;  %v13048_v40 = vpack.c.bf16 %v2319_v47, %v2303_v28  ;;  %v3146_v24 = vld [vmem:[%s19426_s12 + $0xa0] sm:$0xff]  ;;  %v13112_v47 = vpack.c.bf16 %v3161_v23, %v3160_v22  ;;  %v3139_v23 = vld [vmem:[%s19426_s12 + $0x68] sm:$0xff] }
 0xa37   : > { %13013 = vmatpush1.bf16.msra.mxu0 %v13012_v38  ;;  %13029 = vmatpush1.bf16.msra.mxu1 %v13028_v39  ;;  %v2338_v38 = vld [vmem:[%s19424_s10 + $0x278] sm:$0xff]  ;;  %v13082_v33 = vpack.c.bf16 %v3147_v25, %v3146_v24  ;;  %v3170_v24 = vld [vmem:[%s19426_s12 + $0x160] sm:$0xff]  ;;  %v3171_v25 = vld [vmem:[%s19426_s12 + $0x168] sm:$0xff] }
 0xa38   : > { %13015 = vmatprep.subr.bf16.mxu0 %v13014_v43  ;;  %13031 = vmatprep.subr.bf16.mxu1 %v13030_v44  ;;  %v2354_v39 = vld [vmem:[%s19424_s10 + $0x2f8] sm:$0xff]  ;;  %v2335_v43 = vld [vmem:[%s19424_s10 + $0x260] sm:$0xff] }
 0xa39   : > { %2890 = vmatprep.mubr.f32.mxu0 %v14425_v2  ;;  %2961 = vmatprep.mubr.f32.mxu1 %v14425_v2  ;;  %v2351_v44 = vld [vmem:[%s19424_s10 + $0x2e0] sm:$0xff]  ;;  %v13066_v29 = vpack.c.bf16 %v2354_v39, %v2338_v38  ;;  %v3148_v38 = vld [vmem:[%s19426_s12 + $0xb0] sm:$0xff]  ;;  %v3149_v39 = vld [vmem:[%s19426_s12 + $0xb8] sm:$0xff] }
 0xa3a   : > { %v13052_v54 = vpack.c.bf16 %v2351_v44, %v2335_v43  ;;  %v13116_v44 = vpack.c.bf16 %v3163_v37, %v3162_v36  ;;  %v13086_v46 = vpack.c.bf16 %v3149_v39, %v3148_v38  ;;  %v3141_v36 = vld [vmem:[%s19426_s12 + $0x78] sm:$0xff]  ;;  %v3172_v39 = vld [vmem:[%s19426_s12 + $0x170] sm:$0xff] }
 0xa3b   : > { %13017 = vmatpush1.bf16.msra.mxu0 %v13016_v51  ;;  %13033 = vmatpush1.bf16.msra.mxu1 %v13032_v52  ;;  %v2370_v51 = vld [vmem:[%s19424_s10 + $0x378] sm:$0xff] }
 0xa3c   : > { %13019 = vmatprep.subr.bf16.mxu0 %v13018_v57  ;;  %13035 = vmatprep.subr.bf16.mxu1 %v13034_v58  ;;  %v2386_v52 = vld [vmem:[%s19424_s10 + $0x3f8] sm:$0xff]  ;;  %v2367_v57 = vld [vmem:[%s19424_s10 + $0x360] sm:$0xff] }
 0xa3d   : > { %v2383_v58 = vld [vmem:[%s19424_s10 + $0x3e0] sm:$0xff]  ;;  %v13070_v60 = vpack.c.bf16 %v2386_v52, %v2370_v51  ;;  %v3151_v52 = vld [vmem:[%s19426_s12 + $0xc8] sm:$0xff] }
 0xa3e   : > { %v13056_v4 = vpack.c.bf16 %v2383_v58, %v2367_v57  ;;  %v3150_v51 = vld [vmem:[%s19426_s12 + $0xc0] sm:$0xff]  ;;  %v13120_v58 = vpack.c.bf16 %v3165_v50, %v3164_v49  ;;  %v577_v50 = vld [vmem:[%s19425_s11 + $0x8] sm:$0x77] }
 0xa3f   : > { %13021 = vmatpush1.bf16.msra.mxu0 %v13020_v1  ;;  %13037 = vmatpush1.bf16.msra.mxu1 %v13036_v3  ;;  %v3174_v1 = vld [vmem:[%s19426_s12 + $0x180] sm:$0xff]  ;;  %v3175_v3 = vld [vmem:[%s19426_s12 + $0x188] sm:$0xff]  ;;  %v13090_v61 = vpack.c.bf16 %v3151_v52, %v3150_v51  ;;  %v2406_v52 = vrot.slane %v577_v50, %v14667_v35 }
 0xa40   : > { %13023 = vmatprep.subr.bf16.mxu0 %v13022_v6  ;;  %13039 = vmatprep.subr.bf16.mxu1 %v13038_v7  ;;  %v3126_v6 = vld [vmem:[%s19426_s12] sm:$0xff]  ;;  %v3127_v7 = vld [vmem:[%s19426_s12 + $0x8] sm:$0xff]  ;;  %v13106_v9 = vpack.c.bf16 %v3175_v3, %v3174_v1  ;;  %v3152_v1 = vld [vmem:[%s19426_s12 + $0xd0] sm:$0xff] }
 0xa41   : > { %v13076_v16 = vpack.c.bf16 %v3127_v7, %v3126_v6  ;;  %v3153_v3 = vld [vmem:[%s19426_s12 + $0xd8] sm:$0xff]  ;;  %v13124_v7 = vpack.c.bf16 %v3167_v0, %v3166_v63  ;;  %v576_v49 = vld [vmem:[%s19425_s11] sm:$0x77]  ;;  %v3191_v0 = vld [vmem:[%s19426_s12 + $0x208] sm:$0xff] }
 0xa42   : > { %v13094_v10 = vpack.c.bf16 %v3153_v3, %v3152_v1  ;;  %v2398_v51 = vrot.slane %v576_v49, %v14667_v35  ;;  %v3190_v63 = vld [vmem:[%s19426_s12 + $0x200] sm:$0xff] }
 0xa43   : > { %13025 = vmatpush1.bf16.msra.mxu0 %v13024_v14  ;;  %13041 = vmatpush1.bf16.msra.mxu1 %v13040_v15  ;;  %v3176_v14 = vld [vmem:[%s19426_s12 + $0x190] sm:$0xff]  ;;  %v3177_v15 = vld [vmem:[%s19426_s12 + $0x198] sm:$0xff] }
 0xa44   : > { %13043 = vmatprep.subr.bf16.mxu0 %v13042_v18  ;;  %13059 = vmatprep.subr.bf16.mxu1 %v13058_v19  ;;  %v3128_v18 = vld [vmem:[%s19426_s12 + $0x10] sm:$0xff]  ;;  %v3129_v19 = vld [vmem:[%s19426_s12 + $0x18] sm:$0xff]  ;;  %v13110_v21 = vpack.c.bf16 %v3177_v15, %v3176_v14  ;;  %v3154_v14 = vld [vmem:[%s19426_s12 + $0xe0] sm:$0xff] }
 0xa45   : > { %v13080_v28 = vpack.c.bf16 %v3129_v19, %v3128_v18  ;;  %v3155_v15 = vld [vmem:[%s19426_s12 + $0xe8] sm:$0xff]  ;;  %v13128_v19 = vpack.c.bf16 %v3169_v13, %v3168_v12  ;;  %v3240_v12 = vld [vmem:[%s19426_s12 + $0x390] sm:$0xff]  ;;  %v3241_v13 = vld [vmem:[%s19426_s12 + $0x398] sm:$0xff] }
 0xa46   : > { %10731 = vmatmul.mubr.msk.f32.vlgmr.msra.gmra.mrb[26].mxu0 %vm705_vm2, %v15047_v53  ;;  %10732 = vmatmul.mubr.msk.f32.vlgmr.msra.gmra.mrb[20].mxu1 %vm705_vm2, %v15047_v53 }
 0xa47   : > { %13045 = vmatpush1.bf16.msra.mxu0 %v13044_v26  ;;  %13061 = vmatpush1.bf16.msra.mxu1 %v13060_v27  ;;  %v3178_v26 = vld [vmem:[%s19426_s12 + $0x1a0] sm:$0xff]  ;;  %v3179_v27 = vld [vmem:[%s19426_s12 + $0x1a8] sm:$0xff] }
 0xa48   : > { %13047 = vmatprep.subr.bf16.mxu0 %v13046_v30  ;;  %13063 = vmatprep.subr.bf16.mxu1 %v13062_v31  ;;  %v3130_v30 = vld [vmem:[%s19426_s12 + $0x20] sm:$0xff]  ;;  %v3131_v31 = vld [vmem:[%s19426_s12 + $0x28] sm:$0xff]  ;;  %v13114_v32 = vpack.c.bf16 %v3179_v27, %v3178_v26  ;;  %v13132_v27 = vpack.c.bf16 %v3171_v25, %v3170_v24  ;;  %v3224_v24 = vld [vmem:[%s19426_s12 + $0x310] sm:$0xff] }
 0xa49   : > { %3032 = vmatprep.mubr.f32.mxu0 %v14425_v2  ;;  %3103 = vmatprep.mubr.f32.mxu1 %v14425_v2  ;;  %v13084_v43 = vpack.c.bf16 %v3131_v31, %v3130_v30  ;;  %v3188_v30 = vld [vmem:[%s19426_s12 + $0x1f0] sm:$0xff]  ;;  %v3225_v25 = vld [vmem:[%s19426_s12 + $0x318] sm:$0xff] }
 0xa4b   : > { %13049 = vmatpush1.bf16.msra.mxu0 %v13048_v40  ;;  %13065 = vmatpush1.bf16.msra.mxu1 %v13064_v41  ;;  %v3180_v40 = vld [vmem:[%s19426_s12 + $0x1b0] sm:$0xff]  ;;  %v3181_v41 = vld [vmem:[%s19426_s12 + $0x1b8] sm:$0xff] }
 0xa4c   : > { %13051 = vmatprep.subr.bf16.mxu0 %v13050_v45  ;;  %13067 = vmatprep.subr.bf16.mxu1 %v13066_v29  ;;  %v3132_v45 = vld [vmem:[%s19426_s12 + $0x30] sm:$0xff]  ;;  %v3133_v29 = vld [vmem:[%s19426_s12 + $0x38] sm:$0xff]  ;;  %v13118_v48 = vpack.c.bf16 %v3181_v41, %v3180_v40 }
 0xa4d   : > { %v13088_v57 = vpack.c.bf16 %v3133_v29, %v3132_v45  ;;  %v3173_v40 = vld [vmem:[%s19426_s12 + $0x178] sm:$0xff]  ;;  %v3238_v45 = vld [vmem:[%s19426_s12 + $0x380] sm:$0xff] }
 0xa4e   : > { %v13136_v41 = vpack.c.bf16 %v3173_v40, %v3172_v39  ;;  %v3226_v40 = vld [vmem:[%s19426_s12 + $0x320] sm:$0xff] }
 0xa4f   : > { %13053 = vmatpush1.bf16.msra.mxu0 %v13052_v54  ;;  %13069 = vmatpush1.bf16.msra.mxu1 %v13068_v55  ;;  %v3182_v54 = vld [vmem:[%s19426_s12 + $0x1c0] sm:$0xff]  ;;  %v3183_v55 = vld [vmem:[%s19426_s12 + $0x1c8] sm:$0xff] }
 0xa50   : > { %13055 = vmatprep.subr.bf16.mxu0 %v13054_v59  ;;  %13071 = vmatprep.subr.bf16.mxu1 %v13070_v60  ;;  %v3134_v59 = vld [vmem:[%s19426_s12 + $0x40] sm:$0xff]  ;;  %v3135_v60 = vld [vmem:[%s19426_s12 + $0x48] sm:$0xff]  ;;  %v13122_v62 = vpack.c.bf16 %v3183_v55, %v3182_v54  ;;  %v2402_v54 = vrot.slane %v576_v49, %v14691_v42  ;;  %v2410_v55 = vrot.slane %v577_v50, %v14691_v42 }
 0xa51   : > { %v13092_v6 = vpack.c.bf16 %v3135_v60, %v3134_v59 }
 0xa52   : > { %v2482_v59 = vrot.slane %v2402_v54, %v14667_v35  ;;  %v2490_v60 = vrot.slane %v2410_v55, %v14667_v35 }
 0xa53   : > { %13057 = vmatpush1.bf16.msra.mxu0 %v13056_v4  ;;  %13073 = vmatpush1.bf16.msra.mxu1 %v13072_v5  ;;  %v3184_v4 = vld [vmem:[%s19426_s12 + $0x1d0] sm:$0xff]  ;;  %v3185_v5 = vld [vmem:[%s19426_s12 + $0x1d8] sm:$0xff] }
 0xa54   : > { %13075 = vmatprep.subr.bf16.mxu0 %v13074_v8  ;;  %13107 = vmatprep.subr.bf16.mxu1 %v13106_v9  ;;  %v3136_v8 = vld [vmem:[%s19426_s12 + $0x50] sm:$0xff]  ;;  %v3137_v9 = vld [vmem:[%s19426_s12 + $0x58] sm:$0xff]  ;;  %v13126_v11 = vpack.c.bf16 %v3185_v5, %v3184_v4 }
 0xa55   : > { %v13096_v18 = vpack.c.bf16 %v3137_v9, %v3136_v8  ;;  %v3208_v8 = vld [vmem:[%s19426_s12 + $0x290] sm:$0xff] }
 0xa56   : > { %10733 = vmatmul.mubr.msk.f32.vlgmr.msra.gmra.mrb[28].mxu0 %vm705_vm2, %v15047_v53  ;;  %10734 = vmatmul.mubr.msk.f32.vlgmr.msra.gmra.mrb[22].mxu1 %vm705_vm2, %v15047_v53 }
 0xa57   : > { %13077 = vmatpush3.bf16.msra.mxu0 %v13076_v16  ;;  %13109 = vmatpush3.bf16.msra.mxu1 %v13108_v17  ;;  %v3186_v16 = vld [vmem:[%s19426_s12 + $0x1e0] sm:$0xff]  ;;  %v3187_v17 = vld [vmem:[%s19426_s12 + $0x1e8] sm:$0xff] }
 0xa58   : > { %13079 = vmatprep.subr.bf16.mxu0 %v13078_v20  ;;  %13111 = vmatprep.subr.bf16.mxu1 %v13110_v21  ;;  %v3138_v20 = vld [vmem:[%s19426_s12 + $0x60] sm:$0xff]  ;;  %v13098_v21 = vpack.c.bf16 %v3155_v15, %v3154_v14  ;;  %v13130_v22 = vpack.c.bf16 %v3187_v17, %v3186_v16  ;;  %v13140_v16 = vpack.c.bf16 %v3191_v0, %v3190_v63  ;;  %v3247_v0 = vld [vmem:[%s19426_s12 + $0x3c8] sm:$0xff] }
 0xa59   : > { %v13100_v26 = vpack.c.bf16 %v3139_v23, %v3138_v20  ;;  %v13174_v23 = vpack.c.bf16 %v3241_v13, %v3240_v12  ;;  %v3246_v63 = vld [vmem:[%s19426_s12 + $0x3c0] sm:$0xff]  ;;  %v3231_v13 = vld [vmem:[%s19426_s12 + $0x348] sm:$0xff] }
 0xa5a   : > { %v3230_v12 = vld [vmem:[%s19426_s12 + $0x340] sm:$0xff] }
 0xa5b   : > { %13081 = vmatpush3.bf16.msra.mxu0 %v13080_v28  ;;  %13113 = vmatpush3.bf16.msra.mxu1 %v13112_v47  ;;  %v3156_v28 = vld [vmem:[%s19426_s12 + $0xf0] sm:$0xff]  ;;  %v3157_v47 = vld [vmem:[%s19426_s12 + $0xf8] sm:$0xff] }
 0xa5c   : > { %13083 = vmatprep.subr.bf16.mxu0 %v13082_v33  ;;  %13115 = vmatprep.subr.bf16.mxu1 %v13114_v32  ;;  %v13102_v31 = vpack.c.bf16 %v3157_v47, %v3156_v28  ;;  %v3189_v33 = vld [vmem:[%s19426_s12 + $0x1f8] sm:$0xff]  ;;  %v3140_v32 = vld [vmem:[%s19426_s12 + $0x70] sm:$0xff]  ;;  %v3242_v28 = vld [vmem:[%s19426_s12 + $0x3a0] sm:$0xff] }
 0xa5d   : > { %v13134_v37 = vpack.c.bf16 %v3189_v33, %v3188_v30  ;;  %v13104_v38 = vpack.c.bf16 %v3141_v36, %v3140_v32  ;;  %v3243_v47 = vld [vmem:[%s19426_s12 + $0x3a8] sm:$0xff]  ;;  %v15586_v30 = vld [vmem:[%s19425_s11 + $0x10] sm:$0x77]  ;;  %v13176_v32 = vpack.c.bf16 %v3225_v25, %v3224_v24  ;;  %v3194_v36 = vld [vmem:[%s19426_s12 + $0x220] sm:$0xff] }
 0xa5e   : > { %v13178_v39 = vpack.c.bf16 %v3243_v47, %v3242_v28  ;;  %v3200_v24 = vld [vmem:[%s19426_s12 + $0x250] sm:$0xff]  ;;  %v3201_v25 = vld [vmem:[%s19426_s12 + $0x258] sm:$0xff] }
 0xa5f   : > { %13085 = vmatpush3.bf16.msra.mxu0 %v13084_v43  ;;  %13117 = vmatpush3.bf16.msra.mxu1 %v13116_v44  ;;  %v3206_v43 = vld [vmem:[%s19426_s12 + $0x280] sm:$0xff]  ;;  %v3207_v44 = vld [vmem:[%s19426_s12 + $0x288] sm:$0xff]  ;;  %v3232_v28 = vld [vmem:[%s19426_s12 + $0x350] sm:$0xff] }
 0xa60   : > { %13087 = vmatprep.subr.bf16.mxu0 %v13086_v46  ;;  %13119 = vmatprep.subr.bf16.mxu1 %v13118_v48  ;;  %v13138_v29 = vpack.c.bf16 %v3207_v44, %v3206_v43  ;;  %v3239_v46 = vld [vmem:[%s19426_s12 + $0x388] sm:$0xff]  ;;  %v3212_v43 = vld [vmem:[%s19426_s12 + $0x2b0] sm:$0xff]  ;;  %v2418_v44 = vrot.slane %v15586_v30, %v14691_v42  ;;  %v3233_v47 = vld [vmem:[%s19426_s12 + $0x358] sm:$0xff] }
 0xa61   : > { %v13170_v48 = vpack.c.bf16 %v3239_v46, %v3238_v45  ;;  %v3244_v46 = vld [vmem:[%s19426_s12 + $0x3b0] sm:$0xff] }
 0xa63   : > { %13089 = vmatpush3.bf16.msra.mxu0 %v13088_v57  ;;  %13121 = vmatpush3.bf16.msra.mxu1 %v13120_v58  ;;  %v2478_v57 = vrot.slane %v2398_v51, %v14667_v35  ;;  %v2486_v58 = vrot.slane %v2406_v52, %v14667_v35  ;;  %v3196_v51 = vld [vmem:[%s19426_s12 + $0x230] sm:$0xff]  ;;  %v3197_v52 = vld [vmem:[%s19426_s12 + $0x238] sm:$0xff] }
 0xa64   : > { %13091 = vmatprep.subr.bf16.mxu0 %v13090_v61  ;;  %13123 = vmatprep.subr.bf16.mxu1 %v13122_v62 }
 0xa67   : > { %13093 = vmatpush3.bf16.msra.mxu0 %v13092_v6  ;;  %13125 = vmatpush3.bf16.msra.mxu1 %v13124_v7  ;;  %v3222_v6 = vld [vmem:[%s19426_s12 + $0x300] sm:$0xff]  ;;  %v3223_v7 = vld [vmem:[%s19426_s12 + $0x308] sm:$0xff] }
 0xa68   : > { %13095 = vmatprep.subr.bf16.mxu0 %v13094_v10  ;;  %13127 = vmatprep.subr.bf16.mxu1 %v13126_v11  ;;  %v3209_v11 = vld [vmem:[%s19426_s12 + $0x298] sm:$0xff]  ;;  %v13172_v17 = vpack.c.bf16 %v3223_v7, %v3222_v6  ;;  %v3198_v6 = vld [vmem:[%s19426_s12 + $0x240] sm:$0xff]  ;;  %v3199_v7 = vld [vmem:[%s19426_s12 + $0x248] sm:$0xff] }
 0xa6b   : > { %13097 = vmatpush3.bf16.msra.mxu0 %v13096_v18  ;;  %13129 = vmatpush3.bf16.msra.mxu1 %v13128_v19  ;;  %v3192_v18 = vld [vmem:[%s19426_s12 + $0x210] sm:$0xff]  ;;  %v3193_v19 = vld [vmem:[%s19426_s12 + $0x218] sm:$0xff] }
 0xa6c   : > { %13099 = vmatprep.subr.bf16.mxu0 %v13098_v21  ;;  %13131 = vmatprep.subr.bf16.mxu1 %v13130_v22  ;;  %v13142_v22 = vpack.c.bf16 %v3209_v11, %v3208_v8  ;;  %v13144_v33 = vpack.c.bf16 %v3193_v19, %v3192_v18  ;;  %v13186_v11 = vpack.c.bf16 %v3247_v0, %v3246_v63  ;;  %v3248_v18 = vld [vmem:[%s19426_s12 + $0x3d0] sm:$0xff]  ;;  %v3249_v19 = vld [vmem:[%s19426_s12 + $0x3d8] sm:$0xff] }
 0xa6f   : > { %13101 = vmatpush3.bf16.msra.mxu0 %v13100_v26  ;;  %13133 = vmatpush3.bf16.msra.mxu1 %v13132_v27  ;;  %v3210_v26 = vld [vmem:[%s19426_s12 + $0x2a0] sm:$0xff]  ;;  %v3211_v27 = vld [vmem:[%s19426_s12 + $0x2a8] sm:$0xff] }
 0xa70   : > { %13103 = vmatprep.subr.bf16.mxu0 %v13102_v31  ;;  %13135 = vmatprep.subr.bf16.mxu1 %v13134_v37  ;;  %v15591_v31 = vld [vmem:[%s19425_s11 + $0x18] sm:$0x77]  ;;  %v3195_v37 = vld [vmem:[%s19426_s12 + $0x228] sm:$0xff] }
 0xa71   : > { %v2426_v45 = vrot.slane %v15591_v31, %v14691_v42  ;;  %v13148_v49 = vpack.c.bf16 %v3195_v37, %v3194_v36  ;;  %v3250_v36 = vld [vmem:[%s19426_s12 + $0x3e0] sm:$0xff]  ;;  %v3251_v37 = vld [vmem:[%s19426_s12 + $0x3e8] sm:$0xff] }
 0xa73   : > { %13105 = vmatpush3.bf16.msra.mxu0 %v13104_v38  ;;  %13137 = vmatpush3.bf16.msra.mxu1 %v13136_v41  ;;  %v13146_v38 = vpack.c.bf16 %v3211_v27, %v3210_v26  ;;  %v3227_v41 = vld [vmem:[%s19426_s12 + $0x328] sm:$0xff]  ;;  %v13190_v27 = vpack.c.bf16 %v3249_v19, %v3248_v18 }
 0xa74   : > { %13139 = vmatprep.subr.bf16.mxu0 %v13138_v29  ;;  %13171 = vmatprep.subr.bf16.mxu1 %v13170_v48  ;;  %v3213_v29 = vld [vmem:[%s19426_s12 + $0x2b8] sm:$0xff]  ;;  %v13180_v50 = vpack.c.bf16 %v3227_v41, %v3226_v40  ;;  %v13160_v40 = vpack.c.bf16 %v3201_v25, %v3200_v24  ;;  %v13192_v41 = vpack.c.bf16 %v3233_v47, %v3232_v28  ;;  %v3272_v25 = vld [vmem:[%s19426_s12 + $0x490] sm:$0xff] }
 0xa75   : > { %v3245_v48 = vld [vmem:[%s19426_s12 + $0x3b8] sm:$0xff]  ;;  %v13150_v54 = vpack.c.bf16 %v3213_v29, %v3212_v43  ;;  %v15709_v43 = vld [vmem:[%s19425_s11 + $0x28] sm:$0x77]  ;;  %v3304_v28 = vld [vmem:[%s19426_s12 + $0x590] sm:$0xff] }
 0xa76   : > { %v13182_v55 = vpack.c.bf16 %v3245_v48, %v3244_v46  ;;  %v13194_v46 = vpack.c.bf16 %v3251_v37, %v3250_v36  ;;  %v3234_v48 = vld [vmem:[%s19426_s12 + $0x360] sm:$0xff]  ;;  %v3305_v47 = vld [vmem:[%s19426_s12 + $0x598] sm:$0xff] }
 0xaf9   : > { %v2608_v61 = vpop.f32.mrb[22].mxu0  ;;  %v2679_v62 = vpop.f32.mrb[16].mxu1 }
 0xafa   : > { %v2609_v1 = vadd.f32 %v2608_v61, %v2478_v57  ;;  %v2680_v3 = vadd.f32 %v2679_v62, %v2486_v58  ;;  %v2610_v4 = vpop.f32.mrb[23].mxu0  ;;  %v2681_v5 = vpop.f32.mrb[17].mxu1  ;;  %v3228_v57 = vld [vmem:[%s19426_s12 + $0x330] sm:$0xff]  ;;  %v3229_v58 = vld [vmem:[%s19426_s12 + $0x338] sm:$0xff]  ;;  %v2506_v61 = vrot.slane %v2426_v45, %v14667_v35  ;;  %v3215_v62 = vld [vmem:[%s19426_s12 + $0x2c8] sm:$0xff] }
 0xafb   : > { %v2611_v9 = vadd.f32 %v2610_v4, %v2482_v59  ;;  %v2682_v10 = vadd.f32 %v2681_v5, %v2490_v60  ;;  %v3214_v59 = vld [vmem:[%s19426_s12 + $0x2c0] sm:$0xff]  ;;  %v2498_v60 = vrot.slane %v2418_v44, %v14667_v35  ;;  %v13152_v4 = vpack.c.bf16 %v3197_v52, %v3196_v51  ;;  %v3203_v45 = vld [vmem:[%s19426_s12 + $0x268] sm:$0xff]  ;;  %v3252_v52 = vld [vmem:[%s19426_s12 + $0x3f0] sm:$0xff] }
 0xafc   : > { %v3110_v20 = vmax.f32 %v2609_v1, 0.0  ;;  %v3112_v21 = vmax.f32 %v2680_v3, 0.0  ;;  %v13184_v5 = vpack.c.bf16 %v3229_v58, %v3228_v57  ;;  %v3202_v44 = vld [vmem:[%s19426_s12 + $0x260] sm:$0xff] }
 0xafd   : > { %v3111_v14 = vmax.f32 %v2611_v9, 0.0  ;;  %v3113_v15 = vmax.f32 %v2682_v10, 0.0  ;;  %v13154_v10 = vpack.c.bf16 %v3215_v62, %v3214_v59  ;;  %v13164_v58 = vpack.c.bf16 %v3203_v45, %v3202_v44  ;;  %v3236_v62 = vld [vmem:[%s19426_s12 + $0x370] sm:$0xff] }
 0xaff   : > { %3450 = vmatprep.mubr.f32.mxu0 %v3111_v14  ;;  %3520 = vmatprep.mubr.f32.mxu1 %v3113_v15  ;;  %v3216_v14 = vld [vmem:[%s19426_s12 + $0x2d0] sm:$0xff] }
 0xb00   : > { %3451 = vmatmul.mubr.f32.vlgmr.msra.gmra.mrb[30].mxu0 %v3110_v20  ;;  %3521 = vmatmul.mubr.f32.vlgmr.msra.gmra.mrb[24].mxu1 %v3112_v21 }
 0xb01   : > { %13141 = vmatpush3.bf16.msra.mxu0 %v13140_v16  ;;  %13173 = vmatpush3.bf16.msra.mxu1 %v13172_v17  ;;  %v3217_v17 = vld [vmem:[%s19426_s12 + $0x2d8] sm:$0xff] }
 0xb02   : > { %13143 = vmatprep.subr.bf16.mxu0 %v13142_v22  ;;  %13175 = vmatprep.subr.bf16.mxu1 %v13174_v23  ;;  %v13156_v22 = vpack.c.bf16 %v3199_v7, %v3198_v6  ;;  %v13188_v23 = vpack.c.bf16 %v3231_v13, %v3230_v12  ;;  %v13158_v26 = vpack.c.bf16 %v3217_v17, %v3216_v14  ;;  %v3270_v6 = vld [vmem:[%s19426_s12 + $0x480] sm:$0xff]  ;;  %v3271_v7 = vld [vmem:[%s19426_s12 + $0x488] sm:$0xff] }
 0xb05   : > { %13145 = vmatpush3.bf16.msra.mxu0 %v13144_v33  ;;  %13177 = vmatpush3.bf16.msra.mxu1 %v13176_v32  ;;  %v3218_v33 = vld [vmem:[%s19426_s12 + $0x2e0] sm:$0xff]  ;;  %v3219_v32 = vld [vmem:[%s19426_s12 + $0x2e8] sm:$0xff] }
 0xb06   : > { %13147 = vmatprep.subr.bf16.mxu0 %v13146_v38  ;;  %13179 = vmatprep.subr.bf16.mxu1 %v13178_v39  ;;  %v15702_v38 = vld [vmem:[%s19425_s11 + $0x20] sm:$0x77]  ;;  %v2414_v39 = vrot.slane %v15586_v30, %v14667_v35  ;;  %v2422_v30 = vrot.slane %v15591_v31, %v14667_v35  ;;  %v13162_v29 = vpack.c.bf16 %v3219_v32, %v3218_v33  ;;  %v3221_v31 = vld [vmem:[%s19426_s12 + $0x2f8] sm:$0xff] }
 0xb07   : > { %v2434_v51 = vrot.slane %v15702_v38, %v14691_v42 }
 0xb08   : > { %v2494_v57 = vrot.slane %v2414_v39, %v14667_v35  ;;  %v2502_v63 = vrot.slane %v2422_v30, %v14667_v35  ;;  %v3256_v39 = vld [vmem:[%s19426_s12 + $0x410] sm:$0xff]  ;;  %v13238_v30 = vpack.c.bf16 %v3305_v47, %v3304_v28  ;;  %v3281_v47 = vld [vmem:[%s19426_s12 + $0x4d8] sm:$0xff] }
 0xb09   : > { %v15647_v1 = vpop.f32.mrb[24].mxu0  ;;  %v15649_v3 = vpop.f32.mrb[18].mxu1  ;;  %13149 = vmatpush3.bf16.msra.mxu0 %v13148_v49  ;;  %13181 = vmatpush3.bf16.msra.mxu1 %v13180_v50  ;;  %v3235_v49 = vld [vmem:[%s19426_s12 + $0x368] sm:$0xff]  ;;  %v3220_v50 = vld [vmem:[%s19426_s12 + $0x2f0] sm:$0xff] }
 0xb0a   : > { %v2752_v8 = vpop.f32.mrb[25].mxu0  ;;  %v2823_v9 = vpop.f32.mrb[19].mxu1  ;;  %13151 = vmatprep.subr.bf16.mxu0 %v13150_v54  ;;  %13183 = vmatprep.subr.bf16.mxu1 %v13182_v55  ;;  %v3253_v54 = vld [vmem:[%s19426_s12 + $0x3f8] sm:$0xff]  ;;  %v2442_v55 = vrot.slane %v15709_v43, %v14691_v42  ;;  %v13196_v59 = vpack.c.bf16 %v3235_v49, %v3234_v48  ;;  %v13166_v0 = vpack.c.bf16 %v3221_v31, %v3220_v50  ;;  %v3275_v48 = vld [vmem:[%s19426_s12 + $0x4a8] sm:$0xff]  ;;  %v3306_v50 = vld [vmem:[%s19426_s12 + $0x5a0] sm:$0xff] }
 0xb0b   : > { %v2753_v15 = vadd.f32 %v2752_v8, %v2498_v60  ;;  %v2824_v16 = vadd.f32 %v2823_v9, %v2506_v61  ;;  %v3204_v60 = vld [vmem:[%s19426_s12 + $0x270] sm:$0xff]  ;;  %v3205_v61 = vld [vmem:[%s19426_s12 + $0x278] sm:$0xff]  ;;  %v2514_v8 = vrot.slane %v2434_v51, %v14667_v35  ;;  %v3302_v9 = vld [vmem:[%s19426_s12 + $0x580] sm:$0xff]  ;;  %v2751_v17 = vadd.f32 %v15647_v1, %v2494_v57 }
 0xb0c   : > { %v13168_v14 = vpack.c.bf16 %v3205_v61, %v3204_v60  ;;  %v2822_v18 = vadd.f32 %v15649_v3, %v2502_v63  ;;  %v3286_v1 = vld [vmem:[%s19426_s12 + $0x500] sm:$0xff]  ;;  %v3287_v3 = vld [vmem:[%s19426_s12 + $0x508] sm:$0xff]  ;;  %v3276_v61 = vld [vmem:[%s19426_s12 + $0x4b0] sm:$0xff] }
 0xb0d   : > { %v3115_v20 = vmax.f32 %v2753_v15, 0.0  ;;  %v3117_v21 = vmax.f32 %v2824_v16, 0.0  ;;  %13153 = vmatpush3.bf16.msra.mxu0 %v13152_v4  ;;  %13185 = vmatpush3.bf16.msra.mxu1 %v13184_v5  ;;  %v13198_v4 = vpack.c.bf16 %v3253_v54, %v3252_v52  ;;  %v3237_v5 = vld [vmem:[%s19426_s12 + $0x378] sm:$0xff]  ;;  %v13202_v16 = vpack.c.bf16 %v3271_v7, %v3270_v6  ;;  %v3307_v51 = vld [vmem:[%s19426_s12 + $0x5a8] sm:$0xff]  ;;  %v3308_v63 = vld [vmem:[%s19426_s12 + $0x5b0] sm:$0xff] }
 0xb0e   : > { %13155 = vmatprep.subr.bf16.mxu0 %v13154_v10  ;;  %13187 = vmatprep.subr.bf16.mxu1 %v13186_v11  ;;  %v3303_v10 = vld [vmem:[%s19426_s12 + $0x588] sm:$0xff]  ;;  %v2522_v11 = vrot.slane %v2442_v55, %v14667_v35  ;;  %v13200_v15 = vpack.c.bf16 %v3237_v5, %v3236_v62  ;;  %v3114_v32 = vmax.f32 %v2751_v17, 0.0  ;;  %v3116_v36 = vmax.f32 %v2822_v18, 0.0  ;;  %v3258_v55 = vld [vmem:[%s19426_s12 + $0x420] sm:$0xff]  ;;  %v3277_v62 = vld [vmem:[%s19426_s12 + $0x4b8] sm:$0xff] }
 0xb0f   : > { %3590 = vmatprep.mubr.f32.mxu0 %v3115_v20  ;;  %3660 = vmatprep.mubr.f32.mxu1 %v3117_v21  ;;  %v13234_v21 = vpack.c.bf16 %v3303_v10, %v3302_v9  ;;  %v13236_v37 = vpack.c.bf16 %v3287_v3, %v3286_v1  ;;  %v3259_v57 = vld [vmem:[%s19426_s12 + $0x428] sm:$0xff]  ;;  %v13214_v6 = vpack.c.bf16 %v3277_v62, %v3276_v61  ;;  %v3260_v7 = vld [vmem:[%s19426_s12 + $0x430] sm:$0xff]  ;;  %v3262_v1 = vld [vmem:[%s19426_s12 + $0x440] sm:$0xff] }
 0xb10   : > { %v3291_v60 = vld [vmem:[%s19426_s12 + $0x528] sm:$0xff]  ;;  %v3292_v9 = vld [vmem:[%s19426_s12 + $0x530] sm:$0xff] }
 0xb11   : > { %13157 = vmatpush3.bf16.msra.mxu0 %v13156_v22  ;;  %13189 = vmatpush3.bf16.msra.mxu1 %v13188_v23  ;;  %v3254_v22 = vld [vmem:[%s19426_s12 + $0x400] sm:$0xff]  ;;  %v3255_v23 = vld [vmem:[%s19426_s12 + $0x408] sm:$0xff]  ;;  %v3280_v28 = vld [vmem:[%s19426_s12 + $0x4d0] sm:$0xff] }
 0xb12   : > { %13159 = vmatprep.subr.bf16.mxu0 %v13158_v26  ;;  %13191 = vmatprep.subr.bf16.mxu1 %v13190_v27  ;;  %v3273_v27 = vld [vmem:[%s19426_s12 + $0x498] sm:$0xff]  ;;  %v13204_v33 = vpack.c.bf16 %v3255_v23, %v3254_v22  ;;  %v3311_v17 = vld [vmem:[%s19426_s12 + $0x5c8] sm:$0xff]  ;;  %v3284_v62 = vld [vmem:[%s19426_s12 + $0x4f0] sm:$0xff] }
 0xb13   : > { %v13206_v45 = vpack.c.bf16 %v3273_v27, %v3272_v25  ;;  %v3263_v3 = vld [vmem:[%s19426_s12 + $0x448] sm:$0xff]  ;;  %v3294_v25 = vld [vmem:[%s19426_s12 + $0x540] sm:$0xff] }
 0xb14   : > { %v3295_v27 = vld [vmem:[%s19426_s12 + $0x548] sm:$0xff] }
 0xb15   : > { %13161 = vmatpush3.bf16.msra.mxu0 %v13160_v40  ;;  %13193 = vmatpush3.bf16.msra.mxu1 %v13192_v41  ;;  %v3257_v40 = vld [vmem:[%s19426_s12 + $0x418] sm:$0xff]  ;;  %v3288_v41 = vld [vmem:[%s19426_s12 + $0x510] sm:$0xff]  ;;  %v3299_v61 = vld [vmem:[%s19426_s12 + $0x568] sm:$0xff] }
 0xb16   : > { %13163 = vmatprep.subr.bf16.mxu0 %v13162_v29  ;;  %13195 = vmatprep.subr.bf16.mxu1 %v13194_v46  ;;  %v3289_v29 = vld [vmem:[%s19426_s12 + $0x518] sm:$0xff]  ;;  %v3274_v46 = vld [vmem:[%s19426_s12 + $0x4a0] sm:$0xff]  ;;  %v13208_v31 = vpack.c.bf16 %v3257_v40, %v3256_v39  ;;  %v13222_v39 = vpack.c.bf16 %v3281_v47, %v3280_v28  ;;  %v3264_v40 = vld [vmem:[%s19426_s12 + $0x450] sm:$0xff] }
 0xb17   : > { %v13240_v52 = vpack.c.bf16 %v3289_v29, %v3288_v41  ;;  %v13210_v54 = vpack.c.bf16 %v3275_v48, %v3274_v46  ;;  %v3265_v41 = vld [vmem:[%s19426_s12 + $0x458] sm:$0xff]  ;;  %v3282_v29 = vld [vmem:[%s19426_s12 + $0x4e0] sm:$0xff]  ;;  %v3283_v46 = vld [vmem:[%s19426_s12 + $0x4e8] sm:$0xff] }
 0xb18   : > { %v3314_v48 = vld [vmem:[%s19426_s12 + $0x5e0] sm:$0xff] }
 0xb19   : > { %v15769_v12 = vpop.f32.mrb[26].mxu0  ;;  %v15771_v13 = vpop.f32.mrb[20].mxu1  ;;  %13165 = vmatpush3.bf16.msra.mxu0 %v13164_v58  ;;  %13197 = vmatpush3.bf16.msra.mxu1 %v13196_v59  ;;  %v3290_v58 = vld [vmem:[%s19426_s12 + $0x520] sm:$0xff]  ;;  %v13242_v59 = vpack.c.bf16 %v3307_v51, %v3306_v50  ;;  %v15930_v50 = vld [vmem:[%s19425_s11 + $0x30] sm:$0x77] }
 0xb1a   : > { %v2894_v19 = vpop.f32.mrb[27].mxu0  ;;  %v2965_v20 = vpop.f32.mrb[21].mxu1  ;;  %13167 = vmatprep.subr.bf16.mxu0 %v13166_v0  ;;  %13199 = vmatprep.subr.bf16.mxu1 %v13198_v4  ;;  %v3309_v0 = vld [vmem:[%s19426_s12 + $0x5b8] sm:$0xff]  ;;  %v13212_v4 = vpack.c.bf16 %v3259_v57, %v3258_v55  ;;  %v13244_v5 = vpack.c.bf16 %v3291_v60, %v3290_v58  ;;  %v13226_v55 = vpack.c.bf16 %v3283_v46, %v3282_v29  ;;  %v3266_v57 = vld [vmem:[%s19426_s12 + $0x460] sm:$0xff]  ;;  %v3267_v58 = vld [vmem:[%s19426_s12 + $0x468] sm:$0xff] }
 0xb1b   : > { %v2895_v24 = vadd.f32 %v2894_v19, %v2514_v8  ;;  %v2966_v26 = vadd.f32 %v2965_v20, %v2522_v11  ;;  %v3261_v8 = vld [vmem:[%s19426_s12 + $0x438] sm:$0xff]  ;;  %v13246_v10 = vpack.c.bf16 %v3309_v0, %v3308_v63  ;;  %v2438_v60 = vrot.slane %v15709_v43, %v14667_v35  ;;  %v3316_v43 = vld [vmem:[%s19426_s12 + $0x5f0] sm:$0xff]  ;;  %v3318_v47 = vld [vmem:[%s19426_s12 + $0x600] sm:$0xff] }
 0xb1c   : > { %v3293_v11 = vld [vmem:[%s19426_s12 + $0x538] sm:$0xff]  ;;  %v13216_v20 = vpack.c.bf16 %v3261_v8, %v3260_v7  ;;  %v2450_v0 = vrot.slane %v15930_v50, %v14691_v42  ;;  %v3320_v46 = vld [vmem:[%s19426_s12 + $0x610] sm:$0xff] }
 0xb1d   : > { %13169 = vmatpush3.bf16.msra.mxu0 %v13168_v14  ;;  %13201 = vmatpush3.bf16.msra.mxu1 %v13200_v15  ;;  %v3119_v44 = vmax.f32 %v2895_v24, 0.0  ;;  %v3121_v49 = vmax.f32 %v2966_v26, 0.0  ;;  %v3278_v14 = vld [vmem:[%s19426_s12 + $0x4c0] sm:$0xff]  ;;  %v3279_v15 = vld [vmem:[%s19426_s12 + $0x4c8] sm:$0xff]  ;;  %v13248_v23 = vpack.c.bf16 %v3293_v11, %v3292_v9  ;;  %v15935_v51 = vld [vmem:[%s19425_s11 + $0x38] sm:$0x77] }
 0xb1e   : > { %13203 = vmatprep.subr.bf16.mxu0 %v13202_v16  ;;  %13235 = vmatprep.subr.bf16.mxu1 %v13234_v21  ;;  %v3310_v16 = vld [vmem:[%s19426_s12 + $0x5c0] sm:$0xff]  ;;  %v13218_v24 = vpack.c.bf16 %v3279_v15, %v3278_v14  ;;  %v3285_v63 = vld [vmem:[%s19426_s12 + $0x4f8] sm:$0xff]  ;;  %v2518_v14 = vrot.slane %v2438_v60, %v14667_v35  ;;  %v3371_v60 = vld [vmem:[%s19426_s12 + $0x7a8] sm:$0xff] }
 0xb1f   : > { %v13250_v26 = vpack.c.bf16 %v3311_v17, %v3310_v16  ;;  %v13230_v9 = vpack.c.bf16 %v3285_v63, %v3284_v62  ;;  %v3269_v11 = vld [vmem:[%s19426_s12 + $0x478] sm:$0xff]  ;;  %v3334_v17 = vld [vmem:[%s19426_s12 + $0x680] sm:$0xff] }
 0xb20   : > { %3591 = vmatmul.mubr.f32.vlgmr.msra.gmra.mrb[32].mxu0 %v3114_v32  ;;  %3661 = vmatmul.mubr.f32.vlgmr.msra.gmra.mrb[26].mxu1 %v3116_v36  ;;  %v3313_v32 = vld [vmem:[%s19426_s12 + $0x5d8] sm:$0xff]  ;;  %v13220_v36 = vpack.c.bf16 %v3263_v3, %v3262_v1  ;;  %v3367_v1 = vld [vmem:[%s19426_s12 + $0x788] sm:$0xff] }
 0xb21   : > { %13205 = vmatpush3.bf16.msra.mxu0 %v13204_v33  ;;  %3730 = vmatprep.mubr.f32.mxu0 %v3119_v44  ;;  %v3312_v33 = vld [vmem:[%s19426_s12 + $0x5d0] sm:$0xff]  ;;  %v3301_v16 = vld [vmem:[%s19426_s12 + $0x578] sm:$0xff] }
 0xb22   : > { %13237 = vmatpush3.bf16.msra.mxu1 %v13236_v37  ;;  %3800 = vmatprep.mubr.f32.mxu1 %v3121_v49  ;;  %v13252_v37 = vpack.c.bf16 %v3295_v27, %v3294_v25  ;;  %v3296_v44 = vld [vmem:[%s19426_s12 + $0x550] sm:$0xff]  ;;  %v3315_v49 = vld [vmem:[%s19426_s12 + $0x5e8] sm:$0xff] }
 0xb23   : > { %13207 = vmatprep.subr.bf16.mxu0 %v13206_v45  ;;  %13239 = vmatprep.subr.bf16.mxu1 %v13238_v30  ;;  %v13254_v45 = vpack.c.bf16 %v3313_v32, %v3312_v33  ;;  %v3297_v30 = vld [vmem:[%s19426_s12 + $0x558] sm:$0xff]  ;;  %v3319_v33 = vld [vmem:[%s19426_s12 + $0x608] sm:$0xff]  ;;  %v2964_v32 = vadd.f32 %v15771_v13, %v2518_v14 }
 0xb24   : > { %v3337_v13 = vld [vmem:[%s19426_s12 + $0x698] sm:$0xff] }
 0xb25   : > { %13209 = vmatpush3.bf16.msra.mxu0 %v13208_v31  ;;  %v13224_v31 = vpack.c.bf16 %v3265_v41, %v3264_v40  ;;  %v3336_v40 = vld [vmem:[%s19426_s12 + $0x690] sm:$0xff] }
 0xb26   : > { %13241 = vmatpush3.bf16.msra.mxu1 %v13240_v52  ;;  %13211 = vmatprep.subr.bf16.mxu0 %v13210_v54  ;;  %v2430_v52 = vrot.slane %v15702_v38, %v14667_v35  ;;  %v13256_v54 = vpack.c.bf16 %v3297_v30, %v3296_v44  ;;  %v13258_v38 = vpack.c.bf16 %v3315_v49, %v3314_v48  ;;  %v3352_v48 = vld [vmem:[%s19426_s12 + $0x710] sm:$0xff]  ;;  %v3120_v49 = vmax.f32 %v2964_v32, 0.0  ;;  %v3358_v32 = vld [vmem:[%s19426_s12 + $0x740] sm:$0xff] }
 0xb27   : > { %13243 = vmatprep.subr.bf16.mxu1 %v13242_v59  ;;  %v3298_v59 = vld [vmem:[%s19426_s12 + $0x560] sm:$0xff]  ;;  %v13268_v44 = vpack.c.bf16 %v3319_v33, %v3318_v47  ;;  %v3327_v33 = vld [vmem:[%s19426_s12 + $0x648] sm:$0xff] }
 0xb28   : > { %v2510_v7 = vrot.slane %v2430_v52, %v14667_v35  ;;  %v13260_v8 = vpack.c.bf16 %v3299_v61, %v3298_v59  ;;  %v3353_v52 = vld [vmem:[%s19426_s12 + $0x718] sm:$0xff]  ;;  %v3370_v59 = vld [vmem:[%s19426_s12 + $0x7a0] sm:$0xff] }
 0xb29   : > { %v15871_v18 = vpop.f32.mrb[28].mxu0  ;;  %v15873_v19 = vpop.f32.mrb[22].mxu1  ;;  %13213 = vmatpush3.bf16.msra.mxu0 %v13212_v4  ;;  %v3317_v4 = vld [vmem:[%s19426_s12 + $0x5f8] sm:$0xff]  ;;  %v13304_v62 = vpack.c.bf16 %v3353_v52, %v3352_v48  ;;  %v3326_v47 = vld [vmem:[%s19426_s12 + $0x640] sm:$0xff]  ;;  %v3379_v52 = vld [vmem:[%s19426_s12 + $0x7e8] sm:$0xff] }
 0xb2a   : > { %13245 = vmatpush3.bf16.msra.mxu1 %v13244_v5  ;;  %v15875_v21 = vpop.f32.mrb[29].mxu0  ;;  %v15877_v22 = vpop.f32.mrb[23].mxu1  ;;  %13215 = vmatprep.subr.bf16.mxu0 %v13214_v6  ;;  %v2458_v5 = vrot.slane %v15935_v51, %v14691_v42  ;;  %v13228_v6 = vpack.c.bf16 %v3267_v58, %v3266_v57  ;;  %v3300_v42 = vld [vmem:[%s19426_s12 + $0x570] sm:$0xff]  ;;  %v13262_v15 = vpack.c.bf16 %v3317_v4, %v3316_v43  ;;  %v3323_v43 = vld [vmem:[%s19426_s12 + $0x628] sm:$0xff]  ;;  %v3354_v4 = vld [vmem:[%s19426_s12 + $0x720] sm:$0xff] }
 0xb2b   : > { %13247 = vmatprep.subr.bf16.mxu1 %v13246_v10  ;;  %v3268_v10 = vld [vmem:[%s19426_s12 + $0x470] sm:$0xff]  ;;  %v13264_v27 = vpack.c.bf16 %v3301_v16, %v3300_v42  ;;  %v3325_v16 = vld [vmem:[%s19426_s12 + $0x638] sm:$0xff]  ;;  %v3346_v48 = vld [vmem:[%s19426_s12 + $0x6e0] sm:$0xff] }
 0xb2c   : > { %v2538_v3 = vrot.slane %v2458_v5, %v14667_v35  ;;  %v13232_v25 = vpack.c.bf16 %v3269_v11, %v3268_v10  ;;  %v13306_v5 = vpack.c.bf16 %v3371_v60, %v3370_v59  ;;  %v3373_v10 = vld [vmem:[%s19426_s12 + $0x7b8] sm:$0xff]  ;;  %v3330_v59 = vld [vmem:[%s19426_s12 + $0x660] sm:$0xff]  ;;  %v3331_v60 = vld [vmem:[%s19426_s12 + $0x668] sm:$0xff] }
 0xb2d   : > { %13217 = vmatpush3.bf16.msra.mxu0 %v13216_v20  ;;  %v3335_v20 = vld [vmem:[%s19426_s12 + $0x688] sm:$0xff] }
 0xb2e   : > { %13249 = vmatpush3.bf16.msra.mxu1 %v13248_v23  ;;  %13219 = vmatprep.subr.bf16.mxu0 %v13218_v24  ;;  %v2530_v23 = vrot.slane %v2450_v0, %v14667_v35  ;;  %v3366_v24 = vld [vmem:[%s19426_s12 + $0x780] sm:$0xff]  ;;  %v13266_v28 = vpack.c.bf16 %v3335_v20, %v3334_v17  ;;  %v3108_v41 = vadd.f32 %v15877_v22, %v2538_v3  ;;  %v3321_v22 = vld [vmem:[%s19426_s12 + $0x618] sm:$0xff]  ;;  %v3356_v17 = vld [vmem:[%s19426_s12 + $0x730] sm:$0xff] }
 0xb2f   : > { %13251 = vmatprep.subr.bf16.mxu1 %v13250_v26  ;;  %v2893_v26 = vadd.f32 %v15769_v12, %v2510_v7  ;;  %v3350_v12 = vld [vmem:[%s19426_s12 + $0x700] sm:$0xff]  ;;  %v13272_v61 = vpack.c.bf16 %v3321_v22, %v3320_v46  ;;  %v3340_v7 = vld [vmem:[%s19426_s12 + $0x6b0] sm:$0xff]  ;;  %v3361_v22 = vld [vmem:[%s19426_s12 + $0x758] sm:$0xff] }
 0xb30   : > { %v3322_v0 = vld [vmem:[%s19426_s12 + $0x620] sm:$0xff] }
 0xb31   : > { %13221 = vmatpush3.bf16.msra.mxu0 %v13220_v36  ;;  %v13298_v36 = vpack.c.bf16 %v3367_v1, %v3366_v24  ;;  %v3118_v30 = vmax.f32 %v2893_v26, 0.0  ;;  %v13276_v11 = vpack.c.bf16 %v3323_v43, %v3322_v0  ;;  %v3342_v24 = vld [vmem:[%s19426_s12 + $0x6c0] sm:$0xff]  ;;  %v3343_v1 = vld [vmem:[%s19426_s12 + $0x6c8] sm:$0xff]  ;;  %v3349_v0 = vld [vmem:[%s19426_s12 + $0x6f8] sm:$0xff] }
 0xb32   : > { %13253 = vmatpush3.bf16.msra.mxu1 %v13252_v37  ;;  %13223 = vmatprep.subr.bf16.mxu0 %v13222_v39  ;;  %v3351_v37 = vld [vmem:[%s19426_s12 + $0x708] sm:$0xff]  ;;  %v3037_v39 = vadd.f32 %v15875_v21, %v2530_v23  ;;  %v3369_v21 = vld [vmem:[%s19426_s12 + $0x798] sm:$0xff]  ;;  %v3374_v3 = vld [vmem:[%s19426_s12 + $0x7c0] sm:$0xff] }
 0xb33   : > { %13255 = vmatprep.subr.bf16.mxu1 %v13254_v45  ;;  %v3368_v45 = vld [vmem:[%s19426_s12 + $0x790] sm:$0xff]  ;;  %v13300_v29 = vpack.c.bf16 %v3351_v37, %v3350_v12  ;;  %v3357_v23 = vld [vmem:[%s19426_s12 + $0x738] sm:$0xff]  ;;  %v3359_v12 = vld [vmem:[%s19426_s12 + $0x748] sm:$0xff] }
 0xb34   : > { %v3123_v57 = vmax.f32 %v3037_v39, 0.0  ;;  %v13302_v58 = vpack.c.bf16 %v3369_v21, %v3368_v45  ;;  %v3344_v37 = vld [vmem:[%s19426_s12 + $0x6d0] sm:$0xff]  ;;  %v3345_v39 = vld [vmem:[%s19426_s12 + $0x6d8] sm:$0xff] }
 0xb35   : > { %13225 = vmatpush3.bf16.msra.mxu0 %v13224_v31  ;;  %v13270_v31 = vpack.c.bf16 %v3337_v13, %v3336_v40  ;;  %v3376_v40 = vld [vmem:[%s19426_s12 + $0x7d0] sm:$0xff]  ;;  %v3377_v13 = vld [vmem:[%s19426_s12 + $0x7d8] sm:$0xff]  ;;  %v13286_v45 = vpack.c.bf16 %v3345_v39, %v3344_v37 }
 0xb36   : > { %13257 = vmatpush3.bf16.msra.mxu1 %v13256_v54  ;;  %13227 = vmatprep.subr.bf16.mxu0 %v13226_v55  ;;  %v3338_v54 = vld [vmem:[%s19426_s12 + $0x6a0] sm:$0xff]  ;;  %v3339_v55 = vld [vmem:[%s19426_s12 + $0x6a8] sm:$0xff]  ;;  %v3328_v21 = vld [vmem:[%s19426_s12 + $0x650] sm:$0xff]  ;;  %v13318_v46 = vpack.c.bf16 %v3377_v13, %v3376_v40 }
 0xb37   : > { %13259 = vmatprep.subr.bf16.mxu1 %v13258_v38  ;;  %v3125_v38 = vmax.f32 %v3108_v41, 0.0  ;;  %v13274_v63 = vpack.c.bf16 %v3339_v55, %v3338_v54  ;;  %v13284_v41 = vpack.c.bf16 %v3327_v33, %v3326_v47  ;;  %v2446_v55 = vrot.slane %v15930_v50, %v14667_v35  ;;  %v3380_v43 = vld [vmem:[%s19426_s12 + $0x7f0] sm:$0xff] }
 0xb39   : > { %13229 = vmatpush3.bf16.msra.mxu0 %v13228_v6  ;;  %v3355_v6 = vld [vmem:[%s19426_s12 + $0x728] sm:$0xff] }
 0xb3a   : > { %13261 = vmatpush3.bf16.msra.mxu1 %v13260_v8  ;;  %13231 = vmatprep.subr.bf16.mxu0 %v13230_v9  ;;  %v3341_v8 = vld [vmem:[%s19426_s12 + $0x6b8] sm:$0xff]  ;;  %v3372_v9 = vld [vmem:[%s19426_s12 + $0x7b0] sm:$0xff]  ;;  %v13308_v42 = vpack.c.bf16 %v3355_v6, %v3354_v4  ;;  %v13292_v4 = vpack.c.bf16 %v3331_v60, %v3330_v59 }
 0xb3b   : > { %13263 = vmatprep.subr.bf16.mxu1 %v13262_v15  ;;  %v13278_v14 = vpack.c.bf16 %v3341_v8, %v3340_v7  ;;  %v3324_v15 = vld [vmem:[%s19426_s12 + $0x630] sm:$0xff]  ;;  %v13310_v20 = vpack.c.bf16 %v3373_v10, %v3372_v9  ;;  %v3333_v9 = vld [vmem:[%s19426_s12 + $0x678] sm:$0xff] }
 0xb3c   : > { %v13280_v26 = vpack.c.bf16 %v3325_v16, %v3324_v15  ;;  %v3332_v8 = vld [vmem:[%s19426_s12 + $0x670] sm:$0xff] }
 0xb3d   : > { %13233 = vmatpush3.bf16.msra.mxu0 %v13232_v25  ;;  %v3375_v25 = vld [vmem:[%s19426_s12 + $0x7c8] sm:$0xff]  ;;  %v13296_v15 = vpack.c.bf16 %v3333_v9, %v3332_v8  ;;  %v10742_v8 = vld [vmem:[%s19418_s4 + $0xb8] sm:$0xff] }
 0xb3e   : > { %13265 = vmatpush3.bf16.msra.mxu1 %v13264_v27  ;;  %13267 = vmatprep.subr.bf16.mxu0 %v13266_v28  ;;  %v13312_v27 = vpack.c.bf16 %v3357_v23, %v3356_v17  ;;  %v13282_v28 = vpack.c.bf16 %v3343_v1, %v3342_v24 }
 0xb3f   : > { %13299 = vmatprep.subr.bf16.mxu1 %v13298_v36  ;;  %v13314_v36 = vpack.c.bf16 %v3375_v25, %v3374_v3 }
 0xb40   : > { %3731 = vmatmul.mubr.f32.vlgmr.msra.gmra.mrb[34].mxu0 %v3118_v30  ;;  %v3329_v30 = vld [vmem:[%s19426_s12 + $0x658] sm:$0xff] }
 0xb41   : > { %3801 = vmatmul.mubr.f32.vlgmr.msra.gmra.mrb[28].mxu1 %v3120_v49  ;;  %13269 = vmatpush3.bf16.msra.mxu0 %v13268_v44  ;;  %v13316_v44 = vpack.c.bf16 %v3359_v12, %v3358_v32  ;;  %v3347_v49 = vld [vmem:[%s19426_s12 + $0x6e8] sm:$0xff]  ;;  %v13288_v54 = vpack.c.bf16 %v3329_v30, %v3328_v21 }
 0xb42   : > { %3870 = vmatprep.mubr.f32.mxu0 %v3123_v57  ;;  %13301 = vmatpush3.bf16.msra.mxu1 %v13300_v29  ;;  %v3360_v29 = vld [vmem:[%s19426_s12 + $0x750] sm:$0xff] }
 0xb43   : > { %3940 = vmatprep.mubr.f32.mxu1 %v3125_v38  ;;  %13271 = vmatprep.subr.bf16.mxu0 %v13270_v31  ;;  %v3378_v31 = vld [vmem:[%s19426_s12 + $0x7e0] sm:$0xff]  ;;  %v13320_v57 = vpack.c.bf16 %v3361_v22, %v3360_v29 }
 0xb44   : > { %13303 = vmatprep.subr.bf16.mxu1 %v13302_v58  ;;  %v13290_v58 = vpack.c.bf16 %v3347_v49, %v3346_v48  ;;  %v3362_v38 = vld [vmem:[%s19426_s12 + $0x760] sm:$0xff]  ;;  %v13322_v50 = vpack.c.bf16 %v3379_v52, %v3378_v31 }
 0xb45   : > { %13273 = vmatpush3.bf16.msra.mxu0 %v13272_v61  ;;  %v2454_v61 = vrot.slane %v15935_v51, %v14667_v35  ;;  %v3381_v51 = vld [vmem:[%s19426_s12 + $0x7f8] sm:$0xff] }
 0xb46   : > { %13305 = vmatpush3.bf16.msra.mxu1 %v13304_v62  ;;  %13275 = vmatprep.subr.bf16.mxu0 %v13274_v63  ;;  %v3363_v62 = vld [vmem:[%s19426_s12 + $0x768] sm:$0xff]  ;;  %v3348_v63 = vld [vmem:[%s19426_s12 + $0x6f0] sm:$0xff] }
 0xb47   : > { %13307 = vmatprep.subr.bf16.mxu1 %v13306_v5  ;;  %v2526_v5 = vrot.slane %v2446_v55, %v14667_v35  ;;  %v13324_v6 = vpack.c.bf16 %v3363_v62, %v3362_v38  ;;  %v13294_v7 = vpack.c.bf16 %v3349_v0, %v3348_v63  ;;  %v2534_v10 = vrot.slane %v2454_v61, %v14667_v35 }
 0xb49   : > { %13277 = vmatpush3.bf16.msra.mxu0 %v13276_v11  ;;  %v13326_v11 = vpack.c.bf16 %v3381_v51, %v3380_v43  ;;  %v3035_v16 = vadd.f32 %v15871_v18, %v2526_v5  ;;  %v584_v18 = vld [vmem:[%s19427_s13] sm:$0x7]  ;;  %v10736_v43 = vld [vmem:[%s19418_s4 + $0x88] sm:$0xff]  ;;  %v10738_v51 = vld [vmem:[%s19418_s4 + $0x98] sm:$0xff] }
 0xb4a   : > { %13309 = vmatpush3.bf16.msra.mxu1 %v13308_v42  ;;  %13279 = vmatprep.subr.bf16.mxu0 %v13278_v14  ;;  %v3364_v42 = vld [vmem:[%s19426_s12 + $0x770] sm:$0xff]  ;;  %v3365_v14 = vld [vmem:[%s19426_s12 + $0x778] sm:$0xff]  ;;  %v3385_v3 = vrot.slane %v584_v18, %v14667_v35 }
 0xb4b   : > { %13311 = vmatprep.subr.bf16.mxu1 %v13310_v20  ;;  %v13328_v17 = vpack.c.bf16 %v3365_v14, %v3364_v42  ;;  %v3106_v20 = vadd.f32 %v15873_v19, %v2534_v10  ;;  %v3122_v23 = vmax.f32 %v3035_v16, 0.0  ;;  %v10737_v5 = vld [vmem:[%s19418_s4 + $0x90] sm:$0xff]  ;;  %v10739_v10 = vld [vmem:[%s19418_s4 + $0xa0] sm:$0xff]  ;;  %v10744_v14 = vld [vmem:[%s19418_s4 + $0xc8] sm:$0xff] }
 0xb4c   : > { %v10750_v18 = vld [vmem:[%s19418_s4 + $0xf8] sm:$0xff] }
 0xb4d   : > { %13281 = vmatpush3.bf16.msra.mxu0 %v13280_v26  ;;  %v3124_v24 = vmax.f32 %v3106_v20, 0.0  ;;  %v10745_v20 = vld [vmem:[%s19418_s4 + $0xd0] sm:$0xff] }
 0xb4e   : > { %13313 = vmatpush3.bf16.msra.mxu1 %v13312_v27  ;;  %13283 = vmatprep.subr.bf16.mxu0 %v13282_v28 }
 0xb4f   : > { %13315 = vmatprep.subr.bf16.mxu1 %v13314_v36 }
 0xb51   : > { %13285 = vmatpush3.bf16.msra.mxu0 %v13284_v41 }
 0xb52   : > { %13317 = vmatpush3.bf16.msra.mxu1 %v13316_v44  ;;  %13287 = vmatprep.subr.bf16.mxu0 %v13286_v45 }
 0xb53   : > { %13319 = vmatprep.subr.bf16.mxu1 %v13318_v46 }
 0xb55   : > { %13289 = vmatpush3.bf16.msra.mxu0 %v13288_v54 }
 0xb56   : > { %13321 = vmatpush3.bf16.msra.mxu1 %v13320_v57  ;;  %13291 = vmatprep.subr.bf16.mxu0 %v13290_v58 }
 0xb57   : > { %13323 = vmatprep.subr.bf16.mxu1 %v13322_v50 }
 0xb59   : > { %13293 = vmatpush3.bf16.msra.mxu0 %v13292_v4  ;;  %v13330_v4 = vpack.c.bf16 %v10738_v51, %v10736_v43 }
 0xb5a   : > { %13325 = vmatpush3.bf16.msra.mxu1 %v13324_v6  ;;  %13295 = vmatprep.subr.bf16.mxu0 %v13294_v7  ;;  %v10740_v7 = vld [vmem:[%s19418_s4 + $0xa8] sm:$0xff] }
 0xb5b   : > { %13327 = vmatprep.subr.bf16.mxu1 %v13326_v11  ;;  %v13334_v9 = vpack.c.bf16 %v10742_v8, %v10740_v7  ;;  %v10741_v11 = vld [vmem:[%s19418_s4 + $0xb0] sm:$0xff] }
 0xb5c   : > { %v13336_v42 = vpack.c.bf16 %v10741_v11, %v10739_v10 }
 0xb5d   : > { %13297 = vmatpush3.bf16.msra.mxu0 %v13296_v15  ;;  %v10746_v15 = vld [vmem:[%s19418_s4 + $0xd8] sm:$0xff] }
 0xb5e   : > { %13329 = vmatpush3.bf16.msra.mxu1 %v13328_v17  ;;  %13331 = vmatprep.subr.bf16.mxu0 %v13330_v4  ;;  %v13338_v16 = vpack.c.bf16 %v10746_v15, %v10744_v14  ;;  %v10743_v17 = vld [vmem:[%s19418_s4 + $0xc0] sm:$0xff] }
 0xb5f   : > { %12701 = vmatprep.subr.mxu1 %v14425_v2 }
 0xb60   : > { %3871 = vmatmul.mubr.f32.vlgmr.msra.gmra.mrb[36].mxu0 %v3122_v23  ;;  %v13340_v23 = vpack.c.bf16 %v10745_v20, %v10743_v17 }
 0xb61   : > { %3941 = vmatmul.mubr.f32.vlgmr.msra.gmra.mrb[30].mxu1 %v3124_v24  ;;  %4072 = vmatprep.mubr.f32.mxu0 %v14425_v2  ;;  %v10748_v24 = vld [vmem:[%s19418_s4 + $0xe8] sm:$0xff] }
 0xb62   : > { %12703 = vmatprep.mubr.msk.f32.mxu1 %vm14426_vm0, %v14425_v2 }
 0xbd3   : > { %v11698_v1 = vpop.f32.mrb[30].mxu0  ;;  %v11733_v19 = vpop.f32.mrb[24].mxu1 }
 0xbd4   : > { %v11699_v25 = vpop.f32.mrb[31].mxu0  ;;  %v11734_v26 = vpop.f32.mrb[25].mxu1 }
 0xbd5   : > { %v11700_v27 = vadd.f32 %v11699_v25, %v11698_v1  ;;  %v11735_v28 = vadd.f32 %v11734_v26, %v11733_v19  ;;  %v10747_v1 = vld [vmem:[%s19418_s4 + $0xe0] sm:$0xff]  ;;  %v13342_v19 = vpack.c.bf16 %v10750_v18, %v10748_v24 }
 0xbd7   : > { %v3453_v47 = vadd.f32 %v11700_v27, %v3385_v3  ;;  %v10749_v3 = vld [vmem:[%s19418_s4 + $0xf0] sm:$0xff] }
 0xbd8   : > { %v13344_v25 = vpack.c.bf16 %v10749_v3, %v10747_v1 }
 0xbd9   : > { %v3523_v33 = vadd.f32 %v11735_v28, %v3453_v47  ;;  %v574_v47 = vld [vmem:[%s19428_s14] sm:$0x7] }
 0xbf3   : > { %v11768_v32 = vpop.f32.mrb[32].mxu0  ;;  %v11803_v36 = vpop.f32.mrb[26].mxu1 }
 0xbf4   : > { %v11769_v12 = vpop.f32.mrb[33].mxu0  ;;  %v11804_v37 = vpop.f32.mrb[27].mxu1 }
 0xbf5   : > { %v11770_v39 = vadd.f32 %v11769_v12, %v11768_v32  ;;  %v11805_v40 = vadd.f32 %v11804_v37, %v11803_v36  ;;  %v3963_v32 = vrot.slane %v574_v47, %v14667_v35 }
 0xbf7   : > { %v3593_v13 = vadd.f32 %v11770_v39, %v3523_v33  ;;  %v575_v33 = vld [vmem:[%s19429_s15] sm:$0x7] }
 0xbf8   : > { %v3968_v37 = vrot.slane %v575_v33, %v14667_v35 }
 0xbf9   : > { %v3663_v41 = vadd.f32 %v11805_v40, %v3593_v13  ;;  %v16264_v13 = vsub.s32 1, %v14664_v34 }
 0xc13   : > { %v11838_v44 = vpop.f32.mrb[34].mxu0 }
 0xc14   : > { %v11873_v45 = vpop.f32.mrb[28].mxu1  ;;  %v11839_v21 = vpop.f32.mrb[35].mxu0 }
 0xc15   : > { %v11840_v30 = vadd.f32 %v11839_v21, %v11838_v44  ;;  %v11874_v29 = vpop.f32.mrb[29].mxu1  ;;  %v14331_v44 = vld [vmem:[%s19419_s5] sm:$0x77] }
 0xc16   : > { %v11875_v46 = vadd.f32 %v11874_v29, %v11873_v45  ;;  %v3990_v35 = vrot.slane %v14331_v44, %v16264_v13 }
 0xc17   : > { %v3733_v22 = vadd.f32 %v11840_v30, %v3663_v41  ;;  %v16267_v41 = vsub.s32 5, %v14664_v34 }
 0xc18   : > { %v4000_v21 = vrot.slane %v3990_v35, %v16264_v13 }
 0xc19   : > { %v3803_v48 = vadd.f32 %v11875_v46, %v3733_v22  ;;  %v3994_v45 = vrot.slane %v14331_v44, %v16267_v41 }
 0xc1b   : > { %v4004_v30 = vrot.slane %v3994_v45, %v16264_v13 }
 0xc33   : > { %v11908_v49 = vpop.f32.mrb[36].mxu0 }
 0xc34   : > { %v11943_v31 = vpop.f32.mrb[30].mxu1  ;;  %v11909_v52 = vpop.f32.mrb[37].mxu0 }
 0xc35   : > { %v11910_v54 = vadd.f32 %v11909_v52, %v11908_v49  ;;  %v11944_v55 = vpop.f32.mrb[31].mxu1 }
 0xc36   : > { %v11945_v57 = vadd.f32 %v11944_v55, %v11943_v31 }
 0xc37   : > { %v3873_v58 = vadd.f32 %v11910_v54, %v3803_v48 }
 0xc39   : > { %v3943_v59 = vadd.f32 %v11945_v57, %v3873_v58 }
 0xc3b   : > { %v3946_v60 = vadd.f32 %v3943_v59, %v15047_v53  ;;  %v10735_v53 = vld [vmem:[%s19418_s4 + $0x80] sm:$0xff] }
 0xc3c   : > { %v13332_v6 = vpack.c.bf16 %v10737_v5, %v10735_v53 }
 0xc3d   : > { %v3947_v38 = vsel %vm705_vm2, %v3946_v60, 0.0 }
 0xc3e   : > { %3948 = vadd.xlane.f32.xlu0 %v3947_v38  ;;  %13333 = vmatpush1.bf16.msra.mxu0 %v13332_v6 }
 0xc3f   : > { %13335 = vmatprep.subr.bf16.mxu0 %v13334_v9 }
 0xc42   : > { %13337 = vmatpush1.bf16.msra.mxu0 %v13336_v42 }
 0xc43   : > { %13339 = vmatprep.subr.bf16.mxu0 %v13338_v16 }
 0xc46   : > { %13341 = vmatpush1.bf16.msra.mxu0 %v13340_v23 }
 0xc47   : > { %13343 = vmatprep.subr.bf16.mxu0 %v13342_v19 }
 0xc4a   : > { %13345 = vmatpush1.bf16.msra.mxu0 %v13344_v25 }
 0xc4b   : > { %12706 = vmatprep.subr.mxu0 %v14425_v2 }
 0xccb   : > { %v3949_v61 = vpop.xlane.xlu0 %3948 }
 0xccc   : > { %v3950_v50 = vmul.f32 0.015625, %v3949_v61 }
 0xcce   : > { %v3951_v62 = vsub.f32 %v3946_v60, %v3950_v50 }
 0xcd0   : > { %v3952_v63 = vmul.f32 %v3951_v62, %v3951_v62 }
 0xcd2   : > { %v3953_v0 = vsel %vm705_vm2, %v3952_v63, 0.0 }
 0xcd3   : > { %3954 = vadd.xlane.f32.xlu1 %v3953_v0 }
 0xd60   : > { %v3955_v26 = vpop.xlane.xlu1 %3954 }
 0xd61   : > { %v3956_v27 = vmul.f32 0.015625, %v3955_v26 }
 0xd63   : > { %v3957_v28 = vadd.f32 1e-05, %v3956_v27 }
 0xd65   : > { %14257 = vrsqrt.f32 %v3957_v28 }
 0xd6f   : > { %v14258_v36 = vpop.eup %14257 }
 0xd70   : > { %v3959_v12 = vmul.f32 %v14258_v36, %v3951_v62 }
 0xd72   : > { %v3964_v39 = vmul.f32 %v3963_v32, %v3959_v12 }
 0xd74   : > { %v16257_v40 = vadd.f32 %v3968_v37, %v3964_v39 }
 0xd76   : > { %10751 = vmatmul.mubr.msk.f32.vlgmr.msra.gmra.mrb[38].mxu0 %vm705_vm2, %v16257_v40 }
 0xd77   : > { %12708 = vmatprep.mubr.msk.f32.mxu0 %vm14426_vm0, %v14425_v2 }
 0xe49   : > { %v4074_v29 = vpop.f32.mrb[38].mxu0 }
 0xe4a   : > { %v4075_v46 = vadd.f32 %v4074_v29, %v4000_v21  ;;  %v4076_v22 = vpop.f32.mrb[39].mxu0 }
 0xe4b   : > { %v16276_v48 = vadd.f32 %v4076_v22, %v4004_v30 }
 0xe4c   : > { %4244 = vrot.lane.b32.xlu1 %v4075_v46, %s19508_s21  ;;  %4080 = vrot.lane.b32.xlu0 %v4075_v46, %s19511_s3 }
 0xe4d   : > { %12707 = vmatpush3.msra.mxu0 %v16276_v48 }
 0xe4e   : > { %12716 = vmatprep.subr.mxu0 %v14425_v2 }
 0xe50   : > { %4242 = vrot.lane.b32.xlu1 %v4075_v46, %s19512_s24  ;;  %4416 = vrot.lane.b32.xlu0 %v4075_v46, %s19507_s20 }
 0xe54   : > { %4414 = vrot.lane.b32.xlu1 %v4075_v46, %s19513_s18  ;;  %4587 = vrot.lane.b32.xlu0 %v4075_v46, %s19514_s1 }
 0xe58   : > { %4585 = vrot.lane.b32.xlu1 %v4075_v46, %s19515_s19  ;;  %4758 = vrot.lane.b32.xlu0 %v4075_v46, %s19516_s22 }
 0xe5c   : > { %4756 = vrot.lane.b32.xlu1 %v4075_v46, %s19517_s25  ;;  %4929 = vrot.lane.b32.xlu0 %v4075_v46, %s19518_s26 }
 0xe60   : > { %4927 = vrot.lane.b32.xlu1 %v4075_v46, %s19519_s30  ;;  %5100 = vrot.lane.b32.xlu0 %v4075_v46, %s19520_s27 }
 0xe64   : > { %5098 = vrot.lane.b32.xlu1 %v4075_v46, %s19521_s23  ;;  %5271 = vrot.lane.b32.xlu0 %v4075_v46, %s19522_s29 }
 0xe68   : > { %5269 = vrot.lane.b32.xlu1 %v4075_v46, %s19523_s17 }
 0xe6c   : > { %4333 = vrot.lane.b32.xlu1 %v16276_v48, %s19512_s24 }
 0xebe   : > { %v4245_v49 = vpop.permute.xlu1 %4244  ;;  %v4081_v31 = vpop.permute.xlu0 %4080 }
 0xebf   : > { %12702 = vmatpush3.xpose.msk.msra.mxu1 %vm594_vm1, %v4081_v31 }
 0xec0   : > { %12711 = vmatprep.subr.mxu1 %v14425_v2 }
 0xec2   : > { %v4243_v52 = vpop.permute.xlu1 %4242  ;;  %12704 = vmatmul.mubr.msk.f32.vlgmr.msra.gmra.mrb[32].mxu1 %vm594_vm1, %v4075_v46  ;;  %v4417_v54 = vpop.permute.xlu0 %4416 }
 0xec3   : > { %12712 = vmatpush3.xpose.msk.msra.mxu1 %vm594_vm1, %v4245_v49  ;;  %12713 = vmatprep.mubr.msk.f32.mxu1 %vm14426_vm0, %v14425_v2 }
 0xec4   : > { %12721 = vmatprep.subr.mxu1 %v14425_v2 }
 0xec6   : > { %v4415_v55 = vpop.permute.xlu1 %4414  ;;  %12714 = vmatmul.mubr.msk.f32.vlgmr.msra.gmra.mrb[34].mxu1 %vm594_vm1, %v4243_v52  ;;  %v4588_v57 = vpop.permute.xlu0 %4587 }
 0xec7   : > { %12722 = vmatpush3.xpose.msk.msra.mxu1 %vm594_vm1, %v4417_v54  ;;  %12723 = vmatprep.mubr.msk.f32.mxu1 %vm14426_vm0, %v14425_v2 }
 0xec8   : > { %12731 = vmatprep.subr.mxu1 %v14425_v2 }
 0xeca   : > { %v4586_v58 = vpop.permute.xlu1 %4585  ;;  %12724 = vmatmul.mubr.msk.f32.vlgmr.msra.gmra.mrb[36].mxu1 %vm594_vm1, %v4415_v55  ;;  %v4759_v59 = vpop.permute.xlu0 %4758 }
 0xecb   : > { %12732 = vmatpush3.xpose.msk.msra.mxu1 %vm594_vm1, %v4588_v57  ;;  %12733 = vmatprep.mubr.msk.f32.mxu1 %vm14426_vm0, %v14425_v2 }
 0xecc   : > { %12741 = vmatprep.subr.mxu1 %v14425_v2 }
 0xece   : > { %v4757_v60 = vpop.permute.xlu1 %4756  ;;  %12734 = vmatmul.mubr.msk.f32.vlgmr.msra.gmra.mrb[38].mxu1 %vm594_vm1, %v4586_v58  ;;  %v4930_v38 = vpop.permute.xlu0 %4929 }
 0xecf   : > { %12742 = vmatpush3.xpose.msk.msra.mxu1 %vm594_vm1, %v4759_v59  ;;  %12743 = vmatprep.mubr.msk.f32.mxu1 %vm14426_vm0, %v14425_v2 }
 0xed0   : > { %12751 = vmatprep.subr.mxu1 %v14425_v2 }
 0xed2   : > { %v4928_v61 = vpop.permute.xlu1 %4927  ;;  %12744 = vmatmul.mubr.msk.f32.vlgmr.msra.gmra.mrb[40].mxu1 %vm594_vm1, %v4757_v60  ;;  %v5101_v50 = vpop.permute.xlu0 %5100 }
 0xed3   : > { %12752 = vmatpush3.xpose.msk.msra.mxu1 %vm594_vm1, %v4930_v38  ;;  %12753 = vmatprep.mubr.msk.f32.mxu1 %vm14426_vm0, %v14425_v2 }
 0xed4   : > { %12761 = vmatprep.subr.mxu1 %v14425_v2 }
 0xed6   : > { %12754 = vmatmul.mubr.msk.f32.vlgmr.msra.gmra.mrb[42].mxu1 %vm594_vm1, %v4928_v61  ;;  %v5099_v62 = vpop.permute.xlu1 %5098  ;;  %v5272_v63 = vpop.permute.xlu0 %5271 }
 0xed7   : > { %12762 = vmatpush3.xpose.msk.msra.mxu1 %vm594_vm1, %v5101_v50  ;;  %12763 = vmatprep.mubr.msk.f32.mxu1 %vm14426_vm0, %v14425_v2 }
 0xed8   : > { %12771 = vmatprep.subr.mxu1 %v14425_v2 }
 0xeda   : > { %12764 = vmatmul.mubr.msk.f32.vlgmr.msra.gmra.mrb[44].mxu1 %vm594_vm1, %v5099_v62  ;;  %v5270_v0 = vpop.permute.xlu1 %5269 }
 0xedb   : > { %12772 = vmatpush3.xpose.msk.msra.mxu1 %vm594_vm1, %v5272_v63  ;;  %12773 = vmatprep.mubr.msk.f32.mxu1 %vm14426_vm0, %v14425_v2 }
 0xedc   : > { %13346 = vmatprep.subr.bf16.mxu1 %v14442_v56 }
 0xede   : > { %12774 = vmatmul.mubr.msk.f32.vlgmr.msra.gmra.mrb[46].mxu1 %vm594_vm1, %v5270_v0  ;;  %v16349_v37 = vpop.permute.xlu1 %4333 }
 0xedf   : > { %12797 = vmatprep.mubr.msk.f32.mxu1 %vm14426_vm0, %v14425_v2 }
 0xf95   : > { %v4152_v43 = vpop.f32.mrb[32].mxu1 }
 0xf96   : > { %v4156_v51 = vmul.f32 0.35355338, %v4152_v43  ;;  %v12705_v4 = vpop.f32.mrb[33].mxu1 }
 0xf98   : > { %v4157_v53 = vsel %vm594_vm1, %v4156_v51, -inf }
 0xf99   : > { %4158 = vmax.xlane.f32.xlu0 %v4157_v53  ;;  %v4316_v5 = vpop.f32.mrb[34].mxu1 }
 0xf9a   : > { %v4320_v6 = vmul.f32 0.35355338, %v4316_v5  ;;  %v12715_v7 = vpop.f32.mrb[35].mxu1 }
 0xf9c   : > { %v4321_v8 = vsel %vm594_vm1, %v4320_v6, -inf }
 0xf9d   : > { %4322 = vmax.xlane.f32.xlu1 %v4321_v8  ;;  %v4488_v9 = vpop.f32.mrb[36].mxu1 }
 0xf9e   : > { %v4492_v10 = vmul.f32 0.35355338, %v4488_v9  ;;  %v12725_v11 = vpop.f32.mrb[37].mxu1 }
 0xfa0   : > { %v4493_v42 = vsel %vm594_vm1, %v4492_v10, -inf }
 0xfa1   : > { %4494 = vmax.xlane.f32.xlu0 %v4493_v42  ;;  %v4659_v14 = vpop.f32.mrb[38].mxu1 }
 0xfa2   : > { %v4663_v15 = vmul.f32 0.35355338, %v4659_v14  ;;  %v12735_v16 = vpop.f32.mrb[39].mxu1 }
 0xfa4   : > { %v4664_v17 = vsel %vm594_vm1, %v4663_v15, -inf }
 0xfa5   : > { %4665 = vmax.xlane.f32.xlu0 %v4664_v17  ;;  %v4830_v20 = vpop.f32.mrb[40].mxu1 }
 0xfa6   : > { %v4834_v23 = vmul.f32 0.35355338, %v4830_v20  ;;  %v12745_v24 = vpop.f32.mrb[41].mxu1 }
 0xfa8   : > { %v4835_v18 = vsel %vm594_vm1, %v4834_v23, -inf }
 0xfa9   : > { %4836 = vmax.xlane.f32.xlu1 %v4835_v18  ;;  %v5001_v1 = vpop.f32.mrb[42].mxu1 }
 0xfaa   : > { %v5005_v19 = vmul.f32 0.35355338, %v5001_v1  ;;  %v12755_v3 = vpop.f32.mrb[43].mxu1 }
 0xfac   : > { %v5006_v25 = vsel %vm594_vm1, %v5005_v19, -inf }
 0xfad   : > { %5007 = vmax.xlane.f32.xlu0 %v5006_v25  ;;  %v5172_v26 = vpop.f32.mrb[44].mxu1 }
 0xfae   : > { %v5176_v27 = vmul.f32 0.35355338, %v5172_v26  ;;  %v12765_v28 = vpop.f32.mrb[45].mxu1 }
 0xfb0   : > { %v5177_v47 = vsel %vm594_vm1, %v5176_v27, -inf }
 0xfb1   : > { %5178 = vmax.xlane.f32.xlu1 %v5177_v47  ;;  %v5343_v33 = vpop.f32.mrb[46].mxu1 }
 0xfb2   : > { %v5347_v32 = vmul.f32 0.35355338, %v5343_v33  ;;  %v12775_v36 = vpop.f32.mrb[47].mxu1 }
 0xfb4   : > { %v5348_v12 = vsel %vm594_vm1, %v5347_v32, -inf }
 0xfb5   : > { %5349 = vmax.xlane.f32.xlu0 %v5348_v12 }
 0xfc2   : > { %4675 = vrot.lane.b32.xlu1 %v16276_v48, %s19515_s19 }
 0xfcb   : > { %4504 = vrot.lane.b32.xlu0 %v16276_v48, %s19513_s18 }
0x1026   : > { %v4159_v39 = vpop.xlane.xlu0 %4158 }
0x1027   : > { %v4160_v44 = vsub.f32 %v4156_v51, %v4159_v39 }
0x1029   : > { %v4161_v35 = vmul.f32 1.442695, %v4160_v44 }
0x102a   : > { %v4323_v45 = vpop.xlane.xlu1 %4322 }
0x102b   : > { %14259 = vpow2.f32 %v4161_v35  ;;  %v4324_v21 = vsub.f32 %v4320_v6, %v4323_v45 }
0x102d   : > { %v4325_v30 = vmul.f32 1.442695, %v4324_v21 }
0x102e   : > { %v4495_v29 = vpop.xlane.xlu0 %4494 }
0x102f   : > { %14261 = vpow2.f32 %v4325_v30  ;;  %v4496_v59 = vsub.f32 %v4492_v10, %v4495_v29 }
0x1031   : > { %v4497_v38 = vmul.f32 1.442695, %v4496_v59 }
0x1032   : > { %v4666_v46 = vpop.xlane.xlu0 %4665 }
0x1033   : > { %v4667_v22 = vsub.f32 %v4663_v15, %v4666_v46 }
0x1035   : > { %v14260_v49 = vpop.eup %14259  ;;  %v4668_v31 = vmul.f32 1.442695, %v4667_v22 }
0x1036   : > { %v4163_v52 = vsel %vm594_vm1, %v14260_v49, 0.0  ;;  %v4837_v60 = vpop.xlane.xlu1 %4836 }
0x1037   : > { %14263 = vpow2.f32 %v4668_v31  ;;  %4164 = vadd.xlane.f32.xlu1 %v4163_v52  ;;  %v4838_v61 = vsub.f32 %v4834_v23, %v4837_v60  ;;  %v10776_v60 = vld [vmem:[%s19506_s6 + $0x40] sm:$0xff] }
0x1038   : > { %14265 = vpow2.f32 %v4497_v38  ;;  %v10777_v38 = vld [vmem:[%s19506_s6 + $0x48] sm:$0xff] }
0x1039   : > { %v14262_v54 = vpop.eup %14261  ;;  %v4839_v62 = vmul.f32 1.442695, %v4838_v61 }
0x103a   : > { %v4327_v55 = vsel %vm594_vm1, %v14262_v54, 0.0  ;;  %v5008_v0 = vpop.xlane.xlu0 %5007 }
0x103b   : > { %4328 = vadd.xlane.f32.xlu0 %v4327_v55  ;;  %14267 = vpow2.f32 %v4839_v62  ;;  %v5009_v43 = vsub.f32 %v5005_v19, %v5008_v0  ;;  %v10779_v0 = vld [vmem:[%s19506_s6 + $0x58] sm:$0xff] }
0x103d   : > { %v5010_v53 = vmul.f32 1.442695, %v5009_v43 }
0x103e   : > { %v5179_v50 = vpop.xlane.xlu1 %5178 }
0x103f   : > { %v5180_v63 = vsub.f32 %v5176_v27, %v5179_v50  ;;  %v13347_v50 = vpack.c.bf16 %v10777_v38, %v10776_v60  ;;  %v10836_v60 = vld [vmem:[%s19424_s10 + $0x598] sm:$0xff]  ;;  %v10817_v38 = vld [vmem:[%s19424_s10 + $0x500] sm:$0xff] }
0x1041   : > { %v16353_v57 = vpop.eup %14263  ;;  %v5181_v51 = vmul.f32 1.442695, %v5180_v63  ;;  %13348 = vmatpush3.bf16.msra.mxu1 %v13347_v50  ;;  %v10778_v63 = vld [vmem:[%s19506_s6 + $0x50] sm:$0xff] }
0x1042   : > { %v4670_v58 = vsel %vm594_vm1, %v16353_v57, 0.0  ;;  %v5350_v4 = vpop.xlane.xlu0 %5349  ;;  %v14266_v6 = vpop.eup %14265  ;;  %13349 = vmatprep.subr.bf16.mxu1 %v14442_v56 }
0x1043   : > { %4671 = vadd.xlane.f32.xlu0 %v4670_v58  ;;  %14269 = vpow2.f32 %v5181_v51  ;;  %v5351_v5 = vsub.f32 %v5347_v32, %v5350_v4  ;;  %v4499_v8 = vsel %vm594_vm1, %v14266_v6, 0.0  ;;  %v4676_v20 = vpop.permute.xlu1 %4675  ;;  %v13350_v51 = vpack.c.bf16 %v10779_v0, %v10778_v63  ;;  %v10819_v63 = vld [vmem:[%s19424_s10 + $0x510] sm:$0xff] }
0x1044   : > { %14271 = vpow2.f32 %v5010_v53  ;;  %v10780_v53 = vld [vmem:[%s19506_s6 + $0x60] sm:$0xff]  ;;  %v10835_v0 = vld [vmem:[%s19424_s10 + $0x590] sm:$0xff] }
0x1045   : > { %v5352_v7 = vmul.f32 1.442695, %v5351_v5  ;;  %v14268_v9 = vpop.eup %14267  ;;  %13351 = vmatpush3.bf16.msra.mxu1 %v13350_v51  ;;  %v10781_v5 = vld [vmem:[%s19506_s6 + $0x68] sm:$0xff] }
0x1046   : > { %v4841_v10 = vsel %vm594_vm1, %v14268_v9, 0.0  ;;  %v4505_v23 = vpop.permute.xlu0 %4504  ;;  %13352 = vmatprep.subr.bf16.mxu1 %v14442_v56  ;;  %v10850_v51 = vld [vmem:[%s19424_s10 + $0x608] sm:$0xff] }
0x1047   : > { %14273 = vpow2.f32 %v5352_v7 }
0x1048   : > { %4846 = vrot.lane.b32.xlu1 %v16276_v48, %s19517_s25 }
0x104d   : > { %v16363_v11 = vpop.eup %14269 }
0x104e   : > { %v5183_v42 = vsel %vm594_vm1, %v16363_v11, 0.0  ;;  %v14272_v14 = vpop.eup %14271 }
0x104f   : > { %v5012_v15 = vsel %vm594_vm1, %v14272_v14, 0.0 }
0x1051   : > { %v16368_v16 = vpop.eup %14273 }
0x1052   : > { %v5354_v17 = vsel %vm594_vm1, %v16368_v16, 0.0 }
0x1059   : > { %5017 = vrot.lane.b32.xlu0 %v16276_v48, %s19519_s30  ;;  %s19537_s30 = sld [smem:[#allocation24_spill]] }
0x106c   : > { %4500 = vadd.xlane.f32.xlu1 %v4499_v8  ;;  %v13353_v8 = vpack.c.bf16 %v10781_v5, %v10780_v53  ;;  %v10852_v53 = vld [vmem:[%s19424_s10 + $0x618] sm:$0xff] }
0x106e   : > { %13354 = vmatpush3.bf16.msra.mxu1 %v13353_v8  ;;  %v10865_v8 = vld [vmem:[%s19424_s10 + $0x680] sm:$0xff] }
0x106f   : > { %13355 = vmatprep.subr.bf16.mxu1 %v14442_v56 }
0x1070   : > { %4842 = vadd.xlane.f32.xlu1 %v4841_v10 }
0x1074   : > { %5184 = vadd.xlane.f32.xlu1 %v5183_v42 }
0x1078   : > { %5013 = vadd.xlane.f32.xlu0 %v5012_v15 }
0x107c   : > { %5355 = vadd.xlane.f32.xlu0 %v5354_v17 }
0x1085   : > { %5188 = vrot.lane.b32.xlu1 %v16276_v48, %s19521_s23  ;;  %s19526_s23 = smov 72  }
0x1092   : > { %5359 = vrot.lane.b32.xlu0 %v16276_v48, %s19523_s17 }
0x10c4   : > { %v4165_v24 = vpop.xlane.xlu1 %4164 }
0x10c5   : > { %14275 = vrcp.f32 %v4165_v24 }
0x10c8   : > { %v4329_v18 = vpop.xlane.xlu0 %4328  ;;  %v4847_v48 = vpop.permute.xlu1 %4846 }
0x10c9   : > { %14277 = vrcp.f32 %v4329_v18 }
0x10cf   : > { %v14276_v1 = vpop.eup %14275 }
0x10d0   : > { %v4167_v19 = vmul.f32 %v14276_v1, %v14260_v49  ;;  %v4672_v26 = vpop.xlane.xlu0 %4671 }
0x10d2   : > { %12709 = vmatmul.mubr.msk.f32.vlgmr.msra.gmra.mrb[40].mxu0 %vm594_vm1, %v4167_v19 }
0x10d3   : > { %v14278_v3 = vpop.eup %14277  ;;  %12717 = vmatpush3.msra.mxu0 %v16349_v37  ;;  %12718 = vmatprep.mubr.msk.f32.mxu0 %vm14426_vm0, %v14425_v2 }
0x10d4   : > { %v4331_v25 = vmul.f32 %v14278_v3, %v14262_v54  ;;  %12726 = vmatprep.subr.mxu0 %v14425_v2  ;;  %v5018_v47 = vpop.permute.xlu0 %5017 }
0x10d6   : > { %12719 = vmatmul.mubr.msk.f32.vlgmr.msra.gmra.mrb[42].mxu0 %vm594_vm1, %v4331_v25 }
0x10d7   : > { %12727 = vmatpush3.msra.mxu0 %v4505_v23  ;;  %12728 = vmatprep.mubr.msk.f32.mxu0 %vm14426_vm0, %v14425_v2 }
0x10d8   : > { %12736 = vmatprep.subr.mxu0 %v14425_v2 }
0x10f9   : > { %v4501_v27 = vpop.xlane.xlu1 %4500 }
0x10fa   : > { %14279 = vrcp.f32 %v4501_v27 }
0x10fb   : > { %14281 = vrcp.f32 %v4672_v26 }
0x10fd   : > { %v4843_v28 = vpop.xlane.xlu1 %4842 }
0x10fe   : > { %14283 = vrcp.f32 %v4843_v28 }
0x1101   : > { %v5185_v36 = vpop.xlane.xlu1 %5184 }
0x1104   : > { %v14280_v33 = vpop.eup %14279 }
0x1105   : > { %v4503_v32 = vmul.f32 %v14280_v33, %v14266_v6  ;;  %v5014_v12 = vpop.xlane.xlu0 %5013  ;;  %v14282_v37 = vpop.eup %14281  ;;  %v10782_v6 = vld [vmem:[%s19506_s6 + $0x70] sm:$0xff] }
0x1106   : > { %14285 = vrcp.f32 %v5014_v12  ;;  %v4674_v39 = vmul.f32 %v14282_v37, %v16353_v57  ;;  %v5189_v46 = vpop.permute.xlu1 %5188 }
0x1107   : > { %12729 = vmatmul.mubr.msk.f32.vlgmr.msra.gmra.mrb[44].mxu0 %vm594_vm1, %v4503_v32  ;;  %14287 = vrcp.f32 %v5185_v36 }
0x1108   : > { %12737 = vmatpush3.msra.mxu0 %v4676_v20  ;;  %12738 = vmatprep.mubr.msk.f32.mxu0 %vm14426_vm0, %v14425_v2  ;;  %v14284_v35 = vpop.eup %14283 }
0x1109   : > { %v5356_v44 = vpop.xlane.xlu0 %5355  ;;  %12746 = vmatprep.subr.mxu0 %v14425_v2  ;;  %v4845_v45 = vmul.f32 %v14284_v35, %v14268_v9  ;;  %v10783_v9 = vld [vmem:[%s19506_s6 + $0x78] sm:$0xff]  ;;  %v10786_v35 = vld [vmem:[%s19424_s10 + $0x408] sm:$0xff]  ;;  %s19538_s6 = smov %s19537_s30 }
0x110a   : > { %14289 = vrcp.f32 %v5356_v44  ;;  %v13356_v10 = vpack.c.bf16 %v10783_v9, %v10782_v6  ;;  %v10868_v6 = vld [vmem:[%s19424_s10 + $0x698] sm:$0xff] }
0x110b   : > { %12739 = vmatmul.mubr.msk.f32.vlgmr.msra.gmra.mrb[46].mxu0 %vm594_vm1, %v4674_v39  ;;  %v13382_v9 = vpack.c.bf16 %v10868_v6, %v10852_v53  ;;  %v10853_v6 = vld [vmem:[%s19424_s10 + $0x620] sm:$0xff] }
0x110c   : > { %12747 = vmatpush3.msra.mxu0 %v4847_v48  ;;  %12748 = vmatprep.mubr.msk.f32.mxu0 %vm14426_vm0, %v14425_v2  ;;  %v14332_v48 = vld [vmem:[%s19509_s7] sm:$0x7] }
0x110d   : > { %12756 = vmatprep.subr.mxu0 %v14425_v2  ;;  %v5360_v31 = vpop.permute.xlu0 %5359  ;;  %13357 = vmatpush3.bf16.msra.mxu1 %v13356_v10  ;;  %v5453_v26 = vrot.slane %v14332_v48, %v16264_v13 }
0x110f   : > { %12749 = vmatmul.mubr.msk.f32.vlgmr.msra.gmra.mrb[48].mxu0 %vm594_vm1, %v4845_v45  ;;  %v10788_v45 = vld [vmem:[%s19424_s10 + $0x418] sm:$0xff] }
0x1110   : > { %v14286_v21 = vpop.eup %14285  ;;  %12757 = vmatpush3.msra.mxu0 %v5018_v47  ;;  %12758 = vmatprep.mubr.msk.f32.mxu0 %vm14426_vm0, %v14425_v2 }
0x1111   : > { %v5016_v30 = vmul.f32 %v14286_v21, %v14272_v14  ;;  %12766 = vmatprep.subr.mxu0 %v14425_v2  ;;  %v14288_v29 = vpop.eup %14287 }
0x1112   : > { %v5187_v22 = vmul.f32 %v14288_v29, %v16363_v11  ;;  %v10785_v29 = vld [vmem:[%s19424_s10 + $0x400] sm:$0xff] }
0x1113   : > { %12759 = vmatmul.mubr.msk.f32.vlgmr.msra.gmra.mrb[50].mxu0 %vm594_vm1, %v5016_v30  ;;  %v10804_v30 = vld [vmem:[%s19424_s10 + $0x498] sm:$0xff] }
0x1114   : > { %12767 = vmatpush3.msra.mxu0 %v5189_v46  ;;  %12768 = vmatprep.mubr.msk.f32.mxu0 %vm14426_vm0, %v14425_v2  ;;  %v14290_v49 = vpop.eup %14289  ;;  %v10801_v46 = vld [vmem:[%s19424_s10 + $0x480] sm:$0xff] }
0x1115   : > { %12776 = vmatprep.subr.mxu0 %v14425_v2  ;;  %v5358_v52 = vmul.f32 %v14290_v49, %v16368_v16  ;;  %v13360_v49 = vpack.c.bf16 %v10801_v46, %v10785_v29 }
0x1117   : > { %12769 = vmatmul.mubr.msk.f32.vlgmr.msra.gmra.mrb[52].mxu0 %vm594_vm1, %v5187_v22  ;;  %v13374_v22 = vpack.c.bf16 %v10804_v30, %v10788_v45  ;;  %v10789_v45 = vld [vmem:[%s19424_s10 + $0x420] sm:$0xff] }
0x1118   : > { %12777 = vmatpush3.msra.mxu0 %v5360_v31  ;;  %12778 = vmatprep.mubr.msk.f32.mxu0 %vm14426_vm0, %v14425_v2  ;;  %v10787_v31 = vld [vmem:[%s19424_s10 + $0x410] sm:$0xff]  ;;  %v14334_v30 = vld [vmem:[%s19510_s9] sm:$0x7]  ;;  %s19527_s9 = smov 16  }
0x1119   : > { %13375 = vmatprep.subr.bf16.mxu1 %v13374_v22  ;;  %v5549_v29 = vrot.slane %v14334_v30, %v16264_v13  ;;  %v10791_v22 = vld [vmem:[%s19424_s10 + $0x430] sm:$0xff] }
0x111b   : > { %12779 = vmatmul.mubr.msk.f32.vlgmr.msra.gmra.mrb[54].mxu0 %vm594_vm1, %v5358_v52  ;;  %v10803_v52 = vld [vmem:[%s19424_s10 + $0x490] sm:$0xff] }
0x111c   : > { %5891 = vmatprep.mubr.f32.mxu0 %v14425_v2 }
0x11a5   : > { %v4237_v54 = vpop.f32.mrb[40].mxu0 }
0x11a6   : > { %4241 = vst.msk [vmem:[#allocation2] sm:$0xff] %vm594_vm1, %v4237_v54  ;;  %v12710_v55 = vpop.f32.mrb[41].mxu0  ;;  %v13376_v54 = vpack.c.bf16 %v10803_v52, %v10787_v31  ;;  %v10822_v31 = vld [vmem:[%s19424_s10 + $0x528] sm:$0xff] }
0x11a7   : > { %v10818_v55 = vld [vmem:[%s19424_s10 + $0x508] sm:$0xff] }
0x11a8   : > { %v10838_v52 = vld [vmem:[%s19424_s10 + $0x5a8] sm:$0xff] }
0x11a9   : > { %v4405_v57 = vpop.f32.mrb[42].mxu0 }
0x11aa   : > { %4410 = vrot.lane.b32.xlu1 %v4405_v57, %s19522_s29  ;;  %v12720_v58 = vpop.f32.mrb[43].mxu0  ;;  %v10834_v57 = vld [vmem:[%s19424_s10 + $0x588] sm:$0xff] }
0x11ab   : > { %v10820_v58 = vld [vmem:[%s19424_s10 + $0x518] sm:$0xff] }
0x11ac   : > { %v13378_v50 = vpack.c.bf16 %v10836_v60, %v10820_v58  ;;  %v10837_v60 = vld [vmem:[%s19424_s10 + $0x5a0] sm:$0xff] }
0x11da   : > { %v4576_v59 = vpop.f32.mrb[44].mxu0 }
0x11db   : > { %4581 = vrot.lane.b32.xlu0 %v4576_v59, %s19520_s27  ;;  %v12730_v61 = vpop.f32.mrb[45].mxu0  ;;  %v13362_v59 = vpack.c.bf16 %v10834_v57, %v10818_v55  ;;  %s19524_s27 = smov 88  }
0x11dc   : > { %v10833_v61 = vld [vmem:[%s19424_s10 + $0x580] sm:$0xff] }
0x11de   : > { %v4747_v62 = vpop.f32.mrb[46].mxu0 }
0x11df   : > { %4752 = vrot.lane.b32.xlu1 %v4747_v62, %s19518_s26  ;;  %v12740_v43 = vpop.f32.mrb[47].mxu0  ;;  %v13364_v62 = vpack.c.bf16 %v10833_v61, %v10817_v38  ;;  %v13394_v61 = vpack.c.bf16 %v10838_v52, %v10822_v31  ;;  %v10827_v52 = vld [vmem:[%s19424_s10 + $0x550] sm:$0xff] }
0x11e0   : > { %v13380_v43 = vpack.c.bf16 %v10835_v0, %v10819_v63  ;;  %v10839_v63 = vld [vmem:[%s19424_s10 + $0x5b0] sm:$0xff]  ;;  %v10854_v0 = vld [vmem:[%s19424_s10 + $0x628] sm:$0xff] }
0x11e2   : > { %v4918_v4 = vpop.f32.mrb[48].mxu0 }
0x11e3   : > { %4923 = vrot.lane.b32.xlu0 %v4918_v4, %s19516_s22  ;;  %v12750_v7 = vpop.f32.mrb[49].mxu0  ;;  %v10866_v4 = vld [vmem:[%s19424_s10 + $0x688] sm:$0xff] }
0x11e4   : > { %v13366_v5 = vpack.c.bf16 %v10866_v4, %v10850_v51  ;;  %v10849_v7 = vld [vmem:[%s19424_s10 + $0x600] sm:$0xff]  ;;  %v10856_v51 = vld [vmem:[%s19424_s10 + $0x638] sm:$0xff] }
0x11e5   : > { %v13368_v10 = vpack.c.bf16 %v10865_v8, %v10849_v7  ;;  %v10872_v4 = vld [vmem:[%s19424_s10 + $0x6b8] sm:$0xff]  ;;  %v10869_v7 = vld [vmem:[%s19424_s10 + $0x6a0] sm:$0xff] }
0x11e6   : > { %v5089_v11 = vpop.f32.mrb[50].mxu0 }
0x11e7   : > { %5094 = vrot.lane.b32.xlu1 %v5089_v11, %s19514_s1  ;;  %v12760_v42 = vpop.f32.mrb[51].mxu0  ;;  %v10851_v11 = vld [vmem:[%s19424_s10 + $0x610] sm:$0xff] }
0x11e8   : > { %v10867_v42 = vld [vmem:[%s19424_s10 + $0x690] sm:$0xff] }
0x11ea   : > { %v5260_v14 = vpop.f32.mrb[52].mxu0 }
0x11eb   : > { %5265 = vrot.lane.b32.xlu0 %v5260_v14, %s19507_s20  ;;  %v12770_v15 = vpop.f32.mrb[53].mxu0  ;;  %v13384_v14 = vpack.c.bf16 %v10867_v42, %v10851_v11  ;;  %v10871_v11 = vld [vmem:[%s19424_s10 + $0x6b0] sm:$0xff]  ;;  %v10886_v42 = vld [vmem:[%s19424_s10 + $0x728] sm:$0xff] }
0x11ec   : > { %v10882_v15 = vld [vmem:[%s19424_s10 + $0x708] sm:$0xff] }
0x11ee   : > { %v5431_v16 = vpop.f32.mrb[54].mxu0 }
0x11ef   : > { %5436 = vrot.lane.b32.xlu1 %v5431_v16, %s19508_s21  ;;  %v12780_v17 = vpop.f32.mrb[55].mxu0  ;;  %v10898_v16 = vld [vmem:[%s19424_s10 + $0x788] sm:$0xff] }
0x11f0   : > { %v10884_v17 = vld [vmem:[%s19424_s10 + $0x718] sm:$0xff] }
0x121c   : > { %v4411_v20 = vpop.permute.xlu1 %4410 }
0x121d   : > { %4413 = vst.msk [vmem:[#allocation2] sm:$0xff] %vm1114_vm3, %v4411_v20  ;;  %v13370_v20 = vpack.c.bf16 %v10898_v16, %v10882_v15  ;;  %v10888_v15 = vld [vmem:[%s19424_s10 + $0x738] sm:$0xff] }
0x121e   : > { %v10904_v16 = vld [vmem:[%s19424_s10 + $0x7b8] sm:$0xff] }
0x124d   : > { %v4582_v23 = vpop.permute.xlu0 %4581 }
0x124e   : > { %4584 = vst.msk [vmem:[#allocation2] sm:$0xff] %vm1286_vm4, %v4582_v23  ;;  %v10900_v23 = vld [vmem:[%s19424_s10 + $0x798] sm:$0xff] }
0x1251   : > { %v4753_v24 = vpop.permute.xlu1 %4752 }
0x1252   : > { %4755 = vst.msk [vmem:[#allocation2] sm:$0xff] %vm1458_vm5, %v4753_v24  ;;  %v10881_v24 = vld [vmem:[%s19424_s10 + $0x700] sm:$0xff] }
0x1255   : > { %v4924_v18 = vpop.permute.xlu0 %4923 }
0x1256   : > { %4926 = vst.msk [vmem:[#allocation2] sm:$0xff] %vm1630_vm6, %v4924_v18  ;;  %v10897_v18 = vld [vmem:[%s19424_s10 + $0x780] sm:$0xff] }
0x1259   : > { %v5095_v1 = vpop.permute.xlu1 %5094 }
0x125a   : > { %5097 = vst.msk [vmem:[#allocation2] sm:$0xff] %vm1802_vm7, %v5095_v1  ;;  %v13386_v1 = vpack.c.bf16 %v10900_v23, %v10884_v17  ;;  %v13400_v17 = vpack.c.bf16 %v10869_v7, %v10853_v6  ;;  %v10885_v23 = vld [vmem:[%s19424_s10 + $0x720] sm:$0xff] }
0x125d   : > { %v5266_v19 = vpop.permute.xlu0 %5265 }
0x125e   : > { %5268 = vst.msk [vmem:[#allocation2] sm:$0xff] %vm1974_vm8, %v5266_v19  ;;  %v13372_v19 = vpack.c.bf16 %v10897_v18, %v10881_v24  ;;  %v10901_v24 = vld [vmem:[%s19424_s10 + $0x7a0] sm:$0xff] }
0x1261   : > { %v5437_v3 = vpop.permute.xlu1 %5436 }
0x1262   : > { %5439 = vst.msk [vmem:[#allocation2] sm:$0xff] %vm2146_vm9, %v5437_v3  ;;  %v10883_v3 = vld [vmem:[%s19424_s10 + $0x710] sm:$0xff] }
0x1269   : > { %v5440_v25 = vld [vmem:[#allocation2] sm:$0xff] }
0x126a   : > { %12798 = vmatmul.mubr.msk.f32.vlgmr.msra.gmra.mrb[48].mxu1 %vm705_vm2, %v5440_v25  ;;  %v10899_v25 = vld [vmem:[%s19424_s10 + $0x790] sm:$0xff] }
0x126b   : > { %5962 = vmatprep.mubr.f32.mxu1 %v14425_v2  ;;  %13377 = vmatpush1.bf16.msra.mxu1 %v13376_v54  ;;  %v13388_v48 = vpack.c.bf16 %v10899_v25, %v10883_v3  ;;  %v10840_v54 = vld [vmem:[%s19424_s10 + $0x5b8] sm:$0xff]  ;;  %v10903_v3 = vld [vmem:[%s19424_s10 + $0x7b0] sm:$0xff]  ;;  %v10794_v25 = vld [vmem:[%s19424_s10 + $0x448] sm:$0xff] }
0x126c   : > { %13379 = vmatprep.subr.bf16.mxu1 %v13378_v50 }
0x126f   : > { %13381 = vmatpush1.bf16.msra.mxu1 %v13380_v43  ;;  %v10870_v43 = vld [vmem:[%s19424_s10 + $0x6a8] sm:$0xff] }
0x1270   : > { %13383 = vmatprep.subr.bf16.mxu1 %v13382_v9  ;;  %v13398_v8 = vpack.c.bf16 %v10870_v43, %v10854_v0  ;;  %v13414_v9 = vpack.c.bf16 %v10872_v4, %v10856_v51  ;;  %v10859_v0 = vld [vmem:[%s19424_s10 + $0x650] sm:$0xff]  ;;  %v10890_v51 = vld [vmem:[%s19424_s10 + $0x748] sm:$0xff] }
0x1271   : > { %v10875_v43 = vld [vmem:[%s19424_s10 + $0x6d0] sm:$0xff]  ;;  %v10906_v4 = vld [vmem:[%s19424_s10 + $0x7c8] sm:$0xff] }
0x1272   : > { %v13448_v7 = vpack.c.bf16 %v10875_v43, %v10859_v0 }
0x1273   : > { %13385 = vmatpush1.bf16.msra.mxu1 %v13384_v14  ;;  %v10902_v14 = vld [vmem:[%s19424_s10 + $0x7a8] sm:$0xff] }
0x1274   : > { %13387 = vmatprep.subr.bf16.mxu1 %v13386_v1  ;;  %v13402_v18 = vpack.c.bf16 %v10902_v14, %v10886_v42  ;;  %v13418_v1 = vpack.c.bf16 %v10904_v16, %v10888_v15  ;;  %v10891_v42 = vld [vmem:[%s19424_s10 + $0x750] sm:$0xff]  ;;  %v10798_v15 = vld [vmem:[%s19424_s10 + $0x468] sm:$0xff] }
0x1275   : > { %v10907_v14 = vld [vmem:[%s19424_s10 + $0x7d0] sm:$0xff]  ;;  %v10814_v16 = vld [vmem:[%s19424_s10 + $0x4e8] sm:$0xff] }
0x1277   : > { %13389 = vmatpush1.bf16.msra.mxu1 %v13388_v48  ;;  %v10810_v48 = vld [vmem:[%s19424_s10 + $0x4c8] sm:$0xff] }
0x133d   : > { %v5523_v27 = vpop.f32.mrb[48].mxu1 }
0x133e   : > { %v5524_v28 = vadd.f32 %v5523_v27, %v5453_v26  ;;  %v12799_v47 = vpop.f32.mrb[49].mxu1  ;;  %v10790_v26 = vld [vmem:[%s19424_s10 + $0x428] sm:$0xff] }
0x133f   : > { %v10806_v27 = vld [vmem:[%s19424_s10 + $0x4a8] sm:$0xff] }
0x1340   : > { %v5527_v33 = vadd.f32 %v5524_v28, %v16257_v40  ;;  %v10802_v40 = vld [vmem:[%s19424_s10 + $0x488] sm:$0xff]  ;;  %v10792_v28 = vld [vmem:[%s19424_s10 + $0x438] sm:$0xff]  ;;  %v13390_v47 = vpack.c.bf16 %v10806_v27, %v10790_v26 }
0x1341   : > { %v13358_v21 = vpack.c.bf16 %v10802_v40, %v10786_v35  ;;  %v10796_v26 = vld [vmem:[%s19424_s10 + $0x458] sm:$0xff] }
0x1342   : > { %v5528_v32 = vsel %vm705_vm2, %v5527_v33, 0.0  ;;  %v10812_v27 = vld [vmem:[%s19424_s10 + $0x4d8] sm:$0xff] }
0x1343   : > { %5529 = vadd.xlane.f32.xlu0 %v5528_v32  ;;  %13359 = vmatprep.subr.bf16.mxu0 %v13358_v21  ;;  %v10805_v21 = vld [vmem:[%s19424_s10 + $0x4a0] sm:$0xff] }
0x1344   : > { %13361 = vmatpush1.bf16.msra.mxu0 %v13360_v49  ;;  %v10807_v49 = vld [vmem:[%s19424_s10 + $0x4b0] sm:$0xff]  ;;  %v13392_v57 = vpack.c.bf16 %v10805_v21, %v10789_v45  ;;  %v10828_v45 = vld [vmem:[%s19424_s10 + $0x558] sm:$0xff] }
0x1345   : > { %13363 = vmatprep.subr.bf16.mxu0 %v13362_v59  ;;  %v13408_v58 = vpack.c.bf16 %v10807_v49, %v10791_v22  ;;  %v10821_v59 = vld [vmem:[%s19424_s10 + $0x520] sm:$0xff]  ;;  %v10844_v21 = vld [vmem:[%s19424_s10 + $0x5d8] sm:$0xff] }
0x1346   : > { %v13396_v53 = vpack.c.bf16 %v10837_v60, %v10821_v59  ;;  %v10841_v22 = vld [vmem:[%s19424_s10 + $0x5c0] sm:$0xff]  ;;  %v13442_v31 = vpack.c.bf16 %v10844_v21, %v10828_v45  ;;  %v10862_v45 = vld [vmem:[%s19424_s10 + $0x668] sm:$0xff] }
0x1347   : > { %v10878_v21 = vld [vmem:[%s19424_s10 + $0x6e8] sm:$0xff] }
0x1348   : > { %13365 = vmatpush1.bf16.msra.mxu0 %v13364_v62  ;;  %v10823_v62 = vld [vmem:[%s19424_s10 + $0x530] sm:$0xff] }
0x1349   : > { %13367 = vmatprep.subr.bf16.mxu0 %v13366_v5  ;;  %v13412_v5 = vpack.c.bf16 %v10839_v63, %v10823_v62 }
0x134c   : > { %13369 = vmatpush1.bf16.msra.mxu0 %v13368_v10  ;;  %v10855_v10 = vld [vmem:[%s19424_s10 + $0x630] sm:$0xff] }
0x134d   : > { %13371 = vmatprep.subr.bf16.mxu0 %v13370_v20  ;;  %v13416_v20 = vpack.c.bf16 %v10871_v11, %v10855_v10  ;;  %v13434_v10 = vpack.c.bf16 %v10906_v4, %v10890_v51  ;;  %v10895_v51 = vld [vmem:[%s19424_s10 + $0x770] sm:$0xff] }
0x134e   : > { %v10911_v4 = vld [vmem:[%s19424_s10 + $0x7f0] sm:$0xff] }
0x1350   : > { %13373 = vmatpush1.bf16.msra.mxu0 %v13372_v19  ;;  %v10887_v19 = vld [vmem:[%s19424_s10 + $0x730] sm:$0xff] }
0x1351   : > { %13391 = vmatprep.subr.bf16.mxu0 %v13390_v47  ;;  %v13420_v47 = vpack.c.bf16 %v10903_v3, %v10887_v19  ;;  %v13454_v19 = vpack.c.bf16 %v10814_v16, %v10798_v15  ;;  %v10953_v15 = vld [vmem:[%s19426_s12 + $0x900] sm:$0xff]  ;;  %v10954_v16 = vld [vmem:[%s19426_s12 + $0x908] sm:$0xff] }
0x13d0   : > { %v5530_v36 = vpop.xlane.xlu0 %5529 }
0x13d1   : > { %v5531_v12 = vmul.f32 0.015625, %v5530_v36 }
0x13d3   : > { %v16459_v37 = vsub.f32 %v5527_v33, %v5531_v12  ;;  %v10808_v33 = vld [vmem:[%s19424_s10 + $0x4b8] sm:$0xff] }
0x13d4   : > { %v13406_v32 = vpack.c.bf16 %v10808_v33, %v10792_v28  ;;  %v13404_v28 = vpack.c.bf16 %v10901_v24, %v10885_v23  ;;  %v10793_v33 = vld [vmem:[%s19424_s10 + $0x440] sm:$0xff]  ;;  %v13452_v24 = vpack.c.bf16 %v10907_v14, %v10891_v42 }
0x13d5   : > { %v5533_v39 = vmul.f32 %v16459_v37, %v16459_v37 }
0x13d6   : > { %13407 = vmatprep.subr.bf16.mxu1 %v13406_v32  ;;  %v10809_v32 = vld [vmem:[%s19424_s10 + $0x4c0] sm:$0xff] }
0x13d7   : > { %v5534_v44 = vsel %vm705_vm2, %v5533_v39, 0.0  ;;  %v13424_v30 = vpack.c.bf16 %v10809_v32, %v10793_v33 }
0x13d8   : > { %5535 = vadd.xlane.f32.xlu1 %v5534_v44  ;;  %v14333_v44 = vld [vmem:[%s19422_s8] sm:$0x7] }
0x13d9   : > { %v5544_v35 = vrot.slane %v14333_v44, %v16264_v13  ;;  %v10811_v44 = vld [vmem:[%s19424_s10 + $0x4d0] sm:$0xff] }
0x1465   : > { %v5536_v36 = vpop.xlane.xlu1 %5535 }
0x1466   : > { %v5537_v12 = vmul.f32 0.015625, %v5536_v36  ;;  %v13422_v36 = vpack.c.bf16 %v10810_v48, %v10794_v25  ;;  %v10799_v25 = vld [vmem:[%s19424_s10 + $0x470] sm:$0xff] }
0x1467   : > { %v10815_v48 = vld [vmem:[%s19424_s10 + $0x4f0] sm:$0xff] }
0x1468   : > { %v5538_v39 = vadd.f32 1e-05, %v5537_v12  ;;  %v13438_v12 = vpack.c.bf16 %v10812_v27, %v10796_v26  ;;  %v10830_v26 = vld [vmem:[%s19424_s10 + $0x568] sm:$0xff]  ;;  %v13472_v32 = vpack.c.bf16 %v10815_v48, %v10799_v25 }
0x1469   : > { %v10846_v27 = vld [vmem:[%s19424_s10 + $0x5e8] sm:$0xff] }
0x146a   : > { %14291 = vrsqrt.f32 %v5538_v39  ;;  %v10795_v39 = vld [vmem:[%s19424_s10 + $0x450] sm:$0xff] }
0x1474   : > { %v14292_v40 = vpop.eup %14291 }
0x1475   : > { %v5540_v46 = vmul.f32 %v14292_v40, %v16459_v37  ;;  %v10824_v37 = vld [vmem:[%s19424_s10 + $0x538] sm:$0xff]  ;;  %v10842_v40 = vld [vmem:[%s19424_s10 + $0x5c8] sm:$0xff] }
0x1476   : > { %v13410_v50 = vpack.c.bf16 %v10840_v54, %v10824_v37  ;;  %v10843_v37 = vld [vmem:[%s19424_s10 + $0x5d0] sm:$0xff]  ;;  %v10858_v54 = vld [vmem:[%s19424_s10 + $0x648] sm:$0xff] }
0x1477   : > { %v5545_v55 = vmul.f32 %v5544_v35, %v5540_v46  ;;  %v10826_v35 = vld [vmem:[%s19424_s10 + $0x548] sm:$0xff]  ;;  %v10825_v46 = vld [vmem:[%s19424_s10 + $0x540] sm:$0xff]  ;;  %v13444_v60 = vpack.c.bf16 %v10843_v37, %v10827_v52  ;;  %v13462_v52 = vpack.c.bf16 %v10878_v21, %v10862_v45 }
0x1478   : > { %v13426_v49 = vpack.c.bf16 %v10842_v40, %v10826_v35  ;;  %v13428_v59 = vpack.c.bf16 %v10841_v22, %v10825_v46  ;;  %v10831_v35 = vld [vmem:[%s19424_s10 + $0x570] sm:$0xff]  ;;  %v10957_v45 = vld [vmem:[%s19426_s12 + $0x920] sm:$0xff]  ;;  %v10958_v21 = vld [vmem:[%s19426_s12 + $0x928] sm:$0xff] }
0x1479   : > { %v16611_v38 = vadd.f32 %v5549_v29, %v5545_v55  ;;  %v13440_v29 = vpack.c.bf16 %v10811_v44, %v10795_v39  ;;  %v10874_v55 = vld [vmem:[%s19424_s10 + $0x6c8] sm:$0xff]  ;;  %v13458_v39 = vpack.c.bf16 %v10846_v27, %v10830_v26  ;;  %v10847_v40 = vld [vmem:[%s19424_s10 + $0x5f0] sm:$0xff]  ;;  %v10956_v27 = vld [vmem:[%s19426_s12 + $0x918] sm:$0xff] }
0x147a   : > { %v13430_v62 = vpack.c.bf16 %v10874_v55, %v10858_v54  ;;  %v13476_v22 = vpack.c.bf16 %v10847_v40, %v10831_v35  ;;  %v10863_v54 = vld [vmem:[%s19424_s10 + $0x670] sm:$0xff] }
0x147b   : > { %10913 = vmatmul.mubr.msk.f32.vlgmr.msra.gmra.mrb[56].mxu0 %vm705_vm2, %v16611_v38  ;;  %10914 = vmatmul.mubr.msk.f32.vlgmr.msra.gmra.mrb[50].mxu1 %vm705_vm2, %v16611_v38  ;;  %v10879_v55 = vld [vmem:[%s19424_s10 + $0x6f0] sm:$0xff] }
0x147c   : > { %13393 = vmatpush1.bf16.msra.mxu0 %v13392_v57  ;;  %13409 = vmatpush1.bf16.msra.mxu1 %v13408_v58  ;;  %v10860_v57 = vld [vmem:[%s19424_s10 + $0x658] sm:$0xff]  ;;  %v10955_v26 = vld [vmem:[%s19426_s12 + $0x910] sm:$0xff] }
0x147d   : > { %13395 = vmatprep.subr.bf16.mxu0 %v13394_v61  ;;  %13411 = vmatprep.subr.bf16.mxu1 %v13410_v50  ;;  %v10876_v58 = vld [vmem:[%s19424_s10 + $0x6d8] sm:$0xff]  ;;  %v10857_v61 = vld [vmem:[%s19424_s10 + $0x640] sm:$0xff] }
0x147e   : > { %6033 = vmatprep.mubr.f32.mxu0 %v14425_v2  ;;  %6104 = vmatprep.mubr.f32.mxu1 %v14425_v2  ;;  %v10873_v50 = vld [vmem:[%s19424_s10 + $0x6c0] sm:$0xff]  ;;  %v13446_v63 = vpack.c.bf16 %v10876_v58, %v10860_v57  ;;  %v10894_v57 = vld [vmem:[%s19424_s10 + $0x768] sm:$0xff] }
0x147f   : > { %v13432_v6 = vpack.c.bf16 %v10873_v50, %v10857_v61  ;;  %v10910_v58 = vld [vmem:[%s19424_s10 + $0x7e8] sm:$0xff]  ;;  %v13480_v50 = vpack.c.bf16 %v10879_v55, %v10863_v54 }
0x1480   : > { %13397 = vmatpush1.bf16.msra.mxu0 %v13396_v53  ;;  %13413 = vmatpush1.bf16.msra.mxu1 %v13412_v5  ;;  %v10892_v53 = vld [vmem:[%s19424_s10 + $0x758] sm:$0xff]  ;;  %v13466_v0 = vpack.c.bf16 %v10910_v58, %v10894_v57  ;;  %v10959_v57 = vld [vmem:[%s19426_s12 + $0x930] sm:$0xff] }
0x1481   : > { %13399 = vmatprep.subr.bf16.mxu0 %v13398_v8  ;;  %13415 = vmatprep.subr.bf16.mxu1 %v13414_v9  ;;  %v10908_v5 = vld [vmem:[%s19424_s10 + $0x7d8] sm:$0xff]  ;;  %v10889_v8 = vld [vmem:[%s19424_s10 + $0x740] sm:$0xff] }
0x1482   : > { %v10905_v9 = vld [vmem:[%s19424_s10 + $0x7c0] sm:$0xff]  ;;  %v13450_v11 = vpack.c.bf16 %v10908_v5, %v10892_v53  ;;  %v10938_v5 = vld [vmem:[%s19426_s12 + $0x888] sm:$0xff]  ;;  %v10960_v58 = vld [vmem:[%s19426_s12 + $0x938] sm:$0xff] }
0x1483   : > { %v13436_v23 = vpack.c.bf16 %v10905_v9, %v10889_v8  ;;  %v10937_v53 = vld [vmem:[%s19426_s12 + $0x880] sm:$0xff]  ;;  %v13484_v9 = vpack.c.bf16 %v10911_v4, %v10895_v51 }
0x1484   : > { %13401 = vmatpush1.bf16.msra.mxu0 %v13400_v17  ;;  %13417 = vmatpush1.bf16.msra.mxu1 %v13416_v20  ;;  %v10800_v17 = vld [vmem:[%s19424_s10 + $0x478] sm:$0xff]  ;;  %v13486_v42 = vpack.c.bf16 %v10938_v5, %v10937_v53  ;;  %v10961_v53 = vld [vmem:[%s19426_s12 + $0x940] sm:$0xff]  ;;  %v10962_v5 = vld [vmem:[%s19426_s12 + $0x948] sm:$0xff] }
0x1485   : > { %13403 = vmatprep.subr.bf16.mxu0 %v13402_v18  ;;  %13419 = vmatprep.subr.bf16.mxu1 %v13418_v1  ;;  %v10816_v20 = vld [vmem:[%s19424_s10 + $0x4f8] sm:$0xff]  ;;  %v10797_v18 = vld [vmem:[%s19424_s10 + $0x460] sm:$0xff] }
0x1486   : > { %v10813_v1 = vld [vmem:[%s19424_s10 + $0x4e0] sm:$0xff]  ;;  %v13470_v3 = vpack.c.bf16 %v10816_v20, %v10800_v17  ;;  %v10939_v17 = vld [vmem:[%s19426_s12 + $0x890] sm:$0xff]  ;;  %v10940_v20 = vld [vmem:[%s19426_s12 + $0x898] sm:$0xff] }
0x1487   : > { %v13456_v33 = vpack.c.bf16 %v10813_v1, %v10797_v18  ;;  %v13520_v1 = vpack.c.bf16 %v10954_v16, %v10953_v15  ;;  %v13490_v25 = vpack.c.bf16 %v10940_v20, %v10939_v17  ;;  %v10963_v17 = vld [vmem:[%s19426_s12 + $0x950] sm:$0xff]  ;;  %v10964_v20 = vld [vmem:[%s19426_s12 + $0x958] sm:$0xff] }
0x1488   : > { %13405 = vmatpush1.bf16.msra.mxu0 %v13404_v28  ;;  %13421 = vmatpush1.bf16.msra.mxu1 %v13420_v47  ;;  %v10832_v28 = vld [vmem:[%s19424_s10 + $0x578] sm:$0xff] }
0x1489   : > { %13423 = vmatprep.subr.bf16.mxu0 %v13422_v36  ;;  %13439 = vmatprep.subr.bf16.mxu1 %v13438_v12  ;;  %v10848_v47 = vld [vmem:[%s19424_s10 + $0x5f8] sm:$0xff]  ;;  %v10829_v36 = vld [vmem:[%s19424_s10 + $0x560] sm:$0xff] }
0x148a   : > { %v10845_v12 = vld [vmem:[%s19424_s10 + $0x5e0] sm:$0xff]  ;;  %v13474_v44 = vpack.c.bf16 %v10848_v47, %v10832_v28  ;;  %v10942_v47 = vld [vmem:[%s19426_s12 + $0x8a8] sm:$0xff] }
0x148b   : > { %10915 = vmatmul.mubr.msk.f32.vlgmr.msra.gmra.mrb[58].mxu0 %vm705_vm2, %v16611_v38  ;;  %10916 = vmatmul.mubr.msk.f32.vlgmr.msra.gmra.mrb[52].mxu1 %vm705_vm2, %v16611_v38  ;;  %v13460_v46 = vpack.c.bf16 %v10845_v12, %v10829_v36  ;;  %v10941_v28 = vld [vmem:[%s19426_s12 + $0x8a0] sm:$0xff]  ;;  %v13524_v12 = vpack.c.bf16 %v10956_v27, %v10955_v26  ;;  %v10934_v27 = vld [vmem:[%s19426_s12 + $0x868] sm:$0xff] }
0x148c   : > { %13425 = vmatpush1.bf16.msra.mxu0 %v13424_v30  ;;  %13441 = vmatpush1.bf16.msra.mxu1 %v13440_v29  ;;  %v10864_v30 = vld [vmem:[%s19424_s10 + $0x678] sm:$0xff]  ;;  %v13494_v35 = vpack.c.bf16 %v10942_v47, %v10941_v28  ;;  %v10965_v28 = vld [vmem:[%s19426_s12 + $0x960] sm:$0xff]  ;;  %v10966_v47 = vld [vmem:[%s19426_s12 + $0x968] sm:$0xff] }
0x148d   : > { %13427 = vmatprep.subr.bf16.mxu0 %v13426_v49  ;;  %13443 = vmatprep.subr.bf16.mxu1 %v13442_v31  ;;  %v10880_v29 = vld [vmem:[%s19424_s10 + $0x6f8] sm:$0xff]  ;;  %v10861_v49 = vld [vmem:[%s19424_s10 + $0x660] sm:$0xff] }
0x148e   : > { %6175 = vmatprep.mubr.f32.mxu0 %v14425_v2  ;;  %6246 = vmatprep.mubr.f32.mxu1 %v14425_v2  ;;  %v10877_v31 = vld [vmem:[%s19424_s10 + $0x6e0] sm:$0xff]  ;;  %v13478_v37 = vpack.c.bf16 %v10880_v29, %v10864_v30  ;;  %v10943_v30 = vld [vmem:[%s19426_s12 + $0x8b0] sm:$0xff]  ;;  %v10944_v29 = vld [vmem:[%s19426_s12 + $0x8b8] sm:$0xff] }
0x148f   : > { %v13464_v61 = vpack.c.bf16 %v10877_v31, %v10861_v49  ;;  %v13528_v31 = vpack.c.bf16 %v10958_v21, %v10957_v45  ;;  %v13498_v54 = vpack.c.bf16 %v10944_v29, %v10943_v30  ;;  %v10936_v45 = vld [vmem:[%s19426_s12 + $0x878] sm:$0xff]  ;;  %v10967_v29 = vld [vmem:[%s19426_s12 + $0x970] sm:$0xff] }
0x1490   : > { %13429 = vmatpush1.bf16.msra.mxu0 %v13428_v59  ;;  %13445 = vmatpush1.bf16.msra.mxu1 %v13444_v60  ;;  %v10896_v59 = vld [vmem:[%s19424_s10 + $0x778] sm:$0xff] }
0x1491   : > { %13431 = vmatprep.subr.bf16.mxu0 %v13430_v62  ;;  %13447 = vmatprep.subr.bf16.mxu1 %v13446_v63  ;;  %v10912_v60 = vld [vmem:[%s19424_s10 + $0x7f8] sm:$0xff]  ;;  %v10893_v62 = vld [vmem:[%s19424_s10 + $0x760] sm:$0xff] }
0x1492   : > { %v10909_v63 = vld [vmem:[%s19424_s10 + $0x7e0] sm:$0xff]  ;;  %v13482_v43 = vpack.c.bf16 %v10912_v60, %v10896_v59  ;;  %v10946_v60 = vld [vmem:[%s19426_s12 + $0x8c8] sm:$0xff] }
0x1493   : > { %v13468_v8 = vpack.c.bf16 %v10909_v63, %v10893_v62  ;;  %v10945_v59 = vld [vmem:[%s19426_s12 + $0x8c0] sm:$0xff]  ;;  %v13532_v63 = vpack.c.bf16 %v10960_v58, %v10959_v57 }
0x1494   : > { %13433 = vmatpush1.bf16.msra.mxu0 %v13432_v6  ;;  %13449 = vmatpush1.bf16.msra.mxu1 %v13448_v7  ;;  %v10969_v6 = vld [vmem:[%s19426_s12 + $0x980] sm:$0xff]  ;;  %v10970_v7 = vld [vmem:[%s19426_s12 + $0x988] sm:$0xff]  ;;  %v13502_v51 = vpack.c.bf16 %v10946_v60, %v10945_v59 }
0x1495   : > { %13435 = vmatprep.subr.bf16.mxu0 %v13434_v10  ;;  %13451 = vmatprep.subr.bf16.mxu1 %v13450_v11  ;;  %v10921_v10 = vld [vmem:[%s19426_s12 + $0x800] sm:$0xff]  ;;  %v10922_v11 = vld [vmem:[%s19426_s12 + $0x808] sm:$0xff]  ;;  %v13518_v14 = vpack.c.bf16 %v10970_v7, %v10969_v6  ;;  %v10947_v6 = vld [vmem:[%s19426_s12 + $0x8d0] sm:$0xff] }
0x1496   : > { %v13488_v18 = vpack.c.bf16 %v10922_v11, %v10921_v10  ;;  %v10948_v7 = vld [vmem:[%s19426_s12 + $0x8d8] sm:$0xff]  ;;  %v13536_v11 = vpack.c.bf16 %v10962_v5, %v10961_v53  ;;  %v14335_v57 = vld [vmem:[%s19425_s11] sm:$0x77]  ;;  %v14336_v59 = vld [vmem:[%s19425_s11 + $0x8] sm:$0x77] }
0x1497   : > { %v13506_v15 = vpack.c.bf16 %v10948_v7, %v10947_v6  ;;  %v5683_v58 = vrot.slane %v14335_v57, %v16264_v13  ;;  %v5691_v60 = vrot.slane %v14336_v59, %v16264_v13  ;;  %v10985_v53 = vld [vmem:[%s19426_s12 + $0xa00] sm:$0xff]  ;;  %v10986_v5 = vld [vmem:[%s19426_s12 + $0xa08] sm:$0xff] }
0x1498   : > { %13437 = vmatpush1.bf16.msra.mxu0 %v13436_v23  ;;  %13453 = vmatpush1.bf16.msra.mxu1 %v13452_v24  ;;  %v10971_v23 = vld [vmem:[%s19426_s12 + $0x990] sm:$0xff]  ;;  %v10972_v24 = vld [vmem:[%s19426_s12 + $0x998] sm:$0xff] }
0x1499   : > { %13455 = vmatprep.subr.bf16.mxu0 %v13454_v19  ;;  %13471 = vmatprep.subr.bf16.mxu1 %v13470_v3  ;;  %v10923_v19 = vld [vmem:[%s19426_s12 + $0x810] sm:$0xff]  ;;  %v10924_v3 = vld [vmem:[%s19426_s12 + $0x818] sm:$0xff]  ;;  %v13522_v48 = vpack.c.bf16 %v10972_v24, %v10971_v23  ;;  %v10949_v23 = vld [vmem:[%s19426_s12 + $0x8e0] sm:$0xff] }
0x149a   : > { %v13492_v36 = vpack.c.bf16 %v10924_v3, %v10923_v19  ;;  %v10950_v24 = vld [vmem:[%s19426_s12 + $0x8e8] sm:$0xff]  ;;  %v13540_v3 = vpack.c.bf16 %v10964_v20, %v10963_v17  ;;  %v11035_v17 = vld [vmem:[%s19426_s12 + $0xb90] sm:$0xff]  ;;  %v11036_v20 = vld [vmem:[%s19426_s12 + $0xb98] sm:$0xff] }
0x149b   : > { %10917 = vmatmul.mubr.msk.f32.vlgmr.msra.gmra.mrb[60].mxu0 %vm705_vm2, %v16611_v38  ;;  %10918 = vmatmul.mubr.msk.f32.vlgmr.msra.gmra.mrb[54].mxu1 %vm705_vm2, %v16611_v38 }
0x149c   : > { %13457 = vmatpush1.bf16.msra.mxu0 %v13456_v33  ;;  %13473 = vmatpush1.bf16.msra.mxu1 %v13472_v32  ;;  %v10973_v33 = vld [vmem:[%s19426_s12 + $0x9a0] sm:$0xff]  ;;  %v10974_v32 = vld [vmem:[%s19426_s12 + $0x9a8] sm:$0xff] }
0x149d   : > { %13459 = vmatprep.subr.bf16.mxu0 %v13458_v39  ;;  %13475 = vmatprep.subr.bf16.mxu1 %v13474_v44  ;;  %v10925_v39 = vld [vmem:[%s19426_s12 + $0x820] sm:$0xff]  ;;  %v10926_v44 = vld [vmem:[%s19426_s12 + $0x828] sm:$0xff]  ;;  %v13526_v40 = vpack.c.bf16 %v10974_v32, %v10973_v33  ;;  %v13544_v32 = vpack.c.bf16 %v10966_v47, %v10965_v28  ;;  %v11019_v28 = vld [vmem:[%s19426_s12 + $0xb10] sm:$0xff] }
0x149e   : > { %6317 = vmatprep.mubr.f32.mxu0 %v14425_v2  ;;  %6388 = vmatprep.mubr.f32.mxu1 %v14425_v2  ;;  %v13496_v49 = vpack.c.bf16 %v10926_v44, %v10925_v39  ;;  %v10983_v39 = vld [vmem:[%s19426_s12 + $0x9f0] sm:$0xff]  ;;  %v11020_v47 = vld [vmem:[%s19426_s12 + $0xb18] sm:$0xff] }
0x14a0   : > { %13461 = vmatpush1.bf16.msra.mxu0 %v13460_v46  ;;  %13477 = vmatpush1.bf16.msra.mxu1 %v13476_v22  ;;  %v10975_v46 = vld [vmem:[%s19426_s12 + $0x9b0] sm:$0xff]  ;;  %v10976_v22 = vld [vmem:[%s19426_s12 + $0x9b8] sm:$0xff] }
0x14a1   : > { %13463 = vmatprep.subr.bf16.mxu0 %v13462_v52  ;;  %13479 = vmatprep.subr.bf16.mxu1 %v13478_v37  ;;  %v10927_v52 = vld [vmem:[%s19426_s12 + $0x830] sm:$0xff]  ;;  %v10928_v37 = vld [vmem:[%s19426_s12 + $0x838] sm:$0xff]  ;;  %v13530_v55 = vpack.c.bf16 %v10976_v22, %v10975_v46 }
0x14a2   : > { %v13500_v62 = vpack.c.bf16 %v10928_v37, %v10927_v52  ;;  %v10968_v46 = vld [vmem:[%s19426_s12 + $0x978] sm:$0xff]  ;;  %v11033_v52 = vld [vmem:[%s19426_s12 + $0xb80] sm:$0xff] }
0x14a3   : > { %v13548_v22 = vpack.c.bf16 %v10968_v46, %v10967_v29  ;;  %v11022_v29 = vld [vmem:[%s19426_s12 + $0xb28] sm:$0xff]  ;;  %v11007_v46 = vld [vmem:[%s19426_s12 + $0xab0] sm:$0xff] }
0x14a4   : > { %13465 = vmatpush1.bf16.msra.mxu0 %v13464_v61  ;;  %13481 = vmatpush1.bf16.msra.mxu1 %v13480_v50  ;;  %v10977_v61 = vld [vmem:[%s19426_s12 + $0x9c0] sm:$0xff]  ;;  %v10978_v50 = vld [vmem:[%s19426_s12 + $0x9c8] sm:$0xff] }
0x14a5   : > { %13467 = vmatprep.subr.bf16.mxu0 %v13466_v0  ;;  %13483 = vmatprep.subr.bf16.mxu1 %v13482_v43  ;;  %v10929_v0 = vld [vmem:[%s19426_s12 + $0x840] sm:$0xff]  ;;  %v10930_v43 = vld [vmem:[%s19426_s12 + $0x848] sm:$0xff]  ;;  %v13534_v4 = vpack.c.bf16 %v10978_v50, %v10977_v61  ;;  %v5687_v61 = vrot.slane %v14335_v57, %v16267_v41  ;;  %v5695_v50 = vrot.slane %v14336_v59, %v16267_v41  ;;  %v10991_v59 = vld [vmem:[%s19426_s12 + $0xa30] sm:$0xff] }
0x14a6   : > { %v13504_v10 = vpack.c.bf16 %v10930_v43, %v10929_v0 }
0x14a7   : > { %v5767_v0 = vrot.slane %v5687_v61, %v16264_v13  ;;  %v5775_v43 = vrot.slane %v5695_v50, %v16264_v13 }
0x14a8   : > { %13469 = vmatpush1.bf16.msra.mxu0 %v13468_v8  ;;  %13485 = vmatpush1.bf16.msra.mxu1 %v13484_v9  ;;  %v10979_v8 = vld [vmem:[%s19426_s12 + $0x9d0] sm:$0xff]  ;;  %v10980_v9 = vld [vmem:[%s19426_s12 + $0x9d8] sm:$0xff] }
0x14a9   : > { %13487 = vmatprep.subr.bf16.mxu0 %v13486_v42  ;;  %13519 = vmatprep.subr.bf16.mxu1 %v13518_v14  ;;  %v10931_v42 = vld [vmem:[%s19426_s12 + $0x850] sm:$0xff]  ;;  %v10932_v14 = vld [vmem:[%s19426_s12 + $0x858] sm:$0xff]  ;;  %v13538_v16 = vpack.c.bf16 %v10980_v9, %v10979_v8 }
0x14aa   : > { %v13508_v19 = vpack.c.bf16 %v10932_v14, %v10931_v42  ;;  %v11003_v42 = vld [vmem:[%s19426_s12 + $0xa90] sm:$0xff] }
0x14ab   : > { %10919 = vmatmul.mubr.msk.f32.vlgmr.msra.gmra.mrb[62].mxu0 %vm705_vm2, %v16611_v38  ;;  %10920 = vmatmul.mubr.msk.f32.vlgmr.msra.gmra.mrb[56].mxu1 %vm705_vm2, %v16611_v38 }
0x14ac   : > { %13489 = vmatpush3.bf16.msra.mxu0 %v13488_v18  ;;  %13521 = vmatpush3.bf16.msra.mxu1 %v13520_v1  ;;  %v10981_v18 = vld [vmem:[%s19426_s12 + $0x9e0] sm:$0xff]  ;;  %v10982_v1 = vld [vmem:[%s19426_s12 + $0x9e8] sm:$0xff] }
0x14ad   : > { %13491 = vmatprep.subr.bf16.mxu0 %v13490_v25  ;;  %13523 = vmatprep.subr.bf16.mxu1 %v13522_v48  ;;  %v10933_v25 = vld [vmem:[%s19426_s12 + $0x860] sm:$0xff]  ;;  %v13510_v48 = vpack.c.bf16 %v10950_v24, %v10949_v23  ;;  %v13542_v26 = vpack.c.bf16 %v10982_v1, %v10981_v18  ;;  %v13552_v18 = vpack.c.bf16 %v10986_v5, %v10985_v53  ;;  %v11042_v5 = vld [vmem:[%s19426_s12 + $0xbc8] sm:$0xff] }
0x14ae   : > { %v13512_v33 = vpack.c.bf16 %v10934_v27, %v10933_v25  ;;  %v13586_v27 = vpack.c.bf16 %v11036_v20, %v11035_v17  ;;  %v11041_v53 = vld [vmem:[%s19426_s12 + $0xbc0] sm:$0xff]  ;;  %v11026_v20 = vld [vmem:[%s19426_s12 + $0xb48] sm:$0xff] }
0x14af   : > { %v11025_v17 = vld [vmem:[%s19426_s12 + $0xb40] sm:$0xff] }
0x14b0   : > { %13493 = vmatpush3.bf16.msra.mxu0 %v13492_v36  ;;  %13525 = vmatpush3.bf16.msra.mxu1 %v13524_v12  ;;  %v10951_v36 = vld [vmem:[%s19426_s12 + $0x8f0] sm:$0xff]  ;;  %v10952_v12 = vld [vmem:[%s19426_s12 + $0x8f8] sm:$0xff] }
0x14b1   : > { %13495 = vmatprep.subr.bf16.mxu0 %v13494_v35  ;;  %13527 = vmatprep.subr.bf16.mxu1 %v13526_v40  ;;  %v13514_v44 = vpack.c.bf16 %v10952_v12, %v10951_v36  ;;  %v10984_v35 = vld [vmem:[%s19426_s12 + $0x9f8] sm:$0xff]  ;;  %v10935_v40 = vld [vmem:[%s19426_s12 + $0x870] sm:$0xff]  ;;  %v11037_v36 = vld [vmem:[%s19426_s12 + $0xba0] sm:$0xff] }
0x14b2   : > { %v13546_v21 = vpack.c.bf16 %v10984_v35, %v10983_v39  ;;  %v13516_v30 = vpack.c.bf16 %v10936_v45, %v10935_v40  ;;  %v11038_v12 = vld [vmem:[%s19426_s12 + $0xba8] sm:$0xff]  ;;  %v10989_v35 = vld [vmem:[%s19426_s12 + $0xa20] sm:$0xff] }
0x14b3   : > { %v10990_v40 = vld [vmem:[%s19426_s12 + $0xa28] sm:$0xff] }
0x14b4   : > { %13497 = vmatpush3.bf16.msra.mxu0 %v13496_v49  ;;  %13529 = vmatpush3.bf16.msra.mxu1 %v13528_v31  ;;  %v11001_v49 = vld [vmem:[%s19426_s12 + $0xa80] sm:$0xff]  ;;  %v11002_v31 = vld [vmem:[%s19426_s12 + $0xa88] sm:$0xff]  ;;  %v13560_v57 = vpack.c.bf16 %v10990_v40, %v10989_v35 }
0x14b5   : > { %13499 = vmatprep.subr.bf16.mxu0 %v13498_v54  ;;  %13531 = vmatprep.subr.bf16.mxu1 %v13530_v55  ;;  %v13550_v37 = vpack.c.bf16 %v11002_v31, %v11001_v49  ;;  %v11034_v54 = vld [vmem:[%s19426_s12 + $0xb88] sm:$0xff]  ;;  %v17172_v31 = vld [vmem:[%s19425_s11 + $0x18] sm:$0x77]  ;;  %v11045_v35 = vld [vmem:[%s19426_s12 + $0xbe0] sm:$0xff] }
0x14b6   : > { %v13582_v55 = vpack.c.bf16 %v11034_v54, %v11033_v52  ;;  %v5711_v52 = vrot.slane %v17172_v31, %v16267_v41  ;;  %v11039_v54 = vld [vmem:[%s19426_s12 + $0xbb0] sm:$0xff]  ;;  %v11046_v40 = vld [vmem:[%s19426_s12 + $0xbe8] sm:$0xff] }
0x14b8   : > { %13501 = vmatpush3.bf16.msra.mxu0 %v13500_v62  ;;  %13533 = vmatpush3.bf16.msra.mxu1 %v13532_v63  ;;  %v5763_v62 = vrot.slane %v5683_v58, %v16264_v13  ;;  %v5771_v63 = vrot.slane %v5691_v60, %v16264_v13  ;;  %v10992_v60 = vld [vmem:[%s19426_s12 + $0xa38] sm:$0xff] }
0x14b9   : > { %13503 = vmatprep.subr.bf16.mxu0 %v13502_v51  ;;  %13535 = vmatprep.subr.bf16.mxu1 %v13534_v4 }
0x14bc   : > { %13505 = vmatpush3.bf16.msra.mxu0 %v13504_v10  ;;  %13537 = vmatpush3.bf16.msra.mxu1 %v13536_v11  ;;  %v11017_v10 = vld [vmem:[%s19426_s12 + $0xb00] sm:$0xff]  ;;  %v11018_v11 = vld [vmem:[%s19426_s12 + $0xb08] sm:$0xff] }
0x14bd   : > { %13507 = vmatprep.subr.bf16.mxu0 %v13506_v15  ;;  %13539 = vmatprep.subr.bf16.mxu1 %v13538_v16  ;;  %v11004_v16 = vld [vmem:[%s19426_s12 + $0xa98] sm:$0xff]  ;;  %v13584_v1 = vpack.c.bf16 %v11018_v11, %v11017_v10  ;;  %v10993_v10 = vld [vmem:[%s19426_s12 + $0xa40] sm:$0xff]  ;;  %v10994_v11 = vld [vmem:[%s19426_s12 + $0xa48] sm:$0xff] }
0x14c0   : > { %13509 = vmatpush3.bf16.msra.mxu0 %v13508_v19  ;;  %13541 = vmatpush3.bf16.msra.mxu1 %v13540_v3  ;;  %v10987_v19 = vld [vmem:[%s19426_s12 + $0xa10] sm:$0xff]  ;;  %v10988_v3 = vld [vmem:[%s19426_s12 + $0xa18] sm:$0xff] }
0x14c1   : > { %13511 = vmatprep.subr.bf16.mxu0 %v13510_v48  ;;  %13543 = vmatprep.subr.bf16.mxu1 %v13542_v26  ;;  %v13554_v26 = vpack.c.bf16 %v11004_v16, %v11003_v42  ;;  %v13556_v39 = vpack.c.bf16 %v10988_v3, %v10987_v19  ;;  %v13598_v16 = vpack.c.bf16 %v11042_v5, %v11041_v53  ;;  %v11043_v19 = vld [vmem:[%s19426_s12 + $0xbd0] sm:$0xff]  ;;  %v11044_v3 = vld [vmem:[%s19426_s12 + $0xbd8] sm:$0xff] }
0x14c4   : > { %13513 = vmatpush3.bf16.msra.mxu0 %v13512_v33  ;;  %13545 = vmatpush3.bf16.msra.mxu1 %v13544_v32  ;;  %v11005_v33 = vld [vmem:[%s19426_s12 + $0xaa0] sm:$0xff]  ;;  %v11006_v32 = vld [vmem:[%s19426_s12 + $0xaa8] sm:$0xff] }
0x14c5   : > { %13515 = vmatprep.subr.bf16.mxu0 %v13514_v44  ;;  %13547 = vmatprep.subr.bf16.mxu1 %v13546_v21  ;;  %v13588_v44 = vpack.c.bf16 %v11020_v47, %v11019_v28  ;;  %v13558_v45 = vpack.c.bf16 %v11006_v32, %v11005_v33  ;;  %v13590_v21 = vpack.c.bf16 %v11038_v12, %v11037_v36  ;;  %v10995_v28 = vld [vmem:[%s19426_s12 + $0xa50] sm:$0xff]  ;;  %v10996_v47 = vld [vmem:[%s19426_s12 + $0xa58] sm:$0xff] }
0x14c6   : > { %v13602_v32 = vpack.c.bf16 %v11044_v3, %v11043_v19  ;;  %v11027_v36 = vld [vmem:[%s19426_s12 + $0xb50] sm:$0xff]  ;;  %v11028_v12 = vld [vmem:[%s19426_s12 + $0xb58] sm:$0xff] }
0x14c8   : > { %13517 = vmatpush3.bf16.msra.mxu0 %v13516_v30  ;;  %13549 = vmatpush3.bf16.msra.mxu1 %v13548_v22  ;;  %v11021_v30 = vld [vmem:[%s19426_s12 + $0xb20] sm:$0xff]  ;;  %v17165_v22 = vld [vmem:[%s19425_s11 + $0x10] sm:$0x77] }
0x14c9   : > { %13551 = vmatprep.subr.bf16.mxu0 %v13550_v37  ;;  %13583 = vmatprep.subr.bf16.mxu1 %v13582_v55  ;;  %v5703_v49 = vrot.slane %v17165_v22, %v16267_v41  ;;  %v11008_v37 = vld [vmem:[%s19426_s12 + $0xab8] sm:$0xff]  ;;  %v13592_v58 = vpack.c.bf16 %v11022_v29, %v11021_v30  ;;  %v13604_v30 = vpack.c.bf16 %v11028_v12, %v11027_v36  ;;  %v10997_v29 = vld [vmem:[%s19426_s12 + $0xa60] sm:$0xff]  ;;  %v11099_v36 = vld [vmem:[%s19426_s12 + $0xd90] sm:$0xff] }
0x14ca   : > { %v11040_v55 = vld [vmem:[%s19426_s12 + $0xbb8] sm:$0xff]  ;;  %v13562_v61 = vpack.c.bf16 %v11008_v37, %v11007_v46  ;;  %v10998_v46 = vld [vmem:[%s19426_s12 + $0xa68] sm:$0xff]  ;;  %v13606_v37 = vpack.c.bf16 %v11046_v40, %v11045_v35 }
0x14cb   : > { %v13594_v50 = vpack.c.bf16 %v11040_v55, %v11039_v54  ;;  %v11030_v54 = vld [vmem:[%s19426_s12 + $0xb68] sm:$0xff]  ;;  %v11015_v55 = vld [vmem:[%s19426_s12 + $0xaf0] sm:$0xff]  ;;  %v11100_v12 = vld [vmem:[%s19426_s12 + $0xd98] sm:$0xff] }
0x154e   : > { %v5893_v51 = vpop.f32.mrb[56].mxu0  ;;  %v5964_v4 = vpop.f32.mrb[50].mxu1 }
0x154f   : > { %v5894_v6 = vadd.f32 %v5893_v51, %v5763_v62  ;;  %v5965_v7 = vadd.f32 %v5964_v4, %v5771_v63  ;;  %v5895_v8 = vpop.f32.mrb[57].mxu0  ;;  %v5966_v9 = vpop.f32.mrb[51].mxu1  ;;  %v11023_v62 = vld [vmem:[%s19426_s12 + $0xb30] sm:$0xff]  ;;  %v11024_v63 = vld [vmem:[%s19426_s12 + $0xb38] sm:$0xff]  ;;  %v5791_v51 = vrot.slane %v5711_v52, %v16264_v13  ;;  %v11010_v4 = vld [vmem:[%s19426_s12 + $0xac8] sm:$0xff] }
0x1550   : > { %v5896_v14 = vadd.f32 %v5895_v8, %v5767_v0  ;;  %v5967_v15 = vadd.f32 %v5966_v9, %v5775_v43  ;;  %v11009_v0 = vld [vmem:[%s19426_s12 + $0xac0] sm:$0xff]  ;;  %v5783_v43 = vrot.slane %v5703_v49, %v16264_v13  ;;  %v13564_v8 = vpack.c.bf16 %v10992_v60, %v10991_v59  ;;  %v11047_v59 = vld [vmem:[%s19426_s12 + $0xbf0] sm:$0xff]  ;;  %v11048_v60 = vld [vmem:[%s19426_s12 + $0xbf8] sm:$0xff] }
0x1551   : > { %v6395_v25 = vmax.f32 %v5894_v6, 0.0  ;;  %v6397_v48 = vmax.f32 %v5965_v7, 0.0  ;;  %v13596_v9 = vpack.c.bf16 %v11024_v63, %v11023_v62  ;;  %v5707_v49 = vrot.slane %v17172_v31, %v16264_v13  ;;  %v17285_v31 = vld [vmem:[%s19425_s11 + $0x20] sm:$0x77] }
0x1552   : > { %v6396_v23 = vmax.f32 %v5896_v14, 0.0  ;;  %v6398_v24 = vmax.f32 %v5967_v15, 0.0  ;;  %v13566_v15 = vpack.c.bf16 %v11010_v4, %v11009_v0  ;;  %v13576_v63 = vpack.c.bf16 %v10998_v46, %v10997_v29  ;;  %v11031_v4 = vld [vmem:[%s19426_s12 + $0xb70] sm:$0xff] }
0x1553   : > { %v5787_v53 = vrot.slane %v5707_v49, %v16264_v13  ;;  %v13650_v49 = vpack.c.bf16 %v11100_v12, %v11099_v36  ;;  %v11075_v36 = vld [vmem:[%s19426_s12 + $0xcd0] sm:$0xff]  ;;  %v11076_v12 = vld [vmem:[%s19426_s12 + $0xcd8] sm:$0xff] }
0x1554   : > { %6736 = vmatprep.mubr.f32.mxu0 %v6396_v23  ;;  %6806 = vmatprep.mubr.f32.mxu1 %v6398_v24  ;;  %v11011_v23 = vld [vmem:[%s19426_s12 + $0xad0] sm:$0xff] }
0x1555   : > { %6737 = vmatmul.mubr.f32.vlgmr.msra.gmra.mrb[64].mxu0 %v6395_v25  ;;  %6807 = vmatmul.mubr.f32.vlgmr.msra.gmra.mrb[58].mxu1 %v6397_v48 }
0x1556   : > { %13553 = vmatpush3.bf16.msra.mxu0 %v13552_v18  ;;  %13585 = vmatpush3.bf16.msra.mxu1 %v13584_v1  ;;  %v11012_v1 = vld [vmem:[%s19426_s12 + $0xad8] sm:$0xff] }
0x1557   : > { %13555 = vmatprep.subr.bf16.mxu0 %v13554_v26  ;;  %13587 = vmatprep.subr.bf16.mxu1 %v13586_v27  ;;  %v13568_v26 = vpack.c.bf16 %v10994_v11, %v10993_v10  ;;  %v13600_v27 = vpack.c.bf16 %v11026_v20, %v11025_v17  ;;  %v13570_v33 = vpack.c.bf16 %v11012_v1, %v11011_v23  ;;  %v11065_v10 = vld [vmem:[%s19426_s12 + $0xc80] sm:$0xff]  ;;  %v11066_v11 = vld [vmem:[%s19426_s12 + $0xc88] sm:$0xff] }
0x155a   : > { %13557 = vmatpush3.bf16.msra.mxu0 %v13556_v39  ;;  %13589 = vmatpush3.bf16.msra.mxu1 %v13588_v44  ;;  %v11013_v39 = vld [vmem:[%s19426_s12 + $0xae0] sm:$0xff]  ;;  %v11014_v44 = vld [vmem:[%s19426_s12 + $0xae8] sm:$0xff] }
0x155b   : > { %13559 = vmatprep.subr.bf16.mxu0 %v13558_v45  ;;  %13591 = vmatprep.subr.bf16.mxu1 %v13590_v21  ;;  %v5699_v45 = vrot.slane %v17165_v22, %v16264_v13  ;;  %v13572_v21 = vpack.c.bf16 %v10996_v47, %v10995_v28  ;;  %v13574_v52 = vpack.c.bf16 %v11014_v44, %v11013_v39  ;;  %v11029_v22 = vld [vmem:[%s19426_s12 + $0xb60] sm:$0xff]  ;;  %v11067_v47 = vld [vmem:[%s19426_s12 + $0xc90] sm:$0xff] }
0x155c   : > { %v13608_v0 = vpack.c.bf16 %v11030_v54, %v11029_v22  ;;  %v11070_v22 = vld [vmem:[%s19426_s12 + $0xca8] sm:$0xff] }
0x155d   : > { %v5779_v62 = vrot.slane %v5699_v45, %v16264_v13  ;;  %v11051_v45 = vld [vmem:[%s19426_s12 + $0xc10] sm:$0xff] }
0x155e   : > { %v17211_v6 = vpop.f32.mrb[58].mxu0  ;;  %v17213_v7 = vpop.f32.mrb[52].mxu1  ;;  %13561 = vmatpush3.bf16.msra.mxu0 %v13560_v57  ;;  %13593 = vmatpush3.bf16.msra.mxu1 %v13592_v58  ;;  %v5719_v57 = vrot.slane %v17285_v31, %v16267_v41  ;;  %v11016_v58 = vld [vmem:[%s19426_s12 + $0xaf8] sm:$0xff] }
0x155f   : > { %v6037_v42 = vpop.f32.mrb[59].mxu0  ;;  %v6108_v14 = vpop.f32.mrb[53].mxu1  ;;  %13563 = vmatprep.subr.bf16.mxu0 %v13562_v61  ;;  %13595 = vmatprep.subr.bf16.mxu1 %v13594_v50  ;;  %v17301_v61 = vld [vmem:[%s19425_s11 + $0x28] sm:$0x77]  ;;  %v13578_v5 = vpack.c.bf16 %v11016_v58, %v11015_v55  ;;  %v6036_v1 = vadd.f32 %v17211_v6, %v5779_v62  ;;  %v6107_v19 = vadd.f32 %v17213_v7, %v5787_v53  ;;  %v11081_v6 = vld [vmem:[%s19426_s12 + $0xd00] sm:$0xff]  ;;  %v11103_v53 = vld [vmem:[%s19426_s12 + $0xdb0] sm:$0xff] }
0x1560   : > { %v6038_v24 = vadd.f32 %v6037_v42, %v5783_v43  ;;  %v6109_v18 = vadd.f32 %v6108_v14, %v5791_v51  ;;  %v5727_v50 = vrot.slane %v17301_v61, %v16267_v41  ;;  %v10999_v43 = vld [vmem:[%s19426_s12 + $0xa70] sm:$0xff]  ;;  %v11000_v51 = vld [vmem:[%s19426_s12 + $0xa78] sm:$0xff]  ;;  %v5799_v42 = vrot.slane %v5719_v57, %v16264_v13  ;;  %v11097_v14 = vld [vmem:[%s19426_s12 + $0xd80] sm:$0xff] }
0x1561   : > { %v13580_v23 = vpack.c.bf16 %v11000_v51, %v10999_v43  ;;  %v11082_v7 = vld [vmem:[%s19426_s12 + $0xd08] sm:$0xff]  ;;  %v6399_v44 = vmax.f32 %v6036_v1, 0.0  ;;  %v6401_v35 = vmax.f32 %v6107_v19, 0.0  ;;  %v11101_v55 = vld [vmem:[%s19426_s12 + $0xda0] sm:$0xff]  ;;  %v11071_v51 = vld [vmem:[%s19426_s12 + $0xcb0] sm:$0xff] }
0x1562   : > { %v6400_v25 = vmax.f32 %v6038_v24, 0.0  ;;  %v6402_v48 = vmax.f32 %v6109_v18, 0.0  ;;  %13565 = vmatpush3.bf16.msra.mxu0 %v13564_v8  ;;  %13597 = vmatpush3.bf16.msra.mxu1 %v13596_v9  ;;  %v13610_v8 = vpack.c.bf16 %v11048_v60, %v11047_v59  ;;  %v11032_v9 = vld [vmem:[%s19426_s12 + $0xb78] sm:$0xff]  ;;  %v13614_v18 = vpack.c.bf16 %v11066_v11, %v11065_v10  ;;  %v11102_v57 = vld [vmem:[%s19426_s12 + $0xda8] sm:$0xff]  ;;  %v11055_v11 = vld [vmem:[%s19426_s12 + $0xc30] sm:$0xff] }
0x1563   : > { %13567 = vmatprep.subr.bf16.mxu0 %v13566_v15  ;;  %13599 = vmatprep.subr.bf16.mxu1 %v13598_v16  ;;  %v11098_v15 = vld [vmem:[%s19426_s12 + $0xd88] sm:$0xff]  ;;  %v5807_v16 = vrot.slane %v5727_v50, %v16264_v13  ;;  %v13612_v24 = vpack.c.bf16 %v11032_v9, %v11031_v4  ;;  %v13648_v40 = vpack.c.bf16 %v11082_v7, %v11081_v6  ;;  %v11053_v50 = vld [vmem:[%s19426_s12 + $0xc20] sm:$0xff]  ;;  %v11072_v4 = vld [vmem:[%s19426_s12 + $0xcb8] sm:$0xff] }
0x1564   : > { %6876 = vmatprep.mubr.f32.mxu0 %v6400_v25  ;;  %6946 = vmatprep.mubr.f32.mxu1 %v6402_v48  ;;  %v13646_v48 = vpack.c.bf16 %v11098_v15, %v11097_v14  ;;  %v11054_v62 = vld [vmem:[%s19426_s12 + $0xc28] sm:$0xff]  ;;  %v13626_v10 = vpack.c.bf16 %v11072_v4, %v11071_v51  ;;  %v11087_v14 = vld [vmem:[%s19426_s12 + $0xd30] sm:$0xff]  ;;  %v11057_v6 = vld [vmem:[%s19426_s12 + $0xc40] sm:$0xff] }
0x1565   : > { %v11086_v43 = vld [vmem:[%s19426_s12 + $0xd28] sm:$0xff]  ;;  %v11080_v51 = vld [vmem:[%s19426_s12 + $0xcf8] sm:$0xff]  ;;  %v17516_v4 = vld [vmem:[%s19425_s11 + $0x30] sm:$0x77] }
0x1566   : > { %13569 = vmatpush3.bf16.msra.mxu0 %v13568_v26  ;;  %13601 = vmatpush3.bf16.msra.mxu1 %v13600_v27  ;;  %v11049_v26 = vld [vmem:[%s19426_s12 + $0xc00] sm:$0xff]  ;;  %v11050_v27 = vld [vmem:[%s19426_s12 + $0xc08] sm:$0xff] }
0x1567   : > { %13571 = vmatprep.subr.bf16.mxu0 %v13570_v33  ;;  %13603 = vmatprep.subr.bf16.mxu1 %v13602_v32  ;;  %v11068_v32 = vld [vmem:[%s19426_s12 + $0xc98] sm:$0xff]  ;;  %v13616_v39 = vpack.c.bf16 %v11050_v27, %v11049_v26  ;;  %v11106_v1 = vld [vmem:[%s19426_s12 + $0xdc8] sm:$0xff] }
0x1568   : > { %v13618_v46 = vpack.c.bf16 %v11068_v32, %v11067_v47  ;;  %v11058_v7 = vld [vmem:[%s19426_s12 + $0xc48] sm:$0xff]  ;;  %v11089_v47 = vld [vmem:[%s19426_s12 + $0xd40] sm:$0xff] }
0x1569   : > { %v11090_v32 = vld [vmem:[%s19426_s12 + $0xd48] sm:$0xff] }
0x156a   : > { %13573 = vmatpush3.bf16.msra.mxu0 %v13572_v21  ;;  %13605 = vmatpush3.bf16.msra.mxu1 %v13604_v30  ;;  %v11052_v21 = vld [vmem:[%s19426_s12 + $0xc18] sm:$0xff]  ;;  %v11083_v30 = vld [vmem:[%s19426_s12 + $0xd10] sm:$0xff] }
0x156b   : > { %13575 = vmatprep.subr.bf16.mxu0 %v13574_v52  ;;  %13607 = vmatprep.subr.bf16.mxu1 %v13606_v37  ;;  %v11084_v52 = vld [vmem:[%s19426_s12 + $0xd18] sm:$0xff]  ;;  %v11069_v37 = vld [vmem:[%s19426_s12 + $0xca0] sm:$0xff]  ;;  %v13620_v58 = vpack.c.bf16 %v11052_v21, %v11051_v45  ;;  %v13634_v45 = vpack.c.bf16 %v11076_v12, %v11075_v36  ;;  %v11059_v21 = vld [vmem:[%s19426_s12 + $0xc50] sm:$0xff] }
0x156c   : > { %v13652_v59 = vpack.c.bf16 %v11084_v52, %v11083_v30  ;;  %v13622_v60 = vpack.c.bf16 %v11070_v22, %v11069_v37  ;;  %v11060_v30 = vld [vmem:[%s19426_s12 + $0xc58] sm:$0xff]  ;;  %v11077_v52 = vld [vmem:[%s19426_s12 + $0xce0] sm:$0xff]  ;;  %v11078_v37 = vld [vmem:[%s19426_s12 + $0xce8] sm:$0xff] }
0x156d   : > { %v11109_v22 = vld [vmem:[%s19426_s12 + $0xde0] sm:$0xff] }
0x156e   : > { %v17333_v17 = vpop.f32.mrb[60].mxu0  ;;  %v17335_v20 = vpop.f32.mrb[54].mxu1  ;;  %13577 = vmatpush3.bf16.msra.mxu0 %v13576_v63  ;;  %13609 = vmatpush3.bf16.msra.mxu1 %v13608_v0  ;;  %v11085_v63 = vld [vmem:[%s19426_s12 + $0xd20] sm:$0xff]  ;;  %v13654_v0 = vpack.c.bf16 %v11102_v57, %v11101_v55  ;;  %v13636_v55 = vpack.c.bf16 %v11060_v30, %v11059_v21  ;;  %v5715_v57 = vrot.slane %v17285_v31, %v16264_v13  ;;  %v11131_v21 = vld [vmem:[%s19426_s12 + $0xe90] sm:$0xff] }
0x156f   : > { %v6179_v3 = vpop.f32.mrb[61].mxu0  ;;  %v6250_v25 = vpop.f32.mrb[55].mxu1  ;;  %13579 = vmatprep.subr.bf16.mxu0 %v13578_v5  ;;  %13611 = vmatprep.subr.bf16.mxu1 %v13610_v8  ;;  %v11104_v5 = vld [vmem:[%s19426_s12 + $0xdb8] sm:$0xff]  ;;  %v13624_v8 = vpack.c.bf16 %v11054_v62, %v11053_v50  ;;  %v13656_v9 = vpack.c.bf16 %v11086_v43, %v11085_v63  ;;  %v11062_v50 = vld [vmem:[%s19426_s12 + $0xc68] sm:$0xff]  ;;  %v11093_v62 = vld [vmem:[%s19426_s12 + $0xd60] sm:$0xff]  ;;  %v5723_v63 = vrot.slane %v17301_v61, %v16264_v13 }
0x1570   : > { %v6180_v28 = vadd.f32 %v6179_v3, %v5799_v42  ;;  %v6251_v33 = vadd.f32 %v6250_v25, %v5807_v16  ;;  %v11056_v42 = vld [vmem:[%s19426_s12 + $0xc38] sm:$0xff]  ;;  %v13658_v15 = vpack.c.bf16 %v11104_v5, %v11103_v53  ;;  %v11079_v43 = vld [vmem:[%s19426_s12 + $0xcf0] sm:$0xff]  ;;  %v5735_v61 = vrot.slane %v17516_v4, %v16267_v41  ;;  %v11113_v12 = vld [vmem:[%s19426_s12 + $0xe00] sm:$0xff] }
0x1571   : > { %v11088_v16 = vld [vmem:[%s19426_s12 + $0xd38] sm:$0xff]  ;;  %v13628_v25 = vpack.c.bf16 %v11056_v42, %v11055_v11  ;;  %v11111_v53 = vld [vmem:[%s19426_s12 + $0xdf0] sm:$0xff]  ;;  %v5795_v11 = vrot.slane %v5715_v57, %v16264_v13 }
0x1572   : > { %13581 = vmatpush3.bf16.msra.mxu0 %v13580_v23  ;;  %13613 = vmatpush3.bf16.msra.mxu1 %v13612_v24  ;;  %v6404_v29 = vmax.f32 %v6180_v28, 0.0  ;;  %v6406_v54 = vmax.f32 %v6251_v33, 0.0  ;;  %v11073_v23 = vld [vmem:[%s19426_s12 + $0xcc0] sm:$0xff]  ;;  %v11074_v24 = vld [vmem:[%s19426_s12 + $0xcc8] sm:$0xff]  ;;  %v13660_v27 = vpack.c.bf16 %v11088_v16, %v11087_v14  ;;  %v11112_v5 = vld [vmem:[%s19426_s12 + $0xdf8] sm:$0xff]  ;;  %v13642_v14 = vpack.c.bf16 %v11080_v51, %v11079_v43 }
0x1573   : > { %13615 = vmatprep.subr.bf16.mxu0 %v13614_v18  ;;  %13647 = vmatprep.subr.bf16.mxu1 %v13646_v48  ;;  %v11105_v18 = vld [vmem:[%s19426_s12 + $0xdc0] sm:$0xff]  ;;  %v13630_v28 = vpack.c.bf16 %v11074_v24, %v11073_v23  ;;  %v11064_v16 = vld [vmem:[%s19426_s12 + $0xc78] sm:$0xff]  ;;  %v5803_v23 = vrot.slane %v5723_v63, %v16264_v13  ;;  %v13674_v24 = vpack.c.bf16 %v11112_v5, %v11111_v53  ;;  %v11166_v63 = vld [vmem:[%s19426_s12 + $0xfa8] sm:$0xff] }
0x1574   : > { %v13662_v33 = vpack.c.bf16 %v11106_v1, %v11105_v18  ;;  %v11096_v18 = vld [vmem:[%s19426_s12 + $0xd78] sm:$0xff]  ;;  %v11129_v1 = vld [vmem:[%s19426_s12 + $0xe80] sm:$0xff]  ;;  %v11118_v53 = vld [vmem:[%s19426_s12 + $0xe28] sm:$0xff] }
0x1575   : > { %6877 = vmatmul.mubr.f32.vlgmr.msra.gmra.mrb[66].mxu0 %v6399_v44  ;;  %6947 = vmatmul.mubr.f32.vlgmr.msra.gmra.mrb[60].mxu1 %v6401_v35  ;;  %v11108_v44 = vld [vmem:[%s19426_s12 + $0xdd8] sm:$0xff]  ;;  %v13632_v35 = vpack.c.bf16 %v11058_v7, %v11057_v6  ;;  %v11162_v6 = vld [vmem:[%s19426_s12 + $0xf88] sm:$0xff]  ;;  %v11149_v5 = vld [vmem:[%s19426_s12 + $0xf20] sm:$0xff] }
0x1576   : > { %13617 = vmatpush3.bf16.msra.mxu0 %v13616_v39  ;;  %7016 = vmatprep.mubr.f32.mxu0 %v6404_v29  ;;  %v11107_v39 = vld [vmem:[%s19426_s12 + $0xdd0] sm:$0xff]  ;;  %v11148_v57 = vld [vmem:[%s19426_s12 + $0xf18] sm:$0xff] }
0x1577   : > { %13649 = vmatpush3.bf16.msra.mxu1 %v13648_v40  ;;  %7086 = vmatprep.mubr.f32.mxu1 %v6406_v54  ;;  %v13664_v40 = vpack.c.bf16 %v11090_v32, %v11089_v47  ;;  %v11091_v29 = vld [vmem:[%s19426_s12 + $0xd50] sm:$0xff]  ;;  %v11110_v54 = vld [vmem:[%s19426_s12 + $0xde8] sm:$0xff] }
0x1578   : > { %13619 = vmatprep.subr.bf16.mxu0 %v13618_v46  ;;  %13651 = vmatprep.subr.bf16.mxu1 %v13650_v49  ;;  %v13666_v46 = vpack.c.bf16 %v11108_v44, %v11107_v39  ;;  %v11092_v49 = vld [vmem:[%s19426_s12 + $0xd58] sm:$0xff]  ;;  %v13670_v31 = vpack.c.bf16 %v11110_v54, %v11109_v22  ;;  %v11114_v39 = vld [vmem:[%s19426_s12 + $0xe08] sm:$0xff]  ;;  %v6249_v44 = vadd.f32 %v17335_v20, %v5803_v23  ;;  %v11147_v22 = vld [vmem:[%s19426_s12 + $0xf10] sm:$0xff] }
0x1579   : > { %v11132_v20 = vld [vmem:[%s19426_s12 + $0xe98] sm:$0xff]  ;;  %v13716_v43 = vpack.c.bf16 %v11148_v57, %v11147_v22  ;;  %v11141_v22 = vld [vmem:[%s19426_s12 + $0xee0] sm:$0xff]  ;;  %v11174_v57 = vld [vmem:[%s19426_s12 + $0xfe8] sm:$0xff] }
0x157a   : > { %13621 = vmatpush3.bf16.msra.mxu0 %v13620_v58  ;;  %v13668_v58 = vpack.c.bf16 %v11092_v49, %v11091_v29  ;;  %v13680_v29 = vpack.c.bf16 %v11114_v39, %v11113_v12  ;;  %v6405_v54 = vmax.f32 %v6249_v44, 0.0  ;;  %v11121_v12 = vld [vmem:[%s19426_s12 + $0xe40] sm:$0xff]  ;;  %v11122_v39 = vld [vmem:[%s19426_s12 + $0xe48] sm:$0xff] }
0x157b   : > { %13653 = vmatpush3.bf16.msra.mxu1 %v13652_v59  ;;  %13623 = vmatprep.subr.bf16.mxu0 %v13622_v60  ;;  %v13638_v59 = vpack.c.bf16 %v11078_v37, %v11077_v52  ;;  %v11061_v60 = vld [vmem:[%s19426_s12 + $0xc60] sm:$0xff]  ;;  %v11115_v37 = vld [vmem:[%s19426_s12 + $0xe10] sm:$0xff] }
0x157c   : > { %13655 = vmatprep.subr.bf16.mxu1 %v13654_v0  ;;  %v11094_v0 = vld [vmem:[%s19426_s12 + $0xd68] sm:$0xff]  ;;  %v11153_v44 = vld [vmem:[%s19426_s12 + $0xf40] sm:$0xff] }
0x157d   : > { %v13672_v42 = vpack.c.bf16 %v11094_v0, %v11093_v62  ;;  %v11165_v62 = vld [vmem:[%s19426_s12 + $0xfa0] sm:$0xff] }
0x157e   : > { %v17435_v19 = vpop.f32.mrb[62].mxu0  ;;  %v17437_v3 = vpop.f32.mrb[56].mxu1  ;;  %13625 = vmatpush3.bf16.msra.mxu0 %v13624_v8  ;;  %v17529_v8 = vld [vmem:[%s19425_s11 + $0x38] sm:$0x77] }
0x157f   : > { %13657 = vmatpush3.bf16.msra.mxu1 %v13656_v9  ;;  %v17439_v48 = vpop.f32.mrb[63].mxu0  ;;  %v17441_v26 = vpop.f32.mrb[57].mxu1  ;;  %13627 = vmatprep.subr.bf16.mxu0 %v13626_v10  ;;  %v5743_v9 = vrot.slane %v17529_v8, %v16267_v41  ;;  %v13640_v10 = vpack.c.bf16 %v11062_v50, %v11061_v60  ;;  %v11095_v41 = vld [vmem:[%s19426_s12 + $0xd70] sm:$0xff] }
0x1580   : > { %13659 = vmatprep.subr.bf16.mxu1 %v13658_v15  ;;  %v11063_v15 = vld [vmem:[%s19426_s12 + $0xc70] sm:$0xff]  ;;  %v13676_v32 = vpack.c.bf16 %v11096_v18, %v11095_v41  ;;  %v11120_v18 = vld [vmem:[%s19426_s12 + $0xe38] sm:$0xff] }
0x1581   : > { %v5823_v7 = vrot.slane %v5743_v9, %v16264_v13  ;;  %v13644_v47 = vpack.c.bf16 %v11064_v16, %v11063_v15  ;;  %v13718_v9 = vpack.c.bf16 %v11166_v63, %v11165_v62  ;;  %v11168_v15 = vld [vmem:[%s19426_s12 + $0xfb8] sm:$0xff]  ;;  %v11125_v62 = vld [vmem:[%s19426_s12 + $0xe60] sm:$0xff]  ;;  %v11126_v63 = vld [vmem:[%s19426_s12 + $0xe68] sm:$0xff] }
0x1582   : > { %13629 = vmatpush3.bf16.msra.mxu0 %v13628_v25  ;;  %v11130_v25 = vld [vmem:[%s19426_s12 + $0xe88] sm:$0xff] }
0x1583   : > { %13661 = vmatpush3.bf16.msra.mxu1 %v13660_v27  ;;  %13631 = vmatprep.subr.bf16.mxu0 %v13630_v28  ;;  %v5815_v27 = vrot.slane %v5735_v61, %v16264_v13  ;;  %v11161_v28 = vld [vmem:[%s19426_s12 + $0xf80] sm:$0xff]  ;;  %v13678_v36 = vpack.c.bf16 %v11130_v25, %v11129_v1  ;;  %v6393_v30 = vadd.f32 %v17441_v26, %v5823_v7  ;;  %v11116_v26 = vld [vmem:[%s19426_s12 + $0xe18] sm:$0xff]  ;;  %v11151_v1 = vld [vmem:[%s19426_s12 + $0xf30] sm:$0xff] }
0x1584   : > { %13663 = vmatprep.subr.bf16.mxu1 %v13662_v33  ;;  %v6178_v33 = vadd.f32 %v17333_v17, %v5795_v11  ;;  %v11145_v17 = vld [vmem:[%s19426_s12 + $0xf00] sm:$0xff]  ;;  %v13684_v0 = vpack.c.bf16 %v11116_v26, %v11115_v37  ;;  %v11135_v11 = vld [vmem:[%s19426_s12 + $0xeb0] sm:$0xff]  ;;  %v11156_v26 = vld [vmem:[%s19426_s12 + $0xf58] sm:$0xff] }
0x1585   : > { %v11117_v61 = vld [vmem:[%s19426_s12 + $0xe20] sm:$0xff] }
0x1586   : > { %13633 = vmatpush3.bf16.msra.mxu0 %v13632_v35  ;;  %v13710_v35 = vpack.c.bf16 %v11162_v6, %v11161_v28  ;;  %v6403_v49 = vmax.f32 %v6178_v33, 0.0  ;;  %v13688_v16 = vpack.c.bf16 %v11118_v53, %v11117_v61  ;;  %v11137_v28 = vld [vmem:[%s19426_s12 + $0xec0] sm:$0xff]  ;;  %v11138_v6 = vld [vmem:[%s19426_s12 + $0xec8] sm:$0xff]  ;;  %v11144_v61 = vld [vmem:[%s19426_s12 + $0xef8] sm:$0xff] }
0x1587   : > { %13665 = vmatpush3.bf16.msra.mxu1 %v13664_v40  ;;  %13635 = vmatprep.subr.bf16.mxu0 %v13634_v45  ;;  %v11146_v40 = vld [vmem:[%s19426_s12 + $0xf08] sm:$0xff]  ;;  %v6322_v45 = vadd.f32 %v17439_v48, %v5815_v27  ;;  %v11164_v48 = vld [vmem:[%s19426_s12 + $0xf98] sm:$0xff]  ;;  %v11169_v7 = vld [vmem:[%s19426_s12 + $0xfc0] sm:$0xff] }
0x1588   : > { %13667 = vmatprep.subr.bf16.mxu1 %v13666_v46  ;;  %v11163_v46 = vld [vmem:[%s19426_s12 + $0xf90] sm:$0xff]  ;;  %v13712_v52 = vpack.c.bf16 %v11146_v40, %v11145_v17  ;;  %v11152_v27 = vld [vmem:[%s19426_s12 + $0xf38] sm:$0xff]  ;;  %v11154_v17 = vld [vmem:[%s19426_s12 + $0xf48] sm:$0xff] }
0x1589   : > { %v6408_v60 = vmax.f32 %v6322_v45, 0.0  ;;  %v13714_v50 = vpack.c.bf16 %v11164_v48, %v11163_v46  ;;  %v11139_v40 = vld [vmem:[%s19426_s12 + $0xed0] sm:$0xff]  ;;  %v11140_v45 = vld [vmem:[%s19426_s12 + $0xed8] sm:$0xff] }
0x158a   : > { %13637 = vmatpush3.bf16.msra.mxu0 %v13636_v55  ;;  %v13682_v55 = vpack.c.bf16 %v11132_v20, %v11131_v21  ;;  %v11171_v21 = vld [vmem:[%s19426_s12 + $0xfd0] sm:$0xff]  ;;  %v11172_v20 = vld [vmem:[%s19426_s12 + $0xfd8] sm:$0xff]  ;;  %v13698_v46 = vpack.c.bf16 %v11140_v45, %v11139_v40 }
0x158b   : > { %13669 = vmatpush3.bf16.msra.mxu1 %v13668_v58  ;;  %13639 = vmatprep.subr.bf16.mxu0 %v13638_v59  ;;  %v11133_v58 = vld [vmem:[%s19426_s12 + $0xea0] sm:$0xff]  ;;  %v11134_v59 = vld [vmem:[%s19426_s12 + $0xea8] sm:$0xff]  ;;  %v11123_v48 = vld [vmem:[%s19426_s12 + $0xe50] sm:$0xff]  ;;  %v13730_v37 = vpack.c.bf16 %v11172_v20, %v11171_v21 }
0x158c   : > { %13671 = vmatprep.subr.bf16.mxu1 %v13670_v31  ;;  %v6410_v31 = vmax.f32 %v6393_v30, 0.0  ;;  %v13686_v51 = vpack.c.bf16 %v11134_v59, %v11133_v58  ;;  %v13696_v30 = vpack.c.bf16 %v11122_v39, %v11121_v12  ;;  %v5731_v59 = vrot.slane %v17516_v4, %v16264_v13  ;;  %v11175_v53 = vld [vmem:[%s19426_s12 + $0xff0] sm:$0xff] }
0x158e   : > { %13641 = vmatpush3.bf16.msra.mxu0 %v13640_v10  ;;  %v11150_v10 = vld [vmem:[%s19426_s12 + $0xf28] sm:$0xff] }
0x158f   : > { %13673 = vmatpush3.bf16.msra.mxu1 %v13672_v42  ;;  %13643 = vmatprep.subr.bf16.mxu0 %v13642_v14  ;;  %v11136_v42 = vld [vmem:[%s19426_s12 + $0xeb8] sm:$0xff]  ;;  %v11167_v14 = vld [vmem:[%s19426_s12 + $0xfb0] sm:$0xff]  ;;  %v13720_v41 = vpack.c.bf16 %v11150_v10, %v11149_v5  ;;  %v13704_v5 = vpack.c.bf16 %v11126_v63, %v11125_v62 }
0x1590   : > { %13675 = vmatprep.subr.bf16.mxu1 %v13674_v24  ;;  %v13690_v23 = vpack.c.bf16 %v11136_v42, %v11135_v11  ;;  %v11119_v24 = vld [vmem:[%s19426_s12 + $0xe30] sm:$0xff]  ;;  %v13722_v25 = vpack.c.bf16 %v11168_v15, %v11167_v14  ;;  %v11128_v14 = vld [vmem:[%s19426_s12 + $0xe78] sm:$0xff] }
0x1591   : > { %v13692_v33 = vpack.c.bf16 %v11120_v18, %v11119_v24  ;;  %v11127_v42 = vld [vmem:[%s19426_s12 + $0xe70] sm:$0xff] }
0x1592   : > { %13645 = vmatpush3.bf16.msra.mxu0 %v13644_v47  ;;  %v11170_v47 = vld [vmem:[%s19426_s12 + $0xfc8] sm:$0xff]  ;;  %v13708_v24 = vpack.c.bf16 %v11128_v14, %v11127_v42  ;;  %v11184_v42 = vld [vmem:[%s19418_s4 + $0x138] sm:$0xff] }
0x1593   : > { %13677 = vmatpush3.bf16.msra.mxu1 %v13676_v32  ;;  %13679 = vmatprep.subr.bf16.mxu0 %v13678_v36  ;;  %v13724_v32 = vpack.c.bf16 %v11152_v27, %v11151_v1  ;;  %v13694_v36 = vpack.c.bf16 %v11138_v6, %v11137_v28 }
0x1594   : > { %13711 = vmatprep.subr.bf16.mxu1 %v13710_v35  ;;  %v13726_v35 = vpack.c.bf16 %v11170_v47, %v11169_v7 }
0x1595   : > { %7017 = vmatmul.mubr.f32.vlgmr.msra.gmra.mrb[68].mxu0 %v6403_v49  ;;  %v11124_v49 = vld [vmem:[%s19426_s12 + $0xe58] sm:$0xff] }
0x1596   : > { %7087 = vmatmul.mubr.f32.vlgmr.msra.gmra.mrb[62].mxu1 %v6405_v54  ;;  %13681 = vmatpush3.bf16.msra.mxu0 %v13680_v29  ;;  %v13728_v29 = vpack.c.bf16 %v11154_v17, %v11153_v44  ;;  %v11142_v54 = vld [vmem:[%s19426_s12 + $0xee8] sm:$0xff]  ;;  %v13700_v58 = vpack.c.bf16 %v11124_v49, %v11123_v48 }
0x1597   : > { %7156 = vmatprep.mubr.f32.mxu0 %v6408_v60  ;;  %13713 = vmatpush3.bf16.msra.mxu1 %v13712_v52  ;;  %v11155_v52 = vld [vmem:[%s19426_s12 + $0xf50] sm:$0xff] }
0x1598   : > { %7226 = vmatprep.mubr.f32.mxu1 %v6410_v31  ;;  %13683 = vmatprep.subr.bf16.mxu0 %v13682_v55  ;;  %v11173_v55 = vld [vmem:[%s19426_s12 + $0xfe0] sm:$0xff]  ;;  %v13732_v60 = vpack.c.bf16 %v11156_v26, %v11155_v52 }
0x1599   : > { %13715 = vmatprep.subr.bf16.mxu1 %v13714_v50  ;;  %v13702_v50 = vpack.c.bf16 %v11142_v54, %v11141_v22  ;;  %v11157_v31 = vld [vmem:[%s19426_s12 + $0xf60] sm:$0xff]  ;;  %v13734_v4 = vpack.c.bf16 %v11174_v57, %v11173_v55 }
0x159a   : > { %13685 = vmatpush3.bf16.msra.mxu0 %v13684_v0  ;;  %v5739_v0 = vrot.slane %v17529_v8, %v16264_v13  ;;  %v11176_v8 = vld [vmem:[%s19426_s12 + $0xff8] sm:$0xff] }
0x159b   : > { %13717 = vmatpush3.bf16.msra.mxu1 %v13716_v43  ;;  %13687 = vmatprep.subr.bf16.mxu0 %v13686_v51  ;;  %v11158_v43 = vld [vmem:[%s19426_s12 + $0xf68] sm:$0xff]  ;;  %v11143_v51 = vld [vmem:[%s19426_s12 + $0xef0] sm:$0xff] }
0x159c   : > { %13719 = vmatprep.subr.bf16.mxu1 %v13718_v9  ;;  %v5811_v9 = vrot.slane %v5731_v59, %v16264_v13  ;;  %v13736_v10 = vpack.c.bf16 %v11158_v43, %v11157_v31  ;;  %v13706_v11 = vpack.c.bf16 %v11144_v61, %v11143_v51  ;;  %v5819_v15 = vrot.slane %v5739_v0, %v16264_v13 }
0x159e   : > { %13689 = vmatpush3.bf16.msra.mxu0 %v13688_v16  ;;  %v13738_v16 = vpack.c.bf16 %v11176_v8, %v11175_v53  ;;  %v6320_v18 = vadd.f32 %v17435_v19, %v5811_v9  ;;  %v11178_v53 = vld [vmem:[%s19418_s4 + $0x108] sm:$0xff]  ;;  %v11180_v8 = vld [vmem:[%s19418_s4 + $0x118] sm:$0xff]  ;;  %v11179_v9 = vld [vmem:[%s19418_s4 + $0x110] sm:$0xff] }
0x159f   : > { %13721 = vmatpush3.bf16.msra.mxu1 %v13720_v41  ;;  %13691 = vmatprep.subr.bf16.mxu0 %v13690_v23  ;;  %v11159_v41 = vld [vmem:[%s19426_s12 + $0xf70] sm:$0xff]  ;;  %v11160_v23 = vld [vmem:[%s19426_s12 + $0xf78] sm:$0xff] }
0x15a0   : > { %13723 = vmatprep.subr.bf16.mxu1 %v13722_v25  ;;  %v13740_v1 = vpack.c.bf16 %v11160_v23, %v11159_v41  ;;  %v6391_v25 = vadd.f32 %v17437_v3, %v5819_v15  ;;  %v6407_v27 = vmax.f32 %v6320_v18, 0.0  ;;  %v14343_v3 = vld [vmem:[%s19427_s13] sm:$0x7]  ;;  %v11186_v23 = vld [vmem:[%s19418_s4 + $0x148] sm:$0xff] }
0x15a1   : > { %v6671_v7 = vrot.slane %v14343_v3, %v16264_v13  ;;  %v11181_v15 = vld [vmem:[%s19418_s4 + $0x120] sm:$0xff] }
0x15a2   : > { %13693 = vmatpush3.bf16.msra.mxu0 %v13692_v33  ;;  %v6409_v28 = vmax.f32 %v6391_v25, 0.0  ;;  %v11187_v25 = vld [vmem:[%s19418_s4 + $0x150] sm:$0xff] }
0x15a3   : > { %13725 = vmatpush3.bf16.msra.mxu1 %v13724_v32  ;;  %13695 = vmatprep.subr.bf16.mxu0 %v13694_v36 }
0x15a4   : > { %13727 = vmatprep.subr.bf16.mxu1 %v13726_v35 }
0x15a6   : > { %13697 = vmatpush3.bf16.msra.mxu0 %v13696_v30 }
0x15a7   : > { %13729 = vmatpush3.bf16.msra.mxu1 %v13728_v29  ;;  %13699 = vmatprep.subr.bf16.mxu0 %v13698_v46 }
0x15a8   : > { %13731 = vmatprep.subr.bf16.mxu1 %v13730_v37 }
0x15aa   : > { %13701 = vmatpush3.bf16.msra.mxu0 %v13700_v58 }
0x15ab   : > { %13733 = vmatpush3.bf16.msra.mxu1 %v13732_v60  ;;  %13703 = vmatprep.subr.bf16.mxu0 %v13702_v50 }
0x15ac   : > { %13735 = vmatprep.subr.bf16.mxu1 %v13734_v4 }
0x15ae   : > { %13705 = vmatpush3.bf16.msra.mxu0 %v13704_v5  ;;  %v13742_v5 = vpack.c.bf16 %v11180_v8, %v11178_v53 }
0x15af   : > { %13737 = vmatpush3.bf16.msra.mxu1 %v13736_v10  ;;  %13707 = vmatprep.subr.bf16.mxu0 %v13706_v11  ;;  %v11182_v11 = vld [vmem:[%s19418_s4 + $0x128] sm:$0xff] }
0x15b0   : > { %13739 = vmatprep.subr.bf16.mxu1 %v13738_v16  ;;  %v13746_v14 = vpack.c.bf16 %v11184_v42, %v11182_v11  ;;  %v11183_v16 = vld [vmem:[%s19418_s4 + $0x130] sm:$0xff] }
0x15b1   : > { %v13748_v41 = vpack.c.bf16 %v11183_v16, %v11181_v15 }
0x15b2   : > { %13709 = vmatpush3.bf16.msra.mxu0 %v13708_v24  ;;  %v11188_v24 = vld [vmem:[%s19418_s4 + $0x158] sm:$0xff] }
0x15b3   : > { %13741 = vmatpush3.bf16.msra.mxu1 %v13740_v1  ;;  %13743 = vmatprep.subr.bf16.mxu0 %v13742_v5  ;;  %v13750_v18 = vpack.c.bf16 %v11188_v24, %v11186_v23  ;;  %v11185_v1 = vld [vmem:[%s19418_s4 + $0x140] sm:$0xff] }
0x15b4   : > { %12800 = vmatprep.subr.mxu1 %v14425_v2 }
0x15b5   : > { %7157 = vmatmul.mubr.f32.vlgmr.msra.gmra.mrb[70].mxu0 %v6407_v27  ;;  %v13752_v27 = vpack.c.bf16 %v11187_v25, %v11185_v1 }
0x15b6   : > { %7227 = vmatmul.mubr.f32.vlgmr.msra.gmra.mrb[64].mxu1 %v6409_v28  ;;  %7358 = vmatprep.mubr.f32.mxu0 %v14425_v2  ;;  %v11190_v28 = vld [vmem:[%s19418_s4 + $0x168] sm:$0xff] }
0x15b7   : > { %12802 = vmatprep.mubr.msk.f32.mxu1 %vm14426_vm0, %v14425_v2 }
0x1628   : > { %v12019_v19 = vpop.f32.mrb[64].mxu0  ;;  %v12054_v6 = vpop.f32.mrb[58].mxu1 }
0x1629   : > { %v12020_v47 = vpop.f32.mrb[65].mxu0  ;;  %v12055_v33 = vpop.f32.mrb[59].mxu1 }
0x162a   : > { %v12021_v32 = vadd.f32 %v12020_v47, %v12019_v19  ;;  %v12056_v36 = vadd.f32 %v12055_v33, %v12054_v6  ;;  %v11192_v19 = vld [vmem:[%s19418_s4 + $0x178] sm:$0xff]  ;;  %v11189_v6 = vld [vmem:[%s19418_s4 + $0x160] sm:$0xff] }
0x162b   : > { %v13754_v3 = vpack.c.bf16 %v11192_v19, %v11190_v28 }
0x162c   : > { %v6739_v12 = vadd.f32 %v12021_v32, %v6671_v7  ;;  %v11191_v7 = vld [vmem:[%s19418_s4 + $0x170] sm:$0xff] }
0x162d   : > { %v13756_v47 = vpack.c.bf16 %v11191_v7, %v11189_v6 }
0x162e   : > { %v6809_v39 = vadd.f32 %v12056_v36, %v6739_v12  ;;  %v14344_v12 = vld [vmem:[%s19428_s14] sm:$0x7] }
0x1648   : > { %v12089_v44 = vpop.f32.mrb[66].mxu0  ;;  %v12124_v35 = vpop.f32.mrb[60].mxu1 }
0x1649   : > { %v12090_v17 = vpop.f32.mrb[67].mxu0  ;;  %v12125_v40 = vpop.f32.mrb[61].mxu1 }
0x164a   : > { %v12091_v45 = vadd.f32 %v12090_v17, %v12089_v44  ;;  %v12126_v21 = vadd.f32 %v12125_v40, %v12124_v35  ;;  %v14345_v17 = vld [vmem:[%s19429_s15] sm:$0x7] }
0x164b   : > { %v7254_v40 = vrot.slane %v14345_v17, %v16264_v13 }
0x164c   : > { %v6879_v20 = vadd.f32 %v12091_v45, %v6809_v39  ;;  %v7249_v39 = vrot.slane %v14344_v12, %v16264_v13 }
0x164e   : > { %v6949_v30 = vadd.f32 %v12126_v21, %v6879_v20  ;;  %v17828_v20 = vsub.s32 2, %v14664_v34 }
0x1668   : > { %v12159_v29 = vpop.f32.mrb[68].mxu0 }
0x1669   : > { %v12194_v46 = vpop.f32.mrb[62].mxu1  ;;  %v12160_v48 = vpop.f32.mrb[69].mxu0 }
0x166a   : > { %v12161_v49 = vadd.f32 %v12160_v48, %v12159_v29  ;;  %v12195_v52 = vpop.f32.mrb[63].mxu1  ;;  %v14346_v29 = vld [vmem:[%s19419_s5] sm:$0x77] }
0x166b   : > { %v12196_v37 = vadd.f32 %v12195_v52, %v12194_v46  ;;  %v7276_v13 = vrot.slane %v14346_v29, %v17828_v20 }
0x166c   : > { %v7019_v26 = vadd.f32 %v12161_v49, %v6949_v30  ;;  %v17831_v30 = vsub.s32 6, %v14664_v34 }
0x166d   : > { %v7286_v48 = vrot.slane %v7276_v13, %v17828_v20 }
0x166e   : > { %v7089_v22 = vadd.f32 %v12196_v37, %v7019_v26  ;;  %v7280_v46 = vrot.slane %v14346_v29, %v17831_v30 }
0x1670   : > { %v7290_v49 = vrot.slane %v7280_v46, %v17828_v20 }
0x1688   : > { %v12229_v54 = vpop.f32.mrb[70].mxu0 }
0x1689   : > { %v12264_v55 = vpop.f32.mrb[64].mxu1  ;;  %v12230_v57 = vpop.f32.mrb[71].mxu0 }
0x168a   : > { %v12231_v58 = vadd.f32 %v12230_v57, %v12229_v54  ;;  %v12265_v59 = vpop.f32.mrb[65].mxu1 }
0x168b   : > { %v12266_v60 = vadd.f32 %v12265_v59, %v12264_v55 }
0x168c   : > { %v7159_v50 = vadd.f32 %v12231_v58, %v7089_v22 }
0x168e   : > { %v7229_v62 = vadd.f32 %v12266_v60, %v7159_v50 }
0x1690   : > { %v7232_v63 = vadd.f32 %v7229_v62, %v16611_v38  ;;  %v11177_v38 = vld [vmem:[%s19418_s4 + $0x100] sm:$0xff] }
0x1691   : > { %v13744_v10 = vpack.c.bf16 %v11179_v9, %v11177_v38 }
0x1692   : > { %v7233_v31 = vsel %vm705_vm2, %v7232_v63, 0.0 }
0x1693   : > { %7234 = vadd.xlane.f32.xlu0 %v7233_v31  ;;  %13745 = vmatpush1.bf16.msra.mxu0 %v13744_v10 }
0x1694   : > { %13747 = vmatprep.subr.bf16.mxu0 %v13746_v14 }
0x1697   : > { %13749 = vmatpush1.bf16.msra.mxu0 %v13748_v41 }
0x1698   : > { %13751 = vmatprep.subr.bf16.mxu0 %v13750_v18 }
0x169b   : > { %13753 = vmatpush1.bf16.msra.mxu0 %v13752_v27 }
0x169c   : > { %13755 = vmatprep.subr.bf16.mxu0 %v13754_v3 }
0x169f   : > { %13757 = vmatpush1.bf16.msra.mxu0 %v13756_v47 }
0x16a0   : > { %12805 = vmatprep.subr.mxu0 %v14425_v2 }
0x1720   : > { %v7235_v0 = vpop.xlane.xlu0 %7234 }
0x1721   : > { %v7236_v4 = vmul.f32 0.015625, %v7235_v0 }
0x1723   : > { %v7237_v43 = vsub.f32 %v7232_v63, %v7236_v4 }
0x1725   : > { %v7238_v51 = vmul.f32 %v7237_v43, %v7237_v43 }
0x1727   : > { %v7239_v61 = vsel %vm705_vm2, %v7238_v51, 0.0 }
0x1728   : > { %7240 = vadd.xlane.f32.xlu0 %v7239_v61 }
0x17b5   : > { %v7241_v33 = vpop.xlane.xlu0 %7240 }
0x17b6   : > { %v7242_v32 = vmul.f32 0.015625, %v7241_v33 }
0x17b8   : > { %v7243_v36 = vadd.f32 1e-05, %v7242_v32 }
0x17ba   : > { %14293 = vrsqrt.f32 %v7243_v36 }
0x17c4   : > { %v14294_v44 = vpop.eup %14293 }
0x17c5   : > { %v7245_v35 = vmul.f32 %v14294_v44, %v7237_v43 }
0x17c7   : > { %v7250_v45 = vmul.f32 %v7249_v39, %v7245_v35 }
0x17c9   : > { %v17821_v21 = vadd.f32 %v7254_v40, %v7250_v45 }
0x17cb   : > { %11193 = vmatmul.mubr.msk.f32.vlgmr.msra.gmra.mrb[72].mxu0 %vm705_vm2, %v17821_v21 }
0x17cc   : > { %12807 = vmatprep.mubr.msk.f32.mxu0 %vm14426_vm0, %v14425_v2 }
0x189e   : > { %v7360_v52 = vpop.f32.mrb[72].mxu0 }
0x189f   : > { %v7361_v37 = vadd.f32 %v7360_v52, %v7286_v48  ;;  %v7362_v26 = vpop.f32.mrb[73].mxu0 }
0x18a0   : > { %v17840_v22 = vadd.f32 %v7362_v26, %v7290_v49 }
0x18a1   : > { %7530 = vrot.lane.b32.xlu0 %v7361_v37, %s19508_s21  ;;  %7366 = vrot.lane.b32.xlu1 %v7361_v37, %s19511_s3  ;;  %s19525_s3 = smov 80  }
0x18a2   : > { %12806 = vmatpush3.msra.mxu0 %v17840_v22 }
0x18a3   : > { %12815 = vmatprep.subr.mxu0 %v14425_v2 }
0x18a5   : > { %7700 = vrot.lane.b32.xlu0 %v7361_v37, %s19513_s18  ;;  %7528 = vrot.lane.b32.xlu1 %v7361_v37, %s19512_s24 }
0x18a9   : > { %7871 = vrot.lane.b32.xlu0 %v7361_v37, %s19515_s19  ;;  %7702 = vrot.lane.b32.xlu1 %v7361_v37, %s19507_s20 }
0x18ad   : > { %8042 = vrot.lane.b32.xlu0 %v7361_v37, %s19517_s25  ;;  %7873 = vrot.lane.b32.xlu1 %v7361_v37, %s19514_s1 }
0x18b1   : > { %8213 = vrot.lane.b32.xlu0 %v7361_v37, %s19524_s27  ;;  %8044 = vrot.lane.b32.xlu1 %v7361_v37, %s19516_s22 }
0x18b5   : > { %8384 = vrot.lane.b32.xlu0 %v7361_v37, %s19525_s3  ;;  %8215 = vrot.lane.b32.xlu1 %v7361_v37, %s19518_s26 }
0x18b9   : > { %8555 = vrot.lane.b32.xlu0 %v7361_v37, %s19526_s23  ;;  %8386 = vrot.lane.b32.xlu1 %v7361_v37, %s19527_s9 }
0x18bd   : > { %8557 = vrot.lane.b32.xlu1 %v7361_v37, %s19528_s16 }
0x1913   : > { %v7531_v34 = vpop.permute.xlu0 %7530  ;;  %v7367_v54 = vpop.permute.xlu1 %7366 }
0x1914   : > { %12801 = vmatpush3.xpose.msk.msra.mxu1 %vm594_vm1, %v7367_v54 }
0x1915   : > { %12810 = vmatprep.subr.mxu1 %v14425_v2 }
0x1917   : > { %v7701_v55 = vpop.permute.xlu0 %7700  ;;  %12803 = vmatmul.mubr.msk.f32.vlgmr.msra.gmra.mrb[66].mxu1 %vm594_vm1, %v7361_v37  ;;  %v7529_v57 = vpop.permute.xlu1 %7528 }
0x1918   : > { %12811 = vmatpush3.xpose.msk.msra.mxu1 %vm594_vm1, %v7531_v34  ;;  %12812 = vmatprep.mubr.msk.f32.mxu1 %vm14426_vm0, %v14425_v2 }
0x1919   : > { %12820 = vmatprep.subr.mxu1 %v14425_v2 }
0x191b   : > { %v7872_v58 = vpop.permute.xlu0 %7871  ;;  %12813 = vmatmul.mubr.msk.f32.vlgmr.msra.gmra.mrb[68].mxu1 %vm594_vm1, %v7529_v57  ;;  %v7703_v59 = vpop.permute.xlu1 %7702 }
0x191c   : > { %12821 = vmatpush3.xpose.msk.msra.mxu1 %vm594_vm1, %v7703_v59  ;;  %12822 = vmatprep.mubr.msk.f32.mxu1 %vm14426_vm0, %v14425_v2 }
0x191d   : > { %12830 = vmatprep.subr.mxu1 %v14425_v2 }
0x191f   : > { %12823 = vmatmul.mubr.msk.f32.vlgmr.msra.gmra.mrb[70].mxu1 %vm594_vm1, %v7701_v55  ;;  %v7874_v60 = vpop.permute.xlu1 %7873  ;;  %v8043_v50 = vpop.permute.xlu0 %8042 }
0x1920   : > { %12831 = vmatpush3.xpose.msk.msra.mxu1 %vm594_vm1, %v7874_v60  ;;  %12832 = vmatprep.mubr.msk.f32.mxu1 %vm14426_vm0, %v14425_v2 }
0x1921   : > { %12840 = vmatprep.subr.mxu1 %v14425_v2 }
0x1923   : > { %12833 = vmatmul.mubr.msk.f32.vlgmr.msra.gmra.mrb[72].mxu1 %vm594_vm1, %v7872_v58  ;;  %v8045_v62 = vpop.permute.xlu1 %8044  ;;  %v8214_v63 = vpop.permute.xlu0 %8213 }
0x1924   : > { %12841 = vmatpush3.xpose.msk.msra.mxu1 %vm594_vm1, %v8045_v62  ;;  %12842 = vmatprep.mubr.msk.f32.mxu1 %vm14426_vm0, %v14425_v2 }
0x1925   : > { %12850 = vmatprep.subr.mxu1 %v14425_v2 }
0x1927   : > { %12843 = vmatmul.mubr.msk.f32.vlgmr.msra.gmra.mrb[74].mxu1 %vm594_vm1, %v8043_v50  ;;  %v8216_v31 = vpop.permute.xlu1 %8215  ;;  %v8385_v4 = vpop.permute.xlu0 %8384 }
0x1928   : > { %12851 = vmatpush3.xpose.msk.msra.mxu1 %vm594_vm1, %v8216_v31  ;;  %12852 = vmatprep.mubr.msk.f32.mxu1 %vm14426_vm0, %v14425_v2 }
0x1929   : > { %12860 = vmatprep.subr.mxu1 %v14425_v2 }
0x192b   : > { %12853 = vmatmul.mubr.msk.f32.vlgmr.msra.gmra.mrb[76].mxu1 %vm594_vm1, %v8214_v63  ;;  %v8387_v0 = vpop.permute.xlu1 %8386  ;;  %v8556_v51 = vpop.permute.xlu0 %8555 }
0x192c   : > { %12861 = vmatpush3.xpose.msk.msra.mxu1 %vm594_vm1, %v8387_v0  ;;  %12862 = vmatprep.mubr.msk.f32.mxu1 %vm14426_vm0, %v14425_v2 }
0x192d   : > { %12870 = vmatprep.subr.mxu1 %v14425_v2 }
0x192f   : > { %12863 = vmatmul.mubr.msk.f32.vlgmr.msra.gmra.mrb[78].mxu1 %vm594_vm1, %v8385_v4  ;;  %v8558_v43 = vpop.permute.xlu1 %8557 }
0x1930   : > { %12871 = vmatpush3.xpose.msk.msra.mxu1 %vm594_vm1, %v8558_v43  ;;  %12872 = vmatprep.mubr.msk.f32.mxu1 %vm14426_vm0, %v14425_v2 }
0x1931   : > { %13758 = vmatprep.subr.bf16.mxu1 %v14442_v56 }
0x1933   : > { %12873 = vmatmul.mubr.msk.f32.vlgmr.msra.gmra.mrb[80].mxu1 %vm594_vm1, %v8556_v51 }
0x1934   : > { %12896 = vmatprep.mubr.msk.f32.mxu1 %vm14426_vm0, %v14425_v2 }
0x19ea   : > { %v7438_v61 = vpop.f32.mrb[66].mxu1 }
0x19eb   : > { %v7442_v53 = vmul.f32 0.35355338, %v7438_v61  ;;  %v12804_v8 = vpop.f32.mrb[67].mxu1 }
0x19ed   : > { %v7443_v5 = vsel %vm594_vm1, %v7442_v53, -inf }
0x19ee   : > { %7444 = vmax.xlane.f32.xlu1 %v7443_v5  ;;  %v7602_v38 = vpop.f32.mrb[68].mxu1 }
0x19ef   : > { %v7606_v9 = vmul.f32 0.35355338, %v7602_v38  ;;  %v12814_v10 = vpop.f32.mrb[69].mxu1 }
0x19f1   : > { %v7607_v11 = vsel %vm594_vm1, %v7606_v9, -inf }
0x19f2   : > { %7608 = vmax.xlane.f32.xlu0 %v7607_v11  ;;  %v7774_v42 = vpop.f32.mrb[70].mxu1 }
0x19f3   : > { %v7778_v14 = vmul.f32 0.35355338, %v7774_v42  ;;  %v12824_v15 = vpop.f32.mrb[71].mxu1 }
0x19f5   : > { %v7779_v16 = vsel %vm594_vm1, %v7778_v14, -inf }
0x19f6   : > { %7780 = vmax.xlane.f32.xlu0 %v7779_v16  ;;  %v7945_v41 = vpop.f32.mrb[72].mxu1 }
0x19f7   : > { %v7949_v23 = vmul.f32 0.35355338, %v7945_v41  ;;  %v12834_v24 = vpop.f32.mrb[73].mxu1 }
0x19f9   : > { %v7950_v18 = vsel %vm594_vm1, %v7949_v23, -inf }
0x19fa   : > { %7951 = vmax.xlane.f32.xlu1 %v7950_v18  ;;  %v8116_v1 = vpop.f32.mrb[74].mxu1 }
0x19fb   : > { %v8120_v25 = vmul.f32 0.35355338, %v8116_v1  ;;  %v12844_v27 = vpop.f32.mrb[75].mxu1 }
0x19fd   : > { %v8121_v28 = vsel %vm594_vm1, %v8120_v25, -inf }
0x19fe   : > { %8122 = vmax.xlane.f32.xlu0 %v8121_v28  ;;  %v8287_v19 = vpop.f32.mrb[76].mxu1 }
0x19ff   : > { %v8291_v6 = vmul.f32 0.35355338, %v8287_v19  ;;  %v12854_v3 = vpop.f32.mrb[77].mxu1 }
0x1a01   : > { %v8292_v7 = vsel %vm594_vm1, %v8291_v6, -inf }
0x1a02   : > { %8293 = vmax.xlane.f32.xlu1 %v8292_v7  ;;  %v8458_v47 = vpop.f32.mrb[78].mxu1 }
0x1a03   : > { %v8462_v33 = vmul.f32 0.35355338, %v8458_v47  ;;  %v12864_v32 = vpop.f32.mrb[79].mxu1 }
0x1a05   : > { %v8463_v36 = vsel %vm594_vm1, %v8462_v33, -inf }
0x1a06   : > { %8464 = vmax.xlane.f32.xlu0 %v8463_v36  ;;  %v8629_v12 = vpop.f32.mrb[80].mxu1 }
0x1a07   : > { %v12874_v39 = vpop.f32.mrb[81].mxu1  ;;  %v8633_v44 = vmul.f32 0.35355338, %v8629_v12 }
0x1a09   : > { %v8634_v35 = vsel %vm594_vm1, %v8633_v44, -inf }
0x1a13   : > { %7790 = vrot.lane.b32.xlu1 %v17840_v22, %s19513_s18 }
0x1a1c   : > { %7619 = vrot.lane.b32.xlu0 %v17840_v22, %s19512_s24 }
0x1a37   : > { %8635 = vmax.xlane.f32.xlu1 %v8634_v35 }
0x1a48   : > { %7961 = vrot.lane.b32.xlu1 %v17840_v22, %s19515_s19  ;;  %s19529_s19 = sld [smem:[#allocation19_spill]] }
0x1a7b   : > { %v7445_v17 = vpop.xlane.xlu1 %7444 }
0x1a7c   : > { %v7446_v40 = vsub.f32 %v7442_v53, %v7445_v17 }
0x1a7e   : > { %v7447_v45 = vmul.f32 1.442695, %v7446_v40 }
0x1a7f   : > { %v7609_v29 = vpop.xlane.xlu0 %7608 }
0x1a80   : > { %14295 = vpow2.f32 %v7447_v45  ;;  %v7610_v13 = vsub.f32 %v7606_v9, %v7609_v29 }
0x1a82   : > { %v7611_v46 = vmul.f32 1.442695, %v7610_v13 }
0x1a83   : > { %v7781_v48 = vpop.xlane.xlu0 %7780 }
0x1a84   : > { %14297 = vpow2.f32 %v7611_v46  ;;  %v7782_v49 = vsub.f32 %v7778_v14, %v7781_v48 }
0x1a86   : > { %v7783_v52 = vmul.f32 1.442695, %v7782_v49 }
0x1a87   : > { %v7952_v58 = vpop.xlane.xlu1 %7951 }
0x1a88   : > { %14299 = vpow2.f32 %v7783_v52  ;;  %v7953_v59 = vsub.f32 %v7949_v23, %v7952_v58 }
0x1a8a   : > { %v14296_v37 = vpop.eup %14295  ;;  %v7954_v63 = vmul.f32 1.442695, %v7953_v59 }
0x1a8b   : > { %v7449_v26 = vsel %vm594_vm1, %v14296_v37, 0.0  ;;  %v8123_v60 = vpop.xlane.xlu0 %8122 }
0x1a8c   : > { %7450 = vadd.xlane.f32.xlu0 %v7449_v26  ;;  %v8124_v62 = vsub.f32 %v8120_v25, %v8123_v60  ;;  %14301 = vpow2.f32 %v7954_v63 }
0x1a8e   : > { %v14298_v34 = vpop.eup %14297  ;;  %v8125_v4 = vmul.f32 1.442695, %v8124_v62  ;;  %v11219_v62 = vld [vmem:[%s19529_s19 + $0x88] sm:$0xff] }
0x1a8f   : > { %v7613_v54 = vsel %vm594_vm1, %v14298_v34, 0.0  ;;  %v8294_v50 = vpop.xlane.xlu1 %8293 }
0x1a90   : > { %7614 = vadd.xlane.f32.xlu1 %v7613_v54  ;;  %v8295_v31 = vsub.f32 %v8291_v6, %v8294_v50  ;;  %14303 = vpow2.f32 %v8125_v4  ;;  %v11218_v50 = vld [vmem:[%s19529_s19 + $0x80] sm:$0xff]  ;;  %v11221_v4 = vld [vmem:[%s19529_s19 + $0x98] sm:$0xff] }
0x1a91   : > { %v13759_v63 = vpack.c.bf16 %v11219_v62, %v11218_v50  ;;  %v11275_v50 = vld [vmem:[%s19424_s10 + $0x980] sm:$0xff] }
0x1a92   : > { %v17915_v55 = vpop.eup %14299  ;;  %v8296_v43 = vmul.f32 1.442695, %v8295_v31 }
0x1a93   : > { %v7785_v57 = vsel %vm594_vm1, %v17915_v55, 0.0  ;;  %v8465_v0 = vpop.xlane.xlu0 %8464  ;;  %v7791_v53 = vpop.permute.xlu1 %7790  ;;  %13760 = vmatpush3.bf16.msra.mxu1 %v13759_v63 }
0x1a94   : > { %7786 = vadd.xlane.f32.xlu0 %v7785_v57  ;;  %v8466_v51 = vsub.f32 %v8462_v33, %v8465_v0  ;;  %14305 = vpow2.f32 %v8296_v43  ;;  %13761 = vmatprep.subr.bf16.mxu1 %v14442_v56  ;;  %v11220_v0 = vld [vmem:[%s19529_s19 + $0x90] sm:$0xff] }
0x1a96   : > { %v8467_v61 = vmul.f32 1.442695, %v8466_v51  ;;  %v14302_v8 = vpop.eup %14301  ;;  %v13762_v51 = vpack.c.bf16 %v11221_v4, %v11220_v0  ;;  %v11277_v0 = vld [vmem:[%s19424_s10 + $0x990] sm:$0xff] }
0x1a97   : > { %v7956_v9 = vsel %vm594_vm1, %v14302_v8, 0.0  ;;  %v7620_v18 = vpop.permute.xlu0 %7619 }
0x1a98   : > { %14307 = vpow2.f32 %v8467_v61  ;;  %13763 = vmatpush3.bf16.msra.mxu1 %v13762_v51  ;;  %v11308_v51 = vld [vmem:[%s19424_s10 + $0xa88] sm:$0xff] }
0x1a99   : > { %13764 = vmatprep.subr.bf16.mxu1 %v14442_v56 }
0x1a9a   : > { %v14304_v5 = vpop.eup %14303 }
0x1a9b   : > { %v8127_v14 = vsel %vm594_vm1, %v14304_v5, 0.0 }
0x1a9e   : > { %v17924_v10 = vpop.eup %14305 }
0x1a9f   : > { %v8298_v15 = vsel %vm594_vm1, %v17924_v10, 0.0 }
0x1aa1   : > { %8303 = vrot.lane.b32.xlu1 %v17840_v22, %s19524_s27  ;;  %s19531_s27 = sld [smem:[#allocation21_spill]] }
0x1aa2   : > { %v17929_v16 = vpop.eup %14307 }
0x1aa3   : > { %v8469_v41 = vsel %vm594_vm1, %v17929_v16, 0.0 }
0x1aaa   : > { %8132 = vrot.lane.b32.xlu0 %v17840_v22, %s19517_s25  ;;  %s19536_s25 = sld [smem:[#allocation23_spill]] }
0x1ac4   : > { %v8636_v38 = vpop.xlane.xlu1 %8635 }
0x1ac5   : > { %v8637_v11 = vsub.f32 %v8633_v44, %v8636_v38  ;;  %7957 = vadd.xlane.f32.xlu1 %v7956_v9 }
0x1ac7   : > { %v8638_v42 = vmul.f32 1.442695, %v8637_v11 }
0x1ac8   : > { %v7962_v1 = vpop.permute.xlu1 %7961 }
0x1ac9   : > { %14309 = vpow2.f32 %v8638_v42  ;;  %8128 = vadd.xlane.f32.xlu0 %v8127_v14  ;;  %8299 = vadd.xlane.f32.xlu1 %v8298_v15 }
0x1acd   : > { %8470 = vadd.xlane.f32.xlu0 %v8469_v41 }
0x1ad3   : > { %v17933_v23 = vpop.eup %14309 }
0x1ad4   : > { %v8640_v24 = vsel %vm594_vm1, %v17933_v23, 0.0 }
0x1ad5   : > { %8641 = vadd.xlane.f32.xlu1 %v8640_v24 }
0x1ae3   : > { %8474 = vrot.lane.b32.xlu0 %v17840_v22, %s19525_s3 }
0x1ae6   : > { %8645 = vrot.lane.b32.xlu1 %v17840_v22, %s19526_s23  ;;  %s19533_s23 = sld [smem:[#allocation7_spill]] }
0x1aec   : > { %s564_s24 = sand.u32 1, %s19533_s23   ;;  %s14443_s23 = smov [#allocation3]  }
0x1aed   : > { %s565_s0 = scalar_lea.vmem [#allocation3], %s564_s24 }
0x1aee   : > { %s10639_s2 = sshll.u32 %s565_s0, 4  ;;  %s19374_s2 = int_to_ptr.vmem [resolvable:$true] %s10639_s2 }
0x1aef   : > { %s14361_s3 = scalar_lea.vmem %s19374_s2, 16 }
0x1af0   : > { %p14362_p11 = scmp.ne.s32.totalorder %s19374_s2, %s14361_s3 }
0x1af2   : > { %p14363_p12 = pnand %p14362_p11, %p14577_p5 }
0x1af4   : > { %p14364_p13 = pneg %p14363_p12 }
0x1b19   : > { %v7451_v25 = vpop.xlane.xlu0 %7450 }
0x1b1a   : > { %14311 = vrcp.f32 %v7451_v25 }
0x1b1d   : > { %v7615_v27 = vpop.xlane.xlu1 %7614 }
0x1b1e   : > { %14313 = vrcp.f32 %v7615_v27 }
0x1b21   : > { %v7787_v28 = vpop.xlane.xlu0 %7786  ;;  %v8304_v33 = vpop.permute.xlu1 %8303 }
0x1b22   : > { %14315 = vrcp.f32 %v7787_v28 }
0x1b24   : > { %v14312_v19 = vpop.eup %14311 }
0x1b25   : > { %v7453_v6 = vmul.f32 %v14312_v19, %v14296_v37  ;;  %v8133_v32 = vpop.permute.xlu0 %8132 }
0x1b27   : > { %12808 = vmatmul.mubr.msk.f32.vlgmr.msra.gmra.mrb[74].mxu0 %vm594_vm1, %v7453_v6 }
0x1b28   : > { %v14314_v3 = vpop.eup %14313  ;;  %12816 = vmatpush3.msra.mxu0 %v7620_v18  ;;  %12817 = vmatprep.mubr.msk.f32.mxu0 %vm14426_vm0, %v14425_v2 }
0x1b29   : > { %v7617_v7 = vmul.f32 %v14314_v3, %v14298_v34  ;;  %12825 = vmatprep.subr.mxu0 %v14425_v2 }
0x1b2b   : > { %12818 = vmatmul.mubr.msk.f32.vlgmr.msra.gmra.mrb[76].mxu0 %vm594_vm1, %v7617_v7 }
0x1b2c   : > { %v14316_v22 = vpop.eup %14315  ;;  %12826 = vmatpush3.msra.mxu0 %v7791_v53  ;;  %12827 = vmatprep.mubr.msk.f32.mxu0 %vm14426_vm0, %v14425_v2  ;;  %v11222_v53 = vld [vmem:[%s19529_s19 + $0xa0] sm:$0xff] }
0x1b2d   : > { %v7789_v47 = vmul.f32 %v14316_v22, %v17915_v55  ;;  %12835 = vmatprep.subr.mxu0 %v14425_v2 }
0x1b2f   : > { %12828 = vmatmul.mubr.msk.f32.vlgmr.msra.gmra.mrb[78].mxu0 %vm594_vm1, %v7789_v47 }
0x1b30   : > { %12836 = vmatpush3.msra.mxu0 %v7962_v1  ;;  %12837 = vmatprep.mubr.msk.f32.mxu0 %vm14426_vm0, %v14425_v2 }
0x1b31   : > { %12845 = vmatprep.subr.mxu0 %v14425_v2 }
0x1b52   : > { %v7958_v36 = vpop.xlane.xlu1 %7957 }
0x1b53   : > { %14317 = vrcp.f32 %v7958_v36 }
0x1b56   : > { %v8129_v12 = vpop.xlane.xlu0 %8128  ;;  %v8300_v39 = vpop.xlane.xlu1 %8299 }
0x1b57   : > { %14319 = vrcp.f32 %v8129_v12 }
0x1b58   : > { %14321 = vrcp.f32 %v8300_v39 }
0x1b5a   : > { %v8471_v44 = vpop.xlane.xlu0 %8470 }
0x1b5b   : > { %14323 = vrcp.f32 %v8471_v44 }
0x1b5d   : > { %v14318_v35 = vpop.eup %14317 }
0x1b5e   : > { %v7960_v17 = vmul.f32 %v14318_v35, %v14302_v8  ;;  %v8475_v49 = vpop.permute.xlu0 %8474  ;;  %v11223_v8 = vld [vmem:[%s19529_s19 + $0xa8] sm:$0xff] }
0x1b5f   : > { %v13765_v9 = vpack.c.bf16 %v11223_v8, %v11222_v53  ;;  %v11310_v8 = vld [vmem:[%s19424_s10 + $0xa98] sm:$0xff] }
0x1b60   : > { %12838 = vmatmul.mubr.msk.f32.vlgmr.msra.gmra.mrb[80].mxu0 %vm594_vm1, %v7960_v17 }
0x1b61   : > { %v14320_v40 = vpop.eup %14319  ;;  %12846 = vmatpush3.msra.mxu0 %v8133_v32  ;;  %12847 = vmatprep.mubr.msk.f32.mxu0 %vm14426_vm0, %v14425_v2 }
0x1b62   : > { %v8131_v45 = vmul.f32 %v14320_v40, %v14304_v5  ;;  %v8642_v29 = vpop.xlane.xlu1 %8641  ;;  %12855 = vmatprep.subr.mxu0 %v14425_v2  ;;  %v14322_v13 = vpop.eup %14321  ;;  %v11224_v5 = vld [vmem:[%s19529_s19 + $0xb0] sm:$0xff]  ;;  %13766 = vmatpush3.bf16.msra.mxu1 %v13765_v9  ;;  %v11228_v40 = vld [vmem:[%s19424_s10 + $0x808] sm:$0xff] }
0x1b63   : > { %14325 = vrcp.f32 %v8642_v29  ;;  %v8302_v46 = vmul.f32 %v14322_v13, %v17924_v10  ;;  %v11225_v10 = vld [vmem:[%s19529_s19 + $0xb8] sm:$0xff]  ;;  %13767 = vmatprep.subr.bf16.mxu1 %v14442_v56 }
0x1b64   : > { %12848 = vmatmul.mubr.msk.f32.vlgmr.msra.gmra.mrb[82].mxu0 %vm594_vm1, %v8131_v45  ;;  %v13768_v11 = vpack.c.bf16 %v11225_v10, %v11224_v5  ;;  %v11230_v45 = vld [vmem:[%s19424_s10 + $0x818] sm:$0xff]  ;;  %v11291_v5 = vld [vmem:[%s19424_s10 + $0xa00] sm:$0xff] }
0x1b65   : > { %12856 = vmatpush3.msra.mxu0 %v8304_v33  ;;  %12857 = vmatprep.mubr.msk.f32.mxu0 %vm14426_vm0, %v14425_v2  ;;  %v14324_v48 = vpop.eup %14323  ;;  %v11246_v13 = vld [vmem:[%s19424_s10 + $0x898] sm:$0xff] }
0x1b66   : > { %12865 = vmatprep.subr.mxu0 %v14425_v2  ;;  %v8473_v52 = vmul.f32 %v14324_v48, %v17929_v16  ;;  %v8646_v37 = vpop.permute.xlu1 %8645  ;;  %13769 = vmatpush3.bf16.msra.mxu1 %v13768_v11  ;;  %v11243_v48 = vld [vmem:[%s19424_s10 + $0x880] sm:$0xff]  ;;  %v11293_v11 = vld [vmem:[%s19424_s10 + $0xa10] sm:$0xff] }
0x1b68   : > { %12858 = vmatmul.mubr.msk.f32.vlgmr.msra.gmra.mrb[84].mxu0 %vm594_vm1, %v8302_v46  ;;  %v11227_v46 = vld [vmem:[%s19424_s10 + $0x800] sm:$0xff] }
0x1b69   : > { %12866 = vmatpush3.msra.mxu0 %v8475_v49  ;;  %12867 = vmatprep.mubr.msk.f32.mxu0 %vm14426_vm0, %v14425_v2  ;;  %v13786_v49 = vpack.c.bf16 %v11246_v13, %v11230_v45  ;;  %v11247_v45 = vld [vmem:[%s19424_s10 + $0x8a0] sm:$0xff] }
0x1b6a   : > { %12875 = vmatprep.subr.mxu0 %v14425_v2 }
0x1b6b   : > { %13787 = vmatprep.subr.bf16.mxu1 %v13786_v49  ;;  %v11249_v49 = vld [vmem:[%s19424_s10 + $0x8b0] sm:$0xff] }
0x1b6c   : > { %12868 = vmatmul.mubr.msk.f32.vlgmr.msra.gmra.mrb[86].mxu0 %vm594_vm1, %v8473_v52  ;;  %v13772_v52 = vpack.c.bf16 %v11243_v48, %v11227_v46  ;;  %v11233_v48 = vld [vmem:[%s19424_s10 + $0x830] sm:$0xff] }
0x1b6d   : > { %v14326_v26 = vpop.eup %14325  ;;  %12876 = vmatpush3.msra.mxu0 %v8646_v37  ;;  %12877 = vmatprep.mubr.msk.f32.mxu0 %vm14426_vm0, %v14425_v2  ;;  %v11229_v37 = vld [vmem:[%s19424_s10 + $0x810] sm:$0xff] }
0x1b6e   : > { %v8644_v34 = vmul.f32 %v14326_v26, %v17933_v23  ;;  %v11245_v26 = vld [vmem:[%s19424_s10 + $0x890] sm:$0xff] }
0x1b70   : > { %12878 = vmatmul.mubr.msk.f32.vlgmr.msra.gmra.mrb[88].mxu0 %vm594_vm1, %v8644_v34  ;;  %v13788_v34 = vpack.c.bf16 %v11245_v26, %v11229_v37  ;;  %v11280_v37 = vld [vmem:[%s19424_s10 + $0x9a8] sm:$0xff]  ;;  %v11282_v26 = vld [vmem:[%s19424_s10 + $0x9b8] sm:$0xff] }
0x1b71   : > { %9177 = vmatprep.mubr.f32.mxu0 %v14425_v2 }
0x1bfa   : > { %v7523_v54 = vpop.f32.mrb[74].mxu0 }
0x1bfb   : > { %7527 = vst.msk [vmem:[#allocation2] sm:$0xff] %vm594_vm1, %v7523_v54  ;;  %v12809_v55 = vpop.f32.mrb[75].mxu0  ;;  %v11260_v54 = vld [vmem:[%s19424_s10 + $0x908] sm:$0xff] }
0x1bfc   : > { %v11276_v55 = vld [vmem:[%s19424_s10 + $0x988] sm:$0xff] }
0x1bfe   : > { %v7691_v57 = vpop.f32.mrb[76].mxu0 }
0x1bff   : > { %7696 = vrot.lane.b32.xlu0 %v7691_v57, %s19528_s16  ;;  %v12819_v58 = vpop.f32.mrb[77].mxu0  ;;  %v11262_v57 = vld [vmem:[%s19424_s10 + $0x918] sm:$0xff]  ;;  %s19532_s16 = sld [smem:[#allocation22_spill]] }
0x1c00   : > { %v13774_v58 = vpack.c.bf16 %v11276_v55, %v11260_v54  ;;  %v13820_v55 = vpack.c.bf16 %v11249_v49, %v11233_v48 }
0x1c02   : > { %v7862_v59 = vpop.f32.mrb[78].mxu0 }
0x1c03   : > { %7867 = vrot.lane.b32.xlu1 %v7862_v59, %s19527_s9  ;;  %v12829_v60 = vpop.f32.mrb[79].mxu0  ;;  %v11278_v59 = vld [vmem:[%s19424_s10 + $0x998] sm:$0xff] }
0x1c04   : > { %v11259_v60 = vld [vmem:[%s19424_s10 + $0x900] sm:$0xff]  ;;  %v13790_v62 = vpack.c.bf16 %v11278_v59, %v11262_v57 }
0x1c05   : > { %v13776_v63 = vpack.c.bf16 %v11275_v50, %v11259_v60  ;;  %v11263_v57 = vld [vmem:[%s19424_s10 + $0x920] sm:$0xff] }
0x1c33   : > { %v8033_v31 = vpop.f32.mrb[80].mxu0 }
0x1c34   : > { %8038 = vrot.lane.b32.xlu0 %v8033_v31, %s19518_s26  ;;  %v12839_v43 = vpop.f32.mrb[81].mxu0  ;;  %v11261_v31 = vld [vmem:[%s19424_s10 + $0x910] sm:$0xff]  ;;  %s19534_s26 = sld [smem:[#allocation10_spill]] }
0x1c35   : > { %v13792_v4 = vpack.c.bf16 %v11277_v0, %v11261_v31  ;;  %v11292_v43 = vld [vmem:[%s19424_s10 + $0xa08] sm:$0xff] }
0x1c36   : > { %v13778_v53 = vpack.c.bf16 %v11308_v51, %v11292_v43  ;;  %v11296_v31 = vld [vmem:[%s19424_s10 + $0xa28] sm:$0xff]  ;;  %v11314_v43 = vld [vmem:[%s19424_s10 + $0xab8] sm:$0xff] }
0x1c37   : > { %v8204_v61 = vpop.f32.mrb[82].mxu0  ;;  %v11312_v0 = vld [vmem:[%s19424_s10 + $0xaa8] sm:$0xff] }
0x1c38   : > { %8209 = vrot.lane.b32.xlu1 %v8204_v61, %s19516_s22  ;;  %v12849_v38 = vpop.f32.mrb[83].mxu0  ;;  %v11294_v61 = vld [vmem:[%s19424_s10 + $0xa18] sm:$0xff] }
0x1c39   : > { %v11307_v38 = vld [vmem:[%s19424_s10 + $0xa80] sm:$0xff]  ;;  %v13794_v9 = vpack.c.bf16 %v11310_v8, %v11294_v61 }
0x1c3a   : > { %v13780_v10 = vpack.c.bf16 %v11307_v38, %v11291_v5  ;;  %v11311_v8 = vld [vmem:[%s19424_s10 + $0xaa0] sm:$0xff]  ;;  %v13810_v5 = vpack.c.bf16 %v11312_v0, %v11296_v31  ;;  %v11317_v31 = vld [vmem:[%s19424_s10 + $0xad0] sm:$0xff]  ;;  %v11332_v0 = vld [vmem:[%s19424_s10 + $0xb48] sm:$0xff]  ;;  %s11620_s28 = sshll.u32 %s19534_s26, 4  ;;  %s14365_s26 = sshll.u32 %s14443_s23, 4  ;;  %s14366_s26 = int_to_ptr.vmem [resolvable:$false] %s14365_s26 }
0x1c3b   : > { %v8375_v42 = vpop.f32.mrb[84].mxu0  ;;  %s19372_s7 = scalar_lea.hbm %s19537_s30, %s11620_s28  ;;  %s14367_s9 = scalar_lea.vmem %s14366_s26, 32 }
0x1c3c   : > { %8380 = vrot.lane.b32.xlu0 %v8375_v42, %s19514_s1  ;;  %v12859_v14 = vpop.f32.mrb[85].mxu0  ;;  %s19530_s1 = sld [smem:[#allocation20_spill]]  ;;  %v11309_v42 = vld [vmem:[%s19424_s10 + $0xa90] sm:$0xff]  ;;  %p14368_p0 = scmp.lt.s32.totalorder %s19374_s2, %s14366_s26 }
0x1c3d   : > { %v13796_v14 = vpack.c.bf16 %v11309_v42, %v11293_v11  ;;  %v11328_v11 = vld [vmem:[%s19424_s10 + $0xb28] sm:$0xff]  ;;  %p14369_p1 = scmp.lt.s32.totalorder %s14367_s9, %s14361_s3 }
0x1c3e   : > { %v11344_v42 = vld [vmem:[%s19424_s10 + $0xba8] sm:$0xff] }
0x1c3f   : > { %v8546_v15 = vpop.f32.mrb[86].mxu0  ;;  %p14370_p2 = por %p14369_p1, %p14368_p0 }
0x1c40   : > { %8551 = vrot.lane.b32.xlu1 %v8546_v15, %s19507_s20  ;;  %v12869_v16 = vpop.f32.mrb[87].mxu0  ;;  %v11324_v15 = vld [vmem:[%s19424_s10 + $0xb08] sm:$0xff] }
0x1c41   : > { %v11340_v16 = vld [vmem:[%s19424_s10 + $0xb88] sm:$0xff]  ;;  %p14371_p3 = pnand %p14370_p2, %p14364_p13 }
0x1c42   : > { %v14347_v3 = vld [vmem:[%s19530_s1] sm:$0x7] }
0x1c43   : > { %v8717_v41 = vpop.f32.mrb[88].mxu0  ;;  %v8739_v7 = vrot.slane %v14347_v3, %v17828_v20  ;;  %v11232_v3 = vld [vmem:[%s19424_s10 + $0x828] sm:$0xff] }
0x1c44   : > { %8722 = vrot.lane.b32.xlu0 %v8717_v41, %s19508_s21  ;;  %v12879_v23 = vpop.f32.mrb[89].mxu0  ;;  %v11326_v41 = vld [vmem:[%s19424_s10 + $0xb18] sm:$0xff] }
0x1c45   : > { %v13782_v23 = vpack.c.bf16 %v11340_v16, %v11324_v15  ;;  %v11346_v15 = vld [vmem:[%s19424_s10 + $0xbb8] sm:$0xff] }
0x1c71   : > { %v7697_v24 = vpop.permute.xlu0 %7696 }
0x1c72   : > { %7699 = vst.msk [vmem:[#allocation2] sm:$0xff] %vm1114_vm3, %v7697_v24  ;;  %v11342_v24 = vld [vmem:[%s19424_s10 + $0xb98] sm:$0xff] }
0x1c75   : > { %v7868_v18 = vpop.permute.xlu1 %7867 }
0x1c76   : > { %7870 = vst.msk [vmem:[#allocation2] sm:$0xff] %vm1286_vm4, %v7868_v18  ;;  %v11323_v18 = vld [vmem:[%s19424_s10 + $0xb00] sm:$0xff] }
0x1ca6   : > { %v8039_v1 = vpop.permute.xlu0 %8038 }
0x1ca7   : > { %8041 = vst.msk [vmem:[#allocation2] sm:$0xff] %vm1458_vm5, %v8039_v1  ;;  %v11339_v1 = vld [vmem:[%s19424_s10 + $0xb80] sm:$0xff] }
0x1caa   : > { %v8210_v25 = vpop.permute.xlu1 %8209 }
0x1cab   : > { %8212 = vst.msk [vmem:[#allocation2] sm:$0xff] %vm1630_vm6, %v8210_v25  ;;  %v13798_v25 = vpack.c.bf16 %v11342_v24, %v11326_v41  ;;  %v11343_v24 = vld [vmem:[%s19424_s10 + $0xba0] sm:$0xff] }
0x1cae   : > { %v8381_v27 = vpop.permute.xlu0 %8380 }
0x1caf   : > { %8383 = vst.msk [vmem:[#allocation2] sm:$0xff] %vm1802_vm7, %v8381_v27  ;;  %v13784_v27 = vpack.c.bf16 %v11339_v1, %v11323_v18  ;;  %v13814_v18 = vpack.c.bf16 %v11344_v42, %v11328_v11  ;;  %v11349_v11 = vld [vmem:[%s19424_s10 + $0xbd0] sm:$0xff]  ;;  %v11240_v42 = vld [vmem:[%s19424_s10 + $0x868] sm:$0xff] }
0x1cb2   : > { %v8552_v28 = vpop.permute.xlu1 %8551 }
0x1cb3   : > { %8554 = vst.msk [vmem:[#allocation2] sm:$0xff] %vm1974_vm8, %v8552_v28  ;;  %v11325_v28 = vld [vmem:[%s19424_s10 + $0xb10] sm:$0xff] }
0x1cb6   : > { %v8723_v19 = vpop.permute.xlu0 %8722 }
0x1cb7   : > { %8725 = vst.msk [vmem:[#allocation2] sm:$0xff] %vm2146_vm9, %v8723_v19  ;;  %v11341_v19 = vld [vmem:[%s19424_s10 + $0xb90] sm:$0xff] }
0x1cbe   : > { %v8726_v6 = vld [vmem:[#allocation2] sm:$0xff] }
0x1cbf   : > { %12897 = vmatmul.mubr.msk.f32.vlgmr.msra.gmra.mrb[82].mxu1 %vm705_vm2, %v8726_v6  ;;  %v13800_v6 = vpack.c.bf16 %v11341_v19, %v11325_v28  ;;  %v11236_v28 = vld [vmem:[%s19424_s10 + $0x848] sm:$0xff] }
0x1cc0   : > { %9248 = vmatprep.mubr.f32.mxu1 %v14425_v2  ;;  %13789 = vmatpush1.bf16.msra.mxu1 %v13788_v34  ;;  %v11252_v19 = vld [vmem:[%s19424_s10 + $0x8c8] sm:$0xff] }
0x1cc1   : > { %13791 = vmatprep.subr.bf16.mxu1 %v13790_v62  ;;  %v11265_v62 = vld [vmem:[%s19424_s10 + $0x930] sm:$0xff] }
0x1cc4   : > { %13793 = vmatpush1.bf16.msra.mxu1 %v13792_v4  ;;  %v11298_v4 = vld [vmem:[%s19424_s10 + $0xa38] sm:$0xff] }
0x1cc5   : > { %13795 = vmatprep.subr.bf16.mxu1 %v13794_v9  ;;  %v13826_v38 = vpack.c.bf16 %v11314_v43, %v11298_v4  ;;  %v11297_v9 = vld [vmem:[%s19424_s10 + $0xa30] sm:$0xff]  ;;  %v11348_v4 = vld [vmem:[%s19424_s10 + $0xbc8] sm:$0xff]  ;;  %v11334_v43 = vld [vmem:[%s19424_s10 + $0xb58] sm:$0xff] }
0x1cc8   : > { %13797 = vmatpush1.bf16.msra.mxu1 %v13796_v14  ;;  %v11330_v14 = vld [vmem:[%s19424_s10 + $0xb38] sm:$0xff] }
0x1cc9   : > { %13799 = vmatprep.subr.bf16.mxu1 %v13798_v25  ;;  %v13830_v1 = vpack.c.bf16 %v11346_v15, %v11330_v14  ;;  %v11329_v25 = vld [vmem:[%s19424_s10 + $0xb30] sm:$0xff]  ;;  %v11256_v14 = vld [vmem:[%s19424_s10 + $0x8e8] sm:$0xff]  ;;  %v11242_v15 = vld [vmem:[%s19424_s10 + $0x878] sm:$0xff] }
0x1ccc   : > { %13801 = vmatpush1.bf16.msra.mxu1 %v13800_v6  ;;  %v11238_v6 = vld [vmem:[%s19424_s10 + $0x858] sm:$0xff] }
0x1d92   : > { %v8809_v22 = vpop.f32.mrb[82].mxu1 }
0x1d93   : > { %v8810_v47 = vadd.f32 %v8809_v22, %v8739_v7  ;;  %v12898_v33 = vpop.f32.mrb[83].mxu1  ;;  %v11248_v7 = vld [vmem:[%s19424_s10 + $0x8a8] sm:$0xff]  ;;  %v11234_v22 = vld [vmem:[%s19424_s10 + $0x838] sm:$0xff] }
0x1d94   : > { %v11250_v33 = vld [vmem:[%s19424_s10 + $0x8b8] sm:$0xff] }
0x1d95   : > { %v8813_v32 = vadd.f32 %v8810_v47, %v17821_v21  ;;  %v11244_v21 = vld [vmem:[%s19424_s10 + $0x888] sm:$0xff]  ;;  %v13802_v47 = vpack.c.bf16 %v11248_v7, %v11232_v3  ;;  %v11254_v3 = vld [vmem:[%s19424_s10 + $0x8d8] sm:$0xff] }
0x1d96   : > { %v13770_v29 = vpack.c.bf16 %v11244_v21, %v11228_v40  ;;  %v11231_v21 = vld [vmem:[%s19424_s10 + $0x820] sm:$0xff] }
0x1d97   : > { %v8814_v36 = vsel %vm705_vm2, %v8813_v32, 0.0  ;;  %v13804_v54 = vpack.c.bf16 %v11247_v45, %v11231_v21  ;;  %v11286_v21 = vld [vmem:[%s19424_s10 + $0x9d8] sm:$0xff] }
0x1d98   : > { %8815 = vadd.xlane.f32.xlu1 %v8814_v36  ;;  %13771 = vmatprep.subr.bf16.mxu0 %v13770_v29  ;;  %v14349_v29 = vld [vmem:[%s19531_s27] sm:$0x7]  ;;  %s10627_s27 = scalar_lea.sflag [#allocation4], %s564_s24 }
0x1d99   : > { %13773 = vmatpush1.bf16.msra.mxu0 %v13772_v52  ;;  %v8835_v13 = vrot.slane %v14349_v29, %v17828_v20  ;;  %v11264_v52 = vld [vmem:[%s19424_s10 + $0x928] sm:$0xff] }
0x1d9a   : > { %13775 = vmatprep.subr.bf16.mxu0 %v13774_v58  ;;  %v11279_v58 = vld [vmem:[%s19424_s10 + $0x9a0] sm:$0xff]  ;;  %v13806_v60 = vpack.c.bf16 %v11280_v37, %v11264_v52  ;;  %v11269_v52 = vld [vmem:[%s19424_s10 + $0x950] sm:$0xff] }
0x1d9b   : > { %v13808_v51 = vpack.c.bf16 %v11279_v58, %v11263_v57  ;;  %v11285_v37 = vld [vmem:[%s19424_s10 + $0x9d0] sm:$0xff]  ;;  %v11299_v58 = vld [vmem:[%s19424_s10 + $0xa40] sm:$0xff] }
0x1d9c   : > { %v13856_v57 = vpack.c.bf16 %v11285_v37, %v11269_v52  ;;  %v11305_v37 = vld [vmem:[%s19424_s10 + $0xa70] sm:$0xff] }
0x1d9d   : > { %13777 = vmatpush1.bf16.msra.mxu0 %v13776_v63  ;;  %v11281_v63 = vld [vmem:[%s19424_s10 + $0x9b0] sm:$0xff] }
0x1d9e   : > { %13779 = vmatprep.subr.bf16.mxu0 %v13778_v53  ;;  %v13824_v61 = vpack.c.bf16 %v11281_v63, %v11265_v62  ;;  %v11295_v53 = vld [vmem:[%s19424_s10 + $0xa20] sm:$0xff]  ;;  %v11301_v63 = vld [vmem:[%s19424_s10 + $0xa50] sm:$0xff] }
0x1d9f   : > { %v13812_v16 = vpack.c.bf16 %v11311_v8, %v11295_v53  ;;  %v13860_v53 = vpack.c.bf16 %v11317_v31, %v11301_v63  ;;  %v11331_v8 = vld [vmem:[%s19424_s10 + $0xb40] sm:$0xff]  ;;  %v11337_v31 = vld [vmem:[%s19424_s10 + $0xb70] sm:$0xff] }
0x1da1   : > { %13781 = vmatpush1.bf16.msra.mxu0 %v13780_v10  ;;  %v11313_v10 = vld [vmem:[%s19424_s10 + $0xab0] sm:$0xff] }
0x1da2   : > { %13783 = vmatprep.subr.bf16.mxu0 %v13782_v23  ;;  %v13828_v41 = vpack.c.bf16 %v11313_v10, %v11297_v9  ;;  %v11327_v23 = vld [vmem:[%s19424_s10 + $0xb20] sm:$0xff]  ;;  %v11333_v10 = vld [vmem:[%s19424_s10 + $0xb50] sm:$0xff] }
0x1da3   : > { %v13816_v7 = vpack.c.bf16 %v11343_v24, %v11327_v23  ;;  %v13864_v23 = vpack.c.bf16 %v11349_v11, %v11333_v10  ;;  %v11239_v24 = vld [vmem:[%s19424_s10 + $0x860] sm:$0xff] }
0x1da4   : > { %v11395_v11 = vld [vmem:[%s19426_s12 + $0x1100] sm:$0xff] }
0x1da5   : > { %13785 = vmatpush1.bf16.msra.mxu0 %v13784_v27  ;;  %v11345_v27 = vld [vmem:[%s19424_s10 + $0xbb0] sm:$0xff] }
0x1da6   : > { %13803 = vmatprep.subr.bf16.mxu0 %v13802_v47  ;;  %v11235_v47 = vld [vmem:[%s19424_s10 + $0x840] sm:$0xff] }
0x1e25   : > { %v8816_v12 = vpop.xlane.xlu1 %8815 }
0x1e26   : > { %v8817_v39 = vmul.f32 0.015625, %v8816_v12 }
0x1e28   : > { %v18024_v44 = vsub.f32 %v8813_v32, %v8817_v39  ;;  %v13818_v32 = vpack.c.bf16 %v11250_v33, %v11234_v22  ;;  %v13832_v22 = vpack.c.bf16 %v11345_v27, %v11329_v25  ;;  %v11251_v33 = vld [vmem:[%s19424_s10 + $0x8c0] sm:$0xff]  ;;  %v11241_v27 = vld [vmem:[%s19424_s10 + $0x870] sm:$0xff] }
0x1e29   : > { %v13836_v45 = vpack.c.bf16 %v11251_v33, %v11235_v47  ;;  %v11271_v33 = vld [vmem:[%s19424_s10 + $0x960] sm:$0xff] }
0x1e2a   : > { %v8819_v35 = vmul.f32 %v18024_v44, %v18024_v44  ;;  %13819 = vmatprep.subr.bf16.mxu1 %v13818_v32  ;;  %v13834_v32 = vpack.c.bf16 %v11252_v19, %v11236_v28  ;;  %v11257_v28 = vld [vmem:[%s19424_s10 + $0x8f0] sm:$0xff]  ;;  %v11272_v19 = vld [vmem:[%s19424_s10 + $0x968] sm:$0xff] }
0x1e2b   : > { %v13884_v47 = vpack.c.bf16 %v11257_v28, %v11241_v27  ;;  %v11397_v28 = vld [vmem:[%s19426_s12 + $0x1110] sm:$0xff] }
0x1e2c   : > { %v8820_v17 = vsel %vm705_vm2, %v8819_v35, 0.0  ;;  %v14348_v35 = vld [vmem:[%s19422_s8] sm:$0x7] }
0x1e2d   : > { %8821 = vadd.xlane.f32.xlu0 %v8820_v17  ;;  %v8830_v17 = vrot.slane %v14348_v35, %v17828_v20  ;;  %v11268_v35 = vld [vmem:[%s19424_s10 + $0x948] sm:$0xff] }
0x1eba   : > { %v8822_v36 = vpop.xlane.xlu0 %8821 }
0x1ebb   : > { %v8823_v12 = vmul.f32 0.015625, %v8822_v36  ;;  %v13850_v36 = vpack.c.bf16 %v11254_v3, %v11238_v6  ;;  %v11288_v6 = vld [vmem:[%s19424_s10 + $0x9e8] sm:$0xff]  ;;  %v11274_v3 = vld [vmem:[%s19424_s10 + $0x978] sm:$0xff] }
0x1ebd   : > { %v8824_v39 = vadd.f32 1e-05, %v8823_v12  ;;  %v11237_v12 = vld [vmem:[%s19424_s10 + $0x850] sm:$0xff] }
0x1ebf   : > { %14327 = vrsqrt.f32 %v8824_v39  ;;  %v11253_v39 = vld [vmem:[%s19424_s10 + $0x8d0] sm:$0xff] }
0x1ec0   : > { %v13852_v29 = vpack.c.bf16 %v11253_v39, %v11237_v12  ;;  %v11273_v39 = vld [vmem:[%s19424_s10 + $0x970] sm:$0xff] }
0x1ec9   : > { %v14328_v40 = vpop.eup %14327 }
0x1eca   : > { %v8826_v46 = vmul.f32 %v14328_v40, %v18024_v44  ;;  %v11266_v44 = vld [vmem:[%s19424_s10 + $0x938] sm:$0xff] }
0x1ecb   : > { %v13822_v50 = vpack.c.bf16 %v11282_v26, %v11266_v44  ;;  %v11270_v40 = vld [vmem:[%s19424_s10 + $0x958] sm:$0xff]  ;;  %v11300_v44 = vld [vmem:[%s19424_s10 + $0xa48] sm:$0xff] }
0x1ecc   : > { %v8831_v34 = vmul.f32 %v8830_v17, %v8826_v46  ;;  %v11284_v17 = vld [vmem:[%s19424_s10 + $0x9c8] sm:$0xff]  ;;  %v11283_v46 = vld [vmem:[%s19424_s10 + $0x9c0] sm:$0xff]  ;;  %v13854_v49 = vpack.c.bf16 %v11286_v21, %v11270_v40  ;;  %v11306_v21 = vld [vmem:[%s19424_s10 + $0xa78] sm:$0xff] }
0x1ecd   : > { %v13838_v48 = vpack.c.bf16 %v11284_v17, %v11268_v35  ;;  %v11316_v26 = vld [vmem:[%s19424_s10 + $0xac8] sm:$0xff]  ;;  %v11289_v35 = vld [vmem:[%s19424_s10 + $0x9f0] sm:$0xff] }
0x1ece   : > { %v18176_v59 = vadd.f32 %v8835_v13, %v8831_v34  ;;  %v11267_v13 = vld [vmem:[%s19424_s10 + $0x940] sm:$0xff]  ;;  %v11302_v34 = vld [vmem:[%s19424_s10 + $0xa58] sm:$0xff]  ;;  %v11304_v17 = vld [vmem:[%s19424_s10 + $0xa68] sm:$0xff] }
0x1ecf   : > { %v11320_v40 = vld [vmem:[%s19424_s10 + $0xae8] sm:$0xff] }
0x1ed0   : > { %11355 = vmatmul.mubr.msk.f32.vlgmr.msra.gmra.mrb[90].mxu0 %vm705_vm2, %v18176_v59  ;;  %11356 = vmatmul.mubr.msk.f32.vlgmr.msra.gmra.mrb[84].mxu1 %vm705_vm2, %v18176_v59 }
0x1ed1   : > { %13805 = vmatpush1.bf16.msra.mxu0 %v13804_v54  ;;  %13821 = vmatpush1.bf16.msra.mxu1 %v13820_v55  ;;  %v11318_v54 = vld [vmem:[%s19424_s10 + $0xad8] sm:$0xff]  ;;  %v13840_v55 = vpack.c.bf16 %v11283_v46, %v11267_v13  ;;  %v13888_v13 = vpack.c.bf16 %v11289_v35, %v11273_v39  ;;  %v11303_v46 = vld [vmem:[%s19424_s10 + $0xa60] sm:$0xff] }
0x1ed2   : > { %13807 = vmatprep.subr.bf16.mxu0 %v13806_v60  ;;  %13823 = vmatprep.subr.bf16.mxu1 %v13822_v50  ;;  %v11315_v60 = vld [vmem:[%s19424_s10 + $0xac0] sm:$0xff]  ;;  %v13842_v50 = vpack.c.bf16 %v11316_v26, %v11300_v44  ;;  %v13858_v62 = vpack.c.bf16 %v11318_v54, %v11302_v34  ;;  %v11321_v44 = vld [vmem:[%s19424_s10 + $0xaf0] sm:$0xff]  ;;  %v11336_v26 = vld [vmem:[%s19424_s10 + $0xb68] sm:$0xff] }
0x1ed3   : > { %9319 = vmatprep.mubr.f32.mxu0 %v14425_v2  ;;  %9390 = vmatprep.mubr.f32.mxu1 %v14425_v2  ;;  %v11352_v34 = vld [vmem:[%s19424_s10 + $0xbe8] sm:$0xff]  ;;  %v11338_v54 = vld [vmem:[%s19424_s10 + $0xb78] sm:$0xff]  ;;  %v11399_v35 = vld [vmem:[%s19426_s12 + $0x1120] sm:$0xff] }
0x1ed5   : > { %13809 = vmatpush1.bf16.msra.mxu0 %v13808_v51  ;;  %13825 = vmatpush1.bf16.msra.mxu1 %v13824_v61  ;;  %v11350_v51 = vld [vmem:[%s19424_s10 + $0xbd8] sm:$0xff]  ;;  %v13844_v61 = vpack.c.bf16 %v11315_v60, %v11299_v58  ;;  %v13892_v58 = vpack.c.bf16 %v11321_v44, %v11305_v37  ;;  %v11335_v60 = vld [vmem:[%s19424_s10 + $0xb60] sm:$0xff]  ;;  %v11401_v44 = vld [vmem:[%s19426_s12 + $0x1130] sm:$0xff] }
0x1ed6   : > { %13811 = vmatprep.subr.bf16.mxu0 %v13810_v5  ;;  %13827 = vmatprep.subr.bf16.mxu1 %v13826_v38  ;;  %v11347_v5 = vld [vmem:[%s19424_s10 + $0xbc0] sm:$0xff]  ;;  %v13846_v38 = vpack.c.bf16 %v11348_v4, %v11332_v0  ;;  %v13862_v9 = vpack.c.bf16 %v11350_v51, %v11334_v43  ;;  %v11353_v0 = vld [vmem:[%s19424_s10 + $0xbf0] sm:$0xff]  ;;  %v11380_v43 = vld [vmem:[%s19426_s12 + $0x1088] sm:$0xff] }
0x1ed7   : > { %v11379_v4 = vld [vmem:[%s19426_s12 + $0x1080] sm:$0xff] }
0x1ed8   : > { %v11411_v51 = vld [vmem:[%s19426_s12 + $0x1180] sm:$0xff] }
0x1ed9   : > { %13813 = vmatpush1.bf16.msra.mxu0 %v13812_v16  ;;  %13829 = vmatpush1.bf16.msra.mxu1 %v13828_v41  ;;  %v11258_v16 = vld [vmem:[%s19424_s10 + $0x8f8] sm:$0xff]  ;;  %v13848_v41 = vpack.c.bf16 %v11347_v5, %v11331_v8  ;;  %v13896_v8 = vpack.c.bf16 %v11353_v0, %v11337_v31  ;;  %v11363_v5 = vld [vmem:[%s19426_s12 + $0x1000] sm:$0xff] }
0x1eda   : > { %13815 = vmatprep.subr.bf16.mxu0 %v13814_v18  ;;  %13831 = vmatprep.subr.bf16.mxu1 %v13830_v1  ;;  %v11255_v18 = vld [vmem:[%s19424_s10 + $0x8e0] sm:$0xff]  ;;  %v13866_v1 = vpack.c.bf16 %v11256_v14, %v11240_v42  ;;  %v13882_v25 = vpack.c.bf16 %v11258_v16, %v11242_v15  ;;  %v11396_v42 = vld [vmem:[%s19426_s12 + $0x1108] sm:$0xff]  ;;  %v11381_v14 = vld [vmem:[%s19426_s12 + $0x1090] sm:$0xff] }
0x1edb   : > { %v11382_v15 = vld [vmem:[%s19426_s12 + $0x1098] sm:$0xff]  ;;  %v11413_v16 = vld [vmem:[%s19426_s12 + $0x1190] sm:$0xff]  ;;  %v11403_v0 = vld [vmem:[%s19426_s12 + $0x1140] sm:$0xff] }
0x1edd   : > { %13817 = vmatpush1.bf16.msra.mxu0 %v13816_v7  ;;  %13833 = vmatpush1.bf16.msra.mxu1 %v13832_v22  ;;  %v11290_v7 = vld [vmem:[%s19424_s10 + $0x9f8] sm:$0xff]  ;;  %v13868_v22 = vpack.c.bf16 %v11255_v18, %v11239_v24  ;;  %v13932_v24 = vpack.c.bf16 %v11396_v42, %v11395_v11  ;;  %v11365_v18 = vld [vmem:[%s19426_s12 + $0x1010] sm:$0xff] }
0x1ede   : > { %13835 = vmatprep.subr.bf16.mxu0 %v13834_v32  ;;  %13851 = vmatprep.subr.bf16.mxu1 %v13850_v36  ;;  %v11287_v32 = vld [vmem:[%s19424_s10 + $0x9e0] sm:$0xff]  ;;  %v13870_v36 = vpack.c.bf16 %v11288_v6, %v11272_v19  ;;  %v13886_v12 = vpack.c.bf16 %v11290_v7, %v11274_v3  ;;  %v11398_v19 = vld [vmem:[%s19426_s12 + $0x1118] sm:$0xff]  ;;  %v11384_v3 = vld [vmem:[%s19426_s12 + $0x10a8] sm:$0xff] }
0x1edf   : > { %v11383_v6 = vld [vmem:[%s19426_s12 + $0x10a0] sm:$0xff]  ;;  %v11405_v42 = vld [vmem:[%s19426_s12 + $0x1150] sm:$0xff] }
0x1ee0   : > { %11357 = vmatmul.mubr.msk.f32.vlgmr.msra.gmra.mrb[92].mxu0 %vm705_vm2, %v18176_v59  ;;  %11358 = vmatmul.mubr.msk.f32.vlgmr.msra.gmra.mrb[86].mxu1 %vm705_vm2, %v18176_v59  ;;  %v11415_v7 = vld [vmem:[%s19426_s12 + $0x11a0] sm:$0xff] }
0x1ee1   : > { %13837 = vmatpush1.bf16.msra.mxu0 %v13836_v45  ;;  %13853 = vmatpush1.bf16.msra.mxu1 %v13852_v29  ;;  %v11322_v45 = vld [vmem:[%s19424_s10 + $0xaf8] sm:$0xff]  ;;  %v13872_v29 = vpack.c.bf16 %v11287_v32, %v11271_v33  ;;  %v13936_v33 = vpack.c.bf16 %v11398_v19, %v11397_v28  ;;  %v11367_v32 = vld [vmem:[%s19426_s12 + $0x1020] sm:$0xff]  ;;  %v11376_v28 = vld [vmem:[%s19426_s12 + $0x1068] sm:$0xff] }
0x1ee2   : > { %13839 = vmatprep.subr.bf16.mxu0 %v13838_v48  ;;  %13855 = vmatprep.subr.bf16.mxu1 %v13854_v49  ;;  %v11319_v48 = vld [vmem:[%s19424_s10 + $0xae0] sm:$0xff]  ;;  %v13874_v49 = vpack.c.bf16 %v11320_v40, %v11304_v17  ;;  %v13890_v52 = vpack.c.bf16 %v11322_v45, %v11306_v21  ;;  %v11400_v17 = vld [vmem:[%s19426_s12 + $0x1128] sm:$0xff]  ;;  %v11385_v40 = vld [vmem:[%s19426_s12 + $0x10b0] sm:$0xff] }
0x1ee3   : > { %9461 = vmatprep.mubr.f32.mxu0 %v14425_v2  ;;  %9532 = vmatprep.mubr.f32.mxu1 %v14425_v2  ;;  %v11386_v21 = vld [vmem:[%s19426_s12 + $0x10b8] sm:$0xff]  ;;  %v11417_v45 = vld [vmem:[%s19426_s12 + $0x11b0] sm:$0xff]  ;;  %v11407_v19 = vld [vmem:[%s19426_s12 + $0x1160] sm:$0xff] }
0x1ee5   : > { %13841 = vmatpush1.bf16.msra.mxu0 %v13840_v55  ;;  %13857 = vmatpush1.bf16.msra.mxu1 %v13856_v57  ;;  %v11354_v55 = vld [vmem:[%s19424_s10 + $0xbf8] sm:$0xff]  ;;  %v13876_v57 = vpack.c.bf16 %v11319_v48, %v11303_v46  ;;  %v13940_v46 = vpack.c.bf16 %v11400_v17, %v11399_v35  ;;  %v11369_v48 = vld [vmem:[%s19426_s12 + $0x1030] sm:$0xff] }
0x1ee6   : > { %13843 = vmatprep.subr.bf16.mxu0 %v13842_v50  ;;  %13859 = vmatprep.subr.bf16.mxu1 %v13858_v62  ;;  %v11351_v50 = vld [vmem:[%s19424_s10 + $0xbe0] sm:$0xff]  ;;  %v13878_v62 = vpack.c.bf16 %v11352_v34, %v11336_v26  ;;  %v13894_v63 = vpack.c.bf16 %v11354_v55, %v11338_v54  ;;  %v11402_v26 = vld [vmem:[%s19426_s12 + $0x1138] sm:$0xff]  ;;  %v11388_v54 = vld [vmem:[%s19426_s12 + $0x10c8] sm:$0xff] }
0x1ee7   : > { %v11387_v34 = vld [vmem:[%s19426_s12 + $0x10c0] sm:$0xff] }
0x1ee8   : > { %v11419_v55 = vld [vmem:[%s19426_s12 + $0x11c0] sm:$0xff] }
0x1ee9   : > { %13845 = vmatpush1.bf16.msra.mxu0 %v13844_v61  ;;  %13861 = vmatpush1.bf16.msra.mxu1 %v13860_v53  ;;  %v11412_v61 = vld [vmem:[%s19426_s12 + $0x1188] sm:$0xff]  ;;  %v13880_v53 = vpack.c.bf16 %v11351_v50, %v11335_v60  ;;  %v13944_v60 = vpack.c.bf16 %v11402_v26, %v11401_v44  ;;  %v11371_v50 = vld [vmem:[%s19426_s12 + $0x1040] sm:$0xff] }
0x1eea   : > { %13847 = vmatprep.subr.bf16.mxu0 %v13846_v38  ;;  %13863 = vmatprep.subr.bf16.mxu1 %v13862_v9  ;;  %v11364_v38 = vld [vmem:[%s19426_s12 + $0x1008] sm:$0xff]  ;;  %v13898_v9 = vpack.c.bf16 %v11380_v43, %v11379_v4  ;;  %v13930_v10 = vpack.c.bf16 %v11412_v61, %v11411_v51  ;;  %v11389_v43 = vld [vmem:[%s19426_s12 + $0x10d0] sm:$0xff]  ;;  %v11390_v51 = vld [vmem:[%s19426_s12 + $0x10d8] sm:$0xff] }
0x1eeb   : > { %v11404_v4 = vld [vmem:[%s19426_s12 + $0x1148] sm:$0xff]  ;;  %v11421_v61 = vld [vmem:[%s19426_s12 + $0x11d0] sm:$0xff] }
0x1eec   : > { %v14351_v26 = vld [vmem:[%s19425_s11 + $0x8] sm:$0x77] }
0x1eed   : > { %13849 = vmatpush1.bf16.msra.mxu0 %v13848_v41  ;;  %13865 = vmatpush1.bf16.msra.mxu1 %v13864_v23  ;;  %v11414_v41 = vld [vmem:[%s19426_s12 + $0x1198] sm:$0xff]  ;;  %v13900_v23 = vpack.c.bf16 %v11364_v38, %v11363_v5  ;;  %v13948_v5 = vpack.c.bf16 %v11404_v4, %v11403_v0  ;;  %v11373_v38 = vld [vmem:[%s19426_s12 + $0x1050] sm:$0xff]  ;;  %v11428_v0 = vld [vmem:[%s19426_s12 + $0x1208] sm:$0xff] }
0x1eee   : > { %13867 = vmatprep.subr.bf16.mxu0 %v13866_v1  ;;  %13883 = vmatprep.subr.bf16.mxu1 %v13882_v25  ;;  %v11366_v1 = vld [vmem:[%s19426_s12 + $0x1018] sm:$0xff]  ;;  %v13902_v25 = vpack.c.bf16 %v11382_v15, %v11381_v14  ;;  %v13934_v27 = vpack.c.bf16 %v11414_v41, %v11413_v16  ;;  %v11391_v15 = vld [vmem:[%s19426_s12 + $0x10e0] sm:$0xff]  ;;  %v11392_v16 = vld [vmem:[%s19426_s12 + $0x10e8] sm:$0xff] }
0x1eef   : > { %v11406_v14 = vld [vmem:[%s19426_s12 + $0x1158] sm:$0xff]  ;;  %v11423_v41 = vld [vmem:[%s19426_s12 + $0x11e0] sm:$0xff] }
0x1ef0   : > { %11359 = vmatmul.mubr.msk.f32.vlgmr.msra.gmra.mrb[94].mxu0 %vm705_vm2, %v18176_v59  ;;  %11360 = vmatmul.mubr.msk.f32.vlgmr.msra.gmra.mrb[88].mxu1 %vm705_vm2, %v18176_v59 }
0x1ef1   : > { %13869 = vmatpush1.bf16.msra.mxu0 %v13868_v22  ;;  %13885 = vmatpush1.bf16.msra.mxu1 %v13884_v47  ;;  %v11416_v22 = vld [vmem:[%s19426_s12 + $0x11a8] sm:$0xff]  ;;  %v13904_v47 = vpack.c.bf16 %v11366_v1, %v11365_v18  ;;  %v13952_v18 = vpack.c.bf16 %v11406_v14, %v11405_v42  ;;  %v11375_v1 = vld [vmem:[%s19426_s12 + $0x1060] sm:$0xff]  ;;  %v11478_v42 = vld [vmem:[%s19426_s12 + $0x1398] sm:$0xff] }
0x1ef2   : > { %13871 = vmatprep.subr.bf16.mxu0 %v13870_v36  ;;  %13887 = vmatprep.subr.bf16.mxu1 %v13886_v12  ;;  %v11368_v36 = vld [vmem:[%s19426_s12 + $0x1028] sm:$0xff]  ;;  %v13906_v12 = vpack.c.bf16 %v11384_v3, %v11383_v6  ;;  %v13938_v39 = vpack.c.bf16 %v11416_v22, %v11415_v7  ;;  %v13924_v3 = vpack.c.bf16 %v11376_v28, %v11375_v1  ;;  %v11393_v22 = vld [vmem:[%s19426_s12 + $0x10f0] sm:$0xff] }
0x1ef3   : > { %9603 = vmatprep.mubr.f32.mxu0 %v14425_v2  ;;  %9674 = vmatprep.mubr.f32.mxu1 %v14425_v2  ;;  %v11408_v6 = vld [vmem:[%s19426_s12 + $0x1168] sm:$0xff]  ;;  %v11461_v28 = vld [vmem:[%s19426_s12 + $0x1310] sm:$0xff] }
0x1ef4   : > { %v13956_v7 = vpack.c.bf16 %v11408_v6, %v11407_v19  ;;  %v11462_v19 = vld [vmem:[%s19426_s12 + $0x1318] sm:$0xff]  ;;  %v11447_v6 = vld [vmem:[%s19426_s12 + $0x12a0] sm:$0xff] }
0x1ef5   : > { %13873 = vmatpush1.bf16.msra.mxu0 %v13872_v29  ;;  %13889 = vmatpush1.bf16.msra.mxu1 %v13888_v13  ;;  %v11418_v29 = vld [vmem:[%s19426_s12 + $0x11b8] sm:$0xff]  ;;  %v13908_v13 = vpack.c.bf16 %v11368_v36, %v11367_v32 }
0x1ef6   : > { %13875 = vmatprep.subr.bf16.mxu0 %v13874_v49  ;;  %13891 = vmatprep.subr.bf16.mxu1 %v13890_v52  ;;  %v11370_v49 = vld [vmem:[%s19426_s12 + $0x1038] sm:$0xff]  ;;  %v13910_v52 = vpack.c.bf16 %v11386_v21, %v11385_v40  ;;  %v13942_v37 = vpack.c.bf16 %v11418_v29, %v11417_v45  ;;  %v11409_v40 = vld [vmem:[%s19426_s12 + $0x1170] sm:$0xff]  ;;  %v11443_v29 = vld [vmem:[%s19426_s12 + $0x1280] sm:$0xff] }
0x1ef7   : > { %v11426_v36 = vld [vmem:[%s19426_s12 + $0x11f8] sm:$0xff] }
0x1ef8   : > { %v11410_v21 = vld [vmem:[%s19426_s12 + $0x1178] sm:$0xff] }
0x1ef9   : > { %13877 = vmatpush1.bf16.msra.mxu0 %v13876_v57  ;;  %13893 = vmatpush1.bf16.msra.mxu1 %v13892_v58  ;;  %v11420_v57 = vld [vmem:[%s19426_s12 + $0x11c8] sm:$0xff]  ;;  %v13912_v58 = vpack.c.bf16 %v11370_v49, %v11369_v48  ;;  %v13960_v45 = vpack.c.bf16 %v11410_v21, %v11409_v40  ;;  %v11449_v40 = vld [vmem:[%s19426_s12 + $0x12b0] sm:$0xff] }
0x1efa   : > { %13879 = vmatprep.subr.bf16.mxu0 %v13878_v62  ;;  %13895 = vmatprep.subr.bf16.mxu1 %v13894_v63  ;;  %v11372_v62 = vld [vmem:[%s19426_s12 + $0x1048] sm:$0xff]  ;;  %v13914_v63 = vpack.c.bf16 %v11388_v54, %v11387_v34  ;;  %v13946_v31 = vpack.c.bf16 %v11420_v57, %v11419_v55  ;;  %v8977_v34 = vrot.slane %v14351_v26, %v17828_v20  ;;  %v18730_v21 = vld [vmem:[%s19425_s11 + $0x10] sm:$0x77] }
0x1efb   : > { %v11476_v49 = vld [vmem:[%s19426_s12 + $0x1388] sm:$0xff]  ;;  %v8981_v55 = vrot.slane %v14351_v26, %v17831_v30  ;;  %v11434_v26 = vld [vmem:[%s19426_s12 + $0x1238] sm:$0xff] }
0x1efd   : > { %13881 = vmatpush1.bf16.msra.mxu0 %v13880_v53  ;;  %13897 = vmatpush1.bf16.msra.mxu1 %v13896_v8  ;;  %v11422_v53 = vld [vmem:[%s19426_s12 + $0x11d8] sm:$0xff]  ;;  %v13916_v8 = vpack.c.bf16 %v11372_v62, %v11371_v50  ;;  %v9061_v50 = vrot.slane %v8981_v55, %v17828_v20  ;;  %v11465_v55 = vld [vmem:[%s19426_s12 + $0x1330] sm:$0xff] }
0x1efe   : > { %13899 = vmatprep.subr.bf16.mxu0 %v13898_v9  ;;  %13931 = vmatprep.subr.bf16.mxu1 %v13930_v10  ;;  %v11374_v9 = vld [vmem:[%s19426_s12 + $0x1058] sm:$0xff]  ;;  %v13918_v10 = vpack.c.bf16 %v11390_v51, %v11389_v43  ;;  %v13950_v11 = vpack.c.bf16 %v11422_v53, %v11421_v61  ;;  %v11459_v53 = vld [vmem:[%s19426_s12 + $0x1300] sm:$0xff] }
0x1f00   : > { %11361 = vmatmul.mubr.msk.f32.vlgmr.msra.gmra.mrb[96].mxu0 %vm705_vm2, %v18176_v59  ;;  %11362 = vmatmul.mubr.msk.f32.vlgmr.msra.gmra.mrb[90].mxu1 %vm705_vm2, %v18176_v59 }
0x1f01   : > { %13901 = vmatpush3.bf16.msra.mxu0 %v13900_v23  ;;  %13933 = vmatpush3.bf16.msra.mxu1 %v13932_v24  ;;  %v11424_v23 = vld [vmem:[%s19426_s12 + $0x11e8] sm:$0xff]  ;;  %v13920_v24 = vpack.c.bf16 %v11374_v9, %v11373_v38 }
0x1f02   : > { %13903 = vmatprep.subr.bf16.mxu0 %v13902_v25  ;;  %13935 = vmatprep.subr.bf16.mxu1 %v13934_v27  ;;  %v13922_v25 = vpack.c.bf16 %v11392_v16, %v11391_v15  ;;  %v13954_v27 = vpack.c.bf16 %v11424_v23, %v11423_v41  ;;  %v11429_v23 = vld [vmem:[%s19426_s12 + $0x1210] sm:$0xff] }
0x1f05   : > { %13905 = vmatpush3.bf16.msra.mxu0 %v13904_v47  ;;  %13937 = vmatpush3.bf16.msra.mxu1 %v13936_v33  ;;  %v11394_v47 = vld [vmem:[%s19426_s12 + $0x10f8] sm:$0xff]  ;;  %v11425_v33 = vld [vmem:[%s19426_s12 + $0x11f0] sm:$0xff] }
0x1f06   : > { %13907 = vmatprep.subr.bf16.mxu0 %v13906_v12  ;;  %13939 = vmatprep.subr.bf16.mxu1 %v13938_v39  ;;  %v13926_v32 = vpack.c.bf16 %v11394_v47, %v11393_v22  ;;  %v11377_v12 = vld [vmem:[%s19426_s12 + $0x1070] sm:$0xff]  ;;  %v11378_v39 = vld [vmem:[%s19426_s12 + $0x1078] sm:$0xff]  ;;  %v13958_v35 = vpack.c.bf16 %v11426_v36, %v11425_v33  ;;  %v11480_v22 = vld [vmem:[%s19426_s12 + $0x13a8] sm:$0xff]  ;;  %v14000_v33 = vpack.c.bf16 %v11462_v19, %v11461_v28 }
0x1f07   : > { %v13928_v17 = vpack.c.bf16 %v11378_v39, %v11377_v12  ;;  %v11432_v36 = vld [vmem:[%s19426_s12 + $0x1228] sm:$0xff]  ;;  %v11438_v28 = vld [vmem:[%s19426_s12 + $0x1258] sm:$0xff] }
0x1f09   : > { %13909 = vmatpush3.bf16.msra.mxu0 %v13908_v13  ;;  %13941 = vmatpush3.bf16.msra.mxu1 %v13940_v46  ;;  %v11444_v13 = vld [vmem:[%s19426_s12 + $0x1288] sm:$0xff]  ;;  %v11475_v46 = vld [vmem:[%s19426_s12 + $0x1380] sm:$0xff] }
0x1f0a   : > { %13911 = vmatprep.subr.bf16.mxu0 %v13910_v52  ;;  %13943 = vmatprep.subr.bf16.mxu1 %v13942_v37  ;;  %v13962_v48 = vpack.c.bf16 %v11444_v13, %v11443_v29  ;;  %v13994_v52 = vpack.c.bf16 %v11476_v49, %v11475_v46  ;;  %v14350_v37 = vld [vmem:[%s19425_s11] sm:$0x77]  ;;  %v18737_v29 = vld [vmem:[%s19425_s11 + $0x18] sm:$0x77] }
0x1f0b   : > { %v8969_v44 = vrot.slane %v14350_v37, %v17828_v20  ;;  %v8973_v54 = vrot.slane %v14350_v37, %v17831_v30  ;;  %v8997_v13 = vrot.slane %v18737_v29, %v17831_v30  ;;  %v11450_v46 = vld [vmem:[%s19426_s12 + $0x12b8] sm:$0xff] }
0x1f0c   : > { %v11482_v49 = vld [vmem:[%s19426_s12 + $0x13b8] sm:$0xff] }
0x1f0d   : > { %13913 = vmatpush3.bf16.msra.mxu0 %v13912_v58  ;;  %13945 = vmatpush3.bf16.msra.mxu1 %v13944_v60  ;;  %v9049_v57 = vrot.slane %v8969_v44, %v17828_v20  ;;  %v9057_v58 = vrot.slane %v8977_v34, %v17828_v20  ;;  %v9053_v60 = vrot.slane %v8973_v54, %v17828_v20  ;;  %v11433_v44 = vld [vmem:[%s19426_s12 + $0x1230] sm:$0xff] }
0x1f0e   : > { %13915 = vmatprep.subr.bf16.mxu0 %v13914_v63  ;;  %13947 = vmatprep.subr.bf16.mxu1 %v13946_v31  ;;  %v11427_v31 = vld [vmem:[%s19426_s12 + $0x1200] sm:$0xff]  ;;  %v13974_v34 = vpack.c.bf16 %v11450_v46, %v11449_v40  ;;  %v8993_v40 = vrot.slane %v18737_v29, %v17828_v20  ;;  %v11472_v46 = vld [vmem:[%s19426_s12 + $0x1368] sm:$0xff] }
0x1f0f   : > { %v13964_v16 = vpack.c.bf16 %v11428_v0, %v11427_v31  ;;  %v11484_v31 = vld [vmem:[%s19426_s12 + $0x13c8] sm:$0xff]  ;;  %v18850_v29 = vld [vmem:[%s19425_s11 + $0x20] sm:$0x77] }
0x1f11   : > { %13917 = vmatpush3.bf16.msra.mxu0 %v13916_v8  ;;  %13949 = vmatpush3.bf16.msra.mxu1 %v13948_v5  ;;  %v11460_v8 = vld [vmem:[%s19426_s12 + $0x1308] sm:$0xff]  ;;  %v11445_v5 = vld [vmem:[%s19426_s12 + $0x1290] sm:$0xff] }
0x1f12   : > { %13919 = vmatprep.subr.bf16.mxu0 %v13918_v10  ;;  %13951 = vmatprep.subr.bf16.mxu1 %v13950_v11  ;;  %v11446_v10 = vld [vmem:[%s19426_s12 + $0x1298] sm:$0xff]  ;;  %v11477_v11 = vld [vmem:[%s19426_s12 + $0x1390] sm:$0xff]  ;;  %v13996_v41 = vpack.c.bf16 %v11460_v8, %v11459_v53  ;;  %v11436_v53 = vld [vmem:[%s19426_s12 + $0x1248] sm:$0xff] }
0x1f15   : > { %13921 = vmatpush3.bf16.msra.mxu0 %v13920_v24  ;;  %13953 = vmatpush3.bf16.msra.mxu1 %v13952_v18  ;;  %v11430_v24 = vld [vmem:[%s19426_s12 + $0x1218] sm:$0xff] }
0x1f16   : > { %13923 = vmatprep.subr.bf16.mxu0 %v13922_v25  ;;  %13955 = vmatprep.subr.bf16.mxu1 %v13954_v27  ;;  %v13966_v25 = vpack.c.bf16 %v11446_v10, %v11445_v5  ;;  %v13998_v27 = vpack.c.bf16 %v11478_v42, %v11477_v11  ;;  %v13968_v47 = vpack.c.bf16 %v11430_v24, %v11429_v23  ;;  %v11467_v10 = vld [vmem:[%s19426_s12 + $0x1340] sm:$0xff]  ;;  %v11468_v11 = vld [vmem:[%s19426_s12 + $0x1348] sm:$0xff]  ;;  %v11453_v42 = vld [vmem:[%s19426_s12 + $0x12d0] sm:$0xff] }
0x1f17   : > { %v11486_v23 = vld [vmem:[%s19426_s12 + $0x13d8] sm:$0xff] }
0x1f19   : > { %13925 = vmatpush3.bf16.msra.mxu0 %v13924_v3  ;;  %13957 = vmatpush3.bf16.msra.mxu1 %v13956_v7  ;;  %v11448_v3 = vld [vmem:[%s19426_s12 + $0x12a8] sm:$0xff]  ;;  %v11479_v7 = vld [vmem:[%s19426_s12 + $0x13a0] sm:$0xff] }
0x1f1a   : > { %13927 = vmatprep.subr.bf16.mxu0 %v13926_v32  ;;  %13959 = vmatprep.subr.bf16.mxu1 %v13958_v35  ;;  %v11431_v32 = vld [vmem:[%s19426_s12 + $0x1220] sm:$0xff]  ;;  %v13970_v12 = vpack.c.bf16 %v11448_v3, %v11447_v6  ;;  %v14002_v39 = vpack.c.bf16 %v11480_v22, %v11479_v7  ;;  %v11469_v3 = vld [vmem:[%s19426_s12 + $0x1350] sm:$0xff]  ;;  %v11470_v7 = vld [vmem:[%s19426_s12 + $0x1358] sm:$0xff] }
0x1f1b   : > { %v11463_v35 = vld [vmem:[%s19426_s12 + $0x1320] sm:$0xff] }
0x1f1c   : > { %v11455_v22 = vld [vmem:[%s19426_s12 + $0x12e0] sm:$0xff] }
0x1f1d   : > { %13929 = vmatpush3.bf16.msra.mxu0 %v13928_v17  ;;  %13961 = vmatpush3.bf16.msra.mxu1 %v13960_v45  ;;  %v11464_v17 = vld [vmem:[%s19426_s12 + $0x1328] sm:$0xff]  ;;  %v8989_v45 = vrot.slane %v18730_v21, %v17831_v30 }
0x1f1e   : > { %13963 = vmatprep.subr.bf16.mxu0 %v13962_v48  ;;  %13995 = vmatprep.subr.bf16.mxu1 %v13994_v52  ;;  %v11481_v48 = vld [vmem:[%s19426_s12 + $0x13b0] sm:$0xff]  ;;  %v13972_v52 = vpack.c.bf16 %v11432_v36, %v11431_v32  ;;  %v14004_v37 = vpack.c.bf16 %v11464_v17, %v11463_v35  ;;  %v11488_v32 = vld [vmem:[%s19426_s12 + $0x13e8] sm:$0xff]  ;;  %v8985_v36 = vrot.slane %v18730_v21, %v17828_v20  ;;  %v11439_v35 = vld [vmem:[%s19426_s12 + $0x1260] sm:$0xff] }
0x1f1f   : > { %v14006_v54 = vpack.c.bf16 %v11482_v49, %v11481_v48  ;;  %v11440_v17 = vld [vmem:[%s19426_s12 + $0x1268] sm:$0xff]  ;;  %v11471_v21 = vld [vmem:[%s19426_s12 + $0x1360] sm:$0xff]  ;;  %v11457_v48 = vld [vmem:[%s19426_s12 + $0x12f0] sm:$0xff]  ;;  %v9005_v49 = vrot.slane %v18850_v29, %v17831_v30 }
0x1fa3   : > { %v9179_v62 = vpop.f32.mrb[90].mxu0  ;;  %v9250_v63 = vpop.f32.mrb[84].mxu1 }
0x1fa4   : > { %v9180_v4 = vadd.f32 %v9179_v62, %v9049_v57  ;;  %v9251_v43 = vadd.f32 %v9250_v63, %v9057_v58  ;;  %v9181_v51 = vpop.f32.mrb[91].mxu0  ;;  %v9252_v61 = vpop.f32.mrb[85].mxu1  ;;  %v11466_v57 = vld [vmem:[%s19426_s12 + $0x1338] sm:$0xff]  ;;  %v11451_v58 = vld [vmem:[%s19426_s12 + $0x12c0] sm:$0xff]  ;;  %v11452_v62 = vld [vmem:[%s19426_s12 + $0x12c8] sm:$0xff] }
0x1fa5   : > { %v9182_v38 = vadd.f32 %v9181_v51, %v9053_v60  ;;  %v9253_v9 = vadd.f32 %v9252_v61, %v9061_v50  ;;  %v9069_v60 = vrot.slane %v8989_v45, %v17828_v20  ;;  %v9077_v50 = vrot.slane %v8997_v13, %v17828_v20  ;;  %v11483_v63 = vld [vmem:[%s19426_s12 + $0x13c0] sm:$0xff] }
0x1fa6   : > { %v9681_v18 = vmax.f32 %v9180_v4, 0.0  ;;  %v9683_v1 = vmax.f32 %v9251_v43, 0.0  ;;  %v13976_v43 = vpack.c.bf16 %v11434_v26, %v11433_v44  ;;  %v14008_v51 = vpack.c.bf16 %v11466_v57, %v11465_v55  ;;  %v11435_v61 = vld [vmem:[%s19426_s12 + $0x1240] sm:$0xff]  ;;  %v11490_v44 = vld [vmem:[%s19426_s12 + $0x13f8] sm:$0xff]  ;;  %v18866_v26 = vld [vmem:[%s19425_s11 + $0x28] sm:$0x77] }
0x1fa7   : > { %v9682_v14 = vmax.f32 %v9182_v38, 0.0  ;;  %v9684_v15 = vmax.f32 %v9253_v9, 0.0  ;;  %v13978_v38 = vpack.c.bf16 %v11452_v62, %v11451_v58  ;;  %v14010_v9 = vpack.c.bf16 %v11484_v31, %v11483_v63  ;;  %v11441_v58 = vld [vmem:[%s19426_s12 + $0x1270] sm:$0xff] }
0x1fa8   : > { %v13988_v55 = vpack.c.bf16 %v11440_v17, %v11439_v35  ;;  %v14020_v57 = vpack.c.bf16 %v11472_v46, %v11471_v21  ;;  %v9073_v62 = vrot.slane %v8993_v40, %v17828_v20  ;;  %v11526_v40 = vld [vmem:[%s19426_s12 + $0x1518] sm:$0xff]  ;;  %v11543_v46 = vld [vmem:[%s19426_s12 + $0x15a0] sm:$0xff] }
0x1fa9   : > { %10022 = vmatprep.mubr.f32.mxu0 %v9682_v14  ;;  %10092 = vmatprep.mubr.f32.mxu1 %v9684_v15 }
0x1faa   : > { %10023 = vmatmul.mubr.f32.vlgmr.msra.gmra.mrb[98].mxu0 %v9681_v18  ;;  %10093 = vmatmul.mubr.f32.vlgmr.msra.gmra.mrb[92].mxu1 %v9683_v1  ;;  %v13980_v1 = vpack.c.bf16 %v11436_v53, %v11435_v61  ;;  %v11508_v61 = vld [vmem:[%s19426_s12 + $0x1488] sm:$0xff]  ;;  %v9085_v53 = vrot.slane %v9005_v49, %v17828_v20 }
0x1fab   : > { %13965 = vmatpush3.bf16.msra.mxu0 %v13964_v16  ;;  %13997 = vmatpush3.bf16.msra.mxu1 %v13996_v41  ;;  %v11454_v16 = vld [vmem:[%s19426_s12 + $0x12d8] sm:$0xff]  ;;  %v11485_v41 = vld [vmem:[%s19426_s12 + $0x13d0] sm:$0xff] }
0x1fac   : > { %13967 = vmatprep.subr.bf16.mxu0 %v13966_v25  ;;  %13999 = vmatprep.subr.bf16.mxu1 %v13998_v27  ;;  %v14012_v25 = vpack.c.bf16 %v11468_v11, %v11467_v10  ;;  %v11437_v27 = vld [vmem:[%s19426_s12 + $0x1250] sm:$0xff]  ;;  %v13982_v19 = vpack.c.bf16 %v11454_v16, %v11453_v42  ;;  %v14014_v6 = vpack.c.bf16 %v11486_v23, %v11485_v41 }
0x1faf   : > { %13969 = vmatpush3.bf16.msra.mxu0 %v13968_v47  ;;  %14001 = vmatpush3.bf16.msra.mxu1 %v14000_v33  ;;  %v11456_v47 = vld [vmem:[%s19426_s12 + $0x12e8] sm:$0xff]  ;;  %v11487_v33 = vld [vmem:[%s19426_s12 + $0x13e0] sm:$0xff] }
0x1fb0   : > { %13971 = vmatprep.subr.bf16.mxu0 %v13970_v12  ;;  %14003 = vmatprep.subr.bf16.mxu1 %v14002_v39  ;;  %v13984_v12 = vpack.c.bf16 %v11438_v28, %v11437_v27  ;;  %v14016_v39 = vpack.c.bf16 %v11470_v7, %v11469_v3  ;;  %v13986_v45 = vpack.c.bf16 %v11456_v47, %v11455_v22  ;;  %v11509_v27 = vld [vmem:[%s19426_s12 + $0x1490] sm:$0xff]  ;;  %v11542_v3 = vld [vmem:[%s19426_s12 + $0x1598] sm:$0xff] }
0x1fb1   : > { %v14018_v13 = vpack.c.bf16 %v11488_v32, %v11487_v33  ;;  %v11493_v32 = vld [vmem:[%s19426_s12 + $0x1410] sm:$0xff] }
0x1fb3   : > { %v18776_v0 = vpop.f32.mrb[92].mxu0  ;;  %v18778_v4 = vpop.f32.mrb[86].mxu1  ;;  %13973 = vmatpush3.bf16.msra.mxu0 %v13972_v52  ;;  %14005 = vmatpush3.bf16.msra.mxu1 %v14004_v37  ;;  %v11458_v52 = vld [vmem:[%s19426_s12 + $0x12f8] sm:$0xff]  ;;  %v11489_v37 = vld [vmem:[%s19426_s12 + $0x13f0] sm:$0xff] }
0x1fb4   : > { %v9323_v8 = vpop.f32.mrb[93].mxu0  ;;  %v9394_v5 = vpop.f32.mrb[87].mxu1  ;;  %13975 = vmatprep.subr.bf16.mxu0 %v13974_v34  ;;  %14007 = vmatprep.subr.bf16.mxu1 %v14006_v54  ;;  %v9013_v34 = vrot.slane %v18866_v26, %v17831_v30  ;;  %v9065_v54 = vrot.slane %v8985_v36, %v17828_v20  ;;  %v13990_v63 = vpack.c.bf16 %v11458_v52, %v11457_v48  ;;  %v11494_v36 = vld [vmem:[%s19426_s12 + $0x1418] sm:$0xff]  ;;  %v11544_v48 = vld [vmem:[%s19426_s12 + $0x15a8] sm:$0xff] }
0x1fb5   : > { %v9324_v14 = vadd.f32 %v9323_v8, %v9069_v60  ;;  %v9395_v15 = vadd.f32 %v9394_v5, %v9077_v50  ;;  %v11442_v60 = vld [vmem:[%s19426_s12 + $0x1278] sm:$0xff]  ;;  %v11473_v50 = vld [vmem:[%s19426_s12 + $0x1370] sm:$0xff]  ;;  %v14022_v31 = vpack.c.bf16 %v11490_v44, %v11489_v37  ;;  %v11539_v8 = vld [vmem:[%s19426_s12 + $0x1580] sm:$0xff]  ;;  %v9393_v16 = vadd.f32 %v18778_v4, %v9073_v62 }
0x1fb6   : > { %v11540_v5 = vld [vmem:[%s19426_s12 + $0x1588] sm:$0xff]  ;;  %v13992_v11 = vpack.c.bf16 %v11442_v60, %v11441_v58  ;;  %v14032_v49 = vpack.c.bf16 %v11494_v36, %v11493_v32  ;;  %v11495_v44 = vld [vmem:[%s19426_s12 + $0x1420] sm:$0xff]  ;;  %v11513_v58 = vld [vmem:[%s19426_s12 + $0x14b0] sm:$0xff] }
0x1fb7   : > { %v9686_v24 = vmax.f32 %v9324_v14, 0.0  ;;  %v9688_v18 = vmax.f32 %v9395_v15, 0.0  ;;  %13977 = vmatpush3.bf16.msra.mxu0 %v13976_v43  ;;  %14009 = vmatpush3.bf16.msra.mxu1 %v14008_v51  ;;  %v11474_v43 = vld [vmem:[%s19426_s12 + $0x1378] sm:$0xff]  ;;  %v11507_v51 = vld [vmem:[%s19426_s12 + $0x1480] sm:$0xff]  ;;  %v9322_v15 = vadd.f32 %v18776_v0, %v9065_v54  ;;  %v11524_v4 = vld [vmem:[%s19426_s12 + $0x1508] sm:$0xff]  ;;  %v9687_v47 = vmax.f32 %v9393_v16, 0.0 }
0x1fb8   : > { %13979 = vmatprep.subr.bf16.mxu0 %v13978_v38  ;;  %14011 = vmatprep.subr.bf16.mxu1 %v14010_v9  ;;  %v9093_v38 = vrot.slane %v9013_v34, %v17828_v20  ;;  %v14024_v42 = vpack.c.bf16 %v11474_v43, %v11473_v50  ;;  %v14026_v14 = vpack.c.bf16 %v11508_v61, %v11507_v51  ;;  %v11523_v0 = vld [vmem:[%s19426_s12 + $0x1500] sm:$0xff]  ;;  %v11496_v34 = vld [vmem:[%s19426_s12 + $0x1428] sm:$0xff]  ;;  %v11514_v60 = vld [vmem:[%s19426_s12 + $0x14b8] sm:$0xff] }
0x1fb9   : > { %10162 = vmatprep.mubr.f32.mxu0 %v9686_v24  ;;  %10232 = vmatprep.mubr.f32.mxu1 %v9688_v18  ;;  %v14058_v24 = vpack.c.bf16 %v11540_v5, %v11539_v8  ;;  %v11491_v18 = vld [vmem:[%s19426_s12 + $0x1400] sm:$0xff]  ;;  %v9685_v22 = vmax.f32 %v9322_v15, 0.0  ;;  %v14060_v33 = vpack.c.bf16 %v11524_v4, %v11523_v0  ;;  %v11545_v50 = vld [vmem:[%s19426_s12 + $0x15b0] sm:$0xff]  ;;  %v11546_v62 = vld [vmem:[%s19426_s12 + $0x15b8] sm:$0xff]  ;;  %v14038_v43 = vpack.c.bf16 %v11514_v60, %v11513_v58 }
0x1fba   : > { %v11527_v54 = vld [vmem:[%s19426_s12 + $0x1520] sm:$0xff]  ;;  %v11497_v51 = vld [vmem:[%s19426_s12 + $0x1430] sm:$0xff]  ;;  %v11498_v61 = vld [vmem:[%s19426_s12 + $0x1438] sm:$0xff]  ;;  %v14070_v8 = vpack.c.bf16 %v11546_v62, %v11545_v50 }
0x1fbb   : > { %13981 = vmatpush3.bf16.msra.mxu0 %v13980_v1  ;;  %14013 = vmatpush3.bf16.msra.mxu1 %v14012_v25  ;;  %v11492_v1 = vld [vmem:[%s19426_s12 + $0x1408] sm:$0xff]  ;;  %v11530_v5 = vld [vmem:[%s19426_s12 + $0x1538] sm:$0xff]  ;;  %v11531_v4 = vld [vmem:[%s19426_s12 + $0x1540] sm:$0xff] }
0x1fbc   : > { %13983 = vmatprep.subr.bf16.mxu0 %v13982_v19  ;;  %14015 = vmatprep.subr.bf16.mxu1 %v14014_v6  ;;  %v11510_v19 = vld [vmem:[%s19426_s12 + $0x1498] sm:$0xff]  ;;  %v11541_v6 = vld [vmem:[%s19426_s12 + $0x1590] sm:$0xff]  ;;  %v14028_v7 = vpack.c.bf16 %v11492_v1, %v11491_v18  ;;  %v11500_v0 = vld [vmem:[%s19426_s12 + $0x1448] sm:$0xff] }
0x1fbd   : > { %v14030_v35 = vpack.c.bf16 %v11510_v19, %v11509_v27  ;;  %v14062_v17 = vpack.c.bf16 %v11542_v3, %v11541_v6  ;;  %v11517_v19 = vld [vmem:[%s19426_s12 + $0x14d0] sm:$0xff]  ;;  %v11518_v6 = vld [vmem:[%s19426_s12 + $0x14d8] sm:$0xff] }
0x1fbe   : > { %v11549_v3 = vld [vmem:[%s19426_s12 + $0x15d0] sm:$0xff]  ;;  %v11502_v36 = vld [vmem:[%s19426_s12 + $0x1458] sm:$0xff] }
0x1fbf   : > { %13985 = vmatpush3.bf16.msra.mxu0 %v13984_v12  ;;  %14017 = vmatpush3.bf16.msra.mxu1 %v14016_v39  ;;  %v11525_v12 = vld [vmem:[%s19426_s12 + $0x1510] sm:$0xff]  ;;  %v11554_v50 = vld [vmem:[%s19426_s12 + $0x15f8] sm:$0xff] }
0x1fc0   : > { %13987 = vmatprep.subr.bf16.mxu0 %v13986_v45  ;;  %14019 = vmatprep.subr.bf16.mxu1 %v14018_v13  ;;  %v11511_v45 = vld [vmem:[%s19426_s12 + $0x14a0] sm:$0xff]  ;;  %v11512_v13 = vld [vmem:[%s19426_s12 + $0x14a8] sm:$0xff]  ;;  %v14064_v52 = vpack.c.bf16 %v11526_v40, %v11525_v12  ;;  %v11501_v32 = vld [vmem:[%s19426_s12 + $0x1450] sm:$0xff] }
0x1fc1   : > { %v14034_v37 = vpack.c.bf16 %v11512_v13, %v11511_v45  ;;  %v11533_v12 = vld [vmem:[%s19426_s12 + $0x1550] sm:$0xff]  ;;  %v11520_v40 = vld [vmem:[%s19426_s12 + $0x14e8] sm:$0xff]  ;;  %v11551_v45 = vld [vmem:[%s19426_s12 + $0x15e0] sm:$0xff] }
0x1fc2   : > { %v11552_v13 = vld [vmem:[%s19426_s12 + $0x15e8] sm:$0xff]  ;;  %v19081_v58 = vld [vmem:[%s19425_s11 + $0x30] sm:$0x77]  ;;  %v19094_v62 = vld [vmem:[%s19425_s11 + $0x38] sm:$0x77] }
0x1fc3   : > { %v18898_v9 = vpop.f32.mrb[94].mxu0  ;;  %v18900_v10 = vpop.f32.mrb[88].mxu1  ;;  %13989 = vmatpush3.bf16.msra.mxu0 %v13988_v55  ;;  %14021 = vmatpush3.bf16.msra.mxu1 %v14020_v57  ;;  %v14066_v55 = vpack.c.bf16 %v11544_v48, %v11543_v46  ;;  %v11528_v57 = vld [vmem:[%s19426_s12 + $0x1528] sm:$0xff]  ;;  %v9001_v46 = vrot.slane %v18850_v29, %v17828_v20  ;;  %v14082_v29 = vpack.c.bf16 %v11552_v13, %v11551_v45  ;;  %v11553_v60 = vld [vmem:[%s19426_s12 + $0x15f0] sm:$0xff] }
0x1fc4   : > { %v9465_v41 = vpop.f32.mrb[95].mxu0  ;;  %v9536_v23 = vpop.f32.mrb[89].mxu1  ;;  %13991 = vmatprep.subr.bf16.mxu0 %v13990_v63  ;;  %14023 = vmatprep.subr.bf16.mxu1 %v14022_v31  ;;  %v14036_v63 = vpack.c.bf16 %v11496_v34, %v11495_v44  ;;  %v14068_v31 = vpack.c.bf16 %v11528_v57, %v11527_v54  ;;  %v11535_v44 = vld [vmem:[%s19426_s12 + $0x1560] sm:$0xff]  ;;  %v9009_v34 = vrot.slane %v18866_v26, %v17828_v20  ;;  %v11536_v54 = vld [vmem:[%s19426_s12 + $0x1568] sm:$0xff]  ;;  %v11522_v57 = vld [vmem:[%s19426_s12 + $0x14f8] sm:$0xff] }
0x1fc5   : > { %v9466_v25 = vadd.f32 %v9465_v41, %v9085_v53  ;;  %v9537_v28 = vadd.f32 %v9536_v23, %v9093_v38  ;;  %v11529_v53 = vld [vmem:[%s19426_s12 + $0x1530] sm:$0xff]  ;;  %v11515_v38 = vld [vmem:[%s19426_s12 + $0x14c0] sm:$0xff]  ;;  %v14040_v41 = vpack.c.bf16 %v11498_v61, %v11497_v51  ;;  %v9021_v26 = vrot.slane %v19081_v58, %v17831_v30 }
0x1fc6   : > { %v14072_v18 = vpack.c.bf16 %v11530_v5, %v11529_v53  ;;  %v14084_v51 = vpack.c.bf16 %v11536_v54, %v11535_v44  ;;  %v11505_v53 = vld [vmem:[%s19426_s12 + $0x1470] sm:$0xff]  ;;  %v9089_v5 = vrot.slane %v9009_v34, %v17828_v20  ;;  %v11608_v44 = vld [vmem:[%s19426_s12 + $0x17a8] sm:$0xff] }
0x1fc7   : > { %13993 = vmatpush3.bf16.msra.mxu0 %v13992_v11  ;;  %14025 = vmatpush3.bf16.msra.mxu1 %v14024_v42  ;;  %v9690_v39 = vmax.f32 %v9466_v25, 0.0  ;;  %v9692_v21 = vmax.f32 %v9537_v28, 0.0  ;;  %v11516_v11 = vld [vmem:[%s19426_s12 + $0x14c8] sm:$0xff]  ;;  %v11547_v42 = vld [vmem:[%s19426_s12 + $0x15c0] sm:$0xff] }
0x1fc8   : > { %14027 = vmatprep.subr.bf16.mxu0 %v14026_v14  ;;  %14059 = vmatprep.subr.bf16.mxu1 %v14058_v24  ;;  %v11548_v14 = vld [vmem:[%s19426_s12 + $0x15c8] sm:$0xff]  ;;  %v14042_v1 = vpack.c.bf16 %v11516_v11, %v11515_v38  ;;  %v11499_v25 = vld [vmem:[%s19426_s12 + $0x1440] sm:$0xff]  ;;  %v14086_v38 = vpack.c.bf16 %v11554_v50, %v11553_v60  ;;  %v11538_v11 = vld [vmem:[%s19426_s12 + $0x1578] sm:$0xff] }
0x1fc9   : > { %v14074_v27 = vpack.c.bf16 %v11548_v14, %v11547_v42  ;;  %v11532_v28 = vld [vmem:[%s19426_s12 + $0x1548] sm:$0xff]  ;;  %v11571_v42 = vld [vmem:[%s19426_s12 + $0x1680] sm:$0xff] }
0x1fca   : > { %10163 = vmatmul.mubr.f32.vlgmr.msra.gmra.mrb[100].mxu0 %v9685_v22  ;;  %10233 = vmatmul.mubr.f32.vlgmr.msra.gmra.mrb[94].mxu1 %v9687_v47  ;;  %v14044_v22 = vpack.c.bf16 %v11500_v0, %v11499_v25  ;;  %v14076_v47 = vpack.c.bf16 %v11532_v28, %v11531_v4  ;;  %v11572_v14 = vld [vmem:[%s19426_s12 + $0x1688] sm:$0xff]  ;;  %v11591_v60 = vld [vmem:[%s19426_s12 + $0x1720] sm:$0xff] }
0x1fcb   : > { %14029 = vmatpush3.bf16.msra.mxu0 %v14028_v7  ;;  %10302 = vmatprep.mubr.f32.mxu0 %v9690_v39  ;;  %v11550_v7 = vld [vmem:[%s19426_s12 + $0x15d8] sm:$0xff]  ;;  %v14090_v28 = vpack.c.bf16 %v11572_v14, %v11571_v42 }
0x1fcc   : > { %14061 = vmatpush3.bf16.msra.mxu1 %v14060_v33  ;;  %10372 = vmatprep.mubr.f32.mxu1 %v9692_v21  ;;  %v14046_v33 = vpack.c.bf16 %v11518_v6, %v11517_v19  ;;  %v14078_v39 = vpack.c.bf16 %v11550_v7, %v11549_v3  ;;  %v14048_v21 = vpack.c.bf16 %v11502_v36, %v11501_v32  ;;  %v11555_v19 = vld [vmem:[%s19426_s12 + $0x1600] sm:$0xff]  ;;  %v11556_v6 = vld [vmem:[%s19426_s12 + $0x1608] sm:$0xff]  ;;  %v11594_v14 = vld [vmem:[%s19426_s12 + $0x1738] sm:$0xff] }
0x1fcd   : > { %14031 = vmatprep.subr.bf16.mxu0 %v14030_v35  ;;  %14063 = vmatprep.subr.bf16.mxu1 %v14062_v17  ;;  %v11534_v35 = vld [vmem:[%s19426_s12 + $0x1558] sm:$0xff]  ;;  %v11519_v17 = vld [vmem:[%s19426_s12 + $0x14e0] sm:$0xff]  ;;  %v9535_v3 = vadd.f32 %v18900_v10, %v9089_v5  ;;  %v14092_v36 = vpack.c.bf16 %v11556_v6, %v11555_v19  ;;  %v11561_v5 = vld [vmem:[%s19426_s12 + $0x1630] sm:$0xff] }
0x1fce   : > { %v14080_v48 = vpack.c.bf16 %v11534_v35, %v11533_v12  ;;  %v11574_v10 = vld [vmem:[%s19426_s12 + $0x1698] sm:$0xff]  ;;  %v11605_v12 = vld [vmem:[%s19426_s12 + $0x1790] sm:$0xff]  ;;  %v11564_v19 = vld [vmem:[%s19426_s12 + $0x1648] sm:$0xff] }
0x1fcf   : > { %14033 = vmatpush3.bf16.msra.mxu0 %v14032_v49  ;;  %v14050_v49 = vpack.c.bf16 %v11520_v40, %v11519_v17  ;;  %v11557_v17 = vld [vmem:[%s19426_s12 + $0x1610] sm:$0xff]  ;;  %v9691_v45 = vmax.f32 %v9535_v3, 0.0  ;;  %v11595_v6 = vld [vmem:[%s19426_s12 + $0x1740] sm:$0xff] }
0x1fd0   : > { %14065 = vmatpush3.bf16.msra.mxu1 %v14064_v52  ;;  %14035 = vmatprep.subr.bf16.mxu0 %v14034_v37  ;;  %v11503_v52 = vld [vmem:[%s19426_s12 + $0x1460] sm:$0xff]  ;;  %v11504_v37 = vld [vmem:[%s19426_s12 + $0x1468] sm:$0xff]  ;;  %v11589_v40 = vld [vmem:[%s19426_s12 + $0x1710] sm:$0xff] }
0x1fd1   : > { %14067 = vmatprep.subr.bf16.mxu1 %v14066_v55  ;;  %v11521_v55 = vld [vmem:[%s19426_s12 + $0x14f0] sm:$0xff] }
0x1fd2   : > { %v14054_v61 = vpack.c.bf16 %v11522_v57, %v11521_v55  ;;  %v11559_v57 = vld [vmem:[%s19426_s12 + $0x1620] sm:$0xff] }
0x1fd3   : > { %v19000_v15 = vpop.f32.mrb[96].mxu0  ;;  %v19002_v16 = vpop.f32.mrb[90].mxu1  ;;  %14037 = vmatpush3.bf16.msra.mxu0 %v14036_v63  ;;  %v9029_v63 = vrot.slane %v19094_v62, %v17831_v30  ;;  %v11537_v30 = vld [vmem:[%s19426_s12 + $0x1570] sm:$0xff] }
0x1fd4   : > { %14069 = vmatpush3.bf16.msra.mxu1 %v14068_v31  ;;  %v19004_v23 = vpop.f32.mrb[97].mxu0  ;;  %v19006_v24 = vpop.f32.mrb[91].mxu1  ;;  %14039 = vmatprep.subr.bf16.mxu0 %v14038_v43  ;;  %v14052_v31 = vpack.c.bf16 %v11504_v37, %v11503_v52  ;;  %v9081_v43 = vrot.slane %v9001_v46, %v17828_v20  ;;  %v11575_v46 = vld [vmem:[%s19426_s12 + $0x16a0] sm:$0xff] }
0x1fd5   : > { %14071 = vmatprep.subr.bf16.mxu1 %v14070_v8  ;;  %v11506_v8 = vld [vmem:[%s19426_s12 + $0x1478] sm:$0xff]  ;;  %v9109_v25 = vrot.slane %v9029_v63, %v17828_v20  ;;  %v11607_v37 = vld [vmem:[%s19426_s12 + $0x17a0] sm:$0xff]  ;;  %v11592_v63 = vld [vmem:[%s19426_s12 + $0x1728] sm:$0xff] }
0x1fd6   : > { %v14056_v0 = vpack.c.bf16 %v11506_v8, %v11505_v53  ;;  %v9464_v4 = vadd.f32 %v18898_v9, %v9081_v43  ;;  %v11587_v9 = vld [vmem:[%s19426_s12 + $0x1700] sm:$0xff]  ;;  %v14130_v50 = vpack.c.bf16 %v11608_v44, %v11607_v37  ;;  %v11578_v43 = vld [vmem:[%s19426_s12 + $0x16b8] sm:$0xff]  ;;  %v14132_v8 = vpack.c.bf16 %v11592_v63, %v11591_v60  ;;  %v11568_v37 = vld [vmem:[%s19426_s12 + $0x1668] sm:$0xff] }
0x1fd7   : > { %14041 = vmatpush3.bf16.msra.mxu0 %v14040_v41  ;;  %v9101_v41 = vrot.slane %v9021_v26, %v17828_v20  ;;  %v9679_v32 = vadd.f32 %v19006_v24, %v9109_v25  ;;  %v11558_v24 = vld [vmem:[%s19426_s12 + $0x1618] sm:$0xff]  ;;  %v11560_v26 = vld [vmem:[%s19426_s12 + $0x1628] sm:$0xff]  ;;  %v11599_v44 = vld [vmem:[%s19426_s12 + $0x1760] sm:$0xff] }
0x1fd8   : > { %14073 = vmatpush3.bf16.msra.mxu1 %v14072_v18  ;;  %14043 = vmatprep.subr.bf16.mxu0 %v14042_v1  ;;  %v11603_v18 = vld [vmem:[%s19426_s12 + $0x1780] sm:$0xff]  ;;  %v11604_v1 = vld [vmem:[%s19426_s12 + $0x1788] sm:$0xff]  ;;  %v14100_v53 = vpack.c.bf16 %v11560_v26, %v11559_v57  ;;  %v11617_v57 = vld [vmem:[%s19426_s12 + $0x17f0] sm:$0xff] }
0x1fd9   : > { %14075 = vmatprep.subr.bf16.mxu1 %v14074_v27  ;;  %v14088_v27 = vpack.c.bf16 %v11538_v11, %v11537_v30  ;;  %v14122_v7 = vpack.c.bf16 %v11604_v1, %v11603_v18  ;;  %v9696_v34 = vmax.f32 %v9679_v32, 0.0  ;;  %v11593_v11 = vld [vmem:[%s19426_s12 + $0x1730] sm:$0xff]  ;;  %v11580_v18 = vld [vmem:[%s19426_s12 + $0x16c8] sm:$0xff]  ;;  %v11611_v1 = vld [vmem:[%s19426_s12 + $0x17c0] sm:$0xff] }
0x1fda   : > { %v11612_v25 = vld [vmem:[%s19426_s12 + $0x17c8] sm:$0xff] }
0x1fdb   : > { %14045 = vmatpush3.bf16.msra.mxu0 %v14044_v22  ;;  %v11588_v22 = vld [vmem:[%s19426_s12 + $0x1708] sm:$0xff]  ;;  %v14138_v3 = vpack.c.bf16 %v11612_v25, %v11611_v1 }
0x1fdc   : > { %14077 = vmatpush3.bf16.msra.mxu1 %v14076_v47  ;;  %14047 = vmatprep.subr.bf16.mxu0 %v14046_v33  ;;  %v9608_v47 = vadd.f32 %v19004_v23, %v9101_v41  ;;  %v11573_v33 = vld [vmem:[%s19426_s12 + $0x1690] sm:$0xff]  ;;  %v11606_v23 = vld [vmem:[%s19426_s12 + $0x1798] sm:$0xff]  ;;  %v14124_v35 = vpack.c.bf16 %v11588_v22, %v11587_v9  ;;  %v11579_v41 = vld [vmem:[%s19426_s12 + $0x16c0] sm:$0xff] }
0x1fdd   : > { %14079 = vmatprep.subr.bf16.mxu1 %v14078_v39  ;;  %v9689_v39 = vmax.f32 %v9464_v4, 0.0  ;;  %v14094_v13 = vpack.c.bf16 %v11574_v10, %v11573_v33  ;;  %v14126_v52 = vpack.c.bf16 %v11606_v23, %v11605_v12  ;;  %v14136_v4 = vpack.c.bf16 %v11594_v14, %v11593_v11  ;;  %v11581_v9 = vld [vmem:[%s19426_s12 + $0x16d0] sm:$0xff]  ;;  %v11582_v22 = vld [vmem:[%s19426_s12 + $0x16d8] sm:$0xff] }
0x1fde   : > { %v11614_v33 = vld [vmem:[%s19426_s12 + $0x17d8] sm:$0xff]  ;;  %v11565_v12 = vld [vmem:[%s19426_s12 + $0x1650] sm:$0xff] }
0x1fdf   : > { %14049 = vmatpush3.bf16.msra.mxu0 %v14048_v21  ;;  %v11590_v21 = vld [vmem:[%s19426_s12 + $0x1718] sm:$0xff] }
0x1fe0   : > { %14081 = vmatpush3.bf16.msra.mxu1 %v14080_v48  ;;  %14051 = vmatprep.subr.bf16.mxu0 %v14050_v49  ;;  %v11576_v48 = vld [vmem:[%s19426_s12 + $0x16a8] sm:$0xff]  ;;  %v9694_v49 = vmax.f32 %v9608_v47, 0.0  ;;  %v14128_v54 = vpack.c.bf16 %v11590_v21, %v11589_v40  ;;  %v11613_v47 = vld [vmem:[%s19426_s12 + $0x17d0] sm:$0xff]  ;;  %v11566_v23 = vld [vmem:[%s19426_s12 + $0x1658] sm:$0xff] }
0x1fe1   : > { %14083 = vmatprep.subr.bf16.mxu1 %v14082_v29  ;;  %v14096_v29 = vpack.c.bf16 %v11558_v24, %v11557_v17  ;;  %v14098_v55 = vpack.c.bf16 %v11576_v48, %v11575_v46  ;;  %v11598_v17 = vld [vmem:[%s19426_s12 + $0x1758] sm:$0xff]  ;;  %v11583_v24 = vld [vmem:[%s19426_s12 + $0x16e0] sm:$0xff]  ;;  %v11584_v40 = vld [vmem:[%s19426_s12 + $0x16e8] sm:$0xff]  ;;  %v14112_v21 = vpack.c.bf16 %v11566_v23, %v11565_v12  ;;  %v9017_v46 = vrot.slane %v19081_v58, %v17828_v20 }
0x1fe3   : > { %14053 = vmatpush3.bf16.msra.mxu0 %v14052_v31  ;;  %v11577_v31 = vld [vmem:[%s19426_s12 + $0x16b0] sm:$0xff]  ;;  %v9097_v60 = vrot.slane %v9017_v46, %v17828_v20 }
0x1fe4   : > { %14085 = vmatpush3.bf16.msra.mxu1 %v14084_v51  ;;  %14055 = vmatprep.subr.bf16.mxu0 %v14054_v61  ;;  %v11609_v51 = vld [vmem:[%s19426_s12 + $0x17b0] sm:$0xff]  ;;  %v11610_v61 = vld [vmem:[%s19426_s12 + $0x17b8] sm:$0xff]  ;;  %v14102_v30 = vpack.c.bf16 %v11578_v43, %v11577_v31 }
0x1fe5   : > { %14087 = vmatprep.subr.bf16.mxu1 %v14086_v38  ;;  %v11562_v38 = vld [vmem:[%s19426_s12 + $0x1638] sm:$0xff]  ;;  %v14134_v42 = vpack.c.bf16 %v11610_v61, %v11609_v51  ;;  %v11569_v31 = vld [vmem:[%s19426_s12 + $0x1670] sm:$0xff] }
0x1fe6   : > { %v11570_v43 = vld [vmem:[%s19426_s12 + $0x1678] sm:$0xff] }
0x1fe7   : > { %14057 = vmatpush3.bf16.msra.mxu0 %v14056_v0  ;;  %v14104_v0 = vpack.c.bf16 %v11562_v38, %v11561_v5  ;;  %v9606_v5 = vadd.f32 %v19000_v15, %v9097_v60  ;;  %v14358_v15 = vld [vmem:[%s19427_s13] sm:$0x7] }
0x1fe8   : > { %14089 = vmatpush3.bf16.msra.mxu1 %v14088_v27  ;;  %14091 = vmatprep.subr.bf16.mxu0 %v14090_v28  ;;  %v14106_v27 = vpack.c.bf16 %v11580_v18, %v11579_v41  ;;  %v11563_v28 = vld [vmem:[%s19426_s12 + $0x1640] sm:$0xff] }
0x1fe9   : > { %14123 = vmatprep.subr.bf16.mxu1 %v14122_v7  ;;  %v11596_v7 = vld [vmem:[%s19426_s12 + $0x1748] sm:$0xff]  ;;  %v14108_v10 = vpack.c.bf16 %v11564_v19, %v11563_v28  ;;  %v10546_v60 = vld [vmem:[%s19532_s16 + $0x20] sm:$0xff] }
0x1fea   : > { %10303 = vmatmul.mubr.f32.vlgmr.msra.gmra.mrb[102].mxu0 %v9689_v39  ;;  %v14140_v32 = vpack.c.bf16 %v11596_v7, %v11595_v6  ;;  %v11597_v39 = vld [vmem:[%s19426_s12 + $0x1750] sm:$0xff] }
0x1feb   : > { %10373 = vmatmul.mubr.f32.vlgmr.msra.gmra.mrb[96].mxu1 %v9691_v45  ;;  %14093 = vmatpush3.bf16.msra.mxu0 %v14092_v36  ;;  %v14110_v36 = vpack.c.bf16 %v11582_v22, %v11581_v9  ;;  %v11615_v45 = vld [vmem:[%s19426_s12 + $0x17e0] sm:$0xff]  ;;  %v14144_v48 = vpack.c.bf16 %v11598_v17, %v11597_v39 }
0x1fec   : > { %10442 = vmatprep.mubr.f32.mxu0 %v9694_v49  ;;  %14125 = vmatpush3.bf16.msra.mxu1 %v14124_v35  ;;  %v14142_v35 = vpack.c.bf16 %v11614_v33, %v11613_v47  ;;  %v14114_v49 = vpack.c.bf16 %v11584_v40, %v11583_v24 }
0x1fed   : > { %10512 = vmatprep.mubr.f32.mxu1 %v9696_v34  ;;  %14095 = vmatprep.subr.bf16.mxu0 %v14094_v13  ;;  %v11616_v13 = vld [vmem:[%s19426_s12 + $0x17e8] sm:$0xff]  ;;  %v9025_v34 = vrot.slane %v19094_v62, %v17828_v20  ;;  %v11618_v62 = vld [vmem:[%s19426_s12 + $0x17f8] sm:$0xff] }
0x1fee   : > { %14127 = vmatprep.subr.bf16.mxu1 %v14126_v52  ;;  %v11567_v52 = vld [vmem:[%s19426_s12 + $0x1660] sm:$0xff]  ;;  %v14146_v58 = vpack.c.bf16 %v11616_v13, %v11615_v45  ;;  %v14150_v61 = vpack.c.bf16 %v11618_v62, %v11617_v57  ;;  %v10545_v62 = vld [vmem:[%s19532_s16 + $0x18] sm:$0xff] }
0x1fef   : > { %14097 = vmatpush3.bf16.msra.mxu0 %v14096_v29  ;;  %v11600_v29 = vld [vmem:[%s19426_s12 + $0x1768] sm:$0xff]  ;;  %v14116_v26 = vpack.c.bf16 %v11568_v37, %v11567_v52  ;;  %v9105_v51 = vrot.slane %v9025_v34, %v17828_v20 }
0x1ff0   : > { %14129 = vmatpush3.bf16.msra.mxu1 %v14128_v54  ;;  %14099 = vmatprep.subr.bf16.mxu0 %v14098_v55  ;;  %v11585_v54 = vld [vmem:[%s19426_s12 + $0x16f0] sm:$0xff]  ;;  %v11586_v55 = vld [vmem:[%s19426_s12 + $0x16f8] sm:$0xff] }
0x1ff1   : > { %14131 = vmatprep.subr.bf16.mxu1 %v14130_v50  ;;  %v14148_v50 = vpack.c.bf16 %v11600_v29, %v11599_v44  ;;  %v14118_v63 = vpack.c.bf16 %v11586_v55, %v11585_v54  ;;  %v9677_v11 = vadd.f32 %v19002_v16, %v9105_v51  ;;  %v9957_v16 = vrot.slane %v14358_v15, %v17828_v20  ;;  %v10542_v54 = vld [vmem:[%s19532_s16] sm:$0xff]  ;;  %v10543_v55 = vld [vmem:[%s19532_s16 + $0x8] sm:$0xff] }
0x1ff2   : > { %v14155_v57 = vpack.c.bf16 %v10543_v55, %v10542_v54  ;;  %v10550_v15 = vld [vmem:[%s19536_s25] sm:$0x1] }
0x1ff3   : > { %14101 = vmatpush3.bf16.msra.mxu0 %v14100_v53  ;;  %v11601_v53 = vld [vmem:[%s19426_s12 + $0x1770] sm:$0xff]  ;;  %v9695_v14 = vmax.f32 %v9677_v11, 0.0 }
0x1ff4   : > { %14133 = vmatpush3.bf16.msra.mxu1 %v14132_v8  ;;  %14103 = vmatprep.subr.bf16.mxu0 %v14102_v30  ;;  %v11602_v8 = vld [vmem:[%s19426_s12 + $0x1778] sm:$0xff]  ;;  %v14120_v30 = vpack.c.bf16 %v11570_v43, %v11569_v31  ;;  %v10548_v31 = vld [vmem:[%s19532_s16 + $0x30] sm:$0xff] }
0x1ff5   : > { %14135 = vmatprep.subr.bf16.mxu1 %v14134_v42  ;;  %v14152_v38 = vpack.c.bf16 %v11602_v8, %v11601_v53  ;;  %v9693_v42 = vmax.f32 %v9606_v5, 0.0  ;;  %v10549_v43 = vld [vmem:[%s19532_s16 + $0x38] sm:$0xff] }
0x1ff6   : > { %v14164_v51 = vpack.c.bf16 %v10549_v43, %v10548_v31 }
0x1ff7   : > { %14105 = vmatpush3.bf16.msra.mxu0 %v14104_v0 }
0x1ff8   : > { %14137 = vmatpush3.bf16.msra.mxu1 %v14136_v4  ;;  %14107 = vmatprep.subr.bf16.mxu0 %v14106_v27 }
0x1ff9   : > { %14139 = vmatprep.subr.bf16.mxu1 %v14138_v3 }
0x1ffb   : > { %14109 = vmatpush3.bf16.msra.mxu0 %v14108_v10 }
0x1ffc   : > { %14141 = vmatpush3.bf16.msra.mxu1 %v14140_v32  ;;  %14111 = vmatprep.subr.bf16.mxu0 %v14110_v36 }
0x1ffd   : > { %14143 = vmatprep.subr.bf16.mxu1 %v14142_v35 }
0x1fff   : > { %14113 = vmatpush3.bf16.msra.mxu0 %v14112_v21 }
0x2000   : > { %14145 = vmatpush3.bf16.msra.mxu1 %v14144_v48  ;;  %14115 = vmatprep.subr.bf16.mxu0 %v14114_v49 }
0x2001   : > { %14147 = vmatprep.subr.bf16.mxu1 %v14146_v58 }
0x2003   : > { %14117 = vmatpush3.bf16.msra.mxu0 %v14116_v26 }
0x2004   : > { %14149 = vmatpush3.bf16.msra.mxu1 %v14148_v50  ;;  %14119 = vmatprep.subr.bf16.mxu0 %v14118_v63  ;;  %v10547_v50 = vld [vmem:[%s19532_s16 + $0x28] sm:$0xff] }
0x2005   : > { %14151 = vmatprep.subr.bf16.mxu1 %v14150_v61  ;;  %v14161_v63 = vpack.c.bf16 %v10547_v50, %v10546_v60 }
0x2007   : > { %14121 = vmatpush3.bf16.msra.mxu0 %v14120_v30  ;;  %v14359_v30 = vld [vmem:[%s19428_s14] sm:$0x7] }
0x2008   : > { %14153 = vmatpush3.bf16.msra.mxu1 %v14152_v38  ;;  %14154 = vmatprep.subr.bf16.mxu0 %v14442_v56  ;;  %v10535_v5 = vrot.slane %v14359_v30, %v17828_v20 }
0x200a   : > { %10443 = vmatmul.mubr.f32.vlgmr.msra.gmra.mrb[104].mxu0 %v9693_v42  ;;  %v14360_v42 = vld [vmem:[%s19429_s15] sm:$0x7] }
0x200b   : > { %10513 = vmatmul.mubr.f32.vlgmr.msra.gmra.mrb[98].mxu1 %v9695_v14  ;;  %12915 = vmatprep.mubr.msk.f32.mxu0 %vm14426_vm0, %v14425_v2 }
0x200c   : > { %14156 = vmatpush3.bf16.msra.mxu0 %v14155_v57 }
0x200d   : > { %14157 = vmatprep.subr.bf16.mxu0 %v14442_v56 }
0x207d   : > { %v12340_v41 = vpop.f32.mrb[98].mxu0  ;;  %v12375_v18 = vpop.f32.mrb[92].mxu1 }
0x207e   : > { %v12341_v1 = vpop.f32.mrb[99].mxu0  ;;  %v12376_v25 = vpop.f32.mrb[93].mxu1 }
0x207f   : > { %v12342_v0 = vadd.f32 %v12341_v1, %v12340_v41  ;;  %v12377_v4 = vadd.f32 %v12376_v25, %v12375_v18 }
0x2081   : > { %v10025_v27 = vadd.f32 %v12342_v0, %v9957_v16 }
0x2083   : > { %v10095_v28 = vadd.f32 %v12377_v4, %v10025_v27 }
0x209d   : > { %v12410_v19 = vpop.f32.mrb[100].mxu0  ;;  %v12445_v6 = vpop.f32.mrb[94].mxu1 }
0x209e   : > { %v12411_v3 = vpop.f32.mrb[101].mxu0  ;;  %v12446_v7 = vpop.f32.mrb[95].mxu1 }
0x209f   : > { %v12412_v9 = vadd.f32 %v12411_v3, %v12410_v19  ;;  %v12447_v2 = vadd.f32 %v12446_v7, %v12445_v6 }
0x20a1   : > { %v10165_v22 = vadd.f32 %v12412_v9, %v10095_v28 }
0x20a3   : > { %v10235_v47 = vadd.f32 %v12447_v2, %v10165_v22 }
0x20bd   : > { %v12480_v33 = vpop.f32.mrb[102].mxu0 }
0x20be   : > { %v12515_v10 = vpop.f32.mrb[96].mxu1  ;;  %v12481_v32 = vpop.f32.mrb[103].mxu0 }
0x20bf   : > { %v12482_v36 = vadd.f32 %v12481_v32, %v12480_v33  ;;  %v12516_v12 = vpop.f32.mrb[97].mxu1 }
0x20c0   : > { %v12517_v23 = vadd.f32 %v12516_v12, %v12515_v10 }
0x20c1   : > { %v10305_v39 = vadd.f32 %v12482_v36, %v10235_v47 }
0x20c3   : > { %v10375_v35 = vadd.f32 %v12517_v23, %v10305_v39 }
0x20dd   : > { %v12550_v17 = vpop.f32.mrb[104].mxu0 }
0x20de   : > { %v12585_v24 = vpop.f32.mrb[98].mxu1  ;;  %v12551_v40 = vpop.f32.mrb[105].mxu0 }
0x20df   : > { %v12552_v45 = vadd.f32 %v12551_v40, %v12550_v17  ;;  %v12586_v13 = vpop.f32.mrb[99].mxu1 }
0x20e0   : > { %v12587_v21 = vadd.f32 %v12586_v13, %v12585_v24 }
0x20e1   : > { %v10445_v46 = vadd.f32 %v12552_v45, %v10375_v35 }
0x20e3   : > { %v10515_v48 = vadd.f32 %v12587_v21, %v10445_v46 }
0x20e5   : > { %v10518_v49 = vadd.f32 %v10515_v48, %v18176_v59  ;;  %v10544_v59 = vld [vmem:[%s19532_s16 + $0x10] sm:$0xff] }
0x20e6   : > { %v14158_v26 = vpack.c.bf16 %v10545_v62, %v10544_v59 }
0x20e7   : > { %v10519_v52 = vsel %vm705_vm2, %v10518_v49, 0.0 }
0x20e8   : > { %10520 = vadd.xlane.f32.xlu0 %v10519_v52  ;;  %14159 = vmatpush3.bf16.msra.mxu0 %v14158_v26 }
0x20e9   : > { %14160 = vmatprep.subr.bf16.mxu0 %v14442_v56 }
0x20ec   : > { %14162 = vmatpush3.bf16.msra.mxu0 %v14161_v63 }
0x20ed   : > { %14163 = vmatprep.subr.bf16.mxu0 %v14442_v56  ;;  %v10540_v56 = vrot.slane %v14360_v42, %v17828_v20 }
0x20f0   : > { %14165 = vmatpush3.bf16.msra.mxu0 %v14164_v51 }
0x2175   : > { %v10521_v37 = vpop.xlane.xlu0 %10520 }
0x2176   : > { %v10522_v44 = vmul.f32 0.015625, %v10521_v37 }
0x2178   : > { %v10523_v34 = vsub.f32 %v10518_v49, %v10522_v44 }
0x217a   : > { %v10524_v58 = vmul.f32 %v10523_v34, %v10523_v34 }
0x217c   : > { %v10525_v29 = vsel %vm705_vm2, %v10524_v58, 0.0 }
0x217d   : > { %10526 = vadd.xlane.f32.xlu1 %v10525_v29 }
0x220a   : > { %v10527_v61 = vpop.xlane.xlu1 %10526 }
0x220b   : > { %v10528_v53 = vmul.f32 0.015625, %v10527_v61 }
0x220d   : > { %v10529_v8 = vadd.f32 1e-05, %v10528_v53 }
0x220f   : > { %14329 = vrsqrt.f32 %v10529_v8 }
0x2219   : > { %v14330_v38 = vpop.eup %14329 }
0x221a   : > { %v10531_v11 = vmul.f32 %v14330_v38, %v10523_v34 }
0x221c   : > { %v10536_v14 = vmul.f32 %v10535_v5, %v10531_v11 }
0x221e   : > { %v10541_v41 = vadd.f32 %v10540_v56, %v10536_v14 }
0x2220   : > { %v10552_v18 = vrot.slane %v10541_v41, 7 }
0x2222   : > { %12916 = vmatmul.mubr.msk.f32.vlgmr.msra.gmra.mrb[106].mxu0 %vm705_vm2, %v10552_v18 }
0x22f5   : > { %v10621_v16 = vpop.f32.mrb[106].mxu0 }
0x22f6   : > { %v10622_v1 = vadd.f32 %v10621_v16, %v10550_v15  ;;  %v12917_v25 = vpop.f32.mrb[107].mxu0 }
0x22f8   : > { %10625 = vst [vmem:[%s565_s0] sm:$0x1] %v10622_v1 }
0x22f9   : > { %14374 = shalt.err (!%p14371_p3)
}
0x22fa   : > { %s14375_s20 = scalar_lea.hbm %s19372_s7, 16  ;;  %s14379_s24 = scalar_lea.hbm %s19538_s6, 32 }
0x22fb   : > { %p14376_p4 = scmp.ne.s32.totalorder %s19372_s7, %s14375_s20  ;;  %p14380_p9 = scmp.lt.u32.totalorder %s19372_s7, %s19538_s6 }
0x22fc   : > { %p14381_p10 = scmp.lt.u32.totalorder %s14379_s24, %s14375_s20  ;;  %p14383_p12 = scmp.lt.u32.totalorder %s14375_s20, %s19372_s7 }
0x22fd   : > { %p14377_p7 = pnand %p14376_p4, %p14577_p5 }
0x22fe   : > { %p14382_p11 = por %p14381_p10, %p14380_p9 }
0x22ff   : > { %p14378_p8 = pneg %p14377_p7 }
0x2300   : > { %p14384_p13 = por %p14383_p12, %p14382_p11 }
0x2302   : > { %p14385_p0 = pnand %p14384_p13, %p14378_p8 }
0x2304   : > { %14388 = shalt.err (!%p14385_p0)
}
0x2305   : > { %14166 = dma.vmem_to_hbm [thread:$0]  (%p14577_p5), %s19374_s2, 16, %s19372_s7, %s10627_s27  }
0x2306 PF: > { %s19539_s25 = sld [smem:[#allocation9_spill]]  ;;  %s19540_s28 = sld [smem:[#allocation6_spill]] }
0x230c   : > { %p14172_p1 = scmp.ge.s32.totalorder %s19539_s25, 2  ;;  %s10651_s17 = sand.u32 1, %s19540_s28  }
0x230d   : > { %s10652_s29 = scalar_lea.sflag [#allocation4], %s10651_s17 }
0x230e   : > { %p14169_p2 = pnand %p14172_p1, %p14581_p6 }
0x2310   : > { %14406 = dma.done.wait (!%p14169_p2), %s10652_s29, 16  }
0x2311   : > { %14408 = vsyncadd (!%p14169_p2), %s10652_s29, 4294967280  ;;  %s19542_s30 = sld [smem:[#allocation11_spill]]  ;;  %s19543_s27 = sld [smem:[#allocation7_spill]] }
0x2312   : > { %s19544_s28 = sld [smem:[#allocation8_spill]]  ;;  %s19545_s29 = sld [smem:[#allocation12_spill]] }
0x2317   : > { %p28_p3 = scmp.ge.s32.totalorder %s19542_s30, 4  }
0x2319   :  { %30 = sbr.rel (!%p28_p3) target bundleno = 14 (0xe), region = 135 }
0x2320   :  { %10656 = vsyncpa [#allocation4], 1 }
0x2321   :  { %10658 = vsyncpa [#allocation4 + $0x1], 1 }

</bundles_post_ra>
